<compile_context>
chip_gen: v7x
topology: tpu7x:2x2x1
jax: 0.10.0
libtpu: 0.0.40
codegen_flags: <defaults>
</compile_context>

<pallas_src>
import functools

import jax
import jax.numpy as jnp
from jax import lax
from jax.experimental import pallas as pl
from jax.experimental.pallas import tpu as pltpu

EPS = 1e-5  # PyTorch InstanceNorm2d default


def _round_up(x, m):
    return ((x + m - 1) // m) * m


def _vmem_limit_bytes():
    # Raise the scoped VMEM limit above the 16/32 MiB defaults, leaving headroom.
    try:
        cap = pltpu.get_tpu_info().vmem_capacity_bytes
    except Exception:
        cap = 64 * 1024 * 1024
    return max(32 * 1024 * 1024, int(cap * 0.85))


def _resblock_kernel(xp_ref, xr_ref, w1_ref, g1_ref, be1_ref, w2_ref, g2_ref, be2_ref,
                     o_ref, hp_ref, *, H, W, WR, C, mm_dtype):
    HWR = H * WR
    inv_hw = 1.0 / (H * W)

    # Valid-column mask: within each WR-wide row, columns j >= W are junk (excluded from
    # InstanceNorm statistics; they only ever feed junk output columns).
    col = lax.broadcasted_iota(jnp.int32, (HWR, 1), 0) % WR
    valid = col < W

    def conv9(tap_slice, w_ref):
        # 9 per-tap (HWR, C) x (C, C) MXU matmuls accumulated in f32.  Every tap operand is
        # a contiguous slice of the flat slab -- no im2col scratch, no compaction copies.
        acc = None
        for kh in range(3):
            for kw in range(3):
                a = tap_slice(kh, kw)
                d = jnp.dot(a, w_ref[kh * 3 + kw], preferred_element_type=jnp.float32)
                acc = d if acc is None else acc + d
        return acc                                                  # (HWR, C) f32

    def inorm(y, g_ref, be_ref):
        # Single sweep: masked sum & sum-of-squares, gamma/beta folded into scale+shift.
        yv = jnp.where(valid, y, 0.0)
        mean = jnp.sum(yv, axis=0, keepdims=True) * inv_hw          # (1, C)
        ex2 = jnp.sum(yv * yv, axis=0, keepdims=True) * inv_hw
        var = jnp.maximum(ex2 - mean * mean, 0.0)                   # clamp: cancellation
        scale = g_ref[...] * lax.rsqrt(var + EPS)
        shift = be_ref[...] - mean * scale
        return scale, shift

    # ---- conv1 (bias elided) -> IN1 -> ReLU ------------------------------------------
    y1 = conv9(lambda kh, kw: xp_ref[pl.ds(kh * WR + kw, HWR), :], w1_ref)
    sc1, sh1 = inorm(y1, g1_ref, be1_ref)
    h = jnp.maximum(y1 * sc1 + sh1, 0.0).astype(mm_dtype)           # (HWR, C), flat rows

    # ---- reflect-pad h into the hp scratch -------------------------------------------
    # hp layout: H+2 padded rows of physical width WR; canonical padded column p lives at
    # physical column p + 7, so the interior slab store below starts at the 8-aligned
    # flat offset WR + 8 (review: aligned interior placement -> plain unmasked stores).
    hp_ref[pl.ds((H + 2) * WR, 16), :] = jnp.zeros((16, C), mm_dtype)     # finite tail
    hp_ref[pl.ds(WR + 8, HWR), :] = h                                     # interior (aligned)
    hp_ref[pl.ds(8, WR), :] = h[WR:2 * WR, :]                             # top row    = h row 1
    hp_ref[pl.ds((H + 1) * WR + 8, WR), :] = h[(H - 2) * WR:(H - 1) * WR, :]  # bottom = h row H-2

    def _mirror_cols(r, carry):                                     # left/right reflect cols
        b = r * WR
        hp_ref[pl.ds(b + 7, 1), :] = hp_ref[pl.ds(b + 9, 1), :]             # left  (incl. corners)
        hp_ref[pl.ds(b + W + 8, 1), :] = hp_ref[pl.ds(b + W + 6, 1), :]     # right (incl. corners)
        return carry

    lax.fori_loop(0, H + 2, _mirror_cols, 0)

    # ---- conv2 -> IN2 -> + residual (fused apply + dense store) -----------------------
    y2 = conv9(lambda kh, kw: hp_ref[pl.ds(kh * WR + kw + 7, HWR), :], w2_ref)
    sc2, sh2 = inorm(y2, g2_ref, be2_ref)
    o_ref[...] = (y2 * sc2 + sh2 + xr_ref[...].astype(jnp.float32)).astype(o_ref.dtype)


def residual_block_pallas(x_nhwc, params, matmul_dtype=jnp.bfloat16):
    """x_nhwc: (N, H, W, C). params: conv weights (HWIO), biases, InstanceNorm affine."""
    N, H, W, C = x_nhwc.shape
    assert H >= 2 and W >= 2, "ReflectionPad2d(1) needs H, W >= 2"

    WR = _round_up(W + 9, 8)       # padded row width (room for reflect cols + aligned offset)
    RIN = (H + 3) * WR             # conv1 input rows (1 extra junk row for tap over-read)
    ROUT = H * WR                  # output rows (valid columns 0..W-1 of each row)

    # conv1 input: reflect-pad once in HBM, zero-pad extra columns + one bottom row,
    # flatten rows, and cast ONCE to the matmul dtype (bf16 DMA on the fast path).
    xp = jnp.pad(x_nhwc, ((0, 0), (1, 1), (1, 1), (0, 0)), mode="reflect")
    xp = jnp.pad(xp, ((0, 0), (0, 1), (0, WR - (W + 2)), (0, 0)))
    xp = xp.reshape(N, RIN, C).astype(matmul_dtype)

    # Residual as a separate dense input (original dtype), in the flat output layout.
    xres = jnp.pad(x_nhwc, ((0, 0), (0, 0), (0, WR - W), (0, 0))).reshape(N, ROUT, C)

    # HWIO (3,3,Cin,Cout) -> (9, Cin, Cout): one (C, C) weight tile per tap.
    w1 = params["w1"].reshape(9, C, C).astype(matmul_dtype)
    w2 = params["w2"].reshape(9, C, C).astype(matmul_dtype)
    g1, be1, g2, be2 = params["g1"], params["be1"], params["g2"], params["be2"]
    # Conv biases b1/b2 intentionally NOT passed: cancelled exactly by the IN mean subtraction.

    kernel = functools.partial(_resblock_kernel, H=H, W=W, WR=WR, C=C, mm_dtype=matmul_dtype)

    vec_spec = pl.BlockSpec((1, C), lambda n: (0, 0))
    wgt_spec = pl.BlockSpec((9, C, C), lambda n: (0, 0, 0))
    xp_spec = pl.BlockSpec((None, RIN, C), lambda n: (n, 0, 0))
    xr_spec = pl.BlockSpec((None, ROUT, C), lambda n: (n, 0, 0))
    out_spec = pl.BlockSpec((None, ROUT, C), lambda n: (n, 0, 0))

    out_flat = pl.pallas_call(
        kernel,
        out_shape=jax.ShapeDtypeStruct((N, ROUT, C), x_nhwc.dtype),
        grid_spec=pltpu.PrefetchScalarGridSpec(
            num_scalar_prefetch=0,
            grid=(N,),
            in_specs=[xp_spec, xr_spec, wgt_spec, vec_spec, vec_spec,
                      wgt_spec, vec_spec, vec_spec],
            out_specs=out_spec,
            scratch_shapes=[
                pltpu.VMEM(((H + 2) * WR + 16, C), matmul_dtype),   # reflect-padded mid act
            ],
        ),
        compiler_params=pltpu.CompilerParams(
            dimension_semantics=("parallel",),
            vmem_limit_bytes=_vmem_limit_bytes(),
        ),
    )(xp, xres, w1, g1, be1, w2, g2, be2)

    return out_flat.reshape(N, H, WR, C)[:, :, :W, :]


# ---------------- pure-JAX reference (correctness check only) ----------------
def _conv_ref(x, w_hwio, b, mm_dtype):
    xpad = jnp.pad(x, ((0, 0), (1, 1), (1, 1), (0, 0)), mode="reflect")
    y = lax.conv_general_dilated(
        xpad.astype(mm_dtype), w_hwio.astype(mm_dtype),
        window_strides=(1, 1), padding="VALID",
        dimension_numbers=("NHWC", "HWIO", "NHWC"),
        preferred_element_type=jnp.float32)
    return y + b.reshape(1, 1, 1, -1)


def _inorm_ref(x, g, b):
    mean = jnp.mean(x, axis=(1, 2), keepdims=True)
    var = jnp.mean((x - mean) ** 2, axis=(1, 2), keepdims=True)
    return (x - mean) * lax.rsqrt(var + EPS) * g.reshape(1, 1, 1, -1) + b.reshape(1, 1, 1, -1)


def residual_block_ref(x, p, mm_dtype=jnp.float32):
    h = jnp.maximum(
        _inorm_ref(_conv_ref(x, p["w1"], p["b1"][0], mm_dtype), p["g1"][0], p["be1"][0]), 0.0)
    h = _inorm_ref(_conv_ref(h, p["w2"], p["b2"][0], mm_dtype), p["g2"][0], p["be2"][0])
    return h + x
# ------------------------------------------------------------------------------


def _make_params(key, C):
    ks = jax.random.split(key, 8)
    return {
        "w1": jax.random.normal(ks[0], (3, 3, C, C), dtype=jnp.float32) * 0.1,   # HWIO
        "b1": jax.random.normal(ks[1], (1, C), dtype=jnp.float32) * 0.1,
        "g1": 1.0 + 0.1 * jax.random.normal(ks[2], (1, C), dtype=jnp.float32),
        "be1": 0.1 * jax.random.normal(ks[3], (1, C), dtype=jnp.float32),
        "w2": jax.random.normal(ks[4], (3, 3, C, C), dtype=jnp.float32) * 0.1,
        "b2": jax.random.normal(ks[5], (1, C), dtype=jnp.float32) * 0.1,
        "g2": 1.0 + 0.1 * jax.random.normal(ks[6], (1, C), dtype=jnp.float32),
        "be2": 0.1 * jax.random.normal(ks[7], (1, C), dtype=jnp.float32),
    }


def _check(name, x_nhwc, params, mm_dtype, atol, rtol):
    out = jax.block_until_ready(residual_block_pallas(x_nhwc, params, mm_dtype))
    ref = residual_block_ref(x_nhwc, params, mm_dtype)
    assert out.shape == ref.shape, (name, out.shape, ref.shape)
    err = float(jnp.max(jnp.abs(out - ref)))
    assert jnp.allclose(out, ref, atol=atol, rtol=rtol), (name, err)


if __name__ == "__main__":
    key = jax.random.PRNGKey(0)
    kx1, kp1, kx2, kp2 = jax.random.split(key, 4)

    # ---- small shape, PyTorch NCHW convention transposed to NHWC for the kernel ----
    N, C, H, W = 2, 4, 16, 16
    x_nchw = jax.random.normal(kx1, (N, C, H, W), dtype=jnp.float32)
    x_nhwc = jnp.transpose(x_nchw, (0, 2, 3, 1))
    params = _make_params(kp1, C)

    # f32-matmul path vs f32 reference (kernel omits conv biases; IN cancels them exactly).
    _check("f32_c4", x_nhwc, params, jnp.float32, atol=1e-3, rtol=1e-3)
    # bf16-matmul path (fast path on v6e+) vs bf16-operand / f32-accumulate reference.
    _check("bf16_c4", x_nhwc, params, jnp.bfloat16, atol=2e-2, rtol=2e-2)

    # ---- lane-dense sanity check at C = 128 (review's correctness concern) ----
    N2, C2, H2, W2 = 1, 128, 8, 8
    x2 = jnp.transpose(jax.random.normal(kx2, (N2, C2, H2, W2), dtype=jnp.float32),
                       (0, 2, 3, 1))
    params2 = _make_params(kp2, C2)
    _check("bf16_c128", x2, params2, jnp.bfloat16, atol=2e-2, rtol=2e-2)

    print("KERNEL_OK")
</pallas_src>

<mosaic_0001>
module attributes {stable_mosaic.version = 11 : i64} {
  func.func @_resblock_kernel(%arg0: i32, %arg1: memref<1x608x4xf32, #tpu.memory_space<vmem>>, %arg2: memref<1x512x4xf32, #tpu.memory_space<vmem>>, %arg3: memref<9x4x4xf32, #tpu.memory_space<vmem>>, %arg4: memref<1x4xf32, #tpu.memory_space<vmem>>, %arg5: memref<1x4xf32, #tpu.memory_space<vmem>>, %arg6: memref<9x4x4xf32, #tpu.memory_space<vmem>>, %arg7: memref<1x4xf32, #tpu.memory_space<vmem>>, %arg8: memref<1x4xf32, #tpu.memory_space<vmem>>, %arg9: memref<1x512x4xf32, #tpu.memory_space<vmem>>, %arg10: memref<592x4xf32, #tpu.memory_space<vmem>>) attributes {dimension_semantics = [#tpu.dimension_semantics<parallel>], iteration_bounds = array<i64: 2>, scalar_prefetch = 0 : i64, scratch_operands = 1 : i64, tpu.core_type = #tpu.core_type<tc>, window_params = [{transform_indices = @transform_0, window_bounds = array<i64: 1, 608, 4>}, {transform_indices = @transform_1, window_bounds = array<i64: 1, 512, 4>}, {pipeline_mode = #tpu.pipeline_mode<synchronous>, transform_indices = @transform_2, window_bounds = array<i64: 9, 4, 4>}, {pipeline_mode = #tpu.pipeline_mode<synchronous>, transform_indices = @transform_3, window_bounds = array<i64: 1, 4>}, {pipeline_mode = #tpu.pipeline_mode<synchronous>, transform_indices = @transform_4, window_bounds = array<i64: 1, 4>}, {pipeline_mode = #tpu.pipeline_mode<synchronous>, transform_indices = @transform_5, window_bounds = array<i64: 9, 4, 4>}, {pipeline_mode = #tpu.pipeline_mode<synchronous>, transform_indices = @transform_6, window_bounds = array<i64: 1, 4>}, {pipeline_mode = #tpu.pipeline_mode<synchronous>, transform_indices = @transform_7, window_bounds = array<i64: 1, 4>}, {transform_indices = @transform_8, window_bounds = array<i64: 1, 512, 4>}]} {
    %0 = tpu.iota {dimensions = array<i32: 0>} : vector<512x1xi32>
    %c32_i32 = arith.constant 32 : i32
    %c0_i32 = arith.constant 0 : i32
    %1 = arith.cmpi eq, %c32_i32, %c0_i32 : i32
    %c1_i32 = arith.constant 1 : i32
    %2 = arith.select %1, %c1_i32, %c32_i32 : i32
    %3 = vector.broadcast %2 : i32 to vector<512x1xi32>
    %4 = arith.remsi %0, %3 : vector<512x1xi32>
    %c0_i32_0 = arith.constant 0 : i32
    %5 = vector.broadcast %c0_i32_0 : i32 to vector<512x1xi32>
    %6 = arith.cmpi ne, %4, %5 : vector<512x1xi32>
    %c0_i32_1 = arith.constant 0 : i32
    %7 = vector.broadcast %c0_i32_1 : i32 to vector<512x1xi32>
    %8 = arith.cmpi slt, %4, %7 : vector<512x1xi32>
    %c0_i32_2 = arith.constant 0 : i32
    %9 = arith.cmpi slt, %2, %c0_i32_2 : i32
    %10 = vector.broadcast %9 : i1 to vector<512x1xi1>
    %11 = vector.broadcast %10 : vector<512x1xi1> to vector<512x1xi1>
    %12 = arith.xori %8, %11 : vector<512x1xi1>
    %13 = arith.andi %12, %6 : vector<512x1xi1>
    %14 = vector.broadcast %2 : i32 to vector<512x1xi32>
    %15 = arith.addi %4, %14 : vector<512x1xi32>
    %16 = arith.select %13, %15, %4 : vector<512x1xi1>, vector<512x1xi32>
    %c16_i32 = arith.constant 16 : i32
    %17 = vector.broadcast %c16_i32 : i32 to vector<512x1xi32>
    %18 = arith.cmpi slt, %16, %17 : vector<512x1xi32>
    %c0 = arith.constant 0 : index
    %c0_3 = arith.constant 0 : index
    %c0_4 = arith.constant 0 : index
    %19 = vector.load %arg1[%c0, %c0_3, %c0_4] : memref<1x608x4xf32, #tpu.memory_space<vmem>>, vector<1x512x4xf32>
    %20 = vector.shape_cast %19 : vector<1x512x4xf32> to vector<512x4xf32>
    %c0_5 = arith.constant 0 : index
    %c0_6 = arith.constant 0 : index
    %c0_7 = arith.constant 0 : index
    %21 = vector.load %arg3[%c0_5, %c0_6, %c0_7] : memref<9x4x4xf32, #tpu.memory_space<vmem>>, vector<1x4x4xf32>
    %22 = vector.shape_cast %21 : vector<1x4x4xf32> to vector<4x4xf32>
    %cst = arith.constant dense<0.000000e+00> : vector<512x4xf32>
    %23 = tpu.matmul %20, %22, %cst {dimension_numbers = #tpu.dot_dimension_numbers<[1], [0], [0], [1], [0, 0, 1, 1], [], []>} : vector<512x4xf32>, vector<4x4xf32>, vector<512x4xf32> -> vector<512x4xf32>
    %c0_8 = arith.constant 0 : index
    %c1 = arith.constant 1 : index
    %c0_9 = arith.constant 0 : index
    %24 = vector.load %arg1[%c0_8, %c1, %c0_9] : memref<1x608x4xf32, #tpu.memory_space<vmem>>, vector<1x512x4xf32>
    %25 = vector.shape_cast %24 : vector<1x512x4xf32> to vector<512x4xf32>
    %c1_10 = arith.constant 1 : index
    %c0_11 = arith.constant 0 : index
    %c0_12 = arith.constant 0 : index
    %26 = vector.load %arg3[%c1_10, %c0_11, %c0_12] : memref<9x4x4xf32, #tpu.memory_space<vmem>>, vector<1x4x4xf32>
    %27 = vector.shape_cast %26 : vector<1x4x4xf32> to vector<4x4xf32>
    %cst_13 = arith.constant dense<0.000000e+00> : vector<512x4xf32>
    %28 = tpu.matmul %25, %27, %cst_13 {dimension_numbers = #tpu.dot_dimension_numbers<[1], [0], [0], [1], [0, 0, 1, 1], [], []>} : vector<512x4xf32>, vector<4x4xf32>, vector<512x4xf32> -> vector<512x4xf32>
    %29 = arith.addf %23, %28 : vector<512x4xf32>
    %c0_14 = arith.constant 0 : index
    %c2 = arith.constant 2 : index
    %c0_15 = arith.constant 0 : index
    %30 = vector.load %arg1[%c0_14, %c2, %c0_15] : memref<1x608x4xf32, #tpu.memory_space<vmem>>, vector<1x512x4xf32>
    %31 = vector.shape_cast %30 : vector<1x512x4xf32> to vector<512x4xf32>
    %c2_16 = arith.constant 2 : index
    %c0_17 = arith.constant 0 : index
    %c0_18 = arith.constant 0 : index
    %32 = vector.load %arg3[%c2_16, %c0_17, %c0_18] : memref<9x4x4xf32, #tpu.memory_space<vmem>>, vector<1x4x4xf32>
    %33 = vector.shape_cast %32 : vector<1x4x4xf32> to vector<4x4xf32>
    %cst_19 = arith.constant dense<0.000000e+00> : vector<512x4xf32>
    %34 = tpu.matmul %31, %33, %cst_19 {dimension_numbers = #tpu.dot_dimension_numbers<[1], [0], [0], [1], [0, 0, 1, 1], [], []>} : vector<512x4xf32>, vector<4x4xf32>, vector<512x4xf32> -> vector<512x4xf32>
    %35 = arith.addf %29, %34 : vector<512x4xf32>
    %c0_20 = arith.constant 0 : index
    %c32 = arith.constant 32 : index
    %c0_21 = arith.constant 0 : index
    %36 = vector.load %arg1[%c0_20, %c32, %c0_21] : memref<1x608x4xf32, #tpu.memory_space<vmem>>, vector<1x512x4xf32>
    %37 = vector.shape_cast %36 : vector<1x512x4xf32> to vector<512x4xf32>
    %c3 = arith.constant 3 : index
    %c0_22 = arith.constant 0 : index
    %c0_23 = arith.constant 0 : index
    %38 = vector.load %arg3[%c3, %c0_22, %c0_23] : memref<9x4x4xf32, #tpu.memory_space<vmem>>, vector<1x4x4xf32>
    %39 = vector.shape_cast %38 : vector<1x4x4xf32> to vector<4x4xf32>
    %cst_24 = arith.constant dense<0.000000e+00> : vector<512x4xf32>
    %40 = tpu.matmul %37, %39, %cst_24 {dimension_numbers = #tpu.dot_dimension_numbers<[1], [0], [0], [1], [0, 0, 1, 1], [], []>} : vector<512x4xf32>, vector<4x4xf32>, vector<512x4xf32> -> vector<512x4xf32>
    %41 = arith.addf %35, %40 : vector<512x4xf32>
    %c0_25 = arith.constant 0 : index
    %c33 = arith.constant 33 : index
    %c0_26 = arith.constant 0 : index
    %42 = vector.load %arg1[%c0_25, %c33, %c0_26] : memref<1x608x4xf32, #tpu.memory_space<vmem>>, vector<1x512x4xf32>
    %43 = vector.shape_cast %42 : vector<1x512x4xf32> to vector<512x4xf32>
    %c4 = arith.constant 4 : index
    %c0_27 = arith.constant 0 : index
    %c0_28 = arith.constant 0 : index
    %44 = vector.load %arg3[%c4, %c0_27, %c0_28] : memref<9x4x4xf32, #tpu.memory_space<vmem>>, vector<1x4x4xf32>
    %45 = vector.shape_cast %44 : vector<1x4x4xf32> to vector<4x4xf32>
    %cst_29 = arith.constant dense<0.000000e+00> : vector<512x4xf32>
    %46 = tpu.matmul %43, %45, %cst_29 {dimension_numbers = #tpu.dot_dimension_numbers<[1], [0], [0], [1], [0, 0, 1, 1], [], []>} : vector<512x4xf32>, vector<4x4xf32>, vector<512x4xf32> -> vector<512x4xf32>
    %47 = arith.addf %41, %46 : vector<512x4xf32>
    %c0_30 = arith.constant 0 : index
    %c34 = arith.constant 34 : index
    %c0_31 = arith.constant 0 : index
    %48 = vector.load %arg1[%c0_30, %c34, %c0_31] : memref<1x608x4xf32, #tpu.memory_space<vmem>>, vector<1x512x4xf32>
    %49 = vector.shape_cast %48 : vector<1x512x4xf32> to vector<512x4xf32>
    %c5 = arith.constant 5 : index
    %c0_32 = arith.constant 0 : index
    %c0_33 = arith.constant 0 : index
    %50 = vector.load %arg3[%c5, %c0_32, %c0_33] : memref<9x4x4xf32, #tpu.memory_space<vmem>>, vector<1x4x4xf32>
    %51 = vector.shape_cast %50 : vector<1x4x4xf32> to vector<4x4xf32>
    %cst_34 = arith.constant dense<0.000000e+00> : vector<512x4xf32>
    %52 = tpu.matmul %49, %51, %cst_34 {dimension_numbers = #tpu.dot_dimension_numbers<[1], [0], [0], [1], [0, 0, 1, 1], [], []>} : vector<512x4xf32>, vector<4x4xf32>, vector<512x4xf32> -> vector<512x4xf32>
    %53 = arith.addf %47, %52 : vector<512x4xf32>
    %c0_35 = arith.constant 0 : index
    %c64 = arith.constant 64 : index
    %c0_36 = arith.constant 0 : index
    %54 = vector.load %arg1[%c0_35, %c64, %c0_36] : memref<1x608x4xf32, #tpu.memory_space<vmem>>, vector<1x512x4xf32>
    %55 = vector.shape_cast %54 : vector<1x512x4xf32> to vector<512x4xf32>
    %c6 = arith.constant 6 : index
    %c0_37 = arith.constant 0 : index
    %c0_38 = arith.constant 0 : index
    %56 = vector.load %arg3[%c6, %c0_37, %c0_38] : memref<9x4x4xf32, #tpu.memory_space<vmem>>, vector<1x4x4xf32>
    %57 = vector.shape_cast %56 : vector<1x4x4xf32> to vector<4x4xf32>
    %cst_39 = arith.constant dense<0.000000e+00> : vector<512x4xf32>
    %58 = tpu.matmul %55, %57, %cst_39 {dimension_numbers = #tpu.dot_dimension_numbers<[1], [0], [0], [1], [0, 0, 1, 1], [], []>} : vector<512x4xf32>, vector<4x4xf32>, vector<512x4xf32> -> vector<512x4xf32>
    %59 = arith.addf %53, %58 : vector<512x4xf32>
    %c0_40 = arith.constant 0 : index
    %c65 = arith.constant 65 : index
    %c0_41 = arith.constant 0 : index
    %60 = vector.load %arg1[%c0_40, %c65, %c0_41] : memref<1x608x4xf32, #tpu.memory_space<vmem>>, vector<1x512x4xf32>
    %61 = vector.shape_cast %60 : vector<1x512x4xf32> to vector<512x4xf32>
    %c7 = arith.constant 7 : index
    %c0_42 = arith.constant 0 : index
    %c0_43 = arith.constant 0 : index
    %62 = vector.load %arg3[%c7, %c0_42, %c0_43] : memref<9x4x4xf32, #tpu.memory_space<vmem>>, vector<1x4x4xf32>
    %63 = vector.shape_cast %62 : vector<1x4x4xf32> to vector<4x4xf32>
    %cst_44 = arith.constant dense<0.000000e+00> : vector<512x4xf32>
    %64 = tpu.matmul %61, %63, %cst_44 {dimension_numbers = #tpu.dot_dimension_numbers<[1], [0], [0], [1], [0, 0, 1, 1], [], []>} : vector<512x4xf32>, vector<4x4xf32>, vector<512x4xf32> -> vector<512x4xf32>
    %65 = arith.addf %59, %64 : vector<512x4xf32>
    %c0_45 = arith.constant 0 : index
    %c66 = arith.constant 66 : index
    %c0_46 = arith.constant 0 : index
    %66 = vector.load %arg1[%c0_45, %c66, %c0_46] : memref<1x608x4xf32, #tpu.memory_space<vmem>>, vector<1x512x4xf32>
    %67 = vector.shape_cast %66 : vector<1x512x4xf32> to vector<512x4xf32>
    %c8 = arith.constant 8 : index
    %c0_47 = arith.constant 0 : index
    %c0_48 = arith.constant 0 : index
    %68 = vector.load %arg3[%c8, %c0_47, %c0_48] : memref<9x4x4xf32, #tpu.memory_space<vmem>>, vector<1x4x4xf32>
    %69 = vector.shape_cast %68 : vector<1x4x4xf32> to vector<4x4xf32>
    %cst_49 = arith.constant dense<0.000000e+00> : vector<512x4xf32>
    %70 = tpu.matmul %67, %69, %cst_49 {dimension_numbers = #tpu.dot_dimension_numbers<[1], [0], [0], [1], [0, 0, 1, 1], [], []>} : vector<512x4xf32>, vector<4x4xf32>, vector<512x4xf32> -> vector<512x4xf32>
    %71 = arith.addf %65, %70 : vector<512x4xf32>
    %cst_50 = arith.constant 0.000000e+00 : f32
    %72 = vector.shape_cast %18 : vector<512x1xi1> to vector<512x1xi1>
    %73 = vector.broadcast %72 : vector<512x1xi1> to vector<512x4xi1>
    %74 = vector.broadcast %cst_50 : f32 to vector<512x4xf32>
    %75 = arith.select %73, %71, %74 : vector<512x4xi1>, vector<512x4xf32>
    %cst_51 = arith.constant dense<0.000000e+00> : vector<4xf32>
    %76 = vector.multi_reduction <add>, %75, %cst_51 [0] : vector<512x4xf32> to vector<4xf32>
    %77 = vector.shape_cast %76 : vector<4xf32> to vector<1x4xf32>
    %cst_52 = arith.constant 3.906250e-03 : f32
    %78 = vector.broadcast %cst_52 : f32 to vector<1x4xf32>
    %79 = arith.mulf %77, %78 : vector<1x4xf32>
    %80 = arith.mulf %75, %75 : vector<512x4xf32>
    %cst_53 = arith.constant dense<0.000000e+00> : vector<4xf32>
    %81 = vector.multi_reduction <add>, %80, %cst_53 [0] : vector<512x4xf32> to vector<4xf32>
    %82 = vector.shape_cast %81 : vector<4xf32> to vector<1x4xf32>
    %cst_54 = arith.constant 3.906250e-03 : f32
    %83 = vector.broadcast %cst_54 : f32 to vector<1x4xf32>
    %84 = arith.mulf %82, %83 : vector<1x4xf32>
    %85 = arith.mulf %79, %79 : vector<1x4xf32>
    %86 = arith.subf %84, %85 : vector<1x4xf32>
    %cst_55 = arith.constant 0.000000e+00 : f32
    %87 = vector.broadcast %cst_55 : f32 to vector<1x4xf32>
    %88 = arith.maximumf %86, %87 : vector<1x4xf32>
    %c0_56 = arith.constant 0 : index
    %c0_57 = arith.constant 0 : index
    %89 = vector.load %arg4[%c0_56, %c0_57] : memref<1x4xf32, #tpu.memory_space<vmem>>, vector<1x4xf32>
    %cst_58 = arith.constant 9.99999974E-6 : f32
    %90 = vector.broadcast %cst_58 : f32 to vector<1x4xf32>
    %91 = arith.addf %88, %90 : vector<1x4xf32>
    %92 = math.rsqrt %91 : vector<1x4xf32>
    %93 = arith.mulf %89, %92 : vector<1x4xf32>
    %c0_59 = arith.constant 0 : index
    %c0_60 = arith.constant 0 : index
    %94 = vector.load %arg5[%c0_59, %c0_60] : memref<1x4xf32, #tpu.memory_space<vmem>>, vector<1x4xf32>
    %95 = arith.mulf %79, %93 : vector<1x4xf32>
    %96 = arith.subf %94, %95 : vector<1x4xf32>
    %97 = vector.broadcast %93 : vector<1x4xf32> to vector<512x4xf32>
    %98 = arith.mulf %71, %97 : vector<512x4xf32>
    %99 = vector.broadcast %96 : vector<1x4xf32> to vector<512x4xf32>
    %100 = arith.addf %98, %99 : vector<512x4xf32>
    %cst_61 = arith.constant 0.000000e+00 : f32
    %101 = vector.broadcast %cst_61 : f32 to vector<512x4xf32>
    %102 = arith.maximumf %100, %101 : vector<512x4xf32>
    %cst_62 = arith.constant 0.000000e+00 : f32
    %103 = vector.broadcast %cst_62 : f32 to vector<16x4xf32>
    %c576 = arith.constant 576 : index
    %c0_63 = arith.constant 0 : index
    %104 = vector.load %arg10[%c576, %c0_63] : memref<592x4xf32, #tpu.memory_space<vmem>>, vector<16x4xf32>
    tpu.vector_store %arg10[%c576, %c0_63], %103 {strides = array<i32>} : memref<592x4xf32, #tpu.memory_space<vmem>>, vector<16x4xf32>,
    %c40 = arith.constant 40 : index
    %c0_64 = arith.constant 0 : index
    %105 = vector.load %arg10[%c40, %c0_64] : memref<592x4xf32, #tpu.memory_space<vmem>>, vector<512x4xf32>
    tpu.vector_store %arg10[%c40, %c0_64], %102 {strides = array<i32>} : memref<592x4xf32, #tpu.memory_space<vmem>>, vector<512x4xf32>,
    %106 = vector.extract_strided_slice %102 {offsets = [32, 0], sizes = [32, 4], strides = [1, 1]} : vector<512x4xf32> to vector<32x4xf32>
    %c8_65 = arith.constant 8 : index
    %c0_66 = arith.constant 0 : index
    %107 = vector.load %arg10[%c8_65, %c0_66] : memref<592x4xf32, #tpu.memory_space<vmem>>, vector<32x4xf32>
    tpu.vector_store %arg10[%c8_65, %c0_66], %106 {strides = array<i32>} : memref<592x4xf32, #tpu.memory_space<vmem>>, vector<32x4xf32>,
    %108 = vector.extract_strided_slice %102 {offsets = [448, 0], sizes = [32, 4], strides = [1, 1]} : vector<512x4xf32> to vector<32x4xf32>
    %c552 = arith.constant 552 : index
    %c0_67 = arith.constant 0 : index
    %109 = vector.load %arg10[%c552, %c0_67] : memref<592x4xf32, #tpu.memory_space<vmem>>, vector<32x4xf32>
    tpu.vector_store %arg10[%c552, %c0_67], %108 {strides = array<i32>} : memref<592x4xf32, #tpu.memory_space<vmem>>, vector<32x4xf32>,
    %c0_i32_68 = arith.constant 0 : i32
    %c18_i32 = arith.constant 18 : i32
    %110 = arith.addi %c0_i32_68, %c18_i32 : i32
    %c1_i32_69 = arith.constant 1 : i32
    scf.for %arg11 = %c0_i32_68 to %110 step %c1_i32_69  : i32 {
      %c32_i32_136 = arith.constant 32 : i32
      %190 = arith.muli %arg11, %c32_i32_136 : i32
      %c9_i32 = arith.constant 9 : i32
      %191 = arith.addi %190, %c9_i32 : i32
      %192 = arith.index_cast %191 : i32 to index
      %c0_137 = arith.constant 0 : index
      %193 = vector.load %arg10[%192, %c0_137] : memref<592x4xf32, #tpu.memory_space<vmem>>, vector<1x4xf32>
      %c7_i32 = arith.constant 7 : i32
      %194 = arith.addi %190, %c7_i32 : i32
      %195 = arith.index_cast %194 : i32 to index
      %c0_138 = arith.constant 0 : index
      %196 = vector.load %arg10[%195, %c0_138] : memref<592x4xf32, #tpu.memory_space<vmem>>, vector<1x4xf32>
      tpu.vector_store %arg10[%195, %c0_138], %193 {strides = array<i32>} : memref<592x4xf32, #tpu.memory_space<vmem>>, vector<1x4xf32>,
      %c16_i32_139 = arith.constant 16 : i32
      %197 = arith.addi %190, %c16_i32_139 : i32
      %c6_i32 = arith.constant 6 : i32
      %198 = arith.addi %197, %c6_i32 : i32
      %199 = arith.index_cast %198 : i32 to index
      %c0_140 = arith.constant 0 : index
      %200 = vector.load %arg10[%199, %c0_140] : memref<592x4xf32, #tpu.memory_space<vmem>>, vector<1x4xf32>
      %c16_i32_141 = arith.constant 16 : i32
      %201 = arith.addi %190, %c16_i32_141 : i32
      %c8_i32 = arith.constant 8 : i32
      %202 = arith.addi %201, %c8_i32 : i32
      %203 = arith.index_cast %202 : i32 to index
      %c0_142 = arith.constant 0 : index
      %204 = vector.load %arg10[%203, %c0_142] : memref<592x4xf32, #tpu.memory_space<vmem>>, vector<1x4xf32>
      tpu.vector_store %arg10[%203, %c0_142], %200 {strides = array<i32>} : memref<592x4xf32, #tpu.memory_space<vmem>>, vector<1x4xf32>,
    }
    %c18_i32_70 = arith.constant 18 : i32
    %c7_71 = arith.constant 7 : index
    %c0_72 = arith.constant 0 : index
    %111 = vector.load %arg10[%c7_71, %c0_72] : memref<592x4xf32, #tpu.memory_space<vmem>>, vector<512x4xf32>
    %c0_73 = arith.constant 0 : index
    %c0_74 = arith.constant 0 : index
    %c0_75 = arith.constant 0 : index
    %112 = vector.load %arg6[%c0_73, %c0_74, %c0_75] : memref<9x4x4xf32, #tpu.memory_space<vmem>>, vector<1x4x4xf32>
    %113 = vector.shape_cast %112 : vector<1x4x4xf32> to vector<4x4xf32>
    %cst_76 = arith.constant dense<0.000000e+00> : vector<512x4xf32>
    %114 = tpu.matmul %111, %113, %cst_76 {dimension_numbers = #tpu.dot_dimension_numbers<[1], [0], [0], [1], [0, 0, 1, 1], [], []>} : vector<512x4xf32>, vector<4x4xf32>, vector<512x4xf32> -> vector<512x4xf32>
    %c8_77 = arith.constant 8 : index
    %c0_78 = arith.constant 0 : index
    %115 = vector.load %arg10[%c8_77, %c0_78] : memref<592x4xf32, #tpu.memory_space<vmem>>, vector<512x4xf32>
    %c1_79 = arith.constant 1 : index
    %c0_80 = arith.constant 0 : index
    %c0_81 = arith.constant 0 : index
    %116 = vector.load %arg6[%c1_79, %c0_80, %c0_81] : memref<9x4x4xf32, #tpu.memory_space<vmem>>, vector<1x4x4xf32>
    %117 = vector.shape_cast %116 : vector<1x4x4xf32> to vector<4x4xf32>
    %cst_82 = arith.constant dense<0.000000e+00> : vector<512x4xf32>
    %118 = tpu.matmul %115, %117, %cst_82 {dimension_numbers = #tpu.dot_dimension_numbers<[1], [0], [0], [1], [0, 0, 1, 1], [], []>} : vector<512x4xf32>, vector<4x4xf32>, vector<512x4xf32> -> vector<512x4xf32>
    %119 = arith.addf %114, %118 : vector<512x4xf32>
    %c9 = arith.constant 9 : index
    %c0_83 = arith.constant 0 : index
    %120 = vector.load %arg10[%c9, %c0_83] : memref<592x4xf32, #tpu.memory_space<vmem>>, vector<512x4xf32>
    %c2_84 = arith.constant 2 : index
    %c0_85 = arith.constant 0 : index
    %c0_86 = arith.constant 0 : index
    %121 = vector.load %arg6[%c2_84, %c0_85, %c0_86] : memref<9x4x4xf32, #tpu.memory_space<vmem>>, vector<1x4x4xf32>
    %122 = vector.shape_cast %121 : vector<1x4x4xf32> to vector<4x4xf32>
    %cst_87 = arith.constant dense<0.000000e+00> : vector<512x4xf32>
    %123 = tpu.matmul %120, %122, %cst_87 {dimension_numbers = #tpu.dot_dimension_numbers<[1], [0], [0], [1], [0, 0, 1, 1], [], []>} : vector<512x4xf32>, vector<4x4xf32>, vector<512x4xf32> -> vector<512x4xf32>
    %124 = arith.addf %119, %123 : vector<512x4xf32>
    %c39 = arith.constant 39 : index
    %c0_88 = arith.constant 0 : index
    %125 = vector.load %arg10[%c39, %c0_88] : memref<592x4xf32, #tpu.memory_space<vmem>>, vector<512x4xf32>
    %c3_89 = arith.constant 3 : index
    %c0_90 = arith.constant 0 : index
    %c0_91 = arith.constant 0 : index
    %126 = vector.load %arg6[%c3_89, %c0_90, %c0_91] : memref<9x4x4xf32, #tpu.memory_space<vmem>>, vector<1x4x4xf32>
    %127 = vector.shape_cast %126 : vector<1x4x4xf32> to vector<4x4xf32>
    %cst_92 = arith.constant dense<0.000000e+00> : vector<512x4xf32>
    %128 = tpu.matmul %125, %127, %cst_92 {dimension_numbers = #tpu.dot_dimension_numbers<[1], [0], [0], [1], [0, 0, 1, 1], [], []>} : vector<512x4xf32>, vector<4x4xf32>, vector<512x4xf32> -> vector<512x4xf32>
    %129 = arith.addf %124, %128 : vector<512x4xf32>
    %c40_93 = arith.constant 40 : index
    %c0_94 = arith.constant 0 : index
    %130 = vector.load %arg10[%c40_93, %c0_94] : memref<592x4xf32, #tpu.memory_space<vmem>>, vector<512x4xf32>
    %c4_95 = arith.constant 4 : index
    %c0_96 = arith.constant 0 : index
    %c0_97 = arith.constant 0 : index
    %131 = vector.load %arg6[%c4_95, %c0_96, %c0_97] : memref<9x4x4xf32, #tpu.memory_space<vmem>>, vector<1x4x4xf32>
    %132 = vector.shape_cast %131 : vector<1x4x4xf32> to vector<4x4xf32>
    %cst_98 = arith.constant dense<0.000000e+00> : vector<512x4xf32>
    %133 = tpu.matmul %130, %132, %cst_98 {dimension_numbers = #tpu.dot_dimension_numbers<[1], [0], [0], [1], [0, 0, 1, 1], [], []>} : vector<512x4xf32>, vector<4x4xf32>, vector<512x4xf32> -> vector<512x4xf32>
    %134 = arith.addf %129, %133 : vector<512x4xf32>
    %c41 = arith.constant 41 : index
    %c0_99 = arith.constant 0 : index
    %135 = vector.load %arg10[%c41, %c0_99] : memref<592x4xf32, #tpu.memory_space<vmem>>, vector<512x4xf32>
    %c5_100 = arith.constant 5 : index
    %c0_101 = arith.constant 0 : index
    %c0_102 = arith.constant 0 : index
    %136 = vector.load %arg6[%c5_100, %c0_101, %c0_102] : memref<9x4x4xf32, #tpu.memory_space<vmem>>, vector<1x4x4xf32>
    %137 = vector.shape_cast %136 : vector<1x4x4xf32> to vector<4x4xf32>
    %cst_103 = arith.constant dense<0.000000e+00> : vector<512x4xf32>
    %138 = tpu.matmul %135, %137, %cst_103 {dimension_numbers = #tpu.dot_dimension_numbers<[1], [0], [0], [1], [0, 0, 1, 1], [], []>} : vector<512x4xf32>, vector<4x4xf32>, vector<512x4xf32> -> vector<512x4xf32>
    %139 = arith.addf %134, %138 : vector<512x4xf32>
    %c71 = arith.constant 71 : index
    %c0_104 = arith.constant 0 : index
    %140 = vector.load %arg10[%c71, %c0_104] : memref<592x4xf32, #tpu.memory_space<vmem>>, vector<512x4xf32>
    %c6_105 = arith.constant 6 : index
    %c0_106 = arith.constant 0 : index
    %c0_107 = arith.constant 0 : index
    %141 = vector.load %arg6[%c6_105, %c0_106, %c0_107] : memref<9x4x4xf32, #tpu.memory_space<vmem>>, vector<1x4x4xf32>
    %142 = vector.shape_cast %141 : vector<1x4x4xf32> to vector<4x4xf32>
    %cst_108 = arith.constant dense<0.000000e+00> : vector<512x4xf32>
    %143 = tpu.matmul %140, %142, %cst_108 {dimension_numbers = #tpu.dot_dimension_numbers<[1], [0], [0], [1], [0, 0, 1, 1], [], []>} : vector<512x4xf32>, vector<4x4xf32>, vector<512x4xf32> -> vector<512x4xf32>
    %144 = arith.addf %139, %143 : vector<512x4xf32>
    %c72 = arith.constant 72 : index
    %c0_109 = arith.constant 0 : index
    %145 = vector.load %arg10[%c72, %c0_109] : memref<592x4xf32, #tpu.memory_space<vmem>>, vector<512x4xf32>
    %c7_110 = arith.constant 7 : index
    %c0_111 = arith.constant 0 : index
    %c0_112 = arith.constant 0 : index
    %146 = vector.load %arg6[%c7_110, %c0_111, %c0_112] : memref<9x4x4xf32, #tpu.memory_space<vmem>>, vector<1x4x4xf32>
    %147 = vector.shape_cast %146 : vector<1x4x4xf32> to vector<4x4xf32>
    %cst_113 = arith.constant dense<0.000000e+00> : vector<512x4xf32>
    %148 = tpu.matmul %145, %147, %cst_113 {dimension_numbers = #tpu.dot_dimension_numbers<[1], [0], [0], [1], [0, 0, 1, 1], [], []>} : vector<512x4xf32>, vector<4x4xf32>, vector<512x4xf32> -> vector<512x4xf32>
    %149 = arith.addf %144, %148 : vector<512x4xf32>
    %c73 = arith.constant 73 : index
    %c0_114 = arith.constant 0 : index
    %150 = vector.load %arg10[%c73, %c0_114] : memref<592x4xf32, #tpu.memory_space<vmem>>, vector<512x4xf32>
    %c8_115 = arith.constant 8 : index
    %c0_116 = arith.constant 0 : index
    %c0_117 = arith.constant 0 : index
    %151 = vector.load %arg6[%c8_115, %c0_116, %c0_117] : memref<9x4x4xf32, #tpu.memory_space<vmem>>, vector<1x4x4xf32>
    %152 = vector.shape_cast %151 : vector<1x4x4xf32> to vector<4x4xf32>
    %cst_118 = arith.constant dense<0.000000e+00> : vector<512x4xf32>
    %153 = tpu.matmul %150, %152, %cst_118 {dimension_numbers = #tpu.dot_dimension_numbers<[1], [0], [0], [1], [0, 0, 1, 1], [], []>} : vector<512x4xf32>, vector<4x4xf32>, vector<512x4xf32> -> vector<512x4xf32>
    %154 = arith.addf %149, %153 : vector<512x4xf32>
    %cst_119 = arith.constant 0.000000e+00 : f32
    %155 = vector.shape_cast %18 : vector<512x1xi1> to vector<512x1xi1>
    %156 = vector.broadcast %155 : vector<512x1xi1> to vector<512x4xi1>
    %157 = vector.broadcast %cst_119 : f32 to vector<512x4xf32>
    %158 = arith.select %156, %154, %157 : vector<512x4xi1>, vector<512x4xf32>
    %cst_120 = arith.constant dense<0.000000e+00> : vector<4xf32>
    %159 = vector.multi_reduction <add>, %158, %cst_120 [0] : vector<512x4xf32> to vector<4xf32>
    %160 = vector.shape_cast %159 : vector<4xf32> to vector<1x4xf32>
    %cst_121 = arith.constant 3.906250e-03 : f32
    %161 = vector.broadcast %cst_121 : f32 to vector<1x4xf32>
    %162 = arith.mulf %160, %161 : vector<1x4xf32>
    %163 = arith.mulf %158, %158 : vector<512x4xf32>
    %cst_122 = arith.constant dense<0.000000e+00> : vector<4xf32>
    %164 = vector.multi_reduction <add>, %163, %cst_122 [0] : vector<512x4xf32> to vector<4xf32>
    %165 = vector.shape_cast %164 : vector<4xf32> to vector<1x4xf32>
    %cst_123 = arith.constant 3.906250e-03 : f32
    %166 = vector.broadcast %cst_123 : f32 to vector<1x4xf32>
    %167 = arith.mulf %165, %166 : vector<1x4xf32>
    %168 = arith.mulf %162, %162 : vector<1x4xf32>
    %169 = arith.subf %167, %168 : vector<1x4xf32>
    %cst_124 = arith.constant 0.000000e+00 : f32
    %170 = vector.broadcast %cst_124 : f32 to vector<1x4xf32>
    %171 = arith.maximumf %169, %170 : vector<1x4xf32>
    %c0_125 = arith.constant 0 : index
    %c0_126 = arith.constant 0 : index
    %172 = vector.load %arg7[%c0_125, %c0_126] : memref<1x4xf32, #tpu.memory_space<vmem>>, vector<1x4xf32>
    %cst_127 = arith.constant 9.99999974E-6 : f32
    %173 = vector.broadcast %cst_127 : f32 to vector<1x4xf32>
    %174 = arith.addf %171, %173 : vector<1x4xf32>
    %175 = math.rsqrt %174 : vector<1x4xf32>
    %176 = arith.mulf %172, %175 : vector<1x4xf32>
    %c0_128 = arith.constant 0 : index
    %c0_129 = arith.constant 0 : index
    %177 = vector.load %arg8[%c0_128, %c0_129] : memref<1x4xf32, #tpu.memory_space<vmem>>, vector<1x4xf32>
    %178 = arith.mulf %162, %176 : vector<1x4xf32>
    %179 = arith.subf %177, %178 : vector<1x4xf32>
    %180 = vector.broadcast %176 : vector<1x4xf32> to vector<512x4xf32>
    %181 = arith.mulf %154, %180 : vector<512x4xf32>
    %182 = vector.broadcast %179 : vector<1x4xf32> to vector<512x4xf32>
    %183 = arith.addf %181, %182 : vector<512x4xf32>
    %c0_130 = arith.constant 0 : index
    %c0_131 = arith.constant 0 : index
    %c0_132 = arith.constant 0 : index
    %184 = vector.load %arg2[%c0_130, %c0_131, %c0_132] : memref<1x512x4xf32, #tpu.memory_space<vmem>>, vector<1x512x4xf32>
    %185 = vector.shape_cast %184 : vector<1x512x4xf32> to vector<512x4xf32>
    %186 = arith.addf %183, %185 : vector<512x4xf32>
    %c0_133 = arith.constant 0 : index
    %c0_134 = arith.constant 0 : index
    %c0_135 = arith.constant 0 : index
    %187 = vector.load %arg9[%c0_133, %c0_134, %c0_135] : memref<1x512x4xf32, #tpu.memory_space<vmem>>, vector<1x512x4xf32>
    %188 = vector.shape_cast %187 : vector<1x512x4xf32> to vector<512x4xf32>
    %189 = vector.shape_cast %186 : vector<512x4xf32> to vector<1x512x4xf32>
    tpu.vector_store %arg9[%c0_133, %c0_134, %c0_135], %189 {strides = array<i32>} : memref<1x512x4xf32, #tpu.memory_space<vmem>>, vector<1x512x4xf32>,
    return
  }
  func.func @transform_0(%arg0: i32) -> (i32, i32, i32) {
    %c0_i32 = arith.constant 0 : i32
    %c0_i32_0 = arith.constant 0 : i32
    %c0_i32_1 = arith.constant 0 : i32
    return %arg0, %c0_i32, %c0_i32_0 : i32, i32, i32
  }
  func.func @transform_1(%arg0: i32) -> (i32, i32, i32) {
    %c0_i32 = arith.constant 0 : i32
    %c0_i32_0 = arith.constant 0 : i32
    %c0_i32_1 = arith.constant 0 : i32
    return %arg0, %c0_i32, %c0_i32_0 : i32, i32, i32
  }
  func.func @transform_2(%arg0: i32) -> (i32, i32, i32) {
    %c0_i32 = arith.constant 0 : i32
    %c0_i32_0 = arith.constant 0 : i32
    %c0_i32_1 = arith.constant 0 : i32
    %c0_i32_2 = arith.constant 0 : i32
    return %c0_i32, %c0_i32_0, %c0_i32_1 : i32, i32, i32
  }
  func.func @transform_3(%arg0: i32) -> (i32, i32) {
    %c0_i32 = arith.constant 0 : i32
    %c0_i32_0 = arith.constant 0 : i32
    %c0_i32_1 = arith.constant 0 : i32
    return %c0_i32, %c0_i32_0 : i32, i32
  }
  func.func @transform_4(%arg0: i32) -> (i32, i32) {
    %c0_i32 = arith.constant 0 : i32
    %c0_i32_0 = arith.constant 0 : i32
    %c0_i32_1 = arith.constant 0 : i32
    return %c0_i32, %c0_i32_0 : i32, i32
  }
  func.func @transform_5(%arg0: i32) -> (i32, i32, i32) {
    %c0_i32 = arith.constant 0 : i32
    %c0_i32_0 = arith.constant 0 : i32
    %c0_i32_1 = arith.constant 0 : i32
    %c0_i32_2 = arith.constant 0 : i32
    return %c0_i32, %c0_i32_0, %c0_i32_1 : i32, i32, i32
  }
  func.func @transform_6(%arg0: i32) -> (i32, i32) {
    %c0_i32 = arith.constant 0 : i32
    %c0_i32_0 = arith.constant 0 : i32
    %c0_i32_1 = arith.constant 0 : i32
    return %c0_i32, %c0_i32_0 : i32, i32
  }
  func.func @transform_7(%arg0: i32) -> (i32, i32) {
    %c0_i32 = arith.constant 0 : i32
    %c0_i32_0 = arith.constant 0 : i32
    %c0_i32_1 = arith.constant 0 : i32
    return %c0_i32, %c0_i32_0 : i32, i32
  }
  func.func @transform_8(%arg0: i32) -> (i32, i32, i32) {
    %c0_i32 = arith.constant 0 : i32
    %c0_i32_0 = arith.constant 0 : i32
    %c0_i32_1 = arith.constant 0 : i32
    return %arg0, %c0_i32, %c0_i32_0 : i32, i32, i32
  }
}

</mosaic_0001>

<bundles_post_ra>
// kernel: tpu_custom_call.1
= control target key start
LH: loop header
LB: loop body
LE: loop exit
PB: predicated region body
PF: predicated region fallthrough
CT: control target
= control target key end

     0   :  { %s20651_s27 = smov 0   ;;  %s25893_s0 = inlined_call_operand.vmem [shape: f32[2,608,4], index: 0, kind: input, shape index: {}]   ;;  %s25894_s1 = inlined_call_operand.vmem [shape: f32[2,512,4], index: 1, kind: input, shape index: {}]   ;;  %s25895_s2 = inlined_call_operand.vmem [shape: f32[9,4,4], index: 2, kind: input, shape index: {}]   ;;  %s25896_s3 = inlined_call_operand.vmem [shape: f32[1,4], index: 3, kind: input, shape index: {}]   ;;  %s25897_s4 = inlined_call_operand.vmem [shape: f32[1,4], index: 4, kind: input, shape index: {}]   ;;  %s25898_s5 = inlined_call_operand.vmem [shape: f32[9,4,4], index: 5, kind: input, shape index: {}]   ;;  %s25899_s6 = inlined_call_operand.vmem [shape: f32[1,4], index: 6, kind: input, shape index: {}]   ;;  %s25900_s7 = inlined_call_operand.vmem [shape: f32[1,4], index: 7, kind: input, shape index: {}]   ;;  %s25901_s8 = inlined_call_operand.vmem [shape: f32[2,512,4], index: 8, kind: output, shape index: {}]  }
   0x1 LB: > { %s15401_s28 = sadd.s32 4294967295, %s20599_s27   ;;  %p15405_p0 = scmp.ge.s32.totalorder %s20599_s27, 1  ;;  %s20599_s27 = sphi %s20651_s27, %s18_s27  }
   0x2   : > { %p272_p1 = scmp.lt.s32.totalorder %s20599_s27, 3 }
   0x4   : > { %p273_p2 = pnand %p15405_p0, %p272_p1 }
   0x6   : > { %276 = sbr.rel (%p273_p2) target bundleno = 2993 (0xbb1), region = 52 }
   0xd   : > { %v15411_v0 = vld [vmem:[%s25895_s2 + $0x4] sm:$0xf]  ;;  %vm1547_vm0 = vcmask 1043456   ;;  %p311_p3 = scmp.lt.s32.totalorder %s15401_s28, 1  ;;  %v1287_v1 = vld [vmem:[%s25895_s2] sm:$0xf] }
   0xe   : > { %17779 = vmatprep.subr.msk.mxu0 %vm1547_vm0, %v15411_v0  ;;  %vm1354_vm1 = vcmask 31744   ;;  %v20690_v5 = vld [vmem:[%s25895_s2 + $0x8] sm:$0xf] }
   0xf   : > { %17780 = vmatpush3.msk.msra.mxu0 %vm1547_vm0, %v15411_v0  ;;  %s26589_s28 = smov (!%p311_p3, %s15401_s28), 1 }
  0x10   : > { %17877 = vmatprep.subr.msk.mxu0 %vm1547_vm0, %v1287_v1  ;;  %s20567_s11 = smul.u32 608, %s26589_s28  ;;  %s16607_s12 = sshll.u32 %s26589_s28, 9 }
  0x11   : > { %s20671_s15 = scalar_lea.vmem %s25894_s1, %s16607_s12  ;;  %s20676_s18 = scalar_lea.vmem %s25901_s8, %s16607_s12 }
  0x12   : > { %s20681_s21 = scalar_lea.vmem %s25893_s0, %s20567_s11 }
  0x13   : > { %v1288_v2 = vld [vmem:[%s20681_s21 + $0x1] sm:$0xff]  ;;  %v1289_v3 = vld [vmem:[%s20681_s21 + $0x9] sm:$0xff]  ;;  %v1290_v4 = vld [vmem:[%s20681_s21 + $0x11] sm:$0xff] }
  0x14   : > { %17781 = vmatprep.mubr.msk.f32.mxu0 %vm1354_vm1, %v1288_v2  ;;  %v1291_v6 = vld [vmem:[%s20681_s21 + $0x19] sm:$0xff]  ;;  %v1292_v7 = vld [vmem:[%s20681_s21 + $0x21] sm:$0xff]  ;;  %v1293_v8 = vld [vmem:[%s20681_s21 + $0x29] sm:$0xff] }
  0x15   : > { %17782 = vmatmul.mubr.msk.f32.vlgmr.msra.gmra.mrb[0].mxu0 %vm1354_vm1, %v1289_v3  ;;  %v1294_v9 = vld [vmem:[%s20681_s21 + $0x31] sm:$0xff]  ;;  %v1295_v10 = vld [vmem:[%s20681_s21 + $0x39] sm:$0xff]  ;;  %v1296_v11 = vld [vmem:[%s20681_s21 + $0x41] sm:$0xff] }
  0x16   : > { %17878 = vmatpush3.msk.msra.mxu0 %vm1547_vm0, %v1287_v1  ;;  %17784 = vmatprep.mubr.msk.f32.mxu0 %vm1354_vm1, %v1290_v4  ;;  %v1297_v12 = vld [vmem:[%s20681_s21 + $0x49] sm:$0xff]  ;;  %v1298_v13 = vld [vmem:[%s20681_s21 + $0x51] sm:$0xff]  ;;  %v1299_v14 = vld [vmem:[%s20681_s21 + $0x59] sm:$0xff] }
  0x17   : > { %17975 = vmatprep.subr.msk.mxu0 %vm1547_vm0, %v20690_v5  ;;  %v1300_v15 = vld [vmem:[%s20681_s21 + $0x61] sm:$0xff]  ;;  %v1301_v16 = vld [vmem:[%s20681_s21 + $0x69] sm:$0xff]  ;;  %v1302_v17 = vld [vmem:[%s20681_s21 + $0x71] sm:$0xff] }
  0x18   : > { %v1303_v18 = vld [vmem:[%s20681_s21 + $0x79] sm:$0xff]  ;;  %v1304_v19 = vld [vmem:[%s20681_s21 + $0x81] sm:$0xff]  ;;  %v1305_v20 = vld [vmem:[%s20681_s21 + $0x89] sm:$0xff] }
  0x19   : > { %17785 = vmatmul.mubr.msk.f32.gmra.mrb[2].mxu0 %vm1354_vm1, %v1291_v6  ;;  %v1306_v21 = vld [vmem:[%s20681_s21 + $0x91] sm:$0xff]  ;;  %v1307_v22 = vld [vmem:[%s20681_s21 + $0x99] sm:$0xff]  ;;  %v1308_v23 = vld [vmem:[%s20681_s21 + $0xa1] sm:$0xff] }
  0x1a   : > { %17787 = vmatprep.mubr.msk.f32.mxu0 %vm1354_vm1, %v1292_v7  ;;  %v1309_v24 = vld [vmem:[%s20681_s21 + $0xa9] sm:$0xff]  ;;  %v1310_v25 = vld [vmem:[%s20681_s21 + $0xb1] sm:$0xff]  ;;  %v1311_v26 = vld [vmem:[%s20681_s21 + $0xb9] sm:$0xff] }
  0x1b   : > { %v1312_v27 = vld [vmem:[%s20681_s21 + $0xc1] sm:$0xff]  ;;  %v1313_v28 = vld [vmem:[%s20681_s21 + $0xc9] sm:$0xff]  ;;  %v1314_v29 = vld [vmem:[%s20681_s21 + $0xd1] sm:$0xff] }
  0x1c   : > { %v1315_v30 = vld [vmem:[%s20681_s21 + $0xd9] sm:$0xff]  ;;  %v1316_v31 = vld [vmem:[%s20681_s21 + $0xe1] sm:$0xff]  ;;  %v1317_v32 = vld [vmem:[%s20681_s21 + $0xe9] sm:$0xff] }
  0x1d   : > { %17788 = vmatmul.mubr.msk.f32.gmra.mrb[4].mxu0 %vm1354_vm1, %v1293_v8  ;;  %v1318_v33 = vld [vmem:[%s20681_s21 + $0xf1] sm:$0xff]  ;;  %v1319_v34 = vld [vmem:[%s20681_s21 + $0xf9] sm:$0xff]  ;;  %v1320_v35 = vld [vmem:[%s20681_s21 + $0x101] sm:$0xff] }
  0x1e   : > { %17790 = vmatprep.mubr.msk.f32.mxu0 %vm1354_vm1, %v1294_v9  ;;  %v1321_v36 = vld [vmem:[%s20681_s21 + $0x109] sm:$0xff]  ;;  %v1322_v37 = vld [vmem:[%s20681_s21 + $0x111] sm:$0xff]  ;;  %v1323_v38 = vld [vmem:[%s20681_s21 + $0x119] sm:$0xff] }
  0x1f   : > { %v1324_v39 = vld [vmem:[%s20681_s21 + $0x121] sm:$0xff]  ;;  %v1325_v40 = vld [vmem:[%s20681_s21 + $0x129] sm:$0xff]  ;;  %v1326_v41 = vld [vmem:[%s20681_s21 + $0x131] sm:$0xff] }
  0x20   : > { %v1327_v42 = vld [vmem:[%s20681_s21 + $0x139] sm:$0xff]  ;;  %v1328_v43 = vld [vmem:[%s20681_s21 + $0x141] sm:$0xff]  ;;  %v1329_v44 = vld [vmem:[%s20681_s21 + $0x149] sm:$0xff] }
  0x21   : > { %17791 = vmatmul.mubr.msk.f32.gmra.mrb[6].mxu0 %vm1354_vm1, %v1295_v10  ;;  %v1330_v45 = vld [vmem:[%s20681_s21 + $0x151] sm:$0xff]  ;;  %v1331_v46 = vld [vmem:[%s20681_s21 + $0x159] sm:$0xff]  ;;  %v1332_v47 = vld [vmem:[%s20681_s21 + $0x161] sm:$0xff] }
  0x22   : > { %17793 = vmatprep.mubr.msk.f32.mxu0 %vm1354_vm1, %v1296_v11  ;;  %v1333_v48 = vld [vmem:[%s20681_s21 + $0x169] sm:$0xff]  ;;  %v1334_v49 = vld [vmem:[%s20681_s21 + $0x171] sm:$0xff]  ;;  %v1335_v50 = vld [vmem:[%s20681_s21 + $0x179] sm:$0xff] }
  0x23   : > { %v1336_v51 = vld [vmem:[%s20681_s21 + $0x181] sm:$0xff]  ;;  %v1337_v52 = vld [vmem:[%s20681_s21 + $0x189] sm:$0xff]  ;;  %v1338_v53 = vld [vmem:[%s20681_s21 + $0x191] sm:$0xff] }
  0x24   : > { %v1339_v54 = vld [vmem:[%s20681_s21 + $0x199] sm:$0xff]  ;;  %v1340_v55 = vld [vmem:[%s20681_s21 + $0x1a1] sm:$0xff]  ;;  %v1341_v56 = vld [vmem:[%s20681_s21 + $0x1a9] sm:$0xff] }
  0x25   : > { %17794 = vmatmul.mubr.msk.f32.gmra.mrb[8].mxu0 %vm1354_vm1, %v1297_v12  ;;  %v1342_v57 = vld [vmem:[%s20681_s21 + $0x1b1] sm:$0xff]  ;;  %v1343_v58 = vld [vmem:[%s20681_s21 + $0x1b9] sm:$0xff]  ;;  %v1344_v59 = vld [vmem:[%s20681_s21 + $0x1c1] sm:$0xff] }
  0x26   : > { %17796 = vmatprep.mubr.msk.f32.mxu0 %vm1354_vm1, %v1298_v13  ;;  %v1345_v60 = vld [vmem:[%s20681_s21 + $0x1c9] sm:$0xff]  ;;  %v1346_v61 = vld [vmem:[%s20681_s21 + $0x1d1] sm:$0xff]  ;;  %v1347_v62 = vld [vmem:[%s20681_s21 + $0x1d9] sm:$0xff] }
  0x27   : > { %v1348_v63 = vld [vmem:[%s20681_s21 + $0x1e1] sm:$0xff]  ;;  %v1349_v0 = vld [vmem:[%s20681_s21 + $0x1e9] sm:$0xff]  ;;  %v1350_v1 = vld [vmem:[%s20681_s21 + $0x1f1] sm:$0xff] }
  0x28   : > { %v1351_v2 = vld [vmem:[%s20681_s21 + $0x1f9] sm:$0xff]  ;;  %v1224_v4 = vld [vmem:[%s20681_s21 + $0x8] sm:$0xff]  ;;  %v1225_v6 = vld [vmem:[%s20681_s21 + $0x10] sm:$0xff] }
  0x29   : > { %17797 = vmatmul.mubr.msk.f32.gmra.mrb[10].mxu0 %vm1354_vm1, %v1299_v14  ;;  %v1223_v3 = vld [vmem:[%s20681_s21] sm:$0xff]  ;;  %v20826_v7 = vld [vmem:[%s25895_s2 + $0xc] sm:$0xf]  ;;  %v1226_v8 = vld [vmem:[%s20681_s21 + $0x18] sm:$0xff] }
  0x2a   : > { %17799 = vmatprep.mubr.msk.f32.mxu0 %vm1354_vm1, %v1300_v15  ;;  %v20834_v9 = vld [vmem:[%s20681_s21 + $0x20] sm:$0xff]  ;;  %v20842_v10 = vld [vmem:[%s20681_s21 + $0x28] sm:$0xff]  ;;  %v20852_v11 = vld [vmem:[%s20681_s21 + $0x38] sm:$0xff] }
  0x2b   : > { %v20855_v12 = vld [vmem:[%s20681_s21 + $0x40] sm:$0xff]  ;;  %v20862_v13 = vld [vmem:[%s20681_s21 + $0x48] sm:$0xff]  ;;  %v20865_v14 = vld [vmem:[%s20681_s21 + $0x50] sm:$0xff] }
  0x2c   : > { %v20872_v15 = vld [vmem:[%s20681_s21 + $0x58] sm:$0xff] }
  0x2d   : > { %17800 = vmatmul.mubr.msk.f32.gmra.mrb[12].mxu0 %vm1354_vm1, %v1301_v16  ;;  %v20875_v16 = vld [vmem:[%s20681_s21 + $0x60] sm:$0xff] }
  0x2e   : > { %17802 = vmatprep.mubr.msk.f32.mxu0 %vm1354_vm1, %v1302_v17  ;;  %v20882_v17 = vld [vmem:[%s20681_s21 + $0x68] sm:$0xff] }
  0x31   : > { %17803 = vmatmul.mubr.msk.f32.gmra.mrb[14].mxu0 %vm1354_vm1, %v1303_v18  ;;  %v20885_v18 = vld [vmem:[%s20681_s21 + $0x70] sm:$0xff] }
  0x32   : > { %17805 = vmatprep.mubr.msk.f32.mxu0 %vm1354_vm1, %v1304_v19  ;;  %v20892_v19 = vld [vmem:[%s20681_s21 + $0x78] sm:$0xff] }
  0x35   : > { %17806 = vmatmul.mubr.msk.f32.gmra.mrb[16].mxu0 %vm1354_vm1, %v1305_v20  ;;  %v20895_v20 = vld [vmem:[%s20681_s21 + $0x80] sm:$0xff] }
  0x36   : > { %17808 = vmatprep.mubr.msk.f32.mxu0 %vm1354_vm1, %v1306_v21  ;;  %v20902_v21 = vld [vmem:[%s20681_s21 + $0x88] sm:$0xff] }
  0x39   : > { %17809 = vmatmul.mubr.msk.f32.gmra.mrb[18].mxu0 %vm1354_vm1, %v1307_v22  ;;  %v20905_v22 = vld [vmem:[%s20681_s21 + $0x90] sm:$0xff] }
  0x3a   : > { %17811 = vmatprep.mubr.msk.f32.mxu0 %vm1354_vm1, %v1308_v23  ;;  %v20912_v23 = vld [vmem:[%s20681_s21 + $0x98] sm:$0xff] }
  0x3d   : > { %17812 = vmatmul.mubr.msk.f32.gmra.mrb[20].mxu0 %vm1354_vm1, %v1309_v24  ;;  %v20915_v24 = vld [vmem:[%s20681_s21 + $0xa0] sm:$0xff] }
  0x3e   : > { %17814 = vmatprep.mubr.msk.f32.mxu0 %vm1354_vm1, %v1310_v25  ;;  %v20922_v25 = vld [vmem:[%s20681_s21 + $0xa8] sm:$0xff] }
  0x41   : > { %17815 = vmatmul.mubr.msk.f32.gmra.mrb[22].mxu0 %vm1354_vm1, %v1311_v26  ;;  %v20925_v26 = vld [vmem:[%s20681_s21 + $0xb0] sm:$0xff] }
  0x42   : > { %17817 = vmatprep.mubr.msk.f32.mxu0 %vm1354_vm1, %v1312_v27  ;;  %v20932_v27 = vld [vmem:[%s20681_s21 + $0xb8] sm:$0xff] }
  0x45   : > { %17818 = vmatmul.mubr.msk.f32.gmra.mrb[24].mxu0 %vm1354_vm1, %v1313_v28  ;;  %v20935_v28 = vld [vmem:[%s20681_s21 + $0xc0] sm:$0xff] }
  0x46   : > { %17820 = vmatprep.mubr.msk.f32.mxu0 %vm1354_vm1, %v1314_v29  ;;  %v20942_v29 = vld [vmem:[%s20681_s21 + $0xc8] sm:$0xff] }
  0x49   : > { %17821 = vmatmul.mubr.msk.f32.gmra.mrb[26].mxu0 %vm1354_vm1, %v1315_v30  ;;  %v20945_v30 = vld [vmem:[%s20681_s21 + $0xd0] sm:$0xff] }
  0x4a   : > { %17823 = vmatprep.mubr.msk.f32.mxu0 %vm1354_vm1, %v1316_v31  ;;  %v20952_v31 = vld [vmem:[%s20681_s21 + $0xd8] sm:$0xff] }
  0x4d   : > { %17824 = vmatmul.mubr.msk.f32.gmra.mrb[28].mxu0 %vm1354_vm1, %v1317_v32  ;;  %v20955_v32 = vld [vmem:[%s20681_s21 + $0xe0] sm:$0xff] }
  0x4e   : > { %17826 = vmatprep.mubr.msk.f32.mxu0 %vm1354_vm1, %v1318_v33  ;;  %v20962_v33 = vld [vmem:[%s20681_s21 + $0xe8] sm:$0xff] }
  0x51   : > { %17827 = vmatmul.mubr.msk.f32.gmra.mrb[30].mxu0 %vm1354_vm1, %v1319_v34  ;;  %v20965_v34 = vld [vmem:[%s20681_s21 + $0xf0] sm:$0xff] }
  0x52   : > { %17829 = vmatprep.mubr.msk.f32.mxu0 %vm1354_vm1, %v1320_v35  ;;  %v20972_v35 = vld [vmem:[%s20681_s21 + $0xf8] sm:$0xff] }
  0x55   : > { %17830 = vmatmul.mubr.msk.f32.gmra.mrb[32].mxu0 %vm1354_vm1, %v1321_v36  ;;  %v20975_v36 = vld [vmem:[%s20681_s21 + $0x100] sm:$0xff] }
  0x56   : > { %17832 = vmatprep.mubr.msk.f32.mxu0 %vm1354_vm1, %v1322_v37  ;;  %v20982_v37 = vld [vmem:[%s20681_s21 + $0x108] sm:$0xff] }
  0x59   : > { %17833 = vmatmul.mubr.msk.f32.gmra.mrb[34].mxu0 %vm1354_vm1, %v1323_v38  ;;  %v20985_v38 = vld [vmem:[%s20681_s21 + $0x110] sm:$0xff] }
  0x5a   : > { %17835 = vmatprep.mubr.msk.f32.mxu0 %vm1354_vm1, %v1324_v39  ;;  %v20992_v39 = vld [vmem:[%s20681_s21 + $0x118] sm:$0xff] }
  0x5d   : > { %17836 = vmatmul.mubr.msk.f32.gmra.mrb[36].mxu0 %vm1354_vm1, %v1325_v40  ;;  %v20995_v40 = vld [vmem:[%s20681_s21 + $0x120] sm:$0xff] }
  0x5e   : > { %17838 = vmatprep.mubr.msk.f32.mxu0 %vm1354_vm1, %v1326_v41  ;;  %v21002_v41 = vld [vmem:[%s20681_s21 + $0x128] sm:$0xff] }
  0x61   : > { %17839 = vmatmul.mubr.msk.f32.gmra.mrb[38].mxu0 %vm1354_vm1, %v1327_v42  ;;  %v21005_v42 = vld [vmem:[%s20681_s21 + $0x130] sm:$0xff] }
  0x62   : > { %17841 = vmatprep.mubr.msk.f32.mxu0 %vm1354_vm1, %v1328_v43  ;;  %v21012_v43 = vld [vmem:[%s20681_s21 + $0x138] sm:$0xff] }
  0x65   : > { %17842 = vmatmul.mubr.msk.f32.gmra.mrb[40].mxu0 %vm1354_vm1, %v1329_v44  ;;  %v21015_v44 = vld [vmem:[%s20681_s21 + $0x140] sm:$0xff] }
  0x66   : > { %17844 = vmatprep.mubr.msk.f32.mxu0 %vm1354_vm1, %v1330_v45  ;;  %v21022_v45 = vld [vmem:[%s20681_s21 + $0x148] sm:$0xff] }
  0x69   : > { %17845 = vmatmul.mubr.msk.f32.gmra.mrb[42].mxu0 %vm1354_vm1, %v1331_v46  ;;  %v21025_v46 = vld [vmem:[%s20681_s21 + $0x150] sm:$0xff] }
  0x6a   : > { %17847 = vmatprep.mubr.msk.f32.mxu0 %vm1354_vm1, %v1332_v47  ;;  %v21032_v47 = vld [vmem:[%s20681_s21 + $0x158] sm:$0xff] }
  0x6d   : > { %17848 = vmatmul.mubr.msk.f32.gmra.mrb[44].mxu0 %vm1354_vm1, %v1333_v48  ;;  %v21035_v48 = vld [vmem:[%s20681_s21 + $0x160] sm:$0xff] }
  0x6e   : > { %17850 = vmatprep.mubr.msk.f32.mxu0 %vm1354_vm1, %v1334_v49  ;;  %v21042_v49 = vld [vmem:[%s20681_s21 + $0x168] sm:$0xff] }
  0x71   : > { %17851 = vmatmul.mubr.msk.f32.gmra.mrb[46].mxu0 %vm1354_vm1, %v1335_v50  ;;  %v21045_v50 = vld [vmem:[%s20681_s21 + $0x170] sm:$0xff] }
  0x72   : > { %17853 = vmatprep.mubr.msk.f32.mxu0 %vm1354_vm1, %v1336_v51  ;;  %v21052_v51 = vld [vmem:[%s20681_s21 + $0x178] sm:$0xff] }
  0x75   : > { %17854 = vmatmul.mubr.msk.f32.gmra.mrb[48].mxu0 %vm1354_vm1, %v1337_v52  ;;  %v21055_v52 = vld [vmem:[%s20681_s21 + $0x180] sm:$0xff] }
  0x76   : > { %17856 = vmatprep.mubr.msk.f32.mxu0 %vm1354_vm1, %v1338_v53  ;;  %v21062_v53 = vld [vmem:[%s20681_s21 + $0x188] sm:$0xff] }
  0x79   : > { %17857 = vmatmul.mubr.msk.f32.gmra.mrb[50].mxu0 %vm1354_vm1, %v1339_v54  ;;  %v21065_v54 = vld [vmem:[%s20681_s21 + $0x190] sm:$0xff] }
  0x7a   : > { %17859 = vmatprep.mubr.msk.f32.mxu0 %vm1354_vm1, %v1340_v55  ;;  %v21072_v55 = vld [vmem:[%s20681_s21 + $0x198] sm:$0xff] }
  0x7d   : > { %17860 = vmatmul.mubr.msk.f32.gmra.mrb[52].mxu0 %vm1354_vm1, %v1341_v56  ;;  %v21075_v56 = vld [vmem:[%s20681_s21 + $0x1a0] sm:$0xff] }
  0x7e   : > { %17862 = vmatprep.mubr.msk.f32.mxu0 %vm1354_vm1, %v1342_v57  ;;  %v21082_v57 = vld [vmem:[%s20681_s21 + $0x1a8] sm:$0xff] }
  0x81   : > { %17863 = vmatmul.mubr.msk.f32.gmra.mrb[54].mxu0 %vm1354_vm1, %v1343_v58  ;;  %v21085_v58 = vld [vmem:[%s20681_s21 + $0x1b0] sm:$0xff] }
  0x82   : > { %17865 = vmatprep.mubr.msk.f32.mxu0 %vm1354_vm1, %v1344_v59  ;;  %v21092_v59 = vld [vmem:[%s20681_s21 + $0x1b8] sm:$0xff] }
  0x85   : > { %17866 = vmatmul.mubr.msk.f32.gmra.mrb[56].mxu0 %vm1354_vm1, %v1345_v60  ;;  %v21095_v60 = vld [vmem:[%s20681_s21 + $0x1c0] sm:$0xff] }
  0x86   : > { %17868 = vmatprep.mubr.msk.f32.mxu0 %vm1354_vm1, %v1346_v61  ;;  %v21102_v61 = vld [vmem:[%s20681_s21 + $0x1c8] sm:$0xff] }
  0x89   : > { %17869 = vmatmul.mubr.msk.f32.gmra.mrb[58].mxu0 %vm1354_vm1, %v1347_v62  ;;  %v21105_v62 = vld [vmem:[%s20681_s21 + $0x1d0] sm:$0xff] }
  0x8a   : > { %17871 = vmatprep.mubr.msk.f32.mxu0 %vm1354_vm1, %v1348_v63  ;;  %v21112_v63 = vld [vmem:[%s20681_s21 + $0x1d8] sm:$0xff] }
  0x8d   : > { %17872 = vmatmul.mubr.msk.f32.gmra.mrb[60].mxu0 %vm1354_vm1, %v1349_v0  ;;  %v21115_v0 = vld [vmem:[%s20681_s21 + $0x1e0] sm:$0xff] }
  0x8e   : > { %17874 = vmatprep.mubr.msk.f32.mxu0 %vm1354_vm1, %v1350_v1  ;;  %v21122_v1 = vld [vmem:[%s20681_s21 + $0x1e8] sm:$0xff] }
  0x8f   : > { %26072 = vst [vmem:[#allocation3_spill] sm:$0xff] %v21122_v1 }
  0x91   : > { %17875 = vmatmul.mubr.msk.f32.gmra.mrb[62].mxu0 %vm1354_vm1, %v1351_v2  ;;  %v21125_v2 = vld [vmem:[%s20681_s21 + $0x1f0] sm:$0xff] }
  0x92   : > { %17879 = vmatprep.mubr.msk.f32.mxu0 %vm1354_vm1, %v1223_v3  ;;  %26073 = vst [vmem:[#allocation4_spill] sm:$0xff] %v21125_v2  ;;  %v21132_v3 = vld [vmem:[%s20681_s21 + $0x1f8] sm:$0xff] }
  0x93   : > { %26074 = vst [vmem:[#allocation5_spill] sm:$0xff] %v21132_v3 }
  0x95   : > { %17880 = vmatmul.mubr.msk.f32.vlgmr.msra.gmra.mrb[0].mxu0 %vm1354_vm1, %v1224_v4  ;;  %v2516_v4 = vld [vmem:[%s20681_s21 + $0x2] sm:$0xff] }
  0x96   : > { %17976 = vmatpush3.msk.msra.mxu0 %vm1547_vm0, %v20690_v5  ;;  %17882 = vmatprep.mubr.msk.f32.mxu0 %vm1354_vm1, %v1225_v6  ;;  %v20845_v5 = vld [vmem:[%s20681_s21 + $0x30] sm:$0xff] }
  0x97   : > { %18073 = vmatprep.subr.msk.mxu0 %vm1547_vm0, %v20826_v7  ;;  %v2517_v6 = vld [vmem:[%s20681_s21 + $0xa] sm:$0xff] }
  0x99   : > { %17883 = vmatmul.mubr.msk.f32.gmra.mrb[2].mxu0 %vm1354_vm1, %v1226_v8  ;;  %v2518_v8 = vld [vmem:[%s20681_s21 + $0x12] sm:$0xff] }
  0x9a   : > { %17885 = vmatprep.mubr.msk.f32.mxu0 %vm1354_vm1, %v20834_v9 }
  0x9d   : > { %17886 = vmatmul.mubr.msk.f32.gmra.mrb[4].mxu0 %vm1354_vm1, %v20842_v10 }
  0x9e   : > { %17888 = vmatprep.mubr.msk.f32.mxu0 %vm1354_vm1, %v20845_v5 }
  0xa1   : > { %17889 = vmatmul.mubr.msk.f32.gmra.mrb[6].mxu0 %vm1354_vm1, %v20852_v11 }
  0xa2   : > { %17891 = vmatprep.mubr.msk.f32.mxu0 %vm1354_vm1, %v20855_v12 }
  0xa5   : > { %17892 = vmatmul.mubr.msk.f32.gmra.mrb[8].mxu0 %vm1354_vm1, %v20862_v13 }
  0xa6   : > { %17894 = vmatprep.mubr.msk.f32.mxu0 %vm1354_vm1, %v20865_v14 }
  0xa9   : > { %17895 = vmatmul.mubr.msk.f32.gmra.mrb[10].mxu0 %vm1354_vm1, %v20872_v15 }
  0xaa   : > { %17897 = vmatprep.mubr.msk.f32.mxu0 %vm1354_vm1, %v20875_v16 }
  0xad   : > { %17898 = vmatmul.mubr.msk.f32.gmra.mrb[12].mxu0 %vm1354_vm1, %v20882_v17 }
  0xae   : > { %17900 = vmatprep.mubr.msk.f32.mxu0 %vm1354_vm1, %v20885_v18 }
  0xb1   : > { %17901 = vmatmul.mubr.msk.f32.gmra.mrb[14].mxu0 %vm1354_vm1, %v20892_v19 }
  0xb2   : > { %17903 = vmatprep.mubr.msk.f32.mxu0 %vm1354_vm1, %v20895_v20 }
  0xb5   : > { %17904 = vmatmul.mubr.msk.f32.gmra.mrb[16].mxu0 %vm1354_vm1, %v20902_v21 }
  0xb6   : > { %17906 = vmatprep.mubr.msk.f32.mxu0 %vm1354_vm1, %v20905_v22 }
  0xb9   : > { %17907 = vmatmul.mubr.msk.f32.gmra.mrb[18].mxu0 %vm1354_vm1, %v20912_v23 }
  0xba   : > { %17909 = vmatprep.mubr.msk.f32.mxu0 %vm1354_vm1, %v20915_v24 }
  0xbd   : > { %17910 = vmatmul.mubr.msk.f32.gmra.mrb[20].mxu0 %vm1354_vm1, %v20922_v25 }
  0xbe   : > { %17912 = vmatprep.mubr.msk.f32.mxu0 %vm1354_vm1, %v20925_v26 }
  0xc1   : > { %17913 = vmatmul.mubr.msk.f32.gmra.mrb[22].mxu0 %vm1354_vm1, %v20932_v27 }
  0xc2   : > { %17915 = vmatprep.mubr.msk.f32.mxu0 %vm1354_vm1, %v20935_v28 }
  0xc5   : > { %17916 = vmatmul.mubr.msk.f32.gmra.mrb[24].mxu0 %vm1354_vm1, %v20942_v29 }
  0xc6   : > { %17918 = vmatprep.mubr.msk.f32.mxu0 %vm1354_vm1, %v20945_v30 }
  0xc9   : > { %17919 = vmatmul.mubr.msk.f32.gmra.mrb[26].mxu0 %vm1354_vm1, %v20952_v31 }
  0xca   : > { %17921 = vmatprep.mubr.msk.f32.mxu0 %vm1354_vm1, %v20955_v32 }
  0xcd   : > { %17922 = vmatmul.mubr.msk.f32.gmra.mrb[28].mxu0 %vm1354_vm1, %v20962_v33 }
  0xce   : > { %17924 = vmatprep.mubr.msk.f32.mxu0 %vm1354_vm1, %v20965_v34 }
  0xd1   : > { %17925 = vmatmul.mubr.msk.f32.gmra.mrb[30].mxu0 %vm1354_vm1, %v20972_v35 }
  0xd2   : > { %17927 = vmatprep.mubr.msk.f32.mxu0 %vm1354_vm1, %v20975_v36 }
  0xd5   : > { %17928 = vmatmul.mubr.msk.f32.gmra.mrb[32].mxu0 %vm1354_vm1, %v20982_v37 }
  0xd6   : > { %17930 = vmatprep.mubr.msk.f32.mxu0 %vm1354_vm1, %v20985_v38 }
  0xd9   : > { %17931 = vmatmul.mubr.msk.f32.gmra.mrb[34].mxu0 %vm1354_vm1, %v20992_v39 }
  0xda   : > { %17933 = vmatprep.mubr.msk.f32.mxu0 %vm1354_vm1, %v20995_v40 }
  0xdd   : > { %17934 = vmatmul.mubr.msk.f32.gmra.mrb[36].mxu0 %vm1354_vm1, %v21002_v41 }
  0xde   : > { %17936 = vmatprep.mubr.msk.f32.mxu0 %vm1354_vm1, %v21005_v42 }
  0xe1   : > { %17937 = vmatmul.mubr.msk.f32.gmra.mrb[38].mxu0 %vm1354_vm1, %v21012_v43 }
  0xe2   : > { %17939 = vmatprep.mubr.msk.f32.mxu0 %vm1354_vm1, %v21015_v44 }
  0xe5   : > { %17940 = vmatmul.mubr.msk.f32.gmra.mrb[40].mxu0 %vm1354_vm1, %v21022_v45 }
  0xe6   : > { %17942 = vmatprep.mubr.msk.f32.mxu0 %vm1354_vm1, %v21025_v46 }
  0xe9   : > { %17943 = vmatmul.mubr.msk.f32.gmra.mrb[42].mxu0 %vm1354_vm1, %v21032_v47 }
  0xea   : > { %17945 = vmatprep.mubr.msk.f32.mxu0 %vm1354_vm1, %v21035_v48 }
  0xed   : > { %17946 = vmatmul.mubr.msk.f32.gmra.mrb[44].mxu0 %vm1354_vm1, %v21042_v49 }
  0xee   : > { %17948 = vmatprep.mubr.msk.f32.mxu0 %vm1354_vm1, %v21045_v50 }
  0xf1   : > { %17949 = vmatmul.mubr.msk.f32.gmra.mrb[46].mxu0 %vm1354_vm1, %v21052_v51 }
  0xf2   : > { %17951 = vmatprep.mubr.msk.f32.mxu0 %vm1354_vm1, %v21055_v52 }
  0xf5   : > { %17952 = vmatmul.mubr.msk.f32.gmra.mrb[48].mxu0 %vm1354_vm1, %v21062_v53 }
  0xf6   : > { %17954 = vmatprep.mubr.msk.f32.mxu0 %vm1354_vm1, %v21065_v54 }
  0xf9   : > { %17955 = vmatmul.mubr.msk.f32.gmra.mrb[50].mxu0 %vm1354_vm1, %v21072_v55 }
  0xfa   : > { %17957 = vmatprep.mubr.msk.f32.mxu0 %vm1354_vm1, %v21075_v56 }
  0xfd   : > { %17958 = vmatmul.mubr.msk.f32.gmra.mrb[52].mxu0 %vm1354_vm1, %v21082_v57 }
  0xfe   : > { %17960 = vmatprep.mubr.msk.f32.mxu0 %vm1354_vm1, %v21085_v58 }
 0x101   : > { %17961 = vmatmul.mubr.msk.f32.gmra.mrb[54].mxu0 %vm1354_vm1, %v21092_v59 }
 0x102   : > { %17963 = vmatprep.mubr.msk.f32.mxu0 %vm1354_vm1, %v21095_v60 }
 0x105   : > { %17964 = vmatmul.mubr.msk.f32.gmra.mrb[56].mxu0 %vm1354_vm1, %v21102_v61 }
 0x106   : > { %17966 = vmatprep.mubr.msk.f32.mxu0 %vm1354_vm1, %v21105_v62 }
 0x109   : > { %17967 = vmatmul.mubr.msk.f32.gmra.mrb[58].mxu0 %vm1354_vm1, %v21112_v63 }
 0x10a   : > { %17969 = vmatprep.mubr.msk.f32.mxu0 %vm1354_vm1, %v21115_v0 }
 0x10d   : > { %17970 = vmatmul.mubr.msk.f32.gmra.mrb[60].mxu0 %vm1354_vm1, %v21122_v1  ;;  %v21143_v1 = vld [vmem:[%s25895_s2 + $0x10] sm:$0xf] }
 0x10e   : > { %17972 = vmatprep.mubr.msk.f32.mxu0 %vm1354_vm1, %v21125_v2  ;;  %v21172_v2 = vld [vmem:[%s20681_s21 + $0x42] sm:$0xff] }
 0x10f   : > { %26079 = vst [vmem:[#allocation10_spill] sm:$0xff] %v21172_v2 }
 0x111   : > { %17973 = vmatmul.mubr.msk.f32.gmra.mrb[62].mxu0 %vm1354_vm1, %v21132_v3  ;;  %v2519_v3 = vld [vmem:[%s20681_s21 + $0x1a] sm:$0xff] }
 0x112   : > { %17977 = vmatprep.mubr.msk.f32.mxu0 %vm1354_vm1, %v2516_v4  ;;  %v21151_v4 = vld [vmem:[%s20681_s21 + $0x22] sm:$0xff] }
 0x113   : > { %26075 = vst [vmem:[#allocation6_spill] sm:$0xff] %v21151_v4 }
 0x115   : > { %17978 = vmatmul.mubr.msk.f32.vlgmr.msra.gmra.mrb[0].mxu0 %vm1354_vm1, %v2517_v6  ;;  %v21159_v6 = vld [vmem:[%s20681_s21 + $0x2a] sm:$0xff] }
 0x116   : > { %18074 = vmatpush3.msk.msra.mxu0 %vm1547_vm0, %v20826_v7  ;;  %17980 = vmatprep.mubr.msk.f32.mxu0 %vm1354_vm1, %v2518_v8  ;;  %26076 = vst [vmem:[#allocation7_spill] sm:$0xff] %v21159_v6  ;;  %v21162_v7 = vld [vmem:[%s20681_s21 + $0x32] sm:$0xff]  ;;  %v21169_v8 = vld [vmem:[%s20681_s21 + $0x3a] sm:$0xff] }
 0x117   : > { %18171 = vmatprep.subr.msk.mxu0 %vm1547_vm0, %v21143_v1  ;;  %26077 = vst [vmem:[#allocation8_spill] sm:$0xff] %v21162_v7  ;;  %26078 = vst [vmem:[#allocation9_spill] sm:$0xff] %v21169_v8 }
 0x119   : > { %17981 = vmatmul.mubr.msk.f32.gmra.mrb[2].mxu0 %vm1354_vm1, %v2519_v3  ;;  %v21179_v3 = vld [vmem:[%s20681_s21 + $0x4a] sm:$0xff] }
 0x11a   : > { %17983 = vmatprep.mubr.msk.f32.mxu0 %vm1354_vm1, %v21151_v4  ;;  %26080 = vst [vmem:[#allocation11_spill] sm:$0xff] %v21179_v3  ;;  %v21182_v4 = vld [vmem:[%s20681_s21 + $0x52] sm:$0xff] }
 0x11b   : > { %26081 = vst [vmem:[#allocation12_spill] sm:$0xff] %v21182_v4 }
 0x11d   : > { %17984 = vmatmul.mubr.msk.f32.gmra.mrb[4].mxu0 %vm1354_vm1, %v21159_v6  ;;  %v21192_v6 = vld [vmem:[%s20681_s21 + $0x62] sm:$0xff] }
 0x11e   : > { %17986 = vmatprep.mubr.msk.f32.mxu0 %vm1354_vm1, %v21162_v7  ;;  %v21189_v7 = vld [vmem:[%s20681_s21 + $0x5a] sm:$0xff]  ;;  %26083 = vst [vmem:[#allocation14_spill] sm:$0xff] %v21192_v6 }
 0x11f   : > { %26082 = vst [vmem:[#allocation13_spill] sm:$0xff] %v21189_v7 }
 0x121   : > { %17987 = vmatmul.mubr.msk.f32.gmra.mrb[6].mxu0 %vm1354_vm1, %v21169_v8  ;;  %v21202_v8 = vld [vmem:[%s20681_s21 + $0x72] sm:$0xff] }
 0x122   : > { %17989 = vmatprep.mubr.msk.f32.mxu0 %vm1354_vm1, %v21172_v2  ;;  %v21199_v2 = vld [vmem:[%s20681_s21 + $0x6a] sm:$0xff]  ;;  %26085 = vst [vmem:[#allocation16_spill] sm:$0xff] %v21202_v8 }
 0x123   : > { %26084 = vst [vmem:[#allocation15_spill] sm:$0xff] %v21199_v2 }
 0x125   : > { %17990 = vmatmul.mubr.msk.f32.gmra.mrb[8].mxu0 %vm1354_vm1, %v21179_v3  ;;  %v21212_v3 = vld [vmem:[%s20681_s21 + $0x82] sm:$0xff] }
 0x126   : > { %17992 = vmatprep.mubr.msk.f32.mxu0 %vm1354_vm1, %v21182_v4  ;;  %v21209_v4 = vld [vmem:[%s20681_s21 + $0x7a] sm:$0xff]  ;;  %26087 = vst [vmem:[#allocation18_spill] sm:$0xff] %v21212_v3 }
 0x127   : > { %26086 = vst [vmem:[#allocation17_spill] sm:$0xff] %v21209_v4 }
 0x129   : > { %17993 = vmatmul.mubr.msk.f32.gmra.mrb[10].mxu0 %vm1354_vm1, %v21189_v7  ;;  %v21222_v7 = vld [vmem:[%s20681_s21 + $0x92] sm:$0xff] }
 0x12a   : > { %17995 = vmatprep.mubr.msk.f32.mxu0 %vm1354_vm1, %v21192_v6  ;;  %v21219_v6 = vld [vmem:[%s20681_s21 + $0x8a] sm:$0xff]  ;;  %26089 = vst [vmem:[#allocation20_spill] sm:$0xff] %v21222_v7 }
 0x12b   : > { %26088 = vst [vmem:[#allocation19_spill] sm:$0xff] %v21219_v6 }
 0x12d   : > { %17996 = vmatmul.mubr.msk.f32.gmra.mrb[12].mxu0 %vm1354_vm1, %v21199_v2  ;;  %v21232_v2 = vld [vmem:[%s20681_s21 + $0xa2] sm:$0xff] }
 0x12e   : > { %17998 = vmatprep.mubr.msk.f32.mxu0 %vm1354_vm1, %v21202_v8  ;;  %v21229_v8 = vld [vmem:[%s20681_s21 + $0x9a] sm:$0xff]  ;;  %26091 = vst [vmem:[#allocation22_spill] sm:$0xff] %v21232_v2 }
 0x12f   : > { %26090 = vst [vmem:[#allocation21_spill] sm:$0xff] %v21229_v8 }
 0x131   : > { %17999 = vmatmul.mubr.msk.f32.gmra.mrb[14].mxu0 %vm1354_vm1, %v21209_v4  ;;  %v21242_v4 = vld [vmem:[%s20681_s21 + $0xb2] sm:$0xff] }
 0x132   : > { %18001 = vmatprep.mubr.msk.f32.mxu0 %vm1354_vm1, %v21212_v3  ;;  %v21239_v3 = vld [vmem:[%s20681_s21 + $0xaa] sm:$0xff]  ;;  %26093 = vst [vmem:[#allocation24_spill] sm:$0xff] %v21242_v4 }
 0x133   : > { %26092 = vst [vmem:[#allocation23_spill] sm:$0xff] %v21239_v3 }
 0x135   : > { %18002 = vmatmul.mubr.msk.f32.gmra.mrb[16].mxu0 %vm1354_vm1, %v21219_v6  ;;  %v21252_v6 = vld [vmem:[%s20681_s21 + $0xc2] sm:$0xff] }
 0x136   : > { %18004 = vmatprep.mubr.msk.f32.mxu0 %vm1354_vm1, %v21222_v7  ;;  %v21249_v7 = vld [vmem:[%s20681_s21 + $0xba] sm:$0xff]  ;;  %26095 = vst [vmem:[#allocation26_spill] sm:$0xff] %v21252_v6 }
 0x137   : > { %26094 = vst [vmem:[#allocation25_spill] sm:$0xff] %v21249_v7 }
 0x139   : > { %18005 = vmatmul.mubr.msk.f32.gmra.mrb[18].mxu0 %vm1354_vm1, %v21229_v8  ;;  %v21262_v8 = vld [vmem:[%s20681_s21 + $0xd2] sm:$0xff] }
 0x13a   : > { %18007 = vmatprep.mubr.msk.f32.mxu0 %vm1354_vm1, %v21232_v2  ;;  %v21259_v2 = vld [vmem:[%s20681_s21 + $0xca] sm:$0xff]  ;;  %26097 = vst [vmem:[#allocation28_spill] sm:$0xff] %v21262_v8 }
 0x13b   : > { %26096 = vst [vmem:[#allocation27_spill] sm:$0xff] %v21259_v2 }
 0x13d   : > { %18008 = vmatmul.mubr.msk.f32.gmra.mrb[20].mxu0 %vm1354_vm1, %v21239_v3  ;;  %v21272_v3 = vld [vmem:[%s20681_s21 + $0xe2] sm:$0xff] }
 0x13e   : > { %18010 = vmatprep.mubr.msk.f32.mxu0 %vm1354_vm1, %v21242_v4  ;;  %v21269_v4 = vld [vmem:[%s20681_s21 + $0xda] sm:$0xff]  ;;  %26099 = vst [vmem:[#allocation30_spill] sm:$0xff] %v21272_v3 }
 0x13f   : > { %26098 = vst [vmem:[#allocation29_spill] sm:$0xff] %v21269_v4 }
 0x141   : > { %18011 = vmatmul.mubr.msk.f32.gmra.mrb[22].mxu0 %vm1354_vm1, %v21249_v7  ;;  %v21282_v7 = vld [vmem:[%s20681_s21 + $0xf2] sm:$0xff] }
 0x142   : > { %18013 = vmatprep.mubr.msk.f32.mxu0 %vm1354_vm1, %v21252_v6  ;;  %v21279_v6 = vld [vmem:[%s20681_s21 + $0xea] sm:$0xff]  ;;  %26101 = vst [vmem:[#allocation32_spill] sm:$0xff] %v21282_v7 }
 0x143   : > { %26100 = vst [vmem:[#allocation31_spill] sm:$0xff] %v21279_v6 }
 0x145   : > { %18014 = vmatmul.mubr.msk.f32.gmra.mrb[24].mxu0 %vm1354_vm1, %v21259_v2  ;;  %v21292_v2 = vld [vmem:[%s20681_s21 + $0x102] sm:$0xff] }
 0x146   : > { %18016 = vmatprep.mubr.msk.f32.mxu0 %vm1354_vm1, %v21262_v8  ;;  %v21289_v8 = vld [vmem:[%s20681_s21 + $0xfa] sm:$0xff]  ;;  %26103 = vst [vmem:[#allocation34_spill] sm:$0xff] %v21292_v2 }
 0x147   : > { %26102 = vst [vmem:[#allocation33_spill] sm:$0xff] %v21289_v8 }
 0x149   : > { %18017 = vmatmul.mubr.msk.f32.gmra.mrb[26].mxu0 %vm1354_vm1, %v21269_v4  ;;  %v21302_v4 = vld [vmem:[%s20681_s21 + $0x112] sm:$0xff] }
 0x14a   : > { %18019 = vmatprep.mubr.msk.f32.mxu0 %vm1354_vm1, %v21272_v3  ;;  %v21299_v3 = vld [vmem:[%s20681_s21 + $0x10a] sm:$0xff]  ;;  %26105 = vst [vmem:[#allocation36_spill] sm:$0xff] %v21302_v4 }
 0x14b   : > { %26104 = vst [vmem:[#allocation35_spill] sm:$0xff] %v21299_v3 }
 0x14d   : > { %18020 = vmatmul.mubr.msk.f32.gmra.mrb[28].mxu0 %vm1354_vm1, %v21279_v6  ;;  %v21312_v6 = vld [vmem:[%s20681_s21 + $0x122] sm:$0xff] }
 0x14e   : > { %18022 = vmatprep.mubr.msk.f32.mxu0 %vm1354_vm1, %v21282_v7  ;;  %v21309_v7 = vld [vmem:[%s20681_s21 + $0x11a] sm:$0xff]  ;;  %26107 = vst [vmem:[#allocation38_spill] sm:$0xff] %v21312_v6 }
 0x14f   : > { %26106 = vst [vmem:[#allocation37_spill] sm:$0xff] %v21309_v7 }
 0x151   : > { %18023 = vmatmul.mubr.msk.f32.gmra.mrb[30].mxu0 %vm1354_vm1, %v21289_v8  ;;  %v21322_v8 = vld [vmem:[%s20681_s21 + $0x132] sm:$0xff] }
 0x152   : > { %18025 = vmatprep.mubr.msk.f32.mxu0 %vm1354_vm1, %v21292_v2  ;;  %v21319_v2 = vld [vmem:[%s20681_s21 + $0x12a] sm:$0xff]  ;;  %26109 = vst [vmem:[#allocation40_spill] sm:$0xff] %v21322_v8 }
 0x153   : > { %26108 = vst [vmem:[#allocation39_spill] sm:$0xff] %v21319_v2 }
 0x155   : > { %18026 = vmatmul.mubr.msk.f32.gmra.mrb[32].mxu0 %vm1354_vm1, %v21299_v3  ;;  %v21332_v3 = vld [vmem:[%s20681_s21 + $0x142] sm:$0xff] }
 0x156   : > { %18028 = vmatprep.mubr.msk.f32.mxu0 %vm1354_vm1, %v21302_v4  ;;  %v21329_v4 = vld [vmem:[%s20681_s21 + $0x13a] sm:$0xff]  ;;  %26111 = vst [vmem:[#allocation42_spill] sm:$0xff] %v21332_v3 }
 0x157   : > { %26110 = vst [vmem:[#allocation41_spill] sm:$0xff] %v21329_v4 }
 0x159   : > { %18029 = vmatmul.mubr.msk.f32.gmra.mrb[34].mxu0 %vm1354_vm1, %v21309_v7  ;;  %v21342_v7 = vld [vmem:[%s20681_s21 + $0x152] sm:$0xff] }
 0x15a   : > { %18031 = vmatprep.mubr.msk.f32.mxu0 %vm1354_vm1, %v21312_v6  ;;  %v21339_v6 = vld [vmem:[%s20681_s21 + $0x14a] sm:$0xff]  ;;  %26113 = vst [vmem:[#allocation44_spill] sm:$0xff] %v21342_v7 }
 0x15b   : > { %26112 = vst [vmem:[#allocation43_spill] sm:$0xff] %v21339_v6 }
 0x15d   : > { %18032 = vmatmul.mubr.msk.f32.gmra.mrb[36].mxu0 %vm1354_vm1, %v21319_v2  ;;  %v21352_v2 = vld [vmem:[%s20681_s21 + $0x162] sm:$0xff] }
 0x15e   : > { %18034 = vmatprep.mubr.msk.f32.mxu0 %vm1354_vm1, %v21322_v8  ;;  %v21349_v8 = vld [vmem:[%s20681_s21 + $0x15a] sm:$0xff]  ;;  %26115 = vst [vmem:[#allocation46_spill] sm:$0xff] %v21352_v2 }
 0x15f   : > { %26114 = vst [vmem:[#allocation45_spill] sm:$0xff] %v21349_v8 }
 0x161   : > { %18035 = vmatmul.mubr.msk.f32.gmra.mrb[38].mxu0 %vm1354_vm1, %v21329_v4  ;;  %v21362_v4 = vld [vmem:[%s20681_s21 + $0x172] sm:$0xff] }
 0x162   : > { %18037 = vmatprep.mubr.msk.f32.mxu0 %vm1354_vm1, %v21332_v3  ;;  %v21359_v3 = vld [vmem:[%s20681_s21 + $0x16a] sm:$0xff]  ;;  %26117 = vst [vmem:[#allocation48_spill] sm:$0xff] %v21362_v4 }
 0x163   : > { %26116 = vst [vmem:[#allocation47_spill] sm:$0xff] %v21359_v3 }
 0x165   : > { %18038 = vmatmul.mubr.msk.f32.gmra.mrb[40].mxu0 %vm1354_vm1, %v21339_v6  ;;  %v21372_v6 = vld [vmem:[%s20681_s21 + $0x182] sm:$0xff] }
 0x166   : > { %18040 = vmatprep.mubr.msk.f32.mxu0 %vm1354_vm1, %v21342_v7  ;;  %v21369_v7 = vld [vmem:[%s20681_s21 + $0x17a] sm:$0xff]  ;;  %26119 = vst [vmem:[#allocation50_spill] sm:$0xff] %v21372_v6 }
 0x167   : > { %26118 = vst [vmem:[#allocation49_spill] sm:$0xff] %v21369_v7 }
 0x169   : > { %18041 = vmatmul.mubr.msk.f32.gmra.mrb[42].mxu0 %vm1354_vm1, %v21349_v8  ;;  %v21382_v8 = vld [vmem:[%s20681_s21 + $0x192] sm:$0xff] }
 0x16a   : > { %18043 = vmatprep.mubr.msk.f32.mxu0 %vm1354_vm1, %v21352_v2  ;;  %v21379_v2 = vld [vmem:[%s20681_s21 + $0x18a] sm:$0xff]  ;;  %26121 = vst [vmem:[#allocation52_spill] sm:$0xff] %v21382_v8 }
 0x16b   : > { %26120 = vst [vmem:[#allocation51_spill] sm:$0xff] %v21379_v2 }
 0x16d   : > { %18044 = vmatmul.mubr.msk.f32.gmra.mrb[44].mxu0 %vm1354_vm1, %v21359_v3  ;;  %v21392_v3 = vld [vmem:[%s20681_s21 + $0x1a2] sm:$0xff] }
 0x16e   : > { %18046 = vmatprep.mubr.msk.f32.mxu0 %vm1354_vm1, %v21362_v4  ;;  %v21389_v4 = vld [vmem:[%s20681_s21 + $0x19a] sm:$0xff]  ;;  %26123 = vst [vmem:[#allocation54_spill] sm:$0xff] %v21392_v3 }
 0x16f   : > { %26122 = vst [vmem:[#allocation53_spill] sm:$0xff] %v21389_v4 }
 0x171   : > { %18047 = vmatmul.mubr.msk.f32.gmra.mrb[46].mxu0 %vm1354_vm1, %v21369_v7  ;;  %v21402_v7 = vld [vmem:[%s20681_s21 + $0x1b2] sm:$0xff] }
 0x172   : > { %18049 = vmatprep.mubr.msk.f32.mxu0 %vm1354_vm1, %v21372_v6  ;;  %v21399_v6 = vld [vmem:[%s20681_s21 + $0x1aa] sm:$0xff]  ;;  %26125 = vst [vmem:[#allocation56_spill] sm:$0xff] %v21402_v7 }
 0x173   : > { %26124 = vst [vmem:[#allocation55_spill] sm:$0xff] %v21399_v6 }
 0x175   : > { %18050 = vmatmul.mubr.msk.f32.gmra.mrb[48].mxu0 %vm1354_vm1, %v21379_v2  ;;  %v21412_v2 = vld [vmem:[%s20681_s21 + $0x1c2] sm:$0xff] }
 0x176   : > { %18052 = vmatprep.mubr.msk.f32.mxu0 %vm1354_vm1, %v21382_v8  ;;  %v21409_v8 = vld [vmem:[%s20681_s21 + $0x1ba] sm:$0xff]  ;;  %26127 = vst [vmem:[#allocation58_spill] sm:$0xff] %v21412_v2 }
 0x177   : > { %26126 = vst [vmem:[#allocation57_spill] sm:$0xff] %v21409_v8 }
 0x179   : > { %18053 = vmatmul.mubr.msk.f32.gmra.mrb[50].mxu0 %vm1354_vm1, %v21389_v4  ;;  %v21422_v4 = vld [vmem:[%s20681_s21 + $0x1d2] sm:$0xff] }
 0x17a   : > { %18055 = vmatprep.mubr.msk.f32.mxu0 %vm1354_vm1, %v21392_v3  ;;  %v21419_v3 = vld [vmem:[%s20681_s21 + $0x1ca] sm:$0xff]  ;;  %26128 = vst [vmem:[#allocation59_spill] sm:$0xff] %v21422_v4 }
 0x17d   : > { %18056 = vmatmul.mubr.msk.f32.gmra.mrb[52].mxu0 %vm1354_vm1, %v21399_v6  ;;  %v21432_v6 = vld [vmem:[%s20681_s21 + $0x1e2] sm:$0xff] }
 0x17e   : > { %18058 = vmatprep.mubr.msk.f32.mxu0 %vm1354_vm1, %v21402_v7  ;;  %v21429_v7 = vld [vmem:[%s20681_s21 + $0x1da] sm:$0xff]  ;;  %26129 = vst [vmem:[#allocation60_spill] sm:$0xff] %v21432_v6 }
 0x181   : > { %18059 = vmatmul.mubr.msk.f32.gmra.mrb[54].mxu0 %vm1354_vm1, %v21409_v8  ;;  %v21442_v8 = vld [vmem:[%s20681_s21 + $0x1f2] sm:$0xff] }
 0x182   : > { %18061 = vmatprep.mubr.msk.f32.mxu0 %vm1354_vm1, %v21412_v2  ;;  %v21439_v2 = vld [vmem:[%s20681_s21 + $0x1ea] sm:$0xff] }
 0x185   : > { %18062 = vmatmul.mubr.msk.f32.gmra.mrb[56].mxu0 %vm1354_vm1, %v21419_v3 }
 0x186   : > { %18064 = vmatprep.mubr.msk.f32.mxu0 %vm1354_vm1, %v21422_v4  ;;  %v21449_v4 = vld [vmem:[%s20681_s21 + $0x1fa] sm:$0xff] }
 0x189   : > { %18065 = vmatmul.mubr.msk.f32.gmra.mrb[58].mxu0 %vm1354_vm1, %v21429_v7 }
 0x18a   : > { %18067 = vmatprep.mubr.msk.f32.mxu0 %vm1354_vm1, %v21432_v6  ;;  %v21458_v6 = vld [vmem:[%s25895_s2 + $0x14] sm:$0xf] }
 0x18d   : > { %18068 = vmatmul.mubr.msk.f32.gmra.mrb[60].mxu0 %vm1354_vm1, %v21439_v2 }
 0x18e   : > { %18070 = vmatprep.mubr.msk.f32.mxu0 %vm1354_vm1, %v21442_v8 }
 0x191   : > { %18071 = vmatmul.mubr.msk.f32.gmra.mrb[62].mxu0 %vm1354_vm1, %v21449_v4 }
 0x192   : > { %18075 = vmatprep.mubr.msk.f32.mxu0 %vm1354_vm1, %v20834_v9  ;;  %v26130_v9 = vld [vmem:[#allocation3_spill] sm:$0xff] }
 0x195   : > { %18076 = vmatmul.mubr.msk.f32.vlgmr.msra.gmra.mrb[0].mxu0 %vm1354_vm1, %v20842_v10  ;;  %v26131_v10 = vld [vmem:[#allocation4_spill] sm:$0xff] }
 0x196   : > { %18172 = vmatpush3.msk.msra.mxu0 %vm1547_vm0, %v21143_v1  ;;  %18078 = vmatprep.mubr.msk.f32.mxu0 %vm1354_vm1, %v20845_v5  ;;  %v21581_v5 = vld [vmem:[%s20681_s21 + $0x200] sm:$0xff]  ;;  %v21845_v1 = vld [vmem:[%s20681_s21 + $0x1a9] sm:$0xff] }
 0x197   : > { %18269 = vmatprep.subr.msk.mxu0 %vm1547_vm0, %v21458_v6 }
 0x199   : > { %18079 = vmatmul.mubr.msk.f32.gmra.mrb[2].mxu0 %vm1354_vm1, %v20852_v11  ;;  %v26132_v11 = vld [vmem:[#allocation5_spill] sm:$0xff] }
 0x19a   : > { %18081 = vmatprep.mubr.msk.f32.mxu0 %vm1354_vm1, %v20855_v12  ;;  %v21588_v12 = vld [vmem:[%s20681_s21 + $0x208] sm:$0xff] }
 0x19d   : > { %18082 = vmatmul.mubr.msk.f32.gmra.mrb[4].mxu0 %vm1354_vm1, %v20862_v13  ;;  %v21591_v13 = vld [vmem:[%s20681_s21 + $0x210] sm:$0xff] }
 0x19e   : > { %18084 = vmatprep.mubr.msk.f32.mxu0 %vm1354_vm1, %v20865_v14  ;;  %v21598_v14 = vld [vmem:[%s20681_s21 + $0x218] sm:$0xff] }
 0x1a1   : > { %18085 = vmatmul.mubr.msk.f32.gmra.mrb[6].mxu0 %vm1354_vm1, %v20872_v15  ;;  %v3936_v15 = vld [vmem:[%s20681_s21 + $0x21] sm:$0xff] }
 0x1a2   : > { %18087 = vmatprep.mubr.msk.f32.mxu0 %vm1354_vm1, %v20875_v16  ;;  %v3937_v16 = vld [vmem:[%s20681_s21 + $0x29] sm:$0xff] }
 0x1a5   : > { %18088 = vmatmul.mubr.msk.f32.gmra.mrb[8].mxu0 %vm1354_vm1, %v20882_v17  ;;  %v3938_v17 = vld [vmem:[%s20681_s21 + $0x31] sm:$0xff] }
 0x1a6   : > { %18090 = vmatprep.mubr.msk.f32.mxu0 %vm1354_vm1, %v20885_v18  ;;  %v21609_v18 = vld [vmem:[%s25895_s2 + $0x18] sm:$0xf] }
 0x1a9   : > { %18091 = vmatmul.mubr.msk.f32.gmra.mrb[10].mxu0 %vm1354_vm1, %v20892_v19  ;;  %v3939_v19 = vld [vmem:[%s20681_s21 + $0x39] sm:$0xff] }
 0x1aa   : > { %18093 = vmatprep.mubr.msk.f32.mxu0 %vm1354_vm1, %v20895_v20  ;;  %v21617_v20 = vld [vmem:[%s20681_s21 + $0x41] sm:$0xff] }
 0x1ad   : > { %18094 = vmatmul.mubr.msk.f32.gmra.mrb[12].mxu0 %vm1354_vm1, %v20902_v21  ;;  %v21625_v21 = vld [vmem:[%s20681_s21 + $0x49] sm:$0xff] }
 0x1ae   : > { %18096 = vmatprep.mubr.msk.f32.mxu0 %vm1354_vm1, %v20905_v22  ;;  %v21628_v22 = vld [vmem:[%s20681_s21 + $0x51] sm:$0xff] }
 0x1b1   : > { %18097 = vmatmul.mubr.msk.f32.gmra.mrb[14].mxu0 %vm1354_vm1, %v20912_v23  ;;  %v21635_v23 = vld [vmem:[%s20681_s21 + $0x59] sm:$0xff] }
 0x1b2   : > { %18099 = vmatprep.mubr.msk.f32.mxu0 %vm1354_vm1, %v20915_v24  ;;  %v21638_v24 = vld [vmem:[%s20681_s21 + $0x61] sm:$0xff] }
 0x1b5   : > { %18100 = vmatmul.mubr.msk.f32.gmra.mrb[16].mxu0 %vm1354_vm1, %v20922_v25  ;;  %v21645_v25 = vld [vmem:[%s20681_s21 + $0x69] sm:$0xff] }
 0x1b6   : > { %18102 = vmatprep.mubr.msk.f32.mxu0 %vm1354_vm1, %v20925_v26  ;;  %v21648_v26 = vld [vmem:[%s20681_s21 + $0x71] sm:$0xff] }
 0x1b9   : > { %18103 = vmatmul.mubr.msk.f32.gmra.mrb[18].mxu0 %vm1354_vm1, %v20932_v27  ;;  %v21655_v27 = vld [vmem:[%s20681_s21 + $0x79] sm:$0xff] }
 0x1ba   : > { %18105 = vmatprep.mubr.msk.f32.mxu0 %vm1354_vm1, %v20935_v28  ;;  %v21658_v28 = vld [vmem:[%s20681_s21 + $0x81] sm:$0xff] }
 0x1bd   : > { %18106 = vmatmul.mubr.msk.f32.gmra.mrb[20].mxu0 %vm1354_vm1, %v20942_v29  ;;  %v21665_v29 = vld [vmem:[%s20681_s21 + $0x89] sm:$0xff] }
 0x1be   : > { %18108 = vmatprep.mubr.msk.f32.mxu0 %vm1354_vm1, %v20945_v30  ;;  %v21668_v30 = vld [vmem:[%s20681_s21 + $0x91] sm:$0xff] }
 0x1c1   : > { %18109 = vmatmul.mubr.msk.f32.gmra.mrb[22].mxu0 %vm1354_vm1, %v20952_v31  ;;  %v21675_v31 = vld [vmem:[%s20681_s21 + $0x99] sm:$0xff] }
 0x1c2   : > { %18111 = vmatprep.mubr.msk.f32.mxu0 %vm1354_vm1, %v20955_v32  ;;  %v21678_v32 = vld [vmem:[%s20681_s21 + $0xa1] sm:$0xff] }
 0x1c5   : > { %18112 = vmatmul.mubr.msk.f32.gmra.mrb[24].mxu0 %vm1354_vm1, %v20962_v33  ;;  %v21685_v33 = vld [vmem:[%s20681_s21 + $0xa9] sm:$0xff] }
 0x1c6   : > { %18114 = vmatprep.mubr.msk.f32.mxu0 %vm1354_vm1, %v20965_v34  ;;  %v21688_v34 = vld [vmem:[%s20681_s21 + $0xb1] sm:$0xff] }
 0x1c9   : > { %18115 = vmatmul.mubr.msk.f32.gmra.mrb[26].mxu0 %vm1354_vm1, %v20972_v35  ;;  %v21695_v35 = vld [vmem:[%s20681_s21 + $0xb9] sm:$0xff] }
 0x1ca   : > { %18117 = vmatprep.mubr.msk.f32.mxu0 %vm1354_vm1, %v20975_v36  ;;  %v21698_v36 = vld [vmem:[%s20681_s21 + $0xc1] sm:$0xff] }
 0x1cd   : > { %18118 = vmatmul.mubr.msk.f32.gmra.mrb[28].mxu0 %vm1354_vm1, %v20982_v37  ;;  %v21705_v37 = vld [vmem:[%s20681_s21 + $0xc9] sm:$0xff] }
 0x1ce   : > { %18120 = vmatprep.mubr.msk.f32.mxu0 %vm1354_vm1, %v20985_v38  ;;  %v21708_v38 = vld [vmem:[%s20681_s21 + $0xd1] sm:$0xff] }
 0x1d1   : > { %18121 = vmatmul.mubr.msk.f32.gmra.mrb[30].mxu0 %vm1354_vm1, %v20992_v39  ;;  %v21715_v39 = vld [vmem:[%s20681_s21 + $0xd9] sm:$0xff] }
 0x1d2   : > { %18123 = vmatprep.mubr.msk.f32.mxu0 %vm1354_vm1, %v20995_v40  ;;  %v21718_v40 = vld [vmem:[%s20681_s21 + $0xe1] sm:$0xff] }
 0x1d5   : > { %18124 = vmatmul.mubr.msk.f32.gmra.mrb[32].mxu0 %vm1354_vm1, %v21002_v41  ;;  %v21725_v41 = vld [vmem:[%s20681_s21 + $0xe9] sm:$0xff] }
 0x1d6   : > { %18126 = vmatprep.mubr.msk.f32.mxu0 %vm1354_vm1, %v21005_v42  ;;  %v21728_v42 = vld [vmem:[%s20681_s21 + $0xf1] sm:$0xff] }
 0x1d9   : > { %18127 = vmatmul.mubr.msk.f32.gmra.mrb[34].mxu0 %vm1354_vm1, %v21012_v43  ;;  %v21735_v43 = vld [vmem:[%s20681_s21 + $0xf9] sm:$0xff] }
 0x1da   : > { %18129 = vmatprep.mubr.msk.f32.mxu0 %vm1354_vm1, %v21015_v44  ;;  %v21738_v44 = vld [vmem:[%s20681_s21 + $0x101] sm:$0xff] }
 0x1dd   : > { %18130 = vmatmul.mubr.msk.f32.gmra.mrb[36].mxu0 %vm1354_vm1, %v21022_v45  ;;  %v21745_v45 = vld [vmem:[%s20681_s21 + $0x109] sm:$0xff] }
 0x1de   : > { %18132 = vmatprep.mubr.msk.f32.mxu0 %vm1354_vm1, %v21025_v46  ;;  %v21748_v46 = vld [vmem:[%s20681_s21 + $0x111] sm:$0xff] }
 0x1e1   : > { %18133 = vmatmul.mubr.msk.f32.gmra.mrb[38].mxu0 %vm1354_vm1, %v21032_v47  ;;  %v21755_v47 = vld [vmem:[%s20681_s21 + $0x119] sm:$0xff] }
 0x1e2   : > { %18135 = vmatprep.mubr.msk.f32.mxu0 %vm1354_vm1, %v21035_v48  ;;  %v21758_v48 = vld [vmem:[%s20681_s21 + $0x121] sm:$0xff] }
 0x1e5   : > { %18136 = vmatmul.mubr.msk.f32.gmra.mrb[40].mxu0 %vm1354_vm1, %v21042_v49  ;;  %v21765_v49 = vld [vmem:[%s20681_s21 + $0x129] sm:$0xff] }
 0x1e6   : > { %18138 = vmatprep.mubr.msk.f32.mxu0 %vm1354_vm1, %v21045_v50  ;;  %v21768_v50 = vld [vmem:[%s20681_s21 + $0x131] sm:$0xff] }
 0x1e9   : > { %18139 = vmatmul.mubr.msk.f32.gmra.mrb[42].mxu0 %vm1354_vm1, %v21052_v51  ;;  %v21775_v51 = vld [vmem:[%s20681_s21 + $0x139] sm:$0xff] }
 0x1ea   : > { %18141 = vmatprep.mubr.msk.f32.mxu0 %vm1354_vm1, %v21055_v52  ;;  %v21778_v52 = vld [vmem:[%s20681_s21 + $0x141] sm:$0xff] }
 0x1ed   : > { %18142 = vmatmul.mubr.msk.f32.gmra.mrb[44].mxu0 %vm1354_vm1, %v21062_v53  ;;  %v21785_v53 = vld [vmem:[%s20681_s21 + $0x149] sm:$0xff] }
 0x1ee   : > { %18144 = vmatprep.mubr.msk.f32.mxu0 %vm1354_vm1, %v21065_v54  ;;  %v21788_v54 = vld [vmem:[%s20681_s21 + $0x151] sm:$0xff] }
 0x1f1   : > { %18145 = vmatmul.mubr.msk.f32.gmra.mrb[46].mxu0 %vm1354_vm1, %v21072_v55  ;;  %v21795_v55 = vld [vmem:[%s20681_s21 + $0x159] sm:$0xff] }
 0x1f2   : > { %18147 = vmatprep.mubr.msk.f32.mxu0 %vm1354_vm1, %v21075_v56  ;;  %v21798_v56 = vld [vmem:[%s20681_s21 + $0x161] sm:$0xff] }
 0x1f5   : > { %18148 = vmatmul.mubr.msk.f32.gmra.mrb[48].mxu0 %vm1354_vm1, %v21082_v57  ;;  %v21805_v57 = vld [vmem:[%s20681_s21 + $0x169] sm:$0xff] }
 0x1f6   : > { %18150 = vmatprep.mubr.msk.f32.mxu0 %vm1354_vm1, %v21085_v58  ;;  %v21808_v58 = vld [vmem:[%s20681_s21 + $0x171] sm:$0xff] }
 0x1f9   : > { %18151 = vmatmul.mubr.msk.f32.gmra.mrb[50].mxu0 %vm1354_vm1, %v21092_v59  ;;  %v21815_v59 = vld [vmem:[%s20681_s21 + $0x179] sm:$0xff] }
 0x1fa   : > { %18153 = vmatprep.mubr.msk.f32.mxu0 %vm1354_vm1, %v21095_v60  ;;  %v21818_v60 = vld [vmem:[%s20681_s21 + $0x181] sm:$0xff] }
 0x1fd   : > { %18154 = vmatmul.mubr.msk.f32.gmra.mrb[52].mxu0 %vm1354_vm1, %v21102_v61  ;;  %v21825_v61 = vld [vmem:[%s20681_s21 + $0x189] sm:$0xff] }
 0x1fe   : > { %18156 = vmatprep.mubr.msk.f32.mxu0 %vm1354_vm1, %v21105_v62  ;;  %v21828_v62 = vld [vmem:[%s20681_s21 + $0x191] sm:$0xff] }
 0x201   : > { %18157 = vmatmul.mubr.msk.f32.gmra.mrb[54].mxu0 %vm1354_vm1, %v21112_v63  ;;  %v21835_v63 = vld [vmem:[%s20681_s21 + $0x199] sm:$0xff] }
 0x202   : > { %18159 = vmatprep.mubr.msk.f32.mxu0 %vm1354_vm1, %v21115_v0  ;;  %v21838_v0 = vld [vmem:[%s20681_s21 + $0x1a1] sm:$0xff] }
 0x205   : > { %18160 = vmatmul.mubr.msk.f32.gmra.mrb[56].mxu0 %vm1354_vm1, %v26130_v9  ;;  %v21855_v9 = vld [vmem:[%s20681_s21 + $0x1b9] sm:$0xff] }
 0x206   : > { %18162 = vmatprep.mubr.msk.f32.mxu0 %vm1354_vm1, %v26131_v10  ;;  %26134 = vst [vmem:[#allocation4_spill] sm:$0xff] %v21855_v9  ;;  %v21858_v10 = vld [vmem:[%s20681_s21 + $0x1c1] sm:$0xff] }
 0x207   : > { %26135 = vst [vmem:[#allocation5_spill] sm:$0xff] %v21858_v10 }
 0x209   : > { %18163 = vmatmul.mubr.msk.f32.gmra.mrb[58].mxu0 %vm1354_vm1, %v26132_v11  ;;  %v21865_v11 = vld [vmem:[%s20681_s21 + $0x1c9] sm:$0xff] }
 0x20a   : > { %18165 = vmatprep.mubr.msk.f32.mxu0 %vm1354_vm1, %v21581_v5  ;;  %26136 = vst [vmem:[#allocation61_spill] sm:$0xff] %v21865_v11 }
 0x20d   : > { %18166 = vmatmul.mubr.msk.f32.gmra.mrb[60].mxu0 %vm1354_vm1, %v21588_v12 }
 0x20e   : > { %18168 = vmatprep.mubr.msk.f32.mxu0 %vm1354_vm1, %v21591_v13 }
 0x211   : > { %18169 = vmatmul.mubr.msk.f32.gmra.mrb[62].mxu0 %vm1354_vm1, %v21598_v14 }
 0x212   : > { %18173 = vmatprep.mubr.msk.f32.mxu0 %vm1354_vm1, %v3936_v15  ;;  %v21868_v15 = vld [vmem:[%s20681_s21 + $0x1d1] sm:$0xff] }
 0x213   : > { %26137 = vst [vmem:[#allocation62_spill] sm:$0xff] %v21868_v15 }
 0x215   : > { %18174 = vmatmul.mubr.msk.f32.vlgmr.msra.gmra.mrb[0].mxu0 %vm1354_vm1, %v3937_v16  ;;  %v21875_v16 = vld [vmem:[%s20681_s21 + $0x1d9] sm:$0xff] }
 0x216   : > { %18270 = vmatpush3.msk.msra.mxu0 %vm1547_vm0, %v21458_v6  ;;  %18176 = vmatprep.mubr.msk.f32.mxu0 %vm1354_vm1, %v3938_v17  ;;  %v21848_v6 = vld [vmem:[%s20681_s21 + $0x1b1] sm:$0xff]  ;;  %26138 = vst [vmem:[#allocation63_spill] sm:$0xff] %v21875_v16  ;;  %v21878_v17 = vld [vmem:[%s20681_s21 + $0x1e1] sm:$0xff] }
 0x217   : > { %18367 = vmatprep.subr.msk.mxu0 %vm1547_vm0, %v21609_v18  ;;  %26133 = vst [vmem:[#allocation3_spill] sm:$0xff] %v21848_v6  ;;  %26139 = vst [vmem:[#allocation64_spill] sm:$0xff] %v21878_v17 }
 0x219   : > { %18177 = vmatmul.mubr.msk.f32.gmra.mrb[2].mxu0 %vm1354_vm1, %v3939_v19  ;;  %v21885_v19 = vld [vmem:[%s20681_s21 + $0x1e9] sm:$0xff] }
 0x21a   : > { %18179 = vmatprep.mubr.msk.f32.mxu0 %vm1354_vm1, %v21617_v20  ;;  %26140 = vst [vmem:[#allocation65_spill] sm:$0xff] %v21885_v19 }
 0x21d   : > { %18180 = vmatmul.mubr.msk.f32.gmra.mrb[4].mxu0 %vm1354_vm1, %v21625_v21 }
 0x21e   : > { %18182 = vmatprep.mubr.msk.f32.mxu0 %vm1354_vm1, %v21628_v22 }
 0x221   : > { %18183 = vmatmul.mubr.msk.f32.gmra.mrb[6].mxu0 %vm1354_vm1, %v21635_v23 }
 0x222   : > { %18185 = vmatprep.mubr.msk.f32.mxu0 %vm1354_vm1, %v21638_v24 }
 0x225   : > { %18186 = vmatmul.mubr.msk.f32.gmra.mrb[8].mxu0 %vm1354_vm1, %v21645_v25 }
 0x226   : > { %18188 = vmatprep.mubr.msk.f32.mxu0 %vm1354_vm1, %v21648_v26 }
 0x229   : > { %18189 = vmatmul.mubr.msk.f32.gmra.mrb[10].mxu0 %vm1354_vm1, %v21655_v27 }
 0x22a   : > { %18191 = vmatprep.mubr.msk.f32.mxu0 %vm1354_vm1, %v21658_v28 }
 0x22d   : > { %18192 = vmatmul.mubr.msk.f32.gmra.mrb[12].mxu0 %vm1354_vm1, %v21665_v29 }
 0x22e   : > { %18194 = vmatprep.mubr.msk.f32.mxu0 %vm1354_vm1, %v21668_v30 }
 0x231   : > { %18195 = vmatmul.mubr.msk.f32.gmra.mrb[14].mxu0 %vm1354_vm1, %v21675_v31 }
 0x232   : > { %18197 = vmatprep.mubr.msk.f32.mxu0 %vm1354_vm1, %v21678_v32 }
 0x235   : > { %18198 = vmatmul.mubr.msk.f32.gmra.mrb[16].mxu0 %vm1354_vm1, %v21685_v33 }
 0x236   : > { %18200 = vmatprep.mubr.msk.f32.mxu0 %vm1354_vm1, %v21688_v34 }
 0x239   : > { %18201 = vmatmul.mubr.msk.f32.gmra.mrb[18].mxu0 %vm1354_vm1, %v21695_v35 }
 0x23a   : > { %18203 = vmatprep.mubr.msk.f32.mxu0 %vm1354_vm1, %v21698_v36 }
 0x23d   : > { %18204 = vmatmul.mubr.msk.f32.gmra.mrb[20].mxu0 %vm1354_vm1, %v21705_v37 }
 0x23e   : > { %18206 = vmatprep.mubr.msk.f32.mxu0 %vm1354_vm1, %v21708_v38 }
 0x241   : > { %18207 = vmatmul.mubr.msk.f32.gmra.mrb[22].mxu0 %vm1354_vm1, %v21715_v39 }
 0x242   : > { %18209 = vmatprep.mubr.msk.f32.mxu0 %vm1354_vm1, %v21718_v40 }
 0x245   : > { %18210 = vmatmul.mubr.msk.f32.gmra.mrb[24].mxu0 %vm1354_vm1, %v21725_v41 }
 0x246   : > { %18212 = vmatprep.mubr.msk.f32.mxu0 %vm1354_vm1, %v21728_v42 }
 0x249   : > { %18213 = vmatmul.mubr.msk.f32.gmra.mrb[26].mxu0 %vm1354_vm1, %v21735_v43 }
 0x24a   : > { %18215 = vmatprep.mubr.msk.f32.mxu0 %vm1354_vm1, %v21738_v44 }
 0x24d   : > { %18216 = vmatmul.mubr.msk.f32.gmra.mrb[28].mxu0 %vm1354_vm1, %v21745_v45 }
 0x24e   : > { %18218 = vmatprep.mubr.msk.f32.mxu0 %vm1354_vm1, %v21748_v46 }
 0x251   : > { %18219 = vmatmul.mubr.msk.f32.gmra.mrb[30].mxu0 %vm1354_vm1, %v21755_v47 }
 0x252   : > { %18221 = vmatprep.mubr.msk.f32.mxu0 %vm1354_vm1, %v21758_v48 }
 0x255   : > { %18222 = vmatmul.mubr.msk.f32.gmra.mrb[32].mxu0 %vm1354_vm1, %v21765_v49 }
 0x256   : > { %18224 = vmatprep.mubr.msk.f32.mxu0 %vm1354_vm1, %v21768_v50 }
 0x259   : > { %18225 = vmatmul.mubr.msk.f32.gmra.mrb[34].mxu0 %vm1354_vm1, %v21775_v51 }
 0x25a   : > { %18227 = vmatprep.mubr.msk.f32.mxu0 %vm1354_vm1, %v21778_v52 }
 0x25d   : > { %18228 = vmatmul.mubr.msk.f32.gmra.mrb[36].mxu0 %vm1354_vm1, %v21785_v53 }
 0x25e   : > { %18230 = vmatprep.mubr.msk.f32.mxu0 %vm1354_vm1, %v21788_v54 }
 0x261   : > { %18231 = vmatmul.mubr.msk.f32.gmra.mrb[38].mxu0 %vm1354_vm1, %v21795_v55 }
 0x262   : > { %18233 = vmatprep.mubr.msk.f32.mxu0 %vm1354_vm1, %v21798_v56 }
 0x265   : > { %18234 = vmatmul.mubr.msk.f32.gmra.mrb[40].mxu0 %vm1354_vm1, %v21805_v57 }
 0x266   : > { %18236 = vmatprep.mubr.msk.f32.mxu0 %vm1354_vm1, %v21808_v58 }
 0x269   : > { %18237 = vmatmul.mubr.msk.f32.gmra.mrb[42].mxu0 %vm1354_vm1, %v21815_v59 }
 0x26a   : > { %18239 = vmatprep.mubr.msk.f32.mxu0 %vm1354_vm1, %v21818_v60 }
 0x26d   : > { %18240 = vmatmul.mubr.msk.f32.gmra.mrb[44].mxu0 %vm1354_vm1, %v21825_v61 }
 0x26e   : > { %18242 = vmatprep.mubr.msk.f32.mxu0 %vm1354_vm1, %v21828_v62 }
 0x271   : > { %18243 = vmatmul.mubr.msk.f32.gmra.mrb[46].mxu0 %vm1354_vm1, %v21835_v63 }
 0x272   : > { %18245 = vmatprep.mubr.msk.f32.mxu0 %vm1354_vm1, %v21838_v0 }
 0x275   : > { %18246 = vmatmul.mubr.msk.f32.gmra.mrb[48].mxu0 %vm1354_vm1, %v21845_v1 }
 0x276   : > { %18248 = vmatprep.mubr.msk.f32.mxu0 %vm1354_vm1, %v21848_v6  ;;  %v26157_v6 = vld [vmem:[#allocation16_spill] sm:$0xff] }
 0x279   : > { %18249 = vmatmul.mubr.msk.f32.gmra.mrb[50].mxu0 %vm1354_vm1, %v21855_v9  ;;  %v26153_v9 = vld [vmem:[#allocation12_spill] sm:$0xff] }
 0x27a   : > { %18251 = vmatprep.mubr.msk.f32.mxu0 %vm1354_vm1, %v21858_v10  ;;  %v21888_v10 = vld [vmem:[%s20681_s21 + $0x1f1] sm:$0xff] }
 0x27b   : > { %26141 = vst [vmem:[#allocation66_spill] sm:$0xff] %v21888_v10 }
 0x27d   : > { %18252 = vmatmul.mubr.msk.f32.gmra.mrb[52].mxu0 %vm1354_vm1, %v21865_v11  ;;  %v21898_v11 = vld [vmem:[%s20681_s21 + $0x201] sm:$0xff] }
 0x27e   : > { %18254 = vmatprep.mubr.msk.f32.mxu0 %vm1354_vm1, %v21868_v15  ;;  %v21895_v15 = vld [vmem:[%s20681_s21 + $0x1f9] sm:$0xff]  ;;  %26143 = vst [vmem:[#allocation68_spill] sm:$0xff] %v21898_v11 }
 0x27f   : > { %26142 = vst [vmem:[#allocation67_spill] sm:$0xff] %v21895_v15 }
 0x281   : > { %18255 = vmatmul.mubr.msk.f32.gmra.mrb[54].mxu0 %vm1354_vm1, %v21875_v16  ;;  %v21908_v16 = vld [vmem:[%s20681_s21 + $0x211] sm:$0xff] }
 0x282   : > { %18257 = vmatprep.mubr.msk.f32.mxu0 %vm1354_vm1, %v21878_v17  ;;  %v21905_v17 = vld [vmem:[%s20681_s21 + $0x209] sm:$0xff]  ;;  %26145 = vst [vmem:[#allocation70_spill] sm:$0xff] %v21908_v16 }
 0x283   : > { %26144 = vst [vmem:[#allocation69_spill] sm:$0xff] %v21905_v17 }
 0x285   : > { %18258 = vmatmul.mubr.msk.f32.gmra.mrb[56].mxu0 %vm1354_vm1, %v21885_v19  ;;  %v26147_v19 = vld [vmem:[#allocation6_spill] sm:$0xff] }
 0x286   : > { %18260 = vmatprep.mubr.msk.f32.mxu0 %vm1354_vm1, %v21888_v10  ;;  %v21915_v10 = vld [vmem:[%s20681_s21 + $0x219] sm:$0xff] }
 0x287   : > { %26146 = vst [vmem:[#allocation71_spill] sm:$0xff] %v21915_v10 }
 0x289   : > { %18261 = vmatmul.mubr.msk.f32.gmra.mrb[58].mxu0 %vm1354_vm1, %v21895_v15  ;;  %v26148_v15 = vld [vmem:[#allocation7_spill] sm:$0xff] }
 0x28a   : > { %18263 = vmatprep.mubr.msk.f32.mxu0 %vm1354_vm1, %v21898_v11  ;;  %v21924_v11 = vld [vmem:[%s25895_s2 + $0x1c] sm:$0xf] }
 0x28d   : > { %18264 = vmatmul.mubr.msk.f32.gmra.mrb[60].mxu0 %vm1354_vm1, %v21905_v17  ;;  %v26152_v17 = vld [vmem:[#allocation11_spill] sm:$0xff] }
 0x28e   : > { %18266 = vmatprep.mubr.msk.f32.mxu0 %vm1354_vm1, %v21908_v16  ;;  %v26149_v16 = vld [vmem:[#allocation8_spill] sm:$0xff] }
 0x291   : > { %18267 = vmatmul.mubr.msk.f32.gmra.mrb[62].mxu0 %vm1354_vm1, %v21915_v10  ;;  %v26150_v10 = vld [vmem:[#allocation9_spill] sm:$0xff] }
 0x292   : > { %18271 = vmatprep.mubr.msk.f32.mxu0 %vm1354_vm1, %v26147_v19  ;;  %v26151_v19 = vld [vmem:[#allocation10_spill] sm:$0xff] }
 0x295   : > { %18272 = vmatmul.mubr.msk.f32.vlgmr.msra.gmra.mrb[0].mxu0 %vm1354_vm1, %v26148_v15  ;;  %v26154_v15 = vld [vmem:[#allocation13_spill] sm:$0xff] }
 0x296   : > { %18368 = vmatpush3.msk.msra.mxu0 %vm1547_vm0, %v21609_v18  ;;  %18274 = vmatprep.mubr.msk.f32.mxu0 %vm1354_vm1, %v26149_v16  ;;  %v26155_v18 = vld [vmem:[#allocation14_spill] sm:$0xff]  ;;  %v26156_v16 = vld [vmem:[#allocation15_spill] sm:$0xff] }
 0x297   : > { %18465 = vmatprep.subr.msk.mxu0 %vm1547_vm0, %v21924_v11 }
 0x299   : > { %18275 = vmatmul.mubr.msk.f32.gmra.mrb[2].mxu0 %vm1354_vm1, %v26150_v10  ;;  %v26158_v10 = vld [vmem:[#allocation17_spill] sm:$0xff] }
 0x29a   : > { %18277 = vmatprep.mubr.msk.f32.mxu0 %vm1354_vm1, %v26151_v19  ;;  %v26159_v19 = vld [vmem:[#allocation18_spill] sm:$0xff] }
 0x29d   : > { %18278 = vmatmul.mubr.msk.f32.gmra.mrb[4].mxu0 %vm1354_vm1, %v26152_v17  ;;  %v26160_v17 = vld [vmem:[#allocation19_spill] sm:$0xff] }
 0x29e   : > { %18280 = vmatprep.mubr.msk.f32.mxu0 %vm1354_vm1, %v26153_v9  ;;  %v26161_v9 = vld [vmem:[#allocation20_spill] sm:$0xff] }
 0x2a1   : > { %18281 = vmatmul.mubr.msk.f32.gmra.mrb[6].mxu0 %vm1354_vm1, %v26154_v15  ;;  %v26162_v15 = vld [vmem:[#allocation21_spill] sm:$0xff] }
 0x2a2   : > { %18283 = vmatprep.mubr.msk.f32.mxu0 %vm1354_vm1, %v26155_v18  ;;  %v26163_v18 = vld [vmem:[#allocation22_spill] sm:$0xff] }
 0x2a5   : > { %18284 = vmatmul.mubr.msk.f32.gmra.mrb[8].mxu0 %vm1354_vm1, %v26156_v16  ;;  %v26164_v16 = vld [vmem:[#allocation23_spill] sm:$0xff] }
 0x2a6   : > { %18286 = vmatprep.mubr.msk.f32.mxu0 %vm1354_vm1, %v26157_v6  ;;  %v26165_v6 = vld [vmem:[#allocation24_spill] sm:$0xff] }
 0x2a9   : > { %18287 = vmatmul.mubr.msk.f32.gmra.mrb[10].mxu0 %vm1354_vm1, %v26158_v10  ;;  %v26166_v10 = vld [vmem:[#allocation25_spill] sm:$0xff] }
 0x2aa   : > { %18289 = vmatprep.mubr.msk.f32.mxu0 %vm1354_vm1, %v26159_v19  ;;  %v26167_v19 = vld [vmem:[#allocation26_spill] sm:$0xff] }
 0x2ad   : > { %18290 = vmatmul.mubr.msk.f32.gmra.mrb[12].mxu0 %vm1354_vm1, %v26160_v17  ;;  %v26168_v17 = vld [vmem:[#allocation27_spill] sm:$0xff] }
 0x2ae   : > { %18292 = vmatprep.mubr.msk.f32.mxu0 %vm1354_vm1, %v26161_v9  ;;  %v26169_v9 = vld [vmem:[#allocation28_spill] sm:$0xff] }
 0x2b1   : > { %18293 = vmatmul.mubr.msk.f32.gmra.mrb[14].mxu0 %vm1354_vm1, %v26162_v15  ;;  %v26170_v15 = vld [vmem:[#allocation29_spill] sm:$0xff] }
 0x2b2   : > { %18295 = vmatprep.mubr.msk.f32.mxu0 %vm1354_vm1, %v26163_v18  ;;  %v26171_v18 = vld [vmem:[#allocation30_spill] sm:$0xff] }
 0x2b5   : > { %18296 = vmatmul.mubr.msk.f32.gmra.mrb[16].mxu0 %vm1354_vm1, %v26164_v16  ;;  %v26172_v16 = vld [vmem:[#allocation31_spill] sm:$0xff] }
 0x2b6   : > { %18298 = vmatprep.mubr.msk.f32.mxu0 %vm1354_vm1, %v26165_v6  ;;  %v26173_v6 = vld [vmem:[#allocation32_spill] sm:$0xff] }
 0x2b9   : > { %18299 = vmatmul.mubr.msk.f32.gmra.mrb[18].mxu0 %vm1354_vm1, %v26166_v10  ;;  %v26174_v10 = vld [vmem:[#allocation33_spill] sm:$0xff] }
 0x2ba   : > { %18301 = vmatprep.mubr.msk.f32.mxu0 %vm1354_vm1, %v26167_v19  ;;  %v26175_v19 = vld [vmem:[#allocation34_spill] sm:$0xff] }
 0x2bd   : > { %18302 = vmatmul.mubr.msk.f32.gmra.mrb[20].mxu0 %vm1354_vm1, %v26168_v17  ;;  %v26176_v17 = vld [vmem:[#allocation35_spill] sm:$0xff] }
 0x2be   : > { %18304 = vmatprep.mubr.msk.f32.mxu0 %vm1354_vm1, %v26169_v9  ;;  %v26177_v9 = vld [vmem:[#allocation36_spill] sm:$0xff] }
 0x2c1   : > { %18305 = vmatmul.mubr.msk.f32.gmra.mrb[22].mxu0 %vm1354_vm1, %v26170_v15  ;;  %v26178_v15 = vld [vmem:[#allocation37_spill] sm:$0xff] }
 0x2c2   : > { %18307 = vmatprep.mubr.msk.f32.mxu0 %vm1354_vm1, %v26171_v18  ;;  %v26179_v18 = vld [vmem:[#allocation38_spill] sm:$0xff] }
 0x2c5   : > { %18308 = vmatmul.mubr.msk.f32.gmra.mrb[24].mxu0 %vm1354_vm1, %v26172_v16  ;;  %v26180_v16 = vld [vmem:[#allocation39_spill] sm:$0xff] }
 0x2c6   : > { %18310 = vmatprep.mubr.msk.f32.mxu0 %vm1354_vm1, %v26173_v6  ;;  %v26181_v6 = vld [vmem:[#allocation40_spill] sm:$0xff] }
 0x2c9   : > { %18311 = vmatmul.mubr.msk.f32.gmra.mrb[26].mxu0 %vm1354_vm1, %v26174_v10  ;;  %v26182_v10 = vld [vmem:[#allocation41_spill] sm:$0xff] }
 0x2ca   : > { %18313 = vmatprep.mubr.msk.f32.mxu0 %vm1354_vm1, %v26175_v19  ;;  %v26183_v19 = vld [vmem:[#allocation42_spill] sm:$0xff] }
 0x2cd   : > { %18314 = vmatmul.mubr.msk.f32.gmra.mrb[28].mxu0 %vm1354_vm1, %v26176_v17  ;;  %v26184_v17 = vld [vmem:[#allocation43_spill] sm:$0xff] }
 0x2ce   : > { %18316 = vmatprep.mubr.msk.f32.mxu0 %vm1354_vm1, %v26177_v9  ;;  %v26185_v9 = vld [vmem:[#allocation44_spill] sm:$0xff] }
 0x2d1   : > { %18317 = vmatmul.mubr.msk.f32.gmra.mrb[30].mxu0 %vm1354_vm1, %v26178_v15  ;;  %v26186_v15 = vld [vmem:[#allocation45_spill] sm:$0xff] }
 0x2d2   : > { %18319 = vmatprep.mubr.msk.f32.mxu0 %vm1354_vm1, %v26179_v18  ;;  %v26187_v18 = vld [vmem:[#allocation46_spill] sm:$0xff] }
 0x2d5   : > { %18320 = vmatmul.mubr.msk.f32.gmra.mrb[32].mxu0 %vm1354_vm1, %v26180_v16  ;;  %v26188_v16 = vld [vmem:[#allocation47_spill] sm:$0xff] }
 0x2d6   : > { %18322 = vmatprep.mubr.msk.f32.mxu0 %vm1354_vm1, %v26181_v6  ;;  %v26189_v6 = vld [vmem:[#allocation48_spill] sm:$0xff] }
 0x2d9   : > { %18323 = vmatmul.mubr.msk.f32.gmra.mrb[34].mxu0 %vm1354_vm1, %v26182_v10  ;;  %v26190_v10 = vld [vmem:[#allocation49_spill] sm:$0xff] }
 0x2da   : > { %18325 = vmatprep.mubr.msk.f32.mxu0 %vm1354_vm1, %v26183_v19  ;;  %v26191_v19 = vld [vmem:[#allocation50_spill] sm:$0xff] }
 0x2dd   : > { %18326 = vmatmul.mubr.msk.f32.gmra.mrb[36].mxu0 %vm1354_vm1, %v26184_v17  ;;  %v26192_v17 = vld [vmem:[#allocation51_spill] sm:$0xff] }
 0x2de   : > { %18328 = vmatprep.mubr.msk.f32.mxu0 %vm1354_vm1, %v26185_v9  ;;  %v26193_v9 = vld [vmem:[#allocation52_spill] sm:$0xff] }
 0x2e1   : > { %18329 = vmatmul.mubr.msk.f32.gmra.mrb[38].mxu0 %vm1354_vm1, %v26186_v15  ;;  %v26194_v15 = vld [vmem:[#allocation53_spill] sm:$0xff] }
 0x2e2   : > { %18331 = vmatprep.mubr.msk.f32.mxu0 %vm1354_vm1, %v26187_v18  ;;  %v26195_v18 = vld [vmem:[#allocation54_spill] sm:$0xff] }
 0x2e5   : > { %18332 = vmatmul.mubr.msk.f32.gmra.mrb[40].mxu0 %vm1354_vm1, %v26188_v16  ;;  %v26196_v16 = vld [vmem:[#allocation55_spill] sm:$0xff] }
 0x2e6   : > { %18334 = vmatprep.mubr.msk.f32.mxu0 %vm1354_vm1, %v26189_v6  ;;  %v26197_v6 = vld [vmem:[#allocation56_spill] sm:$0xff] }
 0x2e9   : > { %18335 = vmatmul.mubr.msk.f32.gmra.mrb[42].mxu0 %vm1354_vm1, %v26190_v10  ;;  %v26198_v10 = vld [vmem:[#allocation57_spill] sm:$0xff] }
 0x2ea   : > { %18337 = vmatprep.mubr.msk.f32.mxu0 %vm1354_vm1, %v26191_v19  ;;  %v26199_v19 = vld [vmem:[#allocation58_spill] sm:$0xff] }
 0x2ed   : > { %18338 = vmatmul.mubr.msk.f32.gmra.mrb[44].mxu0 %vm1354_vm1, %v26192_v17  ;;  %v26200_v17 = vld [vmem:[#allocation59_spill] sm:$0xff] }
 0x2ee   : > { %18340 = vmatprep.mubr.msk.f32.mxu0 %vm1354_vm1, %v26193_v9  ;;  %v26201_v9 = vld [vmem:[#allocation60_spill] sm:$0xff] }
 0x2f1   : > { %18341 = vmatmul.mubr.msk.f32.gmra.mrb[46].mxu0 %vm1354_vm1, %v26194_v15  ;;  %v22047_v15 = vld [vmem:[%s20681_s21 + $0x202] sm:$0xff] }
 0x2f2   : > { %18343 = vmatprep.mubr.msk.f32.mxu0 %vm1354_vm1, %v26195_v18  ;;  %v5358_v18 = vld [vmem:[%s20681_s21 + $0x50] sm:$0xff] }
 0x2f5   : > { %18344 = vmatmul.mubr.msk.f32.gmra.mrb[48].mxu0 %vm1354_vm1, %v26196_v16  ;;  %v22075_v16 = vld [vmem:[%s25895_s2 + $0x20] sm:$0xf] }
 0x2f6   : > { %18346 = vmatprep.mubr.msk.f32.mxu0 %vm1354_vm1, %v26197_v6  ;;  %v5359_v6 = vld [vmem:[%s20681_s21 + $0x58] sm:$0xff] }
 0x2f9   : > { %18347 = vmatmul.mubr.msk.f32.gmra.mrb[50].mxu0 %vm1354_vm1, %v26198_v10  ;;  %v5360_v10 = vld [vmem:[%s20681_s21 + $0x60] sm:$0xff] }
 0x2fa   : > { %18349 = vmatprep.mubr.msk.f32.mxu0 %vm1354_vm1, %v26199_v19  ;;  %v5361_v19 = vld [vmem:[%s20681_s21 + $0x68] sm:$0xff] }
 0x2fd   : > { %18350 = vmatmul.mubr.msk.f32.gmra.mrb[52].mxu0 %vm1354_vm1, %v21419_v3  ;;  %v22057_v3 = vld [vmem:[%s20681_s21 + $0x212] sm:$0xff] }
 0x2fe   : > { %18352 = vmatprep.mubr.msk.f32.mxu0 %vm1354_vm1, %v26200_v17  ;;  %v5362_v17 = vld [vmem:[%s20681_s21 + $0x70] sm:$0xff] }
 0x301   : > { %18353 = vmatmul.mubr.msk.f32.gmra.mrb[54].mxu0 %vm1354_vm1, %v21429_v7  ;;  %v22054_v7 = vld [vmem:[%s20681_s21 + $0x20a] sm:$0xff] }
 0x302   : > { %18355 = vmatprep.mubr.msk.f32.mxu0 %vm1354_vm1, %v26201_v9  ;;  %v5364_v9 = vld [vmem:[%s20681_s21 + $0x80] sm:$0xff] }
 0x305   : > { %18356 = vmatmul.mubr.msk.f32.gmra.mrb[56].mxu0 %vm1354_vm1, %v21439_v2  ;;  %v22064_v2 = vld [vmem:[%s20681_s21 + $0x21a] sm:$0xff] }
 0x306   : > { %18358 = vmatprep.mubr.msk.f32.mxu0 %vm1354_vm1, %v21442_v8  ;;  %v5357_v8 = vld [vmem:[%s20681_s21 + $0x48] sm:$0xff] }
 0x309   : > { %18359 = vmatmul.mubr.msk.f32.gmra.mrb[58].mxu0 %vm1354_vm1, %v21449_v4  ;;  %v5356_v4 = vld [vmem:[%s20681_s21 + $0x40] sm:$0xff] }
 0x30a   : > { %18361 = vmatprep.mubr.msk.f32.mxu0 %vm1354_vm1, %v22047_v15 }
 0x30d   : > { %18362 = vmatmul.mubr.msk.f32.gmra.mrb[60].mxu0 %vm1354_vm1, %v22054_v7 }
 0x30e   : > { %18364 = vmatprep.mubr.msk.f32.mxu0 %vm1354_vm1, %v22057_v3 }
 0x311   : > { %18365 = vmatmul.mubr.msk.f32.gmra.mrb[62].mxu0 %vm1354_vm1, %v22064_v2 }
 0x312   : > { %18369 = vmatprep.mubr.msk.f32.mxu0 %vm1354_vm1, %v5356_v4  ;;  %v5365_v4 = vld [vmem:[%s20681_s21 + $0x88] sm:$0xff] }
 0x315   : > { %18370 = vmatmul.mubr.msk.f32.vlgmr.msra.gmra.mrb[0].mxu0 %vm1354_vm1, %v5357_v8  ;;  %v5366_v8 = vld [vmem:[%s20681_s21 + $0x90] sm:$0xff] }
 0x316   : > { %18466 = vmatpush3.msk.msra.mxu0 %vm1547_vm0, %v21924_v11  ;;  %18372 = vmatprep.mubr.msk.f32.mxu0 %vm1354_vm1, %v5358_v18  ;;  %v5363_v11 = vld [vmem:[%s20681_s21 + $0x78] sm:$0xff] }
 0x317   : > { %18563 = vmatprep.subr.msk.mxu0 %vm1547_vm0, %v22075_v16  ;;  %v5367_v18 = vld [vmem:[%s20681_s21 + $0x98] sm:$0xff] }
 0x319   : > { %18373 = vmatmul.mubr.msk.f32.gmra.mrb[2].mxu0 %vm1354_vm1, %v5359_v6  ;;  %v5368_v6 = vld [vmem:[%s20681_s21 + $0xa0] sm:$0xff] }
 0x31a   : > { %18375 = vmatprep.mubr.msk.f32.mxu0 %vm1354_vm1, %v5360_v10  ;;  %v5369_v10 = vld [vmem:[%s20681_s21 + $0xa8] sm:$0xff] }
 0x31d   : > { %18376 = vmatmul.mubr.msk.f32.gmra.mrb[4].mxu0 %vm1354_vm1, %v5361_v19  ;;  %v5370_v19 = vld [vmem:[%s20681_s21 + $0xb0] sm:$0xff] }
 0x31e   : > { %18378 = vmatprep.mubr.msk.f32.mxu0 %vm1354_vm1, %v5362_v17  ;;  %v5371_v17 = vld [vmem:[%s20681_s21 + $0xb8] sm:$0xff] }
 0x321   : > { %18379 = vmatmul.mubr.msk.f32.gmra.mrb[6].mxu0 %vm1354_vm1, %v5363_v11  ;;  %v5372_v11 = vld [vmem:[%s20681_s21 + $0xc0] sm:$0xff] }
 0x322   : > { %18381 = vmatprep.mubr.msk.f32.mxu0 %vm1354_vm1, %v5364_v9  ;;  %v5373_v9 = vld [vmem:[%s20681_s21 + $0xc8] sm:$0xff] }
 0x325   : > { %18382 = vmatmul.mubr.msk.f32.gmra.mrb[8].mxu0 %vm1354_vm1, %v5365_v4  ;;  %v5374_v4 = vld [vmem:[%s20681_s21 + $0xd0] sm:$0xff] }
 0x326   : > { %18384 = vmatprep.mubr.msk.f32.mxu0 %vm1354_vm1, %v5366_v8  ;;  %v5375_v8 = vld [vmem:[%s20681_s21 + $0xd8] sm:$0xff] }
 0x329   : > { %18385 = vmatmul.mubr.msk.f32.gmra.mrb[10].mxu0 %vm1354_vm1, %v5367_v18  ;;  %v5376_v18 = vld [vmem:[%s20681_s21 + $0xe0] sm:$0xff] }
 0x32a   : > { %18387 = vmatprep.mubr.msk.f32.mxu0 %vm1354_vm1, %v5368_v6  ;;  %v5377_v6 = vld [vmem:[%s20681_s21 + $0xe8] sm:$0xff] }
 0x32d   : > { %18388 = vmatmul.mubr.msk.f32.gmra.mrb[12].mxu0 %vm1354_vm1, %v5369_v10  ;;  %v5378_v10 = vld [vmem:[%s20681_s21 + $0xf0] sm:$0xff] }
 0x32e   : > { %18390 = vmatprep.mubr.msk.f32.mxu0 %vm1354_vm1, %v5370_v19  ;;  %v5379_v19 = vld [vmem:[%s20681_s21 + $0xf8] sm:$0xff] }
 0x331   : > { %18391 = vmatmul.mubr.msk.f32.gmra.mrb[14].mxu0 %vm1354_vm1, %v5371_v17  ;;  %v5380_v17 = vld [vmem:[%s20681_s21 + $0x100] sm:$0xff] }
 0x332   : > { %18393 = vmatprep.mubr.msk.f32.mxu0 %vm1354_vm1, %v5372_v11  ;;  %v5381_v11 = vld [vmem:[%s20681_s21 + $0x108] sm:$0xff] }
 0x335   : > { %18394 = vmatmul.mubr.msk.f32.gmra.mrb[16].mxu0 %vm1354_vm1, %v5373_v9  ;;  %v5382_v9 = vld [vmem:[%s20681_s21 + $0x110] sm:$0xff] }
 0x336   : > { %18396 = vmatprep.mubr.msk.f32.mxu0 %vm1354_vm1, %v5374_v4  ;;  %v5383_v4 = vld [vmem:[%s20681_s21 + $0x118] sm:$0xff] }
 0x339   : > { %18397 = vmatmul.mubr.msk.f32.gmra.mrb[18].mxu0 %vm1354_vm1, %v5375_v8  ;;  %v5384_v8 = vld [vmem:[%s20681_s21 + $0x120] sm:$0xff] }
 0x33a   : > { %18399 = vmatprep.mubr.msk.f32.mxu0 %vm1354_vm1, %v5376_v18  ;;  %v5385_v18 = vld [vmem:[%s20681_s21 + $0x128] sm:$0xff] }
 0x33d   : > { %18400 = vmatmul.mubr.msk.f32.gmra.mrb[20].mxu0 %vm1354_vm1, %v5377_v6  ;;  %v5386_v6 = vld [vmem:[%s20681_s21 + $0x130] sm:$0xff] }
 0x33e   : > { %18402 = vmatprep.mubr.msk.f32.mxu0 %vm1354_vm1, %v5378_v10  ;;  %v5387_v10 = vld [vmem:[%s20681_s21 + $0x138] sm:$0xff] }
 0x341   : > { %18403 = vmatmul.mubr.msk.f32.gmra.mrb[22].mxu0 %vm1354_vm1, %v5379_v19  ;;  %v5388_v19 = vld [vmem:[%s20681_s21 + $0x140] sm:$0xff] }
 0x342   : > { %18405 = vmatprep.mubr.msk.f32.mxu0 %vm1354_vm1, %v5380_v17  ;;  %v5389_v17 = vld [vmem:[%s20681_s21 + $0x148] sm:$0xff] }
 0x345   : > { %18406 = vmatmul.mubr.msk.f32.gmra.mrb[24].mxu0 %vm1354_vm1, %v5381_v11  ;;  %v5390_v11 = vld [vmem:[%s20681_s21 + $0x150] sm:$0xff] }
 0x346   : > { %18408 = vmatprep.mubr.msk.f32.mxu0 %vm1354_vm1, %v5382_v9  ;;  %v5391_v9 = vld [vmem:[%s20681_s21 + $0x158] sm:$0xff] }
 0x349   : > { %18409 = vmatmul.mubr.msk.f32.gmra.mrb[26].mxu0 %vm1354_vm1, %v5383_v4  ;;  %v5392_v4 = vld [vmem:[%s20681_s21 + $0x160] sm:$0xff] }
 0x34a   : > { %18411 = vmatprep.mubr.msk.f32.mxu0 %vm1354_vm1, %v5384_v8  ;;  %v5393_v8 = vld [vmem:[%s20681_s21 + $0x168] sm:$0xff] }
 0x34d   : > { %18412 = vmatmul.mubr.msk.f32.gmra.mrb[28].mxu0 %vm1354_vm1, %v5385_v18  ;;  %v5394_v18 = vld [vmem:[%s20681_s21 + $0x170] sm:$0xff] }
 0x34e   : > { %18414 = vmatprep.mubr.msk.f32.mxu0 %vm1354_vm1, %v5386_v6  ;;  %v5395_v6 = vld [vmem:[%s20681_s21 + $0x178] sm:$0xff] }
 0x351   : > { %18415 = vmatmul.mubr.msk.f32.gmra.mrb[30].mxu0 %vm1354_vm1, %v5387_v10  ;;  %v5396_v10 = vld [vmem:[%s20681_s21 + $0x180] sm:$0xff] }
 0x352   : > { %18417 = vmatprep.mubr.msk.f32.mxu0 %vm1354_vm1, %v5388_v19  ;;  %v5397_v19 = vld [vmem:[%s20681_s21 + $0x188] sm:$0xff] }
 0x355   : > { %18418 = vmatmul.mubr.msk.f32.gmra.mrb[32].mxu0 %vm1354_vm1, %v5389_v17  ;;  %v5398_v17 = vld [vmem:[%s20681_s21 + $0x190] sm:$0xff] }
 0x356   : > { %18420 = vmatprep.mubr.msk.f32.mxu0 %vm1354_vm1, %v5390_v11  ;;  %v5399_v11 = vld [vmem:[%s20681_s21 + $0x198] sm:$0xff] }
 0x359   : > { %18421 = vmatmul.mubr.msk.f32.gmra.mrb[34].mxu0 %vm1354_vm1, %v5391_v9  ;;  %v5400_v9 = vld [vmem:[%s20681_s21 + $0x1a0] sm:$0xff] }
 0x35a   : > { %18423 = vmatprep.mubr.msk.f32.mxu0 %vm1354_vm1, %v5392_v4  ;;  %v5401_v4 = vld [vmem:[%s20681_s21 + $0x1a8] sm:$0xff] }
 0x35d   : > { %18424 = vmatmul.mubr.msk.f32.gmra.mrb[36].mxu0 %vm1354_vm1, %v5393_v8  ;;  %v5402_v8 = vld [vmem:[%s20681_s21 + $0x1b0] sm:$0xff] }
 0x35e   : > { %18426 = vmatprep.mubr.msk.f32.mxu0 %vm1354_vm1, %v5394_v18  ;;  %v5403_v18 = vld [vmem:[%s20681_s21 + $0x1b8] sm:$0xff] }
 0x361   : > { %18427 = vmatmul.mubr.msk.f32.gmra.mrb[38].mxu0 %vm1354_vm1, %v5395_v6  ;;  %v5404_v6 = vld [vmem:[%s20681_s21 + $0x1c0] sm:$0xff] }
 0x362   : > { %18429 = vmatprep.mubr.msk.f32.mxu0 %vm1354_vm1, %v5396_v10  ;;  %v5405_v10 = vld [vmem:[%s20681_s21 + $0x1c8] sm:$0xff] }
 0x365   : > { %18430 = vmatmul.mubr.msk.f32.gmra.mrb[40].mxu0 %vm1354_vm1, %v5397_v19  ;;  %v5406_v19 = vld [vmem:[%s20681_s21 + $0x1d0] sm:$0xff] }
 0x366   : > { %18432 = vmatprep.mubr.msk.f32.mxu0 %vm1354_vm1, %v5398_v17  ;;  %v5407_v17 = vld [vmem:[%s20681_s21 + $0x1d8] sm:$0xff] }
 0x369   : > { %18433 = vmatmul.mubr.msk.f32.gmra.mrb[42].mxu0 %vm1354_vm1, %v5399_v11  ;;  %v5408_v11 = vld [vmem:[%s20681_s21 + $0x1e0] sm:$0xff] }
 0x36a   : > { %18435 = vmatprep.mubr.msk.f32.mxu0 %vm1354_vm1, %v5400_v9  ;;  %v5409_v9 = vld [vmem:[%s20681_s21 + $0x1e8] sm:$0xff] }
 0x36d   : > { %18436 = vmatmul.mubr.msk.f32.gmra.mrb[44].mxu0 %vm1354_vm1, %v5401_v4  ;;  %v5410_v4 = vld [vmem:[%s20681_s21 + $0x1f0] sm:$0xff] }
 0x36e   : > { %18438 = vmatprep.mubr.msk.f32.mxu0 %vm1354_vm1, %v5402_v8  ;;  %v5411_v8 = vld [vmem:[%s20681_s21 + $0x1f8] sm:$0xff] }
 0x371   : > { %18439 = vmatmul.mubr.msk.f32.gmra.mrb[46].mxu0 %vm1354_vm1, %v5403_v18  ;;  %v5416_v18 = vld [vmem:[%s20681_s21 + $0x220] sm:$0xff] }
 0x372   : > { %18441 = vmatprep.mubr.msk.f32.mxu0 %vm1354_vm1, %v5404_v6  ;;  %v5417_v6 = vld [vmem:[%s20681_s21 + $0x228] sm:$0xff] }
 0x375   : > { %18442 = vmatmul.mubr.msk.f32.gmra.mrb[48].mxu0 %vm1354_vm1, %v5405_v10  ;;  %v5418_v10 = vld [vmem:[%s20681_s21 + $0x230] sm:$0xff] }
 0x376   : > { %18444 = vmatprep.mubr.msk.f32.mxu0 %vm1354_vm1, %v5406_v19  ;;  %v5419_v19 = vld [vmem:[%s20681_s21 + $0x238] sm:$0xff] }
 0x379   : > { %18445 = vmatmul.mubr.msk.f32.gmra.mrb[50].mxu0 %vm1354_vm1, %v5407_v17  ;;  %v6809_v17 = vld [vmem:[%s20681_s21 + $0x14a] sm:$0xff] }
 0x37a   : > { %18447 = vmatprep.mubr.msk.f32.mxu0 %vm1354_vm1, %v5408_v11  ;;  %v6810_v11 = vld [vmem:[%s20681_s21 + $0x152] sm:$0xff] }
 0x37d   : > { %18448 = vmatmul.mubr.msk.f32.gmra.mrb[52].mxu0 %vm1354_vm1, %v5409_v9  ;;  %v6811_v9 = vld [vmem:[%s20681_s21 + $0x15a] sm:$0xff] }
 0x37e   : > { %18450 = vmatprep.mubr.msk.f32.mxu0 %vm1354_vm1, %v5410_v4  ;;  %v6812_v4 = vld [vmem:[%s20681_s21 + $0x162] sm:$0xff] }
 0x381   : > { %18451 = vmatmul.mubr.msk.f32.gmra.mrb[54].mxu0 %vm1354_vm1, %v5411_v8  ;;  %v6813_v8 = vld [vmem:[%s20681_s21 + $0x16a] sm:$0xff] }
 0x382   : > { %18453 = vmatprep.mubr.msk.f32.mxu0 %vm1354_vm1, %v21581_v5  ;;  %v26202_v5 = vld [vmem:[#allocation3_spill] sm:$0xff] }
 0x385   : > { %18454 = vmatmul.mubr.msk.f32.gmra.mrb[56].mxu0 %vm1354_vm1, %v21588_v12  ;;  %v26203_v12 = vld [vmem:[#allocation4_spill] sm:$0xff] }
 0x386   : > { %18456 = vmatprep.mubr.msk.f32.mxu0 %vm1354_vm1, %v21591_v13  ;;  %v26204_v13 = vld [vmem:[#allocation5_spill] sm:$0xff] }
 0x389   : > { %18457 = vmatmul.mubr.msk.f32.gmra.mrb[58].mxu0 %vm1354_vm1, %v21598_v14  ;;  %v26205_v14 = vld [vmem:[#allocation61_spill] sm:$0xff] }
 0x38a   : > { %18459 = vmatprep.mubr.msk.f32.mxu0 %vm1354_vm1, %v5416_v18  ;;  %v6814_v18 = vld [vmem:[%s20681_s21 + $0x172] sm:$0xff] }
 0x38d   : > { %18460 = vmatmul.mubr.msk.f32.gmra.mrb[60].mxu0 %vm1354_vm1, %v5417_v6  ;;  %v6815_v6 = vld [vmem:[%s20681_s21 + $0x17a] sm:$0xff] }
 0x38e   : > { %18462 = vmatprep.mubr.msk.f32.mxu0 %vm1354_vm1, %v5418_v10  ;;  %v6816_v10 = vld [vmem:[%s20681_s21 + $0x182] sm:$0xff] }
 0x391   : > { %18463 = vmatmul.mubr.msk.f32.gmra.mrb[62].mxu0 %vm1354_vm1, %v5419_v19  ;;  %v6817_v19 = vld [vmem:[%s20681_s21 + $0x18a] sm:$0xff] }
 0x392   : > { %18467 = vmatprep.mubr.msk.f32.mxu0 %vm1354_vm1, %v21617_v20  ;;  %v26206_v20 = vld [vmem:[#allocation62_spill] sm:$0xff] }
 0x395   : > { %18468 = vmatmul.mubr.msk.f32.vlgmr.msra.gmra.mrb[0].mxu0 %vm1354_vm1, %v21625_v21  ;;  %v26207_v21 = vld [vmem:[#allocation63_spill] sm:$0xff] }
 0x396   : > { %18564 = vmatpush3.msk.msra.mxu0 %vm1547_vm0, %v22075_v16  ;;  %18470 = vmatprep.mubr.msk.f32.mxu0 %vm1354_vm1, %v21628_v22  ;;  %v26208_v22 = vld [vmem:[#allocation64_spill] sm:$0xff]  ;;  %v6808_v16 = vld [vmem:[%s20681_s21 + $0x142] sm:$0xff] }
 0x399   : > { %18471 = vmatmul.mubr.msk.f32.gmra.mrb[2].mxu0 %vm1354_vm1, %v21635_v23  ;;  %v26209_v23 = vld [vmem:[#allocation65_spill] sm:$0xff] }
 0x39a   : > { %18473 = vmatprep.mubr.msk.f32.mxu0 %vm1354_vm1, %v21638_v24  ;;  %v26210_v24 = vld [vmem:[#allocation66_spill] sm:$0xff] }
 0x39d   : > { %18474 = vmatmul.mubr.msk.f32.gmra.mrb[4].mxu0 %vm1354_vm1, %v21645_v25  ;;  %v26211_v25 = vld [vmem:[#allocation67_spill] sm:$0xff] }
 0x39e   : > { %18476 = vmatprep.mubr.msk.f32.mxu0 %vm1354_vm1, %v21648_v26  ;;  %v26212_v26 = vld [vmem:[#allocation68_spill] sm:$0xff] }
 0x3a1   : > { %18477 = vmatmul.mubr.msk.f32.gmra.mrb[6].mxu0 %vm1354_vm1, %v21655_v27  ;;  %v26213_v27 = vld [vmem:[#allocation69_spill] sm:$0xff] }
 0x3a2   : > { %18479 = vmatprep.mubr.msk.f32.mxu0 %vm1354_vm1, %v21658_v28  ;;  %v26214_v28 = vld [vmem:[#allocation70_spill] sm:$0xff] }
 0x3a5   : > { %18480 = vmatmul.mubr.msk.f32.gmra.mrb[8].mxu0 %vm1354_vm1, %v21665_v29  ;;  %v6126_v29 = vld [vmem:[%s20681_s21 + $0x221] sm:$0xff] }
 0x3a6   : > { %18482 = vmatprep.mubr.msk.f32.mxu0 %vm1354_vm1, %v21668_v30  ;;  %v26215_v30 = vld [vmem:[#allocation71_spill] sm:$0xff] }
 0x3a9   : > { %18483 = vmatmul.mubr.msk.f32.gmra.mrb[10].mxu0 %vm1354_vm1, %v21675_v31  ;;  %v6127_v31 = vld [vmem:[%s20681_s21 + $0x229] sm:$0xff] }
 0x3aa   : > { %18485 = vmatprep.mubr.msk.f32.mxu0 %vm1354_vm1, %v21678_v32  ;;  %v6128_v32 = vld [vmem:[%s20681_s21 + $0x231] sm:$0xff] }
 0x3ad   : > { %18486 = vmatmul.mubr.msk.f32.gmra.mrb[12].mxu0 %vm1354_vm1, %v21685_v33  ;;  %v6129_v33 = vld [vmem:[%s20681_s21 + $0x239] sm:$0xff] }
 0x3ae   : > { %18488 = vmatprep.mubr.msk.f32.mxu0 %vm1354_vm1, %v21688_v34  ;;  %v6776_v34 = vld [vmem:[%s20681_s21 + $0x42] sm:$0xff] }
 0x3b1   : > { %18489 = vmatmul.mubr.msk.f32.gmra.mrb[14].mxu0 %vm1354_vm1, %v21695_v35  ;;  %v6777_v35 = vld [vmem:[%s20681_s21 + $0x4a] sm:$0xff] }
 0x3b2   : > { %18491 = vmatprep.mubr.msk.f32.mxu0 %vm1354_vm1, %v21698_v36  ;;  %v6778_v36 = vld [vmem:[%s20681_s21 + $0x52] sm:$0xff] }
 0x3b5   : > { %18492 = vmatmul.mubr.msk.f32.gmra.mrb[16].mxu0 %vm1354_vm1, %v21705_v37  ;;  %v6779_v37 = vld [vmem:[%s20681_s21 + $0x5a] sm:$0xff] }
 0x3b6   : > { %18494 = vmatprep.mubr.msk.f32.mxu0 %vm1354_vm1, %v21708_v38  ;;  %v6780_v38 = vld [vmem:[%s20681_s21 + $0x62] sm:$0xff] }
 0x3b9   : > { %18495 = vmatmul.mubr.msk.f32.gmra.mrb[18].mxu0 %vm1354_vm1, %v21715_v39  ;;  %v6781_v39 = vld [vmem:[%s20681_s21 + $0x6a] sm:$0xff] }
 0x3ba   : > { %18497 = vmatprep.mubr.msk.f32.mxu0 %vm1354_vm1, %v21718_v40  ;;  %v6782_v40 = vld [vmem:[%s20681_s21 + $0x72] sm:$0xff] }
 0x3bd   : > { %18498 = vmatmul.mubr.msk.f32.gmra.mrb[20].mxu0 %vm1354_vm1, %v21725_v41  ;;  %v6783_v41 = vld [vmem:[%s20681_s21 + $0x7a] sm:$0xff] }
 0x3be   : > { %18500 = vmatprep.mubr.msk.f32.mxu0 %vm1354_vm1, %v21728_v42  ;;  %v6784_v42 = vld [vmem:[%s20681_s21 + $0x82] sm:$0xff] }
 0x3c1   : > { %18501 = vmatmul.mubr.msk.f32.gmra.mrb[22].mxu0 %vm1354_vm1, %v21735_v43  ;;  %v6785_v43 = vld [vmem:[%s20681_s21 + $0x8a] sm:$0xff] }
 0x3c2   : > { %18503 = vmatprep.mubr.msk.f32.mxu0 %vm1354_vm1, %v21738_v44  ;;  %v6786_v44 = vld [vmem:[%s20681_s21 + $0x92] sm:$0xff] }
 0x3c5   : > { %18504 = vmatmul.mubr.msk.f32.gmra.mrb[24].mxu0 %vm1354_vm1, %v21745_v45  ;;  %v6787_v45 = vld [vmem:[%s20681_s21 + $0x9a] sm:$0xff] }
 0x3c6   : > { %18506 = vmatprep.mubr.msk.f32.mxu0 %vm1354_vm1, %v21748_v46  ;;  %v6788_v46 = vld [vmem:[%s20681_s21 + $0xa2] sm:$0xff] }
 0x3c9   : > { %18507 = vmatmul.mubr.msk.f32.gmra.mrb[26].mxu0 %vm1354_vm1, %v21755_v47  ;;  %v6789_v47 = vld [vmem:[%s20681_s21 + $0xaa] sm:$0xff] }
 0x3ca   : > { %18509 = vmatprep.mubr.msk.f32.mxu0 %vm1354_vm1, %v21758_v48  ;;  %v6790_v48 = vld [vmem:[%s20681_s21 + $0xb2] sm:$0xff] }
 0x3cd   : > { %18510 = vmatmul.mubr.msk.f32.gmra.mrb[28].mxu0 %vm1354_vm1, %v21765_v49  ;;  %v6791_v49 = vld [vmem:[%s20681_s21 + $0xba] sm:$0xff] }
 0x3ce   : > { %18512 = vmatprep.mubr.msk.f32.mxu0 %vm1354_vm1, %v21768_v50  ;;  %v6792_v50 = vld [vmem:[%s20681_s21 + $0xc2] sm:$0xff] }
 0x3d1   : > { %18513 = vmatmul.mubr.msk.f32.gmra.mrb[30].mxu0 %vm1354_vm1, %v21775_v51  ;;  %v6793_v51 = vld [vmem:[%s20681_s21 + $0xca] sm:$0xff] }
 0x3d2   : > { %18515 = vmatprep.mubr.msk.f32.mxu0 %vm1354_vm1, %v21778_v52  ;;  %v6794_v52 = vld [vmem:[%s20681_s21 + $0xd2] sm:$0xff] }
 0x3d5   : > { %18516 = vmatmul.mubr.msk.f32.gmra.mrb[32].mxu0 %vm1354_vm1, %v21785_v53  ;;  %v6795_v53 = vld [vmem:[%s20681_s21 + $0xda] sm:$0xff] }
 0x3d6   : > { %18518 = vmatprep.mubr.msk.f32.mxu0 %vm1354_vm1, %v21788_v54  ;;  %v6796_v54 = vld [vmem:[%s20681_s21 + $0xe2] sm:$0xff] }
 0x3d9   : > { %18519 = vmatmul.mubr.msk.f32.gmra.mrb[34].mxu0 %vm1354_vm1, %v21795_v55  ;;  %v6797_v55 = vld [vmem:[%s20681_s21 + $0xea] sm:$0xff] }
 0x3da   : > { %18521 = vmatprep.mubr.msk.f32.mxu0 %vm1354_vm1, %v21798_v56  ;;  %v6798_v56 = vld [vmem:[%s20681_s21 + $0xf2] sm:$0xff] }
 0x3dd   : > { %18522 = vmatmul.mubr.msk.f32.gmra.mrb[36].mxu0 %vm1354_vm1, %v21805_v57  ;;  %v6799_v57 = vld [vmem:[%s20681_s21 + $0xfa] sm:$0xff] }
 0x3de   : > { %18524 = vmatprep.mubr.msk.f32.mxu0 %vm1354_vm1, %v21808_v58  ;;  %v6800_v58 = vld [vmem:[%s20681_s21 + $0x102] sm:$0xff] }
 0x3e1   : > { %18525 = vmatmul.mubr.msk.f32.gmra.mrb[38].mxu0 %vm1354_vm1, %v21815_v59  ;;  %v6801_v59 = vld [vmem:[%s20681_s21 + $0x10a] sm:$0xff] }
 0x3e2   : > { %18527 = vmatprep.mubr.msk.f32.mxu0 %vm1354_vm1, %v21818_v60  ;;  %v6802_v60 = vld [vmem:[%s20681_s21 + $0x112] sm:$0xff] }
 0x3e5   : > { %18528 = vmatmul.mubr.msk.f32.gmra.mrb[40].mxu0 %vm1354_vm1, %v21825_v61  ;;  %v6803_v61 = vld [vmem:[%s20681_s21 + $0x11a] sm:$0xff] }
 0x3e6   : > { %18530 = vmatprep.mubr.msk.f32.mxu0 %vm1354_vm1, %v21828_v62  ;;  %v6804_v62 = vld [vmem:[%s20681_s21 + $0x122] sm:$0xff] }
 0x3e9   : > { %18531 = vmatmul.mubr.msk.f32.gmra.mrb[42].mxu0 %vm1354_vm1, %v21835_v63  ;;  %v6805_v63 = vld [vmem:[%s20681_s21 + $0x12a] sm:$0xff] }
 0x3ea   : > { %18533 = vmatprep.mubr.msk.f32.mxu0 %vm1354_vm1, %v21838_v0  ;;  %v6806_v0 = vld [vmem:[%s20681_s21 + $0x132] sm:$0xff] }
 0x3ed   : > { %18534 = vmatmul.mubr.msk.f32.gmra.mrb[44].mxu0 %vm1354_vm1, %v21845_v1  ;;  %v6807_v1 = vld [vmem:[%s20681_s21 + $0x13a] sm:$0xff] }
 0x3ee   : > { %18536 = vmatprep.mubr.msk.f32.mxu0 %vm1354_vm1, %v26202_v5  ;;  %v6818_v5 = vld [vmem:[%s20681_s21 + $0x192] sm:$0xff] }
 0x3f1   : > { %18537 = vmatmul.mubr.msk.f32.gmra.mrb[46].mxu0 %vm1354_vm1, %v26203_v12  ;;  %v6819_v12 = vld [vmem:[%s20681_s21 + $0x19a] sm:$0xff] }
 0x3f2   : > { %18539 = vmatprep.mubr.msk.f32.mxu0 %vm1354_vm1, %v26204_v13  ;;  %v6820_v13 = vld [vmem:[%s20681_s21 + $0x1a2] sm:$0xff] }
 0x3f5   : > { %18540 = vmatmul.mubr.msk.f32.gmra.mrb[48].mxu0 %vm1354_vm1, %v26205_v14  ;;  %v6821_v14 = vld [vmem:[%s20681_s21 + $0x1aa] sm:$0xff] }
 0x3f6   : > { %18542 = vmatprep.mubr.msk.f32.mxu0 %vm1354_vm1, %v26206_v20  ;;  %v6822_v20 = vld [vmem:[%s20681_s21 + $0x1b2] sm:$0xff] }
 0x3f9   : > { %18543 = vmatmul.mubr.msk.f32.gmra.mrb[50].mxu0 %vm1354_vm1, %v26207_v21  ;;  %v6823_v21 = vld [vmem:[%s20681_s21 + $0x1ba] sm:$0xff] }
 0x3fa   : > { %18545 = vmatprep.mubr.msk.f32.mxu0 %vm1354_vm1, %v26208_v22  ;;  %v6824_v22 = vld [vmem:[%s20681_s21 + $0x1c2] sm:$0xff] }
 0x3fd   : > { %18546 = vmatmul.mubr.msk.f32.gmra.mrb[52].mxu0 %vm1354_vm1, %v26209_v23  ;;  %v6825_v23 = vld [vmem:[%s20681_s21 + $0x1ca] sm:$0xff] }
 0x3fe   : > { %18548 = vmatprep.mubr.msk.f32.mxu0 %vm1354_vm1, %v26210_v24  ;;  %v6826_v24 = vld [vmem:[%s20681_s21 + $0x1d2] sm:$0xff] }
 0x401   : > { %18549 = vmatmul.mubr.msk.f32.gmra.mrb[54].mxu0 %vm1354_vm1, %v26211_v25  ;;  %v6827_v25 = vld [vmem:[%s20681_s21 + $0x1da] sm:$0xff] }
 0x402   : > { %18551 = vmatprep.mubr.msk.f32.mxu0 %vm1354_vm1, %v26212_v26  ;;  %v6828_v26 = vld [vmem:[%s20681_s21 + $0x1e2] sm:$0xff] }
 0x405   : > { %18552 = vmatmul.mubr.msk.f32.gmra.mrb[56].mxu0 %vm1354_vm1, %v26213_v27  ;;  %v6829_v27 = vld [vmem:[%s20681_s21 + $0x1ea] sm:$0xff] }
 0x406   : > { %18554 = vmatprep.mubr.msk.f32.mxu0 %vm1354_vm1, %v26214_v28  ;;  %v6830_v28 = vld [vmem:[%s20681_s21 + $0x1f2] sm:$0xff] }
 0x409   : > { %18555 = vmatmul.mubr.msk.f32.gmra.mrb[58].mxu0 %vm1354_vm1, %v26215_v30  ;;  %v6836_v30 = vld [vmem:[%s20681_s21 + $0x222] sm:$0xff] }
 0x40a   : > { %18557 = vmatprep.mubr.msk.f32.mxu0 %vm1354_vm1, %v6126_v29  ;;  %v6831_v29 = vld [vmem:[%s20681_s21 + $0x1fa] sm:$0xff] }
 0x40d   : > { %18558 = vmatmul.mubr.msk.f32.gmra.mrb[60].mxu0 %vm1354_vm1, %v6127_v31  ;;  %v6837_v31 = vld [vmem:[%s20681_s21 + $0x22a] sm:$0xff] }
 0x40e   : > { %18560 = vmatprep.mubr.msk.f32.mxu0 %vm1354_vm1, %v6128_v32  ;;  %v6838_v32 = vld [vmem:[%s20681_s21 + $0x232] sm:$0xff] }
 0x411   : > { %18561 = vmatmul.mubr.msk.f32.gmra.mrb[62].mxu0 %vm1354_vm1, %v6129_v33  ;;  %v6839_v33 = vld [vmem:[%s20681_s21 + $0x23a] sm:$0xff]  ;;  %s20601_s21 = smov 0  }
 0x412   : > { %18565 = vmatprep.mubr.msk.f32.mxu0 %vm1354_vm1, %v6776_v34 }
 0x415   : > { %18566 = vmatmul.mubr.msk.f32.vlgmr.msra.gmra.mrb[0].mxu0 %vm1354_vm1, %v6777_v35 }
 0x416   : > { %18568 = vmatprep.mubr.msk.f32.mxu0 %vm1354_vm1, %v6778_v36 }
 0x419   : > { %18569 = vmatmul.mubr.msk.f32.gmra.mrb[2].mxu0 %vm1354_vm1, %v6779_v37 }
 0x41a   : > { %18571 = vmatprep.mubr.msk.f32.mxu0 %vm1354_vm1, %v6780_v38 }
 0x41d   : > { %18572 = vmatmul.mubr.msk.f32.gmra.mrb[4].mxu0 %vm1354_vm1, %v6781_v39 }
 0x41e   : > { %18574 = vmatprep.mubr.msk.f32.mxu0 %vm1354_vm1, %v6782_v40 }
 0x421   : > { %18575 = vmatmul.mubr.msk.f32.gmra.mrb[6].mxu0 %vm1354_vm1, %v6783_v41 }
 0x422   : > { %18577 = vmatprep.mubr.msk.f32.mxu0 %vm1354_vm1, %v6784_v42 }
 0x425   : > { %18578 = vmatmul.mubr.msk.f32.gmra.mrb[8].mxu0 %vm1354_vm1, %v6785_v43 }
 0x426   : > { %18580 = vmatprep.mubr.msk.f32.mxu0 %vm1354_vm1, %v6786_v44 }
 0x429   : > { %18581 = vmatmul.mubr.msk.f32.gmra.mrb[10].mxu0 %vm1354_vm1, %v6787_v45 }
 0x42a   : > { %18583 = vmatprep.mubr.msk.f32.mxu0 %vm1354_vm1, %v6788_v46 }
 0x42d   : > { %18584 = vmatmul.mubr.msk.f32.gmra.mrb[12].mxu0 %vm1354_vm1, %v6789_v47 }
 0x42e   : > { %18586 = vmatprep.mubr.msk.f32.mxu0 %vm1354_vm1, %v6790_v48 }
 0x431   : > { %18587 = vmatmul.mubr.msk.f32.gmra.mrb[14].mxu0 %vm1354_vm1, %v6791_v49 }
 0x432   : > { %18589 = vmatprep.mubr.msk.f32.mxu0 %vm1354_vm1, %v6792_v50 }
 0x435   : > { %18590 = vmatmul.mubr.msk.f32.gmra.mrb[16].mxu0 %vm1354_vm1, %v6793_v51 }
 0x436   : > { %18592 = vmatprep.mubr.msk.f32.mxu0 %vm1354_vm1, %v6794_v52 }
 0x439   : > { %18593 = vmatmul.mubr.msk.f32.gmra.mrb[18].mxu0 %vm1354_vm1, %v6795_v53 }
 0x43a   : > { %18595 = vmatprep.mubr.msk.f32.mxu0 %vm1354_vm1, %v6796_v54 }
 0x43d   : > { %18596 = vmatmul.mubr.msk.f32.gmra.mrb[20].mxu0 %vm1354_vm1, %v6797_v55 }
 0x43e   : > { %18598 = vmatprep.mubr.msk.f32.mxu0 %vm1354_vm1, %v6798_v56 }
 0x441   : > { %18599 = vmatmul.mubr.msk.f32.gmra.mrb[22].mxu0 %vm1354_vm1, %v6799_v57 }
 0x442   : > { %18601 = vmatprep.mubr.msk.f32.mxu0 %vm1354_vm1, %v6800_v58 }
 0x445   : > { %18602 = vmatmul.mubr.msk.f32.gmra.mrb[24].mxu0 %vm1354_vm1, %v6801_v59 }
 0x446   : > { %18604 = vmatprep.mubr.msk.f32.mxu0 %vm1354_vm1, %v6802_v60 }
 0x449   : > { %18605 = vmatmul.mubr.msk.f32.gmra.mrb[26].mxu0 %vm1354_vm1, %v6803_v61 }
 0x44a   : > { %18607 = vmatprep.mubr.msk.f32.mxu0 %vm1354_vm1, %v6804_v62 }
 0x44d   : > { %18608 = vmatmul.mubr.msk.f32.gmra.mrb[28].mxu0 %vm1354_vm1, %v6805_v63 }
 0x44e   : > { %18610 = vmatprep.mubr.msk.f32.mxu0 %vm1354_vm1, %v6806_v0 }
 0x451   : > { %18611 = vmatmul.mubr.msk.f32.gmra.mrb[30].mxu0 %vm1354_vm1, %v6807_v1 }
 0x452   : > { %18613 = vmatprep.mubr.msk.f32.mxu0 %vm1354_vm1, %v6808_v16 }
 0x455   : > { %18614 = vmatmul.mubr.msk.f32.gmra.mrb[32].mxu0 %vm1354_vm1, %v6809_v17 }
 0x456   : > { %18616 = vmatprep.mubr.msk.f32.mxu0 %vm1354_vm1, %v6810_v11 }
 0x459   : > { %18617 = vmatmul.mubr.msk.f32.gmra.mrb[34].mxu0 %vm1354_vm1, %v6811_v9 }
 0x45a   : > { %18619 = vmatprep.mubr.msk.f32.mxu0 %vm1354_vm1, %v6812_v4 }
 0x45d   : > { %18620 = vmatmul.mubr.msk.f32.gmra.mrb[36].mxu0 %vm1354_vm1, %v6813_v8 }
 0x45e   : > { %18622 = vmatprep.mubr.msk.f32.mxu0 %vm1354_vm1, %v6814_v18 }
 0x461   : > { %18623 = vmatmul.mubr.msk.f32.gmra.mrb[38].mxu0 %vm1354_vm1, %v6815_v6 }
 0x462   : > { %18625 = vmatprep.mubr.msk.f32.mxu0 %vm1354_vm1, %v6816_v10 }
 0x465   : > { %18626 = vmatmul.mubr.msk.f32.gmra.mrb[40].mxu0 %vm1354_vm1, %v6817_v19 }
 0x466   : > { %18628 = vmatprep.mubr.msk.f32.mxu0 %vm1354_vm1, %v6818_v5 }
 0x469   : > { %18629 = vmatmul.mubr.msk.f32.gmra.mrb[42].mxu0 %vm1354_vm1, %v6819_v12 }
 0x46a   : > { %18631 = vmatprep.mubr.msk.f32.mxu0 %vm1354_vm1, %v6820_v13 }
 0x46d   : > { %18632 = vmatmul.mubr.msk.f32.gmra.mrb[44].mxu0 %vm1354_vm1, %v6821_v14 }
 0x46e   : > { %18634 = vmatprep.mubr.msk.f32.mxu0 %vm1354_vm1, %v6822_v20 }
 0x471   : > { %18635 = vmatmul.mubr.msk.f32.gmra.mrb[46].mxu0 %vm1354_vm1, %v6823_v21 }
 0x472   : > { %18637 = vmatprep.mubr.msk.f32.mxu0 %vm1354_vm1, %v6824_v22 }
 0x475   : > { %18638 = vmatmul.mubr.msk.f32.gmra.mrb[48].mxu0 %vm1354_vm1, %v6825_v23 }
 0x476   : > { %18640 = vmatprep.mubr.msk.f32.mxu0 %vm1354_vm1, %v6826_v24 }
 0x479   : > { %18641 = vmatmul.mubr.msk.f32.gmra.mrb[50].mxu0 %vm1354_vm1, %v6827_v25 }
 0x47a   : > { %18643 = vmatprep.mubr.msk.f32.mxu0 %vm1354_vm1, %v6828_v26 }
 0x47d   : > { %18644 = vmatmul.mubr.msk.f32.gmra.mrb[52].mxu0 %vm1354_vm1, %v6829_v27 }
 0x47e   : > { %18646 = vmatprep.mubr.msk.f32.mxu0 %vm1354_vm1, %v6830_v28 }
 0x481   : > { %18647 = vmatmul.mubr.msk.f32.gmra.mrb[54].mxu0 %vm1354_vm1, %v6831_v29 }
 0x482   : > { %18649 = vmatprep.mubr.msk.f32.mxu0 %vm1354_vm1, %v22047_v15 }
 0x485   : > { %18650 = vmatmul.mubr.msk.f32.gmra.mrb[56].mxu0 %vm1354_vm1, %v22054_v7 }
 0x486   : > { %18652 = vmatprep.mubr.msk.f32.mxu0 %vm1354_vm1, %v22057_v3 }
 0x489   : > { %18653 = vmatmul.mubr.msk.f32.gmra.mrb[58].mxu0 %vm1354_vm1, %v22064_v2 }
 0x48a   : > { %18655 = vmatprep.mubr.msk.f32.mxu0 %vm1354_vm1, %v6836_v30 }
 0x48d   : > { %18656 = vmatmul.mubr.msk.f32.gmra.mrb[60].mxu0 %vm1354_vm1, %v6837_v31 }
 0x48e   : > { %18658 = vmatprep.mubr.msk.f32.mxu0 %vm1354_vm1, %v6838_v32 }
 0x491   : > { %18659 = vmatmul.mubr.msk.f32.gmra.mrb[62].mxu0 %vm1354_vm1, %v6839_v33 }
 0x4e8   : > { %v22463_v15 = vpop.f32.mrb[0].mxu0 }
 0x4e9   : > { %v7679_v7 = vsel %vm1354_vm1, %v22463_v15, 0.0  ;;  %v7813_v3 = vmul.f32 %v22463_v15, %v22463_v15  ;;  %v22469_v2 = vpop.f32.mrb[1].mxu0 }
 0x4ea   : > { %v7678_v34 = vsel %vm1354_vm1, %v22469_v2, 0.0  ;;  %v7812_v35 = vmul.f32 %v22469_v2, %v22469_v2 }
 0x4eb   : > { %v7877_v36 = vsel %vm1354_vm1, %v7813_v3, 0.0  ;;  %v7680_v37 = vadd.f32 %v7679_v7, %v7678_v34 }
 0x4ec   : > { %v7876_v38 = vsel %vm1354_vm1, %v7812_v35, 0.0  ;;  %v22477_v39 = vpop.f32.mrb[2].mxu0 }
 0x4ed   : > { %v7878_v40 = vadd.f32 %v7877_v36, %v7876_v38  ;;  %v22479_v41 = vpop.f32.mrb[3].mxu0 }
 0x4f0   : > { %v22481_v42 = vpop.f32.mrb[4].mxu0 }
 0x4f1   : > { %v22483_v43 = vpop.f32.mrb[5].mxu0  ;;  %v7817_v44 = vmul.f32 %v22481_v42, %v22481_v42  ;;  %v7687_v48 = vsel %vm1354_vm1, %v22481_v42, 0.0 }
 0x4f2   : > { %v7685_v45 = vsel %vm1354_vm1, %v22483_v43, 0.0  ;;  %v7816_v46 = vmul.f32 %v22483_v43, %v22483_v43 }
 0x4f3   : > { %v7686_v47 = vadd.f32 %v7685_v45, %v7680_v37  ;;  %v7885_v54 = vsel %vm1354_vm1, %v7817_v44, 0.0 }
 0x4f4   : > { %v7883_v49 = vsel %vm1354_vm1, %v7816_v46, 0.0  ;;  %v22494_v50 = vpop.f32.mrb[6].mxu0 }
 0x4f5   : > { %v7884_v51 = vadd.f32 %v7883_v49, %v7878_v40  ;;  %v22496_v52 = vpop.f32.mrb[7].mxu0  ;;  %v7688_v53 = vadd.f32 %v7687_v48, %v7686_v47 }
 0x4f7   : > { %v7886_v55 = vadd.f32 %v7885_v54, %v7884_v51 }
 0x4f8   : > { %v22499_v56 = vpop.f32.mrb[8].mxu0 }
 0x4f9   : > { %v22501_v57 = vpop.f32.mrb[9].mxu0  ;;  %v7821_v58 = vmul.f32 %v22499_v56, %v22499_v56  ;;  %v7695_v62 = vsel %vm1354_vm1, %v22499_v56, 0.0 }
 0x4fa   : > { %v7693_v59 = vsel %vm1354_vm1, %v22501_v57, 0.0  ;;  %v7820_v60 = vmul.f32 %v22501_v57, %v22501_v57 }
 0x4fb   : > { %v7694_v61 = vadd.f32 %v7693_v59, %v7688_v53  ;;  %v7893_v11 = vsel %vm1354_vm1, %v7821_v58, 0.0 }
 0x4fc   : > { %v7891_v63 = vsel %vm1354_vm1, %v7820_v60, 0.0  ;;  %v22512_v0 = vpop.f32.mrb[10].mxu0 }
 0x4fd   : > { %v7892_v1 = vadd.f32 %v7891_v63, %v7886_v55  ;;  %v22514_v16 = vpop.f32.mrb[11].mxu0  ;;  %v7696_v17 = vadd.f32 %v7695_v62, %v7694_v61 }
 0x4ff   : > { %v7894_v9 = vadd.f32 %v7893_v11, %v7892_v1 }
 0x500   : > { %v22517_v4 = vpop.f32.mrb[12].mxu0 }
 0x501   : > { %v22519_v8 = vpop.f32.mrb[13].mxu0  ;;  %v7825_v18 = vmul.f32 %v22517_v4, %v22517_v4  ;;  %v7703_v5 = vsel %vm1354_vm1, %v22517_v4, 0.0 }
 0x502   : > { %v7701_v6 = vsel %vm1354_vm1, %v22519_v8, 0.0  ;;  %v7824_v10 = vmul.f32 %v22519_v8, %v22519_v8 }
 0x503   : > { %v7702_v19 = vadd.f32 %v7701_v6, %v7696_v17  ;;  %v7901_v22 = vsel %vm1354_vm1, %v7825_v18, 0.0 }
 0x504   : > { %v7899_v12 = vsel %vm1354_vm1, %v7824_v10, 0.0  ;;  %v22530_v13 = vpop.f32.mrb[14].mxu0 }
 0x505   : > { %v7900_v14 = vadd.f32 %v7899_v12, %v7894_v9  ;;  %v22532_v20 = vpop.f32.mrb[15].mxu0  ;;  %v7704_v21 = vadd.f32 %v7703_v5, %v7702_v19 }
 0x507   : > { %v7902_v23 = vadd.f32 %v7901_v22, %v7900_v14 }
 0x508   : > { %v22535_v24 = vpop.f32.mrb[16].mxu0 }
 0x509   : > { %v22537_v25 = vpop.f32.mrb[17].mxu0  ;;  %v7829_v26 = vmul.f32 %v22535_v24, %v22535_v24  ;;  %v7711_v30 = vsel %vm1354_vm1, %v22535_v24, 0.0 }
 0x50a   : > { %v7709_v27 = vsel %vm1354_vm1, %v22537_v25, 0.0  ;;  %v7828_v28 = vmul.f32 %v22537_v25, %v22537_v25 }
 0x50b   : > { %v7710_v29 = vadd.f32 %v7709_v27, %v7704_v21  ;;  %v7909_v34 = vsel %vm1354_vm1, %v7829_v26, 0.0 }
 0x50c   : > { %v7907_v31 = vsel %vm1354_vm1, %v7828_v28, 0.0  ;;  %v22548_v32 = vpop.f32.mrb[18].mxu0 }
 0x50d   : > { %v7908_v33 = vadd.f32 %v7907_v31, %v7902_v23  ;;  %v22550_v7 = vpop.f32.mrb[19].mxu0  ;;  %v7712_v3 = vadd.f32 %v7711_v30, %v7710_v29 }
 0x50f   : > { %v7910_v35 = vadd.f32 %v7909_v34, %v7908_v33 }
 0x510   : > { %v22553_v36 = vpop.f32.mrb[20].mxu0 }
 0x511   : > { %v22555_v37 = vpop.f32.mrb[21].mxu0  ;;  %v7833_v38 = vmul.f32 %v22553_v36, %v22553_v36  ;;  %v7719_v46 = vsel %vm1354_vm1, %v22553_v36, 0.0 }
 0x512   : > { %v7717_v40 = vsel %vm1354_vm1, %v22555_v37, 0.0  ;;  %v7832_v44 = vmul.f32 %v22555_v37, %v22555_v37 }
 0x513   : > { %v7718_v45 = vadd.f32 %v7717_v40, %v7712_v3  ;;  %v7917_v54 = vsel %vm1354_vm1, %v7833_v38, 0.0 }
 0x514   : > { %v7915_v47 = vsel %vm1354_vm1, %v7832_v44, 0.0  ;;  %v22566_v48 = vpop.f32.mrb[22].mxu0 }
 0x515   : > { %v7916_v49 = vadd.f32 %v7915_v47, %v7910_v35  ;;  %v22568_v51 = vpop.f32.mrb[23].mxu0  ;;  %v7720_v53 = vadd.f32 %v7719_v46, %v7718_v45 }
 0x517   : > { %v7918_v55 = vadd.f32 %v7917_v54, %v7916_v49 }
 0x518   : > { %v22571_v58 = vpop.f32.mrb[24].mxu0 }
 0x519   : > { %v22573_v59 = vpop.f32.mrb[25].mxu0  ;;  %v7837_v60 = vmul.f32 %v22571_v58, %v22571_v58  ;;  %v7727_v1 = vsel %vm1354_vm1, %v22571_v58, 0.0 }
 0x51a   : > { %v7725_v61 = vsel %vm1354_vm1, %v22573_v59, 0.0  ;;  %v7836_v62 = vmul.f32 %v22573_v59, %v22573_v59 }
 0x51b   : > { %v7726_v63 = vadd.f32 %v7725_v61, %v7720_v53  ;;  %v7925_v10 = vsel %vm1354_vm1, %v7837_v60, 0.0 }
 0x51c   : > { %v7923_v17 = vsel %vm1354_vm1, %v7836_v62, 0.0  ;;  %v22584_v11 = vpop.f32.mrb[26].mxu0 }
 0x51d   : > { %v7924_v9 = vadd.f32 %v7923_v17, %v7918_v55  ;;  %v22586_v18 = vpop.f32.mrb[27].mxu0  ;;  %v7728_v6 = vadd.f32 %v7727_v1, %v7726_v63 }
 0x51f   : > { %v7926_v19 = vadd.f32 %v7925_v10, %v7924_v9 }
 0x520   : > { %v22589_v5 = vpop.f32.mrb[28].mxu0 }
 0x521   : > { %v22591_v12 = vpop.f32.mrb[29].mxu0  ;;  %v7841_v14 = vmul.f32 %v22589_v5, %v22589_v5  ;;  %v7735_v26 = vsel %vm1354_vm1, %v22589_v5, 0.0 }
 0x522   : > { %v7733_v21 = vsel %vm1354_vm1, %v22591_v12, 0.0  ;;  %v7840_v22 = vmul.f32 %v22591_v12, %v22591_v12 }
 0x523   : > { %v7734_v23 = vadd.f32 %v7733_v21, %v7728_v6  ;;  %v7933_v33 = vsel %vm1354_vm1, %v7841_v14, 0.0 }
 0x524   : > { %v7931_v27 = vsel %vm1354_vm1, %v7840_v22, 0.0  ;;  %v22602_v28 = vpop.f32.mrb[30].mxu0 }
 0x525   : > { %v7932_v29 = vadd.f32 %v7931_v27, %v7926_v19  ;;  %v22604_v30 = vpop.f32.mrb[31].mxu0  ;;  %v7736_v31 = vadd.f32 %v7735_v26, %v7734_v23 }
 0x527   : > { %v7934_v3 = vadd.f32 %v7933_v33, %v7932_v29 }
 0x528   : > { %v22607_v34 = vpop.f32.mrb[32].mxu0 }
 0x529   : > { %v22609_v35 = vpop.f32.mrb[33].mxu0  ;;  %v7845_v38 = vmul.f32 %v22607_v34, %v22607_v34  ;;  %v7743_v46 = vsel %vm1354_vm1, %v22607_v34, 0.0 }
 0x52a   : > { %v7741_v40 = vsel %vm1354_vm1, %v22609_v35, 0.0  ;;  %v7844_v44 = vmul.f32 %v22609_v35, %v22609_v35 }
 0x52b   : > { %v7742_v45 = vadd.f32 %v7741_v40, %v7736_v31  ;;  %v7941_v60 = vsel %vm1354_vm1, %v7845_v38, 0.0 }
 0x52c   : > { %v7939_v47 = vsel %vm1354_vm1, %v7844_v44, 0.0  ;;  %v22620_v49 = vpop.f32.mrb[34].mxu0 }
 0x52d   : > { %v7940_v53 = vadd.f32 %v7939_v47, %v7934_v3  ;;  %v22622_v54 = vpop.f32.mrb[35].mxu0  ;;  %v7744_v55 = vadd.f32 %v7743_v46, %v7742_v45  ;;  %v20605_v47 = vmov 0.0  }
 0x52e   : > { %8224 = vst.msk [vmem:[#allocation2 + $0x240] sm:$0xff] %vm1354_vm1, %v20605_v47  ;;  %8225 = vst.msk [vmem:[#allocation2 + $0x248] sm:$0xff] %vm1354_vm1, %v20605_v47 }
 0x52f   : > { %v7942_v61 = vadd.f32 %v7941_v60, %v7940_v53 }
 0x530   : > { %v22625_v62 = vpop.f32.mrb[36].mxu0 }
 0x531   : > { %v22627_v63 = vpop.f32.mrb[37].mxu0  ;;  %v7849_v1 = vmul.f32 %v22625_v62, %v22625_v62  ;;  %v7751_v10 = vsel %vm1354_vm1, %v22625_v62, 0.0 }
 0x532   : > { %v7749_v17 = vsel %vm1354_vm1, %v22627_v63, 0.0  ;;  %v7848_v9 = vmul.f32 %v22627_v63, %v22627_v63 }
 0x533   : > { %v7750_v6 = vadd.f32 %v7749_v17, %v7744_v55  ;;  %v7949_v26 = vsel %vm1354_vm1, %v7849_v1, 0.0 }
 0x534   : > { %v7947_v19 = vsel %vm1354_vm1, %v7848_v9, 0.0  ;;  %v22638_v14 = vpop.f32.mrb[38].mxu0 }
 0x535   : > { %v7948_v21 = vadd.f32 %v7947_v19, %v7942_v61  ;;  %v22640_v22 = vpop.f32.mrb[39].mxu0  ;;  %v7752_v23 = vadd.f32 %v7751_v10, %v7750_v6 }
 0x537   : > { %v7950_v27 = vadd.f32 %v7949_v26, %v7948_v21 }
 0x538   : > { %v22643_v29 = vpop.f32.mrb[40].mxu0 }
 0x539   : > { %26216 = vst [vmem:[#allocation6_spill] sm:$0xff] %v22643_v29  ;;  %v22645_v31 = vpop.f32.mrb[41].mxu0  ;;  %v7853_v33 = vmul.f32 %v22643_v29, %v22643_v29  ;;  %v7759_v44 = vsel %vm1354_vm1, %v22643_v29, 0.0 }
 0x53a   : > { %v7757_v3 = vsel %vm1354_vm1, %v22645_v31, 0.0  ;;  %v7852_v38 = vmul.f32 %v22645_v31, %v22645_v31 }
 0x53b   : > { %v7758_v40 = vadd.f32 %v7757_v3, %v7752_v23  ;;  %v7957_v61 = vsel %vm1354_vm1, %v7853_v33, 0.0 }
 0x53c   : > { %v7955_v45 = vsel %vm1354_vm1, %v7852_v38, 0.0  ;;  %v22656_v46 = vpop.f32.mrb[42].mxu0 }
 0x53d   : > { %26217 = vst [vmem:[#allocation7_spill] sm:$0xff] %v22656_v46  ;;  %v7956_v53 = vadd.f32 %v7955_v45, %v7950_v27  ;;  %v22660_v55 = vpop.f32.mrb[43].mxu0  ;;  %v7760_v60 = vadd.f32 %v7759_v44, %v7758_v40 }
 0x53e   : > { %26218 = vst [vmem:[#allocation8_spill] sm:$0xff] %v22660_v55 }
 0x53f   : > { %v7958_v1 = vadd.f32 %v7957_v61, %v7956_v53 }
 0x540   : > { %v22663_v17 = vpop.f32.mrb[44].mxu0 }
 0x541   : > { %26219 = vst [vmem:[#allocation9_spill] sm:$0xff] %v22663_v17  ;;  %v22665_v9 = vpop.f32.mrb[45].mxu0  ;;  %v7857_v6 = vmul.f32 %v22663_v17, %v22663_v17  ;;  %v7767_v23 = vsel %vm1354_vm1, %v22663_v17, 0.0 }
 0x542   : > { %26220 = vst [vmem:[#allocation10_spill] sm:$0xff] %v22665_v9  ;;  %v7765_v10 = vsel %vm1354_vm1, %v22665_v9, 0.0  ;;  %v7856_v19 = vmul.f32 %v22665_v9, %v22665_v9 }
 0x543   : > { %v7766_v21 = vadd.f32 %v7765_v10, %v7760_v60  ;;  %v7965_v40 = vsel %vm1354_vm1, %v7857_v6, 0.0 }
 0x544   : > { %v7963_v26 = vsel %vm1354_vm1, %v7856_v19, 0.0  ;;  %v22676_v27 = vpop.f32.mrb[46].mxu0 }
 0x545   : > { %26221 = vst [vmem:[#allocation11_spill] sm:$0xff] %v22676_v27  ;;  %v7964_v33 = vadd.f32 %v7963_v26, %v7958_v1  ;;  %v22678_v3 = vpop.f32.mrb[47].mxu0  ;;  %v7768_v38 = vadd.f32 %v7767_v23, %v7766_v21 }
 0x546   : > { %26222 = vst [vmem:[#allocation12_spill] sm:$0xff] %v22678_v3 }
 0x547   : > { %v7966_v44 = vadd.f32 %v7965_v40, %v7964_v33 }
 0x548   : > { %v22681_v45 = vpop.f32.mrb[48].mxu0 }
 0x549   : > { %26223 = vst [vmem:[#allocation13_spill] sm:$0xff] %v22681_v45  ;;  %v22683_v47 = vpop.f32.mrb[49].mxu0  ;;  %v7861_v53 = vmul.f32 %v22681_v45, %v22681_v45  ;;  %v7775_v10 = vsel %vm1354_vm1, %v22681_v45, 0.0 }
 0x54a   : > { %26224 = vst [vmem:[#allocation14_spill] sm:$0xff] %v22683_v47  ;;  %v7773_v60 = vsel %vm1354_vm1, %v22683_v47, 0.0  ;;  %v7860_v61 = vmul.f32 %v22683_v47, %v22683_v47 }
 0x54b   : > { %v7774_v1 = vadd.f32 %v7773_v60, %v7768_v38  ;;  %v7973_v33 = vsel %vm1354_vm1, %v7861_v53, 0.0 }
 0x54c   : > { %v7971_v6 = vsel %vm1354_vm1, %v7860_v61, 0.0  ;;  %v22694_v19 = vpop.f32.mrb[50].mxu0 }
 0x54d   : > { %26225 = vst [vmem:[#allocation15_spill] sm:$0xff] %v22694_v19  ;;  %v7972_v21 = vadd.f32 %v7971_v6, %v7966_v44  ;;  %v22696_v23 = vpop.f32.mrb[51].mxu0  ;;  %v7776_v26 = vadd.f32 %v7775_v10, %v7774_v1 }
 0x54e   : > { %26226 = vst [vmem:[#allocation16_spill] sm:$0xff] %v22696_v23 }
 0x54f   : > { %v7974_v40 = vadd.f32 %v7973_v33, %v7972_v21 }
 0x550   : > { %v22699_v27 = vpop.f32.mrb[52].mxu0 }
 0x551   : > { %26227 = vst [vmem:[#allocation17_spill] sm:$0xff] %v22699_v27  ;;  %v22701_v3 = vpop.f32.mrb[53].mxu0  ;;  %v7865_v38 = vmul.f32 %v22699_v27, %v22699_v27  ;;  %v7783_v1 = vsel %vm1354_vm1, %v22699_v27, 0.0 }
 0x552   : > { %26228 = vst [vmem:[#allocation18_spill] sm:$0xff] %v22701_v3  ;;  %v7781_v60 = vsel %vm1354_vm1, %v22701_v3, 0.0  ;;  %v7864_v61 = vmul.f32 %v22701_v3, %v22701_v3 }
 0x553   : > { %v7782_v44 = vadd.f32 %v7781_v60, %v7776_v26  ;;  %v7981_v19 = vsel %vm1354_vm1, %v7865_v38, 0.0 }
 0x554   : > { %v7979_v53 = vsel %vm1354_vm1, %v7864_v61, 0.0  ;;  %v22712_v10 = vpop.f32.mrb[54].mxu0 }
 0x555   : > { %26229 = vst [vmem:[#allocation19_spill] sm:$0xff] %v22712_v10  ;;  %v7980_v6 = vadd.f32 %v7979_v53, %v7974_v40  ;;  %v22714_v21 = vpop.f32.mrb[55].mxu0  ;;  %v7784_v33 = vadd.f32 %v7783_v1, %v7782_v44 }
 0x556   : > { %26230 = vst [vmem:[#allocation20_spill] sm:$0xff] %v22714_v21 }
 0x557   : > { %v7982_v23 = vadd.f32 %v7981_v19, %v7980_v6 }
 0x558   : > { %v22717_v45 = vpop.f32.mrb[56].mxu0 }
 0x559   : > { %26231 = vst [vmem:[#allocation21_spill] sm:$0xff] %v22717_v45  ;;  %v22719_v47 = vpop.f32.mrb[57].mxu0  ;;  %v7869_v26 = vmul.f32 %v22717_v45, %v22717_v45  ;;  %v7791_v44 = vsel %vm1354_vm1, %v22717_v45, 0.0 }
 0x55a   : > { %26232 = vst [vmem:[#allocation22_spill] sm:$0xff] %v22719_v47  ;;  %v7789_v60 = vsel %vm1354_vm1, %v22719_v47, 0.0  ;;  %v7868_v61 = vmul.f32 %v22719_v47, %v22719_v47 }
 0x55b   : > { %v7790_v40 = vadd.f32 %v7789_v60, %v7784_v33  ;;  %v7989_v10 = vsel %vm1354_vm1, %v7869_v26, 0.0 }
 0x55c   : > { %v7987_v38 = vsel %vm1354_vm1, %v7868_v61, 0.0  ;;  %v22730_v19 = vpop.f32.mrb[58].mxu0 }
 0x55d   : > { %26233 = vst [vmem:[#allocation23_spill] sm:$0xff] %v22730_v19  ;;  %v7988_v1 = vadd.f32 %v7987_v38, %v7982_v23  ;;  %v22732_v53 = vpop.f32.mrb[59].mxu0  ;;  %v7792_v6 = vadd.f32 %v7791_v44, %v7790_v40 }
 0x55e   : > { %26234 = vst [vmem:[#allocation24_spill] sm:$0xff] %v22732_v53 }
 0x55f   : > { %v7990_v21 = vadd.f32 %v7989_v10, %v7988_v1 }
 0x560   : > { %v22735_v27 = vpop.f32.mrb[60].mxu0 }
 0x561   : > { %26235 = vst [vmem:[#allocation25_spill] sm:$0xff] %v22735_v27  ;;  %v22737_v3 = vpop.f32.mrb[61].mxu0  ;;  %v7873_v33 = vmul.f32 %v22735_v27, %v22735_v27  ;;  %v7799_v40 = vsel %vm1354_vm1, %v22735_v27, 0.0 }
 0x562   : > { %26236 = vst [vmem:[#allocation26_spill] sm:$0xff] %v22737_v3  ;;  %v7797_v60 = vsel %vm1354_vm1, %v22737_v3, 0.0  ;;  %v7872_v61 = vmul.f32 %v22737_v3, %v22737_v3 }
 0x563   : > { %v7798_v23 = vadd.f32 %v7797_v60, %v7792_v6  ;;  %v7997_v19 = vsel %vm1354_vm1, %v7873_v33, 0.0  ;;  %v8021_v33 = vlaneseq }
 0x564   : > { %v7995_v26 = vsel %vm1354_vm1, %v7872_v61, 0.0  ;;  %v22748_v10 = vpop.f32.mrb[62].mxu0 }
 0x565   : > { %26237 = vst [vmem:[#allocation27_spill] sm:$0xff] %v22748_v10  ;;  %v7800_v44 = vadd.f32 %v7799_v40, %v7798_v23  ;;  %v7996_v38 = vadd.f32 %v7995_v26, %v7990_v21  ;;  %v22750_v1 = vpop.f32.mrb[63].mxu0 }
 0x566   : > { %26238 = vst [vmem:[#allocation28_spill] sm:$0xff] %v22750_v1 }
 0x567   : > { %v7805_v53 = vrot.slane %v7800_v44, 4  ;;  %v7998_v45 = vadd.f32 %v7997_v19, %v7996_v38  ;;  %v8022_v19 = vshrl.u32 %v8021_v33, 7 }
 0x569   : > { %v7806_v47 = vadd.f32 %v7805_v53, %v7800_v44  ;;  %v8003_v17 = vrot.slane %v7998_v45, 4 }
 0x56b   : > { %v7807_v9 = vrot.slane %v7806_v47, 2  ;;  %v8004_v3 = vadd.f32 %v8003_v17, %v7998_v45  ;;  %v8013_v17 = vld [vmem:[%s25896_s3] sm:$0x1] }
 0x56d   : > { %v7808_v6 = vadd.f32 %v7807_v9, %v7806_v47  ;;  %v8005_v60 = vrot.slane %v8004_v3, 2  ;;  %v22756_v9 = vsub.s32 0, %v8022_v19  ;;  %v26247_v19 = vld [vmem:[#allocation14_spill] sm:$0xff]  ;;  %v26258_v47 = vld [vmem:[#allocation20_spill] sm:$0xff] }
 0x56f   : > { %v7809_v46 = vrot.slane %v7808_v6, 1  ;;  %v8006_v27 = vadd.f32 %v8005_v60, %v8004_v3  ;;  %26239 = vst [vmem:[#allocation29_spill] sm:$0xff] %v22756_v9  ;;  %v26242_v60 = vld [vmem:[#allocation7_spill] sm:$0xff] }
 0x571   : > { %v7810_v55 = vadd.f32 %v7809_v46, %v7808_v6  ;;  %v8007_v61 = vrot.slane %v8006_v27, 1  ;;  %v22761_v46 = vld [vmem:[%s25897_s4] sm:$0x1]  ;;  %v26241_v6 = vld [vmem:[#allocation8_spill] sm:$0xff] }
 0x573   : > { %v7811_v29 = vmul.f32 0.00390625, %v7810_v55  ;;  %v8008_v10 = vadd.f32 %v8007_v61, %v8006_v27  ;;  %v26243_v61 = vld [vmem:[#allocation10_spill] sm:$0xff] }
 0x575   : > { %v8009_v23 = vmul.f32 0.00390625, %v8008_v10  ;;  %v8010_v21 = vmul.f32 %v7811_v29, %v7811_v29 }
 0x577   : > { %v8011_v40 = vsub.f32 %v8009_v23, %v8010_v21  ;;  %v26244_v23 = vld [vmem:[#allocation9_spill] sm:$0xff]  ;;  %v26245_v21 = vld [vmem:[#allocation12_spill] sm:$0xff] }
 0x579   : > { %v8012_v26 = vmax.f32 %v8011_v40, 0.0 }
 0x57b   : > { %v8014_v1 = vadd.f32 1e-05, %v8012_v26  ;;  %v26246_v26 = vld [vmem:[#allocation11_spill] sm:$0xff] }
 0x57d   : > { %20585 = vrsqrt.f32 %v8014_v1  ;;  %v26240_v1 = vld [vmem:[#allocation6_spill] sm:$0xff] }
 0x587   : > { %v20586_v45 = vpop.eup %20585 }
 0x588   : > { %v8016_v3 = vmul.f32 %v20586_v45, %v8013_v17  ;;  %v26248_v45 = vld [vmem:[#allocation13_spill] sm:$0xff] }
 0x58a   : > { %v22763_v55 = vmul.f32 %v8016_v3, %v7811_v29  ;;  %v22766_v27 = vrot.slane %v8016_v3, %v22756_v9 }
 0x58c   : > { %v22772_v53 = vmul.f32 %v22766_v27, %v22469_v2  ;;  %v22776_v10 = vmul.f32 %v22463_v15, %v22766_v27  ;;  %v22780_v44 = vmul.f32 %v22766_v27, %v22479_v41  ;;  %v22784_v29 = vmul.f32 %v22477_v39, %v22766_v27 }
 0x58d   : > { %v22788_v38 = vmul.f32 %v22766_v27, %v22483_v43  ;;  %v22792_v2 = vmul.f32 %v22481_v42, %v22766_v27  ;;  %v22796_v15 = vmul.f32 %v22766_v27, %v22496_v52  ;;  %v22800_v41 = vmul.f32 %v22494_v50, %v22766_v27 }
 0x58e   : > { %v22804_v39 = vmul.f32 %v22766_v27, %v22501_v57  ;;  %v22808_v43 = vmul.f32 %v22499_v56, %v22766_v27  ;;  %v22812_v42 = vmul.f32 %v22766_v27, %v22514_v16  ;;  %v22816_v52 = vmul.f32 %v22512_v0, %v22766_v27 }
 0x58f   : > { %v22820_v50 = vmul.f32 %v22766_v27, %v22519_v8  ;;  %v22824_v57 = vmul.f32 %v22517_v4, %v22766_v27  ;;  %v22828_v56 = vmul.f32 %v22766_v27, %v22532_v20  ;;  %v22832_v16 = vmul.f32 %v22530_v13, %v22766_v27 }
 0x590   : > { %v22836_v0 = vmul.f32 %v22766_v27, %v22537_v25  ;;  %v22840_v8 = vmul.f32 %v22535_v24, %v22766_v27  ;;  %v22844_v4 = vmul.f32 %v22766_v27, %v22550_v7  ;;  %v22848_v20 = vmul.f32 %v22548_v32, %v22766_v27 }
 0x591   : > { %v22852_v13 = vmul.f32 %v22766_v27, %v22555_v37  ;;  %v22856_v25 = vmul.f32 %v22553_v36, %v22766_v27  ;;  %v22860_v24 = vmul.f32 %v22766_v27, %v22568_v51  ;;  %v22864_v7 = vmul.f32 %v22566_v48, %v22766_v27 }
 0x592   : > { %v22868_v32 = vmul.f32 %v22766_v27, %v22573_v59  ;;  %v22872_v37 = vmul.f32 %v22571_v58, %v22766_v27  ;;  %v22876_v36 = vmul.f32 %v22766_v27, %v22586_v18  ;;  %v22880_v51 = vmul.f32 %v22584_v11, %v22766_v27 }
 0x593   : > { %v22884_v48 = vmul.f32 %v22766_v27, %v22591_v12  ;;  %v22888_v59 = vmul.f32 %v22589_v5, %v22766_v27  ;;  %v22892_v58 = vmul.f32 %v22766_v27, %v22604_v30  ;;  %v22896_v18 = vmul.f32 %v22602_v28, %v22766_v27 }
 0x594   : > { %v22900_v11 = vmul.f32 %v22766_v27, %v22609_v35  ;;  %v22904_v12 = vmul.f32 %v22607_v34, %v22766_v27  ;;  %v22908_v5 = vmul.f32 %v22766_v27, %v22622_v54  ;;  %v22912_v30 = vmul.f32 %v22620_v49, %v22766_v27 }
 0x595   : > { %v22916_v28 = vmul.f32 %v22766_v27, %v22627_v63  ;;  %v22920_v35 = vmul.f32 %v22625_v62, %v22766_v27  ;;  %v22924_v34 = vmul.f32 %v22766_v27, %v22640_v22  ;;  %v22928_v54 = vmul.f32 %v22638_v14, %v22766_v27 }
 0x596   : > { %v22932_v49 = vmul.f32 %v22766_v27, %v22645_v31  ;;  %v22936_v63 = vmul.f32 %v26240_v1, %v22766_v27  ;;  %v22940_v62 = vmul.f32 %v22766_v27, %v26241_v6  ;;  %v22944_v22 = vmul.f32 %v26242_v60, %v22766_v27  ;;  %v26250_v1 = vld [vmem:[#allocation16_spill] sm:$0xff]  ;;  %v26252_v60 = vld [vmem:[#allocation15_spill] sm:$0xff] }
 0x597   : > { %v22948_v14 = vmul.f32 %v22766_v27, %v26243_v61  ;;  %v22952_v31 = vmul.f32 %v26244_v23, %v22766_v27  ;;  %v22956_v40 = vmul.f32 %v22766_v27, %v26245_v21  ;;  %v22960_v33 = vmul.f32 %v26246_v26, %v22766_v27  ;;  %v26254_v23 = vld [vmem:[#allocation18_spill] sm:$0xff]  ;;  %v26256_v26 = vld [vmem:[#allocation17_spill] sm:$0xff] }
 0x598   : > { %v22964_v17 = vmul.f32 %v22766_v27, %v26247_v19  ;;  %v22968_v3 = vmul.f32 %v26248_v45, %v22766_v27  ;;  %v22972_v6 = vmul.f32 %v22766_v27, %v26250_v1  ;;  %v22976_v61 = vmul.f32 %v26252_v60, %v22766_v27 }
 0x599   : > { %v22980_v21 = vmul.f32 %v22766_v27, %v26254_v23  ;;  %v22984_v19 = vmul.f32 %v26256_v26, %v22766_v27  ;;  %v22988_v45 = vmul.f32 %v22766_v27, %v26258_v47 }
 0x59a   : > { %26249 = vst [vmem:[#allocation30_spill] sm:$0xff] %v22968_v3  ;;  %26251 = vst [vmem:[#allocation31_spill] sm:$0xff] %v22972_v6  ;;  %v26260_v3 = vld [vmem:[#allocation19_spill] sm:$0xff]  ;;  %v26262_v6 = vld [vmem:[#allocation22_spill] sm:$0xff] }
 0x59b   : > { %26253 = vst [vmem:[#allocation32_spill] sm:$0xff] %v22976_v61  ;;  %26255 = vst [vmem:[#allocation33_spill] sm:$0xff] %v22980_v21  ;;  %v22992_v1 = vmul.f32 %v26260_v3, %v22766_v27  ;;  %v22996_v60 = vmul.f32 %v22766_v27, %v26262_v6  ;;  %v26263_v61 = vld [vmem:[#allocation21_spill] sm:$0xff]  ;;  %v26265_v21 = vld [vmem:[#allocation24_spill] sm:$0xff] }
 0x59c   : > { %26257 = vst [vmem:[#allocation34_spill] sm:$0xff] %v22984_v19  ;;  %26259 = vst [vmem:[#allocation35_spill] sm:$0xff] %v22988_v45  ;;  %v23000_v23 = vmul.f32 %v26263_v61, %v22766_v27  ;;  %v23004_v26 = vmul.f32 %v22766_v27, %v26265_v21  ;;  %v26267_v19 = vld [vmem:[#allocation23_spill] sm:$0xff]  ;;  %v26269_v45 = vld [vmem:[#allocation26_spill] sm:$0xff]  ;;  %v26271_v61 = vsub.f32 %v22761_v46, %v22763_v55 }
 0x59d   : > { %26261 = vst [vmem:[#allocation36_spill] sm:$0xff] %v22992_v1  ;;  %v23008_v47 = vmul.f32 %v26267_v19, %v22766_v27  ;;  %v23012_v3 = vmul.f32 %v22766_v27, %v26269_v45  ;;  %v26270_v1 = vld [vmem:[#allocation25_spill] sm:$0xff]  ;;  %v26272_v21 = vld [vmem:[#allocation27_spill] sm:$0xff]  ;;  %v26274_v19 = vld [vmem:[#allocation28_spill] sm:$0xff] }
 0x59e   : > { %26264 = vst [vmem:[#allocation37_spill] sm:$0xff] %v23000_v23  ;;  %26266 = vst [vmem:[#allocation38_spill] sm:$0xff] %v23004_v26  ;;  %v23016_v6 = vmul.f32 %v26270_v1, %v22766_v27  ;;  %v23022_v23 = vrot.slane %v26271_v61, %v22756_v9  ;;  %v23026_v26 = vmul.f32 %v26272_v21, %v22766_v27 }
 0x59f   : > { %26268 = vst [vmem:[#allocation39_spill] sm:$0xff] %v23008_v47  ;;  %v23030_v47 = vmul.f32 %v22766_v27, %v26274_v19 }
 0x5a0   : > { %26273 = vst [vmem:[#allocation40_spill] sm:$0xff] %v23026_v26  ;;  %v23034_v45 = vadd.f32 %v23022_v23, %v22772_v53  ;;  %v23038_v1 = vadd.f32 %v23022_v23, %v22776_v10  ;;  %v23042_v46 = vadd.f32 %v23022_v23, %v22780_v44  ;;  %v23046_v55 = vadd.f32 %v23022_v23, %v22784_v29 }
 0x5a1   : > { %26275 = vst [vmem:[#allocation41_spill] sm:$0xff] %v23030_v47  ;;  %v23050_v27 = vadd.f32 %v23022_v23, %v22788_v38  ;;  %v23054_v53 = vadd.f32 %v23022_v23, %v22792_v2  ;;  %v23058_v10 = vadd.f32 %v23022_v23, %v22796_v15  ;;  %v23062_v44 = vadd.f32 %v23022_v23, %v22800_v41  ;;  %v26276_v61 = vld [vmem:[#allocation30_spill] sm:$0xff]  ;;  %v26278_v21 = vld [vmem:[#allocation31_spill] sm:$0xff] }
 0x5a2   : > { %v23066_v29 = vadd.f32 %v23022_v23, %v22804_v39  ;;  %v23070_v38 = vadd.f32 %v23022_v23, %v22808_v43  ;;  %v23074_v2 = vadd.f32 %v23022_v23, %v22812_v42  ;;  %v23078_v15 = vadd.f32 %v23022_v23, %v22816_v52  ;;  %v26279_v19 = vld [vmem:[#allocation32_spill] sm:$0xff]  ;;  %v26281_v9 = vld [vmem:[#allocation33_spill] sm:$0xff] }
 0x5a3   : > { %v23082_v41 = vadd.f32 %v23022_v23, %v22820_v50  ;;  %v23086_v39 = vadd.f32 %v23022_v23, %v22824_v57  ;;  %v23090_v43 = vadd.f32 %v23022_v23, %v22828_v56  ;;  %v23094_v42 = vadd.f32 %v23022_v23, %v22832_v16  ;;  %v26283_v47 = vld [vmem:[#allocation34_spill] sm:$0xff]  ;;  %v26285_v26 = vld [vmem:[#allocation35_spill] sm:$0xff] }
 0x5a4   : > { %v23098_v52 = vadd.f32 %v23022_v23, %v22836_v0  ;;  %v23102_v50 = vadd.f32 %v23022_v23, %v22840_v8  ;;  %v23106_v57 = vadd.f32 %v23022_v23, %v22844_v4  ;;  %v23110_v56 = vadd.f32 %v23022_v23, %v22848_v20 }
 0x5a5   : > { %v23114_v16 = vadd.f32 %v23022_v23, %v22852_v13  ;;  %v23118_v0 = vadd.f32 %v23022_v23, %v22856_v25  ;;  %v23122_v8 = vadd.f32 %v23022_v23, %v22860_v24  ;;  %v23126_v4 = vadd.f32 %v23022_v23, %v22864_v7 }
 0x5a6   : > { %v23130_v20 = vadd.f32 %v23022_v23, %v22868_v32  ;;  %v23134_v13 = vadd.f32 %v23022_v23, %v22872_v37  ;;  %v23138_v25 = vadd.f32 %v23022_v23, %v22876_v36  ;;  %v23142_v24 = vadd.f32 %v23022_v23, %v22880_v51 }
 0x5a7   : > { %v23146_v7 = vadd.f32 %v23022_v23, %v22884_v48  ;;  %v23150_v32 = vadd.f32 %v23022_v23, %v22888_v59  ;;  %v23154_v37 = vadd.f32 %v23022_v23, %v22892_v58  ;;  %v23158_v36 = vadd.f32 %v23022_v23, %v22896_v18 }
 0x5a8   : > { %v23162_v51 = vadd.f32 %v23022_v23, %v22900_v11  ;;  %v23166_v48 = vadd.f32 %v23022_v23, %v22904_v12  ;;  %v23170_v59 = vadd.f32 %v23022_v23, %v22908_v5  ;;  %v23174_v58 = vadd.f32 %v23022_v23, %v22912_v30 }
 0x5a9   : > { %v23178_v18 = vadd.f32 %v23022_v23, %v22916_v28  ;;  %v23182_v11 = vadd.f32 %v23022_v23, %v22920_v35  ;;  %v23186_v12 = vadd.f32 %v23022_v23, %v22924_v34  ;;  %v23190_v5 = vadd.f32 %v23022_v23, %v22928_v54 }
 0x5aa   : > { %v23194_v30 = vadd.f32 %v23022_v23, %v22932_v49  ;;  %v23198_v28 = vadd.f32 %v23022_v23, %v22936_v63  ;;  %v23202_v35 = vadd.f32 %v23022_v23, %v22940_v62  ;;  %v23206_v34 = vadd.f32 %v23022_v23, %v22944_v22 }
 0x5ab   : > { %v23210_v54 = vadd.f32 %v23022_v23, %v22948_v14  ;;  %v23214_v49 = vadd.f32 %v23022_v23, %v22952_v31  ;;  %v23218_v63 = vadd.f32 %v23022_v23, %v22956_v40  ;;  %v23222_v62 = vadd.f32 %v23022_v23, %v22960_v33 }
 0x5ac   : > { %v23226_v22 = vadd.f32 %v23022_v23, %v22964_v17  ;;  %v23230_v14 = vadd.f32 %v23022_v23, %v26276_v61  ;;  %v23234_v31 = vadd.f32 %v23022_v23, %v26278_v21  ;;  %v23238_v40 = vadd.f32 %v23022_v23, %v26279_v19 }
 0x5ad   : > { %v23242_v33 = vadd.f32 %v23022_v23, %v26281_v9  ;;  %v23246_v17 = vadd.f32 %v23022_v23, %v26283_v47  ;;  %v23250_v61 = vadd.f32 %v23022_v23, %v26285_v26  ;;  %v23258_v19 = vadd.f32 %v23022_v23, %v22996_v60 }
 0x5ae   : > { %26277 = vst [vmem:[#allocation42_spill] sm:$0xff] %v23230_v14  ;;  %26280 = vst [vmem:[#allocation43_spill] sm:$0xff] %v23238_v40  ;;  %v26286_v14 = vld [vmem:[#allocation36_spill] sm:$0xff]  ;;  %v26288_v40 = vld [vmem:[#allocation37_spill] sm:$0xff]  ;;  %v23278_v60 = vadd.f32 %v23022_v23, %v23016_v6  ;;  %v8169_v6 = vmax.f32 %v23070_v38, 0.0  ;;  %v8179_v38 = vmax.f32 %v23110_v56, 0.0 }
 0x5af   : > { %26282 = vst [vmem:[#allocation44_spill] sm:$0xff] %v23242_v33  ;;  %26284 = vst [vmem:[#allocation45_spill] sm:$0xff] %v23246_v17  ;;  %v23254_v21 = vadd.f32 %v23022_v23, %v26286_v14  ;;  %v23262_v9 = vadd.f32 %v23022_v23, %v26288_v40  ;;  %v26290_v33 = vld [vmem:[#allocation38_spill] sm:$0xff]  ;;  %v26292_v17 = vld [vmem:[#allocation39_spill] sm:$0xff]  ;;  %v23274_v14 = vadd.f32 %v23022_v23, %v23012_v3  ;;  %v8161_v40 = vmax.f32 %v23038_v1, 0.0 }
 0x5b0   : > { %26287 = vst [vmem:[#allocation46_spill] sm:$0xff] %v23258_v19  ;;  %v23266_v47 = vadd.f32 %v23022_v23, %v26290_v33  ;;  %v23270_v26 = vadd.f32 %v23022_v23, %v26292_v17  ;;  %v8160_v19 = vmax.f32 %v23034_v45, 0.0  ;;  %v8163_v33 = vmax.f32 %v23046_v55, 0.0  ;;  %8235 = vst.msk [vmem:[#allocation2 + $0x70] sm:$0xff] %vm1354_vm1, %v8169_v6 }
 0x5b1   : > { %26289 = vst [vmem:[#allocation47_spill] sm:$0xff] %v23262_v9  ;;  %26294 = vst [vmem:[#allocation50_spill] sm:$0xff] %v23274_v14  ;;  %v8162_v9 = vmax.f32 %v23042_v46, 0.0  ;;  %v8165_v17 = vmax.f32 %v23054_v53, 0.0  ;;  %v8167_v3 = vmax.f32 %v23062_v44, 0.0  ;;  %v8168_v14 = vmax.f32 %v23066_v29, 0.0 }
 0x5b2   : > { %26291 = vst [vmem:[#allocation48_spill] sm:$0xff] %v23266_v47  ;;  %26293 = vst [vmem:[#allocation49_spill] sm:$0xff] %v23270_v26  ;;  %v8164_v47 = vmax.f32 %v23050_v27, 0.0  ;;  %v8166_v26 = vmax.f32 %v23058_v10, 0.0  ;;  %v8170_v45 = vmax.f32 %v23074_v2, 0.0  ;;  %v8171_v1 = vmax.f32 %v23078_v15, 0.0 }
 0x5b3   : > { %8226 = vst.msk [vmem:[#allocation2 + $0x28] sm:$0xff] %vm1354_vm1, %v8160_v19  ;;  %8227 = vst.msk [vmem:[#allocation2 + $0x30] sm:$0xff] %vm1354_vm1, %v8161_v40  ;;  %v8172_v46 = vmax.f32 %v23082_v41, 0.0  ;;  %v8173_v55 = vmax.f32 %v23086_v39, 0.0  ;;  %v8174_v27 = vmax.f32 %v23090_v43, 0.0  ;;  %v8175_v53 = vmax.f32 %v23094_v42, 0.0 }
 0x5b4   : > { %8228 = vst.msk [vmem:[#allocation2 + $0x38] sm:$0xff] %vm1354_vm1, %v8162_v9  ;;  %8229 = vst.msk [vmem:[#allocation2 + $0x40] sm:$0xff] %vm1354_vm1, %v8163_v33  ;;  %v8176_v10 = vmax.f32 %v23098_v52, 0.0  ;;  %v8177_v44 = vmax.f32 %v23102_v50, 0.0  ;;  %v8178_v29 = vmax.f32 %v23106_v57, 0.0  ;;  %v8180_v2 = vmax.f32 %v23114_v16, 0.0 }
 0x5b5   : > { %8230 = vst.msk [vmem:[#allocation2 + $0x48] sm:$0xff] %vm1354_vm1, %v8164_v47  ;;  %8231 = vst.msk [vmem:[#allocation2 + $0x50] sm:$0xff] %vm1354_vm1, %v8165_v17  ;;  %v8181_v15 = vmax.f32 %v23118_v0, 0.0  ;;  %v8182_v41 = vmax.f32 %v23122_v8, 0.0  ;;  %v8183_v39 = vmax.f32 %v23126_v4, 0.0  ;;  %v8184_v43 = vmax.f32 %v23130_v20, 0.0 }
 0x5b6   : > { %8290 = vst.msk [vmem:[#allocation2 + $0x8] sm:$0xff] %vm1354_vm1, %v8164_v47  ;;  %8291 = vst.msk [vmem:[#allocation2 + $0x10] sm:$0xff] %vm1354_vm1, %v8165_v17  ;;  %v8185_v42 = vmax.f32 %v23134_v13, 0.0  ;;  %v8186_v52 = vmax.f32 %v23138_v25, 0.0  ;;  %v8187_v50 = vmax.f32 %v23142_v24, 0.0  ;;  %v8188_v57 = vmax.f32 %v23146_v7, 0.0 }
 0x5b7   : > { %8232 = vst.msk [vmem:[#allocation2 + $0x58] sm:$0xff] %vm1354_vm1, %v8166_v26  ;;  %8233 = vst.msk [vmem:[#allocation2 + $0x60] sm:$0xff] %vm1354_vm1, %v8167_v3  ;;  %v8189_v56 = vmax.f32 %v23150_v32, 0.0  ;;  %v8190_v16 = vmax.f32 %v23154_v37, 0.0  ;;  %v8191_v0 = vmax.f32 %v23158_v36, 0.0  ;;  %v8192_v8 = vmax.f32 %v23162_v51, 0.0 }
 0x5b8   : > { %8234 = vst.msk [vmem:[#allocation2 + $0x68] sm:$0xff] %vm1354_vm1, %v8168_v14  ;;  %8292 = vst.msk [vmem:[#allocation2 + $0x18] sm:$0xff] %vm1354_vm1, %v8166_v26  ;;  %v8193_v4 = vmax.f32 %v23166_v48, 0.0  ;;  %v8194_v20 = vmax.f32 %v23170_v59, 0.0  ;;  %v8195_v13 = vmax.f32 %v23174_v58, 0.0  ;;  %v8196_v25 = vmax.f32 %v23178_v18, 0.0 }
 0x5b9   : > { %8293 = vst.msk [vmem:[#allocation2 + $0x20] sm:$0xff] %vm1354_vm1, %v8167_v3  ;;  %8236 = vst.msk [vmem:[#allocation2 + $0x78] sm:$0xff] %vm1354_vm1, %v8170_v45  ;;  %v8197_v24 = vmax.f32 %v23182_v11, 0.0  ;;  %v8198_v7 = vmax.f32 %v23186_v12, 0.0  ;;  %v8199_v32 = vmax.f32 %v23190_v5, 0.0  ;;  %v8200_v37 = vmax.f32 %v23194_v30, 0.0 }
 0x5ba   : > { %8237 = vst.msk [vmem:[#allocation2 + $0x80] sm:$0xff] %vm1354_vm1, %v8171_v1  ;;  %8238 = vst.msk [vmem:[#allocation2 + $0x88] sm:$0xff] %vm1354_vm1, %v8172_v46  ;;  %v8201_v36 = vmax.f32 %v23198_v28, 0.0  ;;  %v8202_v51 = vmax.f32 %v23202_v35, 0.0  ;;  %v8203_v48 = vmax.f32 %v23206_v34, 0.0  ;;  %v8204_v59 = vmax.f32 %v23210_v54, 0.0 }
 0x5bb   : > { %8239 = vst.msk [vmem:[#allocation2 + $0x90] sm:$0xff] %vm1354_vm1, %v8173_v55  ;;  %8240 = vst.msk [vmem:[#allocation2 + $0x98] sm:$0xff] %vm1354_vm1, %v8174_v27  ;;  %v8205_v58 = vmax.f32 %v23214_v49, 0.0  ;;  %v8206_v18 = vmax.f32 %v23218_v63, 0.0  ;;  %v8207_v11 = vmax.f32 %v23222_v62, 0.0  ;;  %v8208_v12 = vmax.f32 %v23226_v22, 0.0 }
 0x5bc   : > { %8241 = vst.msk [vmem:[#allocation2 + $0xa0] sm:$0xff] %vm1354_vm1, %v8175_v53  ;;  %8242 = vst.msk [vmem:[#allocation2 + $0xa8] sm:$0xff] %vm1354_vm1, %v8176_v10  ;;  %v26295_v5 = vld [vmem:[#allocation42_spill] sm:$0xff]  ;;  %v8210_v28 = vmax.f32 %v23234_v31, 0.0  ;;  %v26296_v35 = vld [vmem:[#allocation43_spill] sm:$0xff]  ;;  %v8214_v22 = vmax.f32 %v23250_v61, 0.0 }
 0x5bd   : > { %8243 = vst.msk [vmem:[#allocation2 + $0xb0] sm:$0xff] %vm1354_vm1, %v8177_v44  ;;  %8244 = vst.msk [vmem:[#allocation2 + $0xb8] sm:$0xff] %vm1354_vm1, %v8178_v29  ;;  %v8209_v30 = vmax.f32 %v26295_v5, 0.0  ;;  %v8211_v34 = vmax.f32 %v26296_v35, 0.0  ;;  %v26297_v54 = vld [vmem:[#allocation44_spill] sm:$0xff]  ;;  %v26298_v63 = vld [vmem:[#allocation45_spill] sm:$0xff] }
 0x5be   : > { %8245 = vst.msk [vmem:[#allocation2 + $0xc0] sm:$0xff] %vm1354_vm1, %v8179_v38  ;;  %8246 = vst.msk [vmem:[#allocation2 + $0xc8] sm:$0xff] %vm1354_vm1, %v8180_v2  ;;  %v8212_v49 = vmax.f32 %v26297_v54, 0.0  ;;  %v8213_v62 = vmax.f32 %v26298_v63, 0.0  ;;  %v8215_v19 = vmax.f32 %v23254_v21, 0.0  ;;  %v26299_v9 = vld [vmem:[#allocation46_spill] sm:$0xff] }
 0x5bf   : > { %8247 = vst.msk [vmem:[#allocation2 + $0xd0] sm:$0xff] %vm1354_vm1, %v8181_v15  ;;  %8248 = vst.msk [vmem:[#allocation2 + $0xd8] sm:$0xff] %vm1354_vm1, %v8182_v41  ;;  %v8216_v31 = vmax.f32 %v26299_v9, 0.0  ;;  %v26300_v47 = vld [vmem:[#allocation47_spill] sm:$0xff]  ;;  %v26301_v14 = vld [vmem:[#allocation48_spill] sm:$0xff]  ;;  %v8221_v21 = vmax.f32 %v23278_v60, 0.0 }
 0x5c0   : > { %8249 = vst.msk [vmem:[#allocation2 + $0xe0] sm:$0xff] %vm1354_vm1, %v8183_v39  ;;  %8250 = vst.msk [vmem:[#allocation2 + $0xe8] sm:$0xff] %vm1354_vm1, %v8184_v43  ;;  %v8217_v26 = vmax.f32 %v26300_v47, 0.0  ;;  %v8218_v40 = vmax.f32 %v26301_v14, 0.0  ;;  %v26302_v33 = vld [vmem:[#allocation49_spill] sm:$0xff]  ;;  %v26303_v3 = vld [vmem:[#allocation50_spill] sm:$0xff] }
 0x5c1   : > { %8251 = vst.msk [vmem:[#allocation2 + $0xf0] sm:$0xff] %vm1354_vm1, %v8185_v42  ;;  %8252 = vst.msk [vmem:[#allocation2 + $0xf8] sm:$0xff] %vm1354_vm1, %v8186_v52  ;;  %v8219_v17 = vmax.f32 %v26302_v33, 0.0  ;;  %v8220_v61 = vmax.f32 %v26303_v3, 0.0  ;;  %v26304_v60 = vld [vmem:[#allocation40_spill] sm:$0xff]  ;;  %v26305_v45 = vld [vmem:[#allocation41_spill] sm:$0xff] }
 0x5c2   : > { %8253 = vst.msk [vmem:[#allocation2 + $0x100] sm:$0xff] %vm1354_vm1, %v8187_v50  ;;  %8254 = vst.msk [vmem:[#allocation2 + $0x108] sm:$0xff] %vm1354_vm1, %v8188_v57  ;;  %v8159_v6 = vadd.f32 %v23022_v23, %v26304_v60  ;;  %v8158_v1 = vadd.f32 %v23022_v23, %v26305_v45 }
 0x5c3   : > { %8255 = vst.msk [vmem:[#allocation2 + $0x110] sm:$0xff] %vm1354_vm1, %v8189_v56  ;;  %8256 = vst.msk [vmem:[#allocation2 + $0x118] sm:$0xff] %vm1354_vm1, %v8190_v16 }
 0x5c4   : > { %8257 = vst.msk [vmem:[#allocation2 + $0x120] sm:$0xff] %vm1354_vm1, %v8191_v0  ;;  %8258 = vst.msk [vmem:[#allocation2 + $0x128] sm:$0xff] %vm1354_vm1, %v8192_v8  ;;  %v8223_v46 = vmax.f32 %v8159_v6, 0.0  ;;  %v8222_v55 = vmax.f32 %v8158_v1, 0.0 }
 0x5c5   : > { %8259 = vst.msk [vmem:[#allocation2 + $0x130] sm:$0xff] %vm1354_vm1, %v8193_v4  ;;  %8260 = vst.msk [vmem:[#allocation2 + $0x138] sm:$0xff] %vm1354_vm1, %v8194_v20 }
 0x5c6   : > { %8261 = vst.msk [vmem:[#allocation2 + $0x140] sm:$0xff] %vm1354_vm1, %v8195_v13  ;;  %8262 = vst.msk [vmem:[#allocation2 + $0x148] sm:$0xff] %vm1354_vm1, %v8196_v25 }
 0x5c7   : > { %8263 = vst.msk [vmem:[#allocation2 + $0x150] sm:$0xff] %vm1354_vm1, %v8197_v24  ;;  %8264 = vst.msk [vmem:[#allocation2 + $0x158] sm:$0xff] %vm1354_vm1, %v8198_v7 }
 0x5c8   : > { %8265 = vst.msk [vmem:[#allocation2 + $0x160] sm:$0xff] %vm1354_vm1, %v8199_v32  ;;  %8266 = vst.msk [vmem:[#allocation2 + $0x168] sm:$0xff] %vm1354_vm1, %v8200_v37 }
 0x5c9   : > { %8267 = vst.msk [vmem:[#allocation2 + $0x170] sm:$0xff] %vm1354_vm1, %v8201_v36  ;;  %8268 = vst.msk [vmem:[#allocation2 + $0x178] sm:$0xff] %vm1354_vm1, %v8202_v51 }
 0x5ca   : > { %8269 = vst.msk [vmem:[#allocation2 + $0x180] sm:$0xff] %vm1354_vm1, %v8203_v48  ;;  %8270 = vst.msk [vmem:[#allocation2 + $0x188] sm:$0xff] %vm1354_vm1, %v8204_v59 }
 0x5cb   : > { %8271 = vst.msk [vmem:[#allocation2 + $0x190] sm:$0xff] %vm1354_vm1, %v8205_v58  ;;  %8272 = vst.msk [vmem:[#allocation2 + $0x198] sm:$0xff] %vm1354_vm1, %v8206_v18 }
 0x5cc   : > { %8273 = vst.msk [vmem:[#allocation2 + $0x1a0] sm:$0xff] %vm1354_vm1, %v8207_v11  ;;  %8274 = vst.msk [vmem:[#allocation2 + $0x1a8] sm:$0xff] %vm1354_vm1, %v8208_v12 }
 0x5cd   : > { %8275 = vst.msk [vmem:[#allocation2 + $0x1b0] sm:$0xff] %vm1354_vm1, %v8209_v30  ;;  %8276 = vst.msk [vmem:[#allocation2 + $0x1b8] sm:$0xff] %vm1354_vm1, %v8210_v28 }
 0x5ce   : > { %8277 = vst.msk [vmem:[#allocation2 + $0x1c0] sm:$0xff] %vm1354_vm1, %v8211_v34  ;;  %8278 = vst.msk [vmem:[#allocation2 + $0x1c8] sm:$0xff] %vm1354_vm1, %v8212_v49 }
 0x5cf   : > { %8279 = vst.msk [vmem:[#allocation2 + $0x1d0] sm:$0xff] %vm1354_vm1, %v8213_v62  ;;  %8280 = vst.msk [vmem:[#allocation2 + $0x1d8] sm:$0xff] %vm1354_vm1, %v8214_v22 }
 0x5d0   : > { %8281 = vst.msk [vmem:[#allocation2 + $0x1e0] sm:$0xff] %vm1354_vm1, %v8215_v19  ;;  %8282 = vst.msk [vmem:[#allocation2 + $0x1e8] sm:$0xff] %vm1354_vm1, %v8216_v31 }
 0x5d1   : > { %8283 = vst.msk [vmem:[#allocation2 + $0x1f0] sm:$0xff] %vm1354_vm1, %v8217_v26  ;;  %8294 = vst.msk [vmem:[#allocation2 + $0x228] sm:$0xff] %vm1354_vm1, %v8216_v31 }
 0x5d2   : > { %8295 = vst.msk [vmem:[#allocation2 + $0x230] sm:$0xff] %vm1354_vm1, %v8217_v26  ;;  %8284 = vst.msk [vmem:[#allocation2 + $0x1f8] sm:$0xff] %vm1354_vm1, %v8218_v40 }
 0x5d3   : > { %8285 = vst.msk [vmem:[#allocation2 + $0x200] sm:$0xff] %vm1354_vm1, %v8219_v17  ;;  %8286 = vst.msk [vmem:[#allocation2 + $0x208] sm:$0xff] %vm1354_vm1, %v8220_v61 }
 0x5d4   : > { %8287 = vst.msk [vmem:[#allocation2 + $0x210] sm:$0xff] %vm1354_vm1, %v8221_v21  ;;  %8296 = vst.msk [vmem:[#allocation2 + $0x238] sm:$0xff] %vm1354_vm1, %v8218_v40 }
 0x5d5   : > { %8297 = vst.msk [vmem:[#allocation2 + $0x240] sm:$0xff] %vm1354_vm1, %v8219_v17  ;;  %8289 = vst.msk [vmem:[#allocation2 + $0x220] sm:$0xff] %vm1354_vm1, %v8223_v46 }
 0x5d6   : > { %8288 = vst.msk [vmem:[#allocation2 + $0x218] sm:$0xff] %vm1354_vm1, %v8222_v55 }
 0x5d7 LB: >> { %s16004_s22 = sshll.u32 %s20603_s21, 5  ;;  %vm8310_vm2 = vcmask 24576   ;;  %s8303_s21 = sadd.s32 1, %s20603_s21   ;;  %s20603_s21 = sphi %s20601_s21, %s8303_s21  }
 0x5d8   : >> { %s15355_s23 = scalar_lea.vmem [#allocation2], %s16004_s22  ;;  %p8300_p4 = scmp.ge.s32.totalorder %s8303_s21, 18  }
 0x5d9   : > { %v16012_v53 = vld [vmem:[%s25898_s5 + $0x4] sm:$0xf] (%p8300_p4)  ;;  %v8382_v29 = vld [vmem:[%s25898_s5] sm:$0xf] (%p8300_p4)  ;;  %v23442_v16 = vld [vmem:[%s25898_s5 + $0x8] sm:$0xf] (%p8300_p4) }
 0x5da   : > { %8302 = sbr.rel (!%p8300_p4) target bundleno = 1495 (0x5d7), region = 112  ;;  %18661 = vmatprep.subr.msk.mxu1 (%p8300_p4), %vm1547_vm0, %v16012_v53 }
 0x5db   : > { %18662 = vmatpush3.msk.msra.mxu1 (%p8300_p4), %vm1547_vm0, %v16012_v53 }
 0x5dc   : > { %18759 = vmatprep.subr.msk.mxu1 (%p8300_p4), %vm1547_vm0, %v8382_v29 }
 0x5dd   : >> { %v16005_v23 = vld [vmem:[%s15355_s23 + $0x9] sm:$0x1]  ;;  %v16009_v27 = vld [vmem:[%s15355_s23 + $0x16] sm:$0x1] }
 0x5de   : >> { %16007 = vst.msk [vmem:[%s15355_s23 + $0x7] sm:$0x1] %vm8310_vm2, %v16005_v23  ;;  %16011 = vst.msk [vmem:[%s15355_s23 + $0x18] sm:$0x1] %vm8310_vm2, %v16009_v27 }
 0x5e5   : > { %v8383_v10 = vld [vmem:[#allocation2 + $0x8] sm:$0xff]  ;;  %v8384_v44 = vld [vmem:[#allocation2 + $0x10] sm:$0xff]  ;;  %v8385_v38 = vld [vmem:[#allocation2 + $0x18] sm:$0xff] }
 0x5e6   : > { %18663 = vmatprep.mubr.msk.f32.mxu1 %vm1354_vm1, %v8383_v10  ;;  %v8386_v2 = vld [vmem:[#allocation2 + $0x20] sm:$0xff]  ;;  %v8387_v15 = vld [vmem:[#allocation2 + $0x28] sm:$0xff]  ;;  %v8388_v41 = vld [vmem:[#allocation2 + $0x30] sm:$0xff] }
 0x5e7   : > { %18664 = vmatmul.mubr.msk.f32.vlgmr.msra.gmra.mrb[0].mxu1 %vm1354_vm1, %v8384_v44  ;;  %v8389_v39 = vld [vmem:[#allocation2 + $0x38] sm:$0xff]  ;;  %v8390_v43 = vld [vmem:[#allocation2 + $0x40] sm:$0xff]  ;;  %v8391_v42 = vld [vmem:[#allocation2 + $0x48] sm:$0xff] }
 0x5e8   : > { %18760 = vmatpush3.msk.msra.mxu1 %vm1547_vm0, %v8382_v29  ;;  %18666 = vmatprep.mubr.msk.f32.mxu1 %vm1354_vm1, %v8385_v38  ;;  %v8392_v52 = vld [vmem:[#allocation2 + $0x50] sm:$0xff]  ;;  %v8393_v50 = vld [vmem:[#allocation2 + $0x58] sm:$0xff]  ;;  %v8394_v57 = vld [vmem:[#allocation2 + $0x60] sm:$0xff] }
 0x5e9   : > { %v8395_v56 = vld [vmem:[#allocation2 + $0x68] sm:$0xff]  ;;  %18857 = vmatprep.subr.msk.mxu1 %vm1547_vm0, %v23442_v16  ;;  %v8396_v0 = vld [vmem:[#allocation2 + $0x70] sm:$0xff]  ;;  %v8397_v8 = vld [vmem:[#allocation2 + $0x78] sm:$0xff] }
 0x5ea   : > { %v8398_v4 = vld [vmem:[#allocation2 + $0x80] sm:$0xff]  ;;  %v8399_v20 = vld [vmem:[#allocation2 + $0x88] sm:$0xff]  ;;  %v8400_v13 = vld [vmem:[#allocation2 + $0x90] sm:$0xff] }
 0x5eb   : > { %18667 = vmatmul.mubr.msk.f32.gmra.mrb[2].mxu1 %vm1354_vm1, %v8386_v2  ;;  %v8401_v25 = vld [vmem:[#allocation2 + $0x98] sm:$0xff]  ;;  %v8402_v24 = vld [vmem:[#allocation2 + $0xa0] sm:$0xff]  ;;  %v8403_v7 = vld [vmem:[#allocation2 + $0xa8] sm:$0xff] }
 0x5ec   : > { %18669 = vmatprep.mubr.msk.f32.mxu1 %vm1354_vm1, %v8387_v15  ;;  %v8404_v32 = vld [vmem:[#allocation2 + $0xb0] sm:$0xff]  ;;  %v8405_v37 = vld [vmem:[#allocation2 + $0xb8] sm:$0xff]  ;;  %v8406_v36 = vld [vmem:[#allocation2 + $0xc0] sm:$0xff] }
 0x5ed   : > { %v8407_v51 = vld [vmem:[#allocation2 + $0xc8] sm:$0xff]  ;;  %v8408_v48 = vld [vmem:[#allocation2 + $0xd0] sm:$0xff]  ;;  %v8409_v59 = vld [vmem:[#allocation2 + $0xd8] sm:$0xff] }
 0x5ee   : > { %v8410_v58 = vld [vmem:[#allocation2 + $0xe0] sm:$0xff]  ;;  %v8411_v18 = vld [vmem:[#allocation2 + $0xe8] sm:$0xff]  ;;  %v8412_v11 = vld [vmem:[#allocation2 + $0xf0] sm:$0xff] }
 0x5ef   : > { %18670 = vmatmul.mubr.msk.f32.gmra.mrb[4].mxu1 %vm1354_vm1, %v8388_v41  ;;  %v8413_v12 = vld [vmem:[#allocation2 + $0xf8] sm:$0xff]  ;;  %v8414_v5 = vld [vmem:[#allocation2 + $0x100] sm:$0xff]  ;;  %v8415_v30 = vld [vmem:[#allocation2 + $0x108] sm:$0xff] }
 0x5f0   : > { %18672 = vmatprep.mubr.msk.f32.mxu1 %vm1354_vm1, %v8389_v39  ;;  %v8416_v28 = vld [vmem:[#allocation2 + $0x110] sm:$0xff]  ;;  %v8417_v35 = vld [vmem:[#allocation2 + $0x118] sm:$0xff]  ;;  %v8418_v34 = vld [vmem:[#allocation2 + $0x120] sm:$0xff] }
 0x5f1   : > { %v8419_v54 = vld [vmem:[#allocation2 + $0x128] sm:$0xff]  ;;  %v8420_v49 = vld [vmem:[#allocation2 + $0x130] sm:$0xff]  ;;  %v8421_v63 = vld [vmem:[#allocation2 + $0x138] sm:$0xff] }
 0x5f2   : > { %v8422_v62 = vld [vmem:[#allocation2 + $0x140] sm:$0xff]  ;;  %v8423_v22 = vld [vmem:[#allocation2 + $0x148] sm:$0xff]  ;;  %v8424_v19 = vld [vmem:[#allocation2 + $0x150] sm:$0xff] }
 0x5f3   : > { %18673 = vmatmul.mubr.msk.f32.gmra.mrb[6].mxu1 %vm1354_vm1, %v8390_v43  ;;  %v8425_v9 = vld [vmem:[#allocation2 + $0x158] sm:$0xff]  ;;  %v8426_v31 = vld [vmem:[#allocation2 + $0x160] sm:$0xff]  ;;  %v8427_v47 = vld [vmem:[#allocation2 + $0x168] sm:$0xff] }
 0x5f4   : > { %18675 = vmatprep.mubr.msk.f32.mxu1 %vm1354_vm1, %v8391_v42  ;;  %v8428_v26 = vld [vmem:[#allocation2 + $0x170] sm:$0xff]  ;;  %v8429_v14 = vld [vmem:[#allocation2 + $0x178] sm:$0xff]  ;;  %v8430_v40 = vld [vmem:[#allocation2 + $0x180] sm:$0xff] }
 0x5f5   : > { %v8431_v33 = vld [vmem:[#allocation2 + $0x188] sm:$0xff]  ;;  %v8432_v17 = vld [vmem:[#allocation2 + $0x190] sm:$0xff]  ;;  %v8433_v3 = vld [vmem:[#allocation2 + $0x198] sm:$0xff] }
 0x5f6   : > { %v8434_v61 = vld [vmem:[#allocation2 + $0x1a0] sm:$0xff]  ;;  %v8435_v21 = vld [vmem:[#allocation2 + $0x1a8] sm:$0xff]  ;;  %v8436_v60 = vld [vmem:[#allocation2 + $0x1b0] sm:$0xff] }
 0x5f7   : > { %18676 = vmatmul.mubr.msk.f32.gmra.mrb[8].mxu1 %vm1354_vm1, %v8392_v52  ;;  %v8437_v6 = vld [vmem:[#allocation2 + $0x1b8] sm:$0xff]  ;;  %v8438_v45 = vld [vmem:[#allocation2 + $0x1c0] sm:$0xff]  ;;  %v8439_v1 = vld [vmem:[#allocation2 + $0x1c8] sm:$0xff] }
 0x5f8   : > { %18678 = vmatprep.mubr.msk.f32.mxu1 %vm1354_vm1, %v8393_v50  ;;  %v8440_v46 = vld [vmem:[#allocation2 + $0x1d0] sm:$0xff]  ;;  %v8441_v55 = vld [vmem:[#allocation2 + $0x1d8] sm:$0xff]  ;;  %v8442_v23 = vld [vmem:[#allocation2 + $0x1e0] sm:$0xff] }
 0x5f9   : > { %v8443_v27 = vld [vmem:[#allocation2 + $0x1e8] sm:$0xff]  ;;  %v8444_v53 = vld [vmem:[#allocation2 + $0x1f0] sm:$0xff]  ;;  %v8445_v10 = vld [vmem:[#allocation2 + $0x1f8] sm:$0xff] }
 0x5fa   : > { %v8446_v44 = vld [vmem:[#allocation2 + $0x200] sm:$0xff]  ;;  %v8319_v38 = vld [vmem:[#allocation2 + $0xf] sm:$0xff]  ;;  %v8320_v2 = vld [vmem:[#allocation2 + $0x17] sm:$0xff] }
 0x5fb   : > { %18679 = vmatmul.mubr.msk.f32.gmra.mrb[10].mxu1 %vm1354_vm1, %v8394_v57  ;;  %v8318_v29 = vld [vmem:[#allocation2 + $0x7] sm:$0xff]  ;;  %v8321_v41 = vld [vmem:[#allocation2 + $0x1f] sm:$0xff]  ;;  %v23516_v43 = vld [vmem:[#allocation2 + $0x2f] sm:$0xff] }
 0x5fc   : > { %18681 = vmatprep.mubr.msk.f32.mxu1 %vm1354_vm1, %v8395_v56  ;;  %v23504_v15 = vld [vmem:[%s25898_s5 + $0xc] sm:$0xf]  ;;  %v23518_v42 = vld [vmem:[#allocation2 + $0x37] sm:$0xff]  ;;  %v23524_v52 = vld [vmem:[#allocation2 + $0x3f] sm:$0xff] }
 0x5fd   : > { %v23509_v39 = vld [vmem:[#allocation2 + $0x27] sm:$0xff]  ;;  %v23532_v57 = vld [vmem:[#allocation2 + $0x4f] sm:$0xff]  ;;  %v23534_v56 = vld [vmem:[#allocation2 + $0x57] sm:$0xff] }
 0x5fe   : > { %v23526_v50 = vld [vmem:[#allocation2 + $0x47] sm:$0xff] }
 0x5ff   : > { %18682 = vmatmul.mubr.msk.f32.gmra.mrb[12].mxu1 %vm1354_vm1, %v8396_v0  ;;  %v23542_v0 = vld [vmem:[#allocation2 + $0x67] sm:$0xff] }
 0x600   : > { %18684 = vmatprep.mubr.msk.f32.mxu1 %vm1354_vm1, %v8397_v8  ;;  %v23548_v8 = vld [vmem:[#allocation2 + $0x6f] sm:$0xff] }
 0x603   : > { %18685 = vmatmul.mubr.msk.f32.gmra.mrb[14].mxu1 %vm1354_vm1, %v8398_v4  ;;  %v23550_v4 = vld [vmem:[#allocation2 + $0x77] sm:$0xff] }
 0x604   : > { %18687 = vmatprep.mubr.msk.f32.mxu1 %vm1354_vm1, %v8399_v20  ;;  %v23556_v20 = vld [vmem:[#allocation2 + $0x7f] sm:$0xff] }
 0x607   : > { %18688 = vmatmul.mubr.msk.f32.gmra.mrb[16].mxu1 %vm1354_vm1, %v8400_v13  ;;  %v23558_v13 = vld [vmem:[#allocation2 + $0x87] sm:$0xff] }
 0x608   : > { %18690 = vmatprep.mubr.msk.f32.mxu1 %vm1354_vm1, %v8401_v25  ;;  %v23564_v25 = vld [vmem:[#allocation2 + $0x8f] sm:$0xff] }
 0x60b   : > { %18691 = vmatmul.mubr.msk.f32.gmra.mrb[18].mxu1 %vm1354_vm1, %v8402_v24  ;;  %v23566_v24 = vld [vmem:[#allocation2 + $0x97] sm:$0xff] }
 0x60c   : > { %18693 = vmatprep.mubr.msk.f32.mxu1 %vm1354_vm1, %v8403_v7  ;;  %v23572_v7 = vld [vmem:[#allocation2 + $0x9f] sm:$0xff] }
 0x60f   : > { %18694 = vmatmul.mubr.msk.f32.gmra.mrb[20].mxu1 %vm1354_vm1, %v8404_v32  ;;  %v23574_v32 = vld [vmem:[#allocation2 + $0xa7] sm:$0xff] }
 0x610   : > { %18696 = vmatprep.mubr.msk.f32.mxu1 %vm1354_vm1, %v8405_v37  ;;  %v23580_v37 = vld [vmem:[#allocation2 + $0xaf] sm:$0xff] }
 0x613   : > { %18697 = vmatmul.mubr.msk.f32.gmra.mrb[22].mxu1 %vm1354_vm1, %v8406_v36  ;;  %v23582_v36 = vld [vmem:[#allocation2 + $0xb7] sm:$0xff] }
 0x614   : > { %18699 = vmatprep.mubr.msk.f32.mxu1 %vm1354_vm1, %v8407_v51  ;;  %v23588_v51 = vld [vmem:[#allocation2 + $0xbf] sm:$0xff] }
 0x617   : > { %18700 = vmatmul.mubr.msk.f32.gmra.mrb[24].mxu1 %vm1354_vm1, %v8408_v48  ;;  %v23590_v48 = vld [vmem:[#allocation2 + $0xc7] sm:$0xff] }
 0x618   : > { %18702 = vmatprep.mubr.msk.f32.mxu1 %vm1354_vm1, %v8409_v59  ;;  %v23596_v59 = vld [vmem:[#allocation2 + $0xcf] sm:$0xff] }
 0x61b   : > { %18703 = vmatmul.mubr.msk.f32.gmra.mrb[26].mxu1 %vm1354_vm1, %v8410_v58  ;;  %v23598_v58 = vld [vmem:[#allocation2 + $0xd7] sm:$0xff] }
 0x61c   : > { %18705 = vmatprep.mubr.msk.f32.mxu1 %vm1354_vm1, %v8411_v18  ;;  %v23604_v18 = vld [vmem:[#allocation2 + $0xdf] sm:$0xff] }
 0x61f   : > { %18706 = vmatmul.mubr.msk.f32.gmra.mrb[28].mxu1 %vm1354_vm1, %v8412_v11  ;;  %v23606_v11 = vld [vmem:[#allocation2 + $0xe7] sm:$0xff] }
 0x620   : > { %18708 = vmatprep.mubr.msk.f32.mxu1 %vm1354_vm1, %v8413_v12  ;;  %v23612_v12 = vld [vmem:[#allocation2 + $0xef] sm:$0xff] }
 0x623   : > { %18709 = vmatmul.mubr.msk.f32.gmra.mrb[30].mxu1 %vm1354_vm1, %v8414_v5  ;;  %v23614_v5 = vld [vmem:[#allocation2 + $0xf7] sm:$0xff] }
 0x624   : > { %18711 = vmatprep.mubr.msk.f32.mxu1 %vm1354_vm1, %v8415_v30  ;;  %v23620_v30 = vld [vmem:[#allocation2 + $0xff] sm:$0xff] }
 0x627   : > { %18712 = vmatmul.mubr.msk.f32.gmra.mrb[32].mxu1 %vm1354_vm1, %v8416_v28  ;;  %v23622_v28 = vld [vmem:[#allocation2 + $0x107] sm:$0xff] }
 0x628   : > { %18714 = vmatprep.mubr.msk.f32.mxu1 %vm1354_vm1, %v8417_v35  ;;  %v23628_v35 = vld [vmem:[#allocation2 + $0x10f] sm:$0xff] }
 0x62b   : > { %18715 = vmatmul.mubr.msk.f32.gmra.mrb[34].mxu1 %vm1354_vm1, %v8418_v34  ;;  %v23630_v34 = vld [vmem:[#allocation2 + $0x117] sm:$0xff] }
 0x62c   : > { %18717 = vmatprep.mubr.msk.f32.mxu1 %vm1354_vm1, %v8419_v54  ;;  %v23636_v54 = vld [vmem:[#allocation2 + $0x11f] sm:$0xff] }
 0x62f   : > { %18718 = vmatmul.mubr.msk.f32.gmra.mrb[36].mxu1 %vm1354_vm1, %v8420_v49  ;;  %v23638_v49 = vld [vmem:[#allocation2 + $0x127] sm:$0xff] }
 0x630   : > { %18720 = vmatprep.mubr.msk.f32.mxu1 %vm1354_vm1, %v8421_v63  ;;  %v23644_v63 = vld [vmem:[#allocation2 + $0x12f] sm:$0xff] }
 0x633   : > { %18721 = vmatmul.mubr.msk.f32.gmra.mrb[38].mxu1 %vm1354_vm1, %v8422_v62  ;;  %v23646_v62 = vld [vmem:[#allocation2 + $0x137] sm:$0xff] }
 0x634   : > { %18723 = vmatprep.mubr.msk.f32.mxu1 %vm1354_vm1, %v8423_v22  ;;  %v23652_v22 = vld [vmem:[#allocation2 + $0x13f] sm:$0xff] }
 0x637   : > { %18724 = vmatmul.mubr.msk.f32.gmra.mrb[40].mxu1 %vm1354_vm1, %v8424_v19  ;;  %v23654_v19 = vld [vmem:[#allocation2 + $0x147] sm:$0xff] }
 0x638   : > { %18726 = vmatprep.mubr.msk.f32.mxu1 %vm1354_vm1, %v8425_v9  ;;  %v23660_v9 = vld [vmem:[#allocation2 + $0x14f] sm:$0xff] }
 0x63b   : > { %18727 = vmatmul.mubr.msk.f32.gmra.mrb[42].mxu1 %vm1354_vm1, %v8426_v31  ;;  %v23662_v31 = vld [vmem:[#allocation2 + $0x157] sm:$0xff] }
 0x63c   : > { %18729 = vmatprep.mubr.msk.f32.mxu1 %vm1354_vm1, %v8427_v47  ;;  %v23668_v47 = vld [vmem:[#allocation2 + $0x15f] sm:$0xff] }
 0x63f   : > { %18730 = vmatmul.mubr.msk.f32.gmra.mrb[44].mxu1 %vm1354_vm1, %v8428_v26  ;;  %v23670_v26 = vld [vmem:[#allocation2 + $0x167] sm:$0xff] }
 0x640   : > { %18732 = vmatprep.mubr.msk.f32.mxu1 %vm1354_vm1, %v8429_v14  ;;  %v23676_v14 = vld [vmem:[#allocation2 + $0x16f] sm:$0xff] }
 0x643   : > { %18733 = vmatmul.mubr.msk.f32.gmra.mrb[46].mxu1 %vm1354_vm1, %v8430_v40  ;;  %v23678_v40 = vld [vmem:[#allocation2 + $0x177] sm:$0xff] }
 0x644   : > { %18735 = vmatprep.mubr.msk.f32.mxu1 %vm1354_vm1, %v8431_v33  ;;  %v23684_v33 = vld [vmem:[#allocation2 + $0x17f] sm:$0xff] }
 0x647   : > { %18736 = vmatmul.mubr.msk.f32.gmra.mrb[48].mxu1 %vm1354_vm1, %v8432_v17  ;;  %v23686_v17 = vld [vmem:[#allocation2 + $0x187] sm:$0xff] }
 0x648   : > { %18738 = vmatprep.mubr.msk.f32.mxu1 %vm1354_vm1, %v8433_v3  ;;  %v23692_v3 = vld [vmem:[#allocation2 + $0x18f] sm:$0xff] }
 0x64b   : > { %18739 = vmatmul.mubr.msk.f32.gmra.mrb[50].mxu1 %vm1354_vm1, %v8434_v61  ;;  %v23694_v61 = vld [vmem:[#allocation2 + $0x197] sm:$0xff] }
 0x64c   : > { %18741 = vmatprep.mubr.msk.f32.mxu1 %vm1354_vm1, %v8435_v21  ;;  %v23700_v21 = vld [vmem:[#allocation2 + $0x19f] sm:$0xff] }
 0x64f   : > { %18742 = vmatmul.mubr.msk.f32.gmra.mrb[52].mxu1 %vm1354_vm1, %v8436_v60  ;;  %v23702_v60 = vld [vmem:[#allocation2 + $0x1a7] sm:$0xff] }
 0x650   : > { %18744 = vmatprep.mubr.msk.f32.mxu1 %vm1354_vm1, %v8437_v6  ;;  %v23708_v6 = vld [vmem:[#allocation2 + $0x1af] sm:$0xff] }
 0x653   : > { %18745 = vmatmul.mubr.msk.f32.gmra.mrb[54].mxu1 %vm1354_vm1, %v8438_v45  ;;  %v23710_v45 = vld [vmem:[#allocation2 + $0x1b7] sm:$0xff] }
 0x654   : > { %18747 = vmatprep.mubr.msk.f32.mxu1 %vm1354_vm1, %v8439_v1  ;;  %v23716_v1 = vld [vmem:[#allocation2 + $0x1bf] sm:$0xff] }
 0x657   : > { %18748 = vmatmul.mubr.msk.f32.gmra.mrb[56].mxu1 %vm1354_vm1, %v8440_v46  ;;  %v23718_v46 = vld [vmem:[#allocation2 + $0x1c7] sm:$0xff] }
 0x658   : > { %18750 = vmatprep.mubr.msk.f32.mxu1 %vm1354_vm1, %v8441_v55  ;;  %v23724_v55 = vld [vmem:[#allocation2 + $0x1cf] sm:$0xff] }
 0x65b   : > { %18751 = vmatmul.mubr.msk.f32.gmra.mrb[58].mxu1 %vm1354_vm1, %v8442_v23  ;;  %v23726_v23 = vld [vmem:[#allocation2 + $0x1d7] sm:$0xff] }
 0x65c   : > { %18753 = vmatprep.mubr.msk.f32.mxu1 %vm1354_vm1, %v8443_v27  ;;  %v23732_v27 = vld [vmem:[#allocation2 + $0x1df] sm:$0xff] }
 0x65f   : > { %18754 = vmatmul.mubr.msk.f32.gmra.mrb[60].mxu1 %vm1354_vm1, %v8444_v53  ;;  %v23734_v53 = vld [vmem:[#allocation2 + $0x1e7] sm:$0xff] }
 0x660   : > { %18756 = vmatprep.mubr.msk.f32.mxu1 %vm1354_vm1, %v8445_v10  ;;  %26306 = vst [vmem:[#allocation51_spill] sm:$0xff] %v23734_v53  ;;  %v23740_v10 = vld [vmem:[#allocation2 + $0x1ef] sm:$0xff] }
 0x661   : > { %26307 = vst [vmem:[#allocation52_spill] sm:$0xff] %v23740_v10 }
 0x663   : > { %18757 = vmatmul.mubr.msk.f32.gmra.mrb[62].mxu1 %vm1354_vm1, %v8446_v44  ;;  %v23742_v44 = vld [vmem:[#allocation2 + $0x1f7] sm:$0xff] }
 0x664   : > { %18761 = vmatprep.mubr.msk.f32.mxu1 %vm1354_vm1, %v8318_v29  ;;  %26308 = vst [vmem:[#allocation53_spill] sm:$0xff] %v23742_v44  ;;  %v23748_v29 = vld [vmem:[#allocation2 + $0x1ff] sm:$0xff] }
 0x667   : > { %18762 = vmatmul.mubr.msk.f32.vlgmr.msra.gmra.mrb[0].mxu1 %vm1354_vm1, %v8319_v38  ;;  %v9609_v38 = vld [vmem:[#allocation2 + $0x9] sm:$0xff] }
 0x668   : > { %18858 = vmatpush3.msk.msra.mxu1 %vm1547_vm0, %v23442_v16  ;;  %18764 = vmatprep.mubr.msk.f32.mxu1 %vm1354_vm1, %v8320_v2  ;;  %v23540_v16 = vld [vmem:[#allocation2 + $0x5f] sm:$0xff]  ;;  %v9610_v2 = vld [vmem:[#allocation2 + $0x11] sm:$0xff] }
 0x669   : > { %18955 = vmatprep.subr.msk.mxu1 %vm1547_vm0, %v23504_v15 }
 0x66b   : > { %18765 = vmatmul.mubr.msk.f32.gmra.mrb[2].mxu1 %vm1354_vm1, %v8321_v41  ;;  %v9611_v41 = vld [vmem:[#allocation2 + $0x19] sm:$0xff] }
 0x66c   : > { %18767 = vmatprep.mubr.msk.f32.mxu1 %vm1354_vm1, %v23509_v39 }
 0x66f   : > { %18768 = vmatmul.mubr.msk.f32.gmra.mrb[4].mxu1 %vm1354_vm1, %v23516_v43 }
 0x670   : > { %18770 = vmatprep.mubr.msk.f32.mxu1 %vm1354_vm1, %v23518_v42 }
 0x673   : > { %18771 = vmatmul.mubr.msk.f32.gmra.mrb[6].mxu1 %vm1354_vm1, %v23524_v52 }
 0x674   : > { %18773 = vmatprep.mubr.msk.f32.mxu1 %vm1354_vm1, %v23526_v50 }
 0x677   : > { %18774 = vmatmul.mubr.msk.f32.gmra.mrb[8].mxu1 %vm1354_vm1, %v23532_v57 }
 0x678   : > { %18776 = vmatprep.mubr.msk.f32.mxu1 %vm1354_vm1, %v23534_v56 }
 0x67b   : > { %18777 = vmatmul.mubr.msk.f32.gmra.mrb[10].mxu1 %vm1354_vm1, %v23540_v16 }
 0x67c   : > { %18779 = vmatprep.mubr.msk.f32.mxu1 %vm1354_vm1, %v23542_v0 }
 0x67f   : > { %18780 = vmatmul.mubr.msk.f32.gmra.mrb[12].mxu1 %vm1354_vm1, %v23548_v8 }
 0x680   : > { %18782 = vmatprep.mubr.msk.f32.mxu1 %vm1354_vm1, %v23550_v4 }
 0x683   : > { %18783 = vmatmul.mubr.msk.f32.gmra.mrb[14].mxu1 %vm1354_vm1, %v23556_v20 }
 0x684   : > { %18785 = vmatprep.mubr.msk.f32.mxu1 %vm1354_vm1, %v23558_v13 }
 0x687   : > { %18786 = vmatmul.mubr.msk.f32.gmra.mrb[16].mxu1 %vm1354_vm1, %v23564_v25 }
 0x688   : > { %18788 = vmatprep.mubr.msk.f32.mxu1 %vm1354_vm1, %v23566_v24 }
 0x68b   : > { %18789 = vmatmul.mubr.msk.f32.gmra.mrb[18].mxu1 %vm1354_vm1, %v23572_v7 }
 0x68c   : > { %18791 = vmatprep.mubr.msk.f32.mxu1 %vm1354_vm1, %v23574_v32 }
 0x68f   : > { %18792 = vmatmul.mubr.msk.f32.gmra.mrb[20].mxu1 %vm1354_vm1, %v23580_v37 }
 0x690   : > { %18794 = vmatprep.mubr.msk.f32.mxu1 %vm1354_vm1, %v23582_v36 }
 0x693   : > { %18795 = vmatmul.mubr.msk.f32.gmra.mrb[22].mxu1 %vm1354_vm1, %v23588_v51 }
 0x694   : > { %18797 = vmatprep.mubr.msk.f32.mxu1 %vm1354_vm1, %v23590_v48 }
 0x697   : > { %18798 = vmatmul.mubr.msk.f32.gmra.mrb[24].mxu1 %vm1354_vm1, %v23596_v59 }
 0x698   : > { %18800 = vmatprep.mubr.msk.f32.mxu1 %vm1354_vm1, %v23598_v58 }
 0x69b   : > { %18801 = vmatmul.mubr.msk.f32.gmra.mrb[26].mxu1 %vm1354_vm1, %v23604_v18 }
 0x69c   : > { %18803 = vmatprep.mubr.msk.f32.mxu1 %vm1354_vm1, %v23606_v11 }
 0x69f   : > { %18804 = vmatmul.mubr.msk.f32.gmra.mrb[28].mxu1 %vm1354_vm1, %v23612_v12 }
 0x6a0   : > { %18806 = vmatprep.mubr.msk.f32.mxu1 %vm1354_vm1, %v23614_v5 }
 0x6a3   : > { %18807 = vmatmul.mubr.msk.f32.gmra.mrb[30].mxu1 %vm1354_vm1, %v23620_v30 }
 0x6a4   : > { %18809 = vmatprep.mubr.msk.f32.mxu1 %vm1354_vm1, %v23622_v28 }
 0x6a7   : > { %18810 = vmatmul.mubr.msk.f32.gmra.mrb[32].mxu1 %vm1354_vm1, %v23628_v35 }
 0x6a8   : > { %18812 = vmatprep.mubr.msk.f32.mxu1 %vm1354_vm1, %v23630_v34 }
 0x6ab   : > { %18813 = vmatmul.mubr.msk.f32.gmra.mrb[34].mxu1 %vm1354_vm1, %v23636_v54 }
 0x6ac   : > { %18815 = vmatprep.mubr.msk.f32.mxu1 %vm1354_vm1, %v23638_v49 }
 0x6af   : > { %18816 = vmatmul.mubr.msk.f32.gmra.mrb[36].mxu1 %vm1354_vm1, %v23644_v63 }
 0x6b0   : > { %18818 = vmatprep.mubr.msk.f32.mxu1 %vm1354_vm1, %v23646_v62 }
 0x6b3   : > { %18819 = vmatmul.mubr.msk.f32.gmra.mrb[38].mxu1 %vm1354_vm1, %v23652_v22 }
 0x6b4   : > { %18821 = vmatprep.mubr.msk.f32.mxu1 %vm1354_vm1, %v23654_v19 }
 0x6b7   : > { %18822 = vmatmul.mubr.msk.f32.gmra.mrb[40].mxu1 %vm1354_vm1, %v23660_v9 }
 0x6b8   : > { %18824 = vmatprep.mubr.msk.f32.mxu1 %vm1354_vm1, %v23662_v31 }
 0x6bb   : > { %18825 = vmatmul.mubr.msk.f32.gmra.mrb[42].mxu1 %vm1354_vm1, %v23668_v47 }
 0x6bc   : > { %18827 = vmatprep.mubr.msk.f32.mxu1 %vm1354_vm1, %v23670_v26 }
 0x6bf   : > { %18828 = vmatmul.mubr.msk.f32.gmra.mrb[44].mxu1 %vm1354_vm1, %v23676_v14 }
 0x6c0   : > { %18830 = vmatprep.mubr.msk.f32.mxu1 %vm1354_vm1, %v23678_v40 }
 0x6c3   : > { %18831 = vmatmul.mubr.msk.f32.gmra.mrb[46].mxu1 %vm1354_vm1, %v23684_v33 }
 0x6c4   : > { %18833 = vmatprep.mubr.msk.f32.mxu1 %vm1354_vm1, %v23686_v17 }
 0x6c7   : > { %18834 = vmatmul.mubr.msk.f32.gmra.mrb[48].mxu1 %vm1354_vm1, %v23692_v3 }
 0x6c8   : > { %18836 = vmatprep.mubr.msk.f32.mxu1 %vm1354_vm1, %v23694_v61 }
 0x6cb   : > { %18837 = vmatmul.mubr.msk.f32.gmra.mrb[50].mxu1 %vm1354_vm1, %v23700_v21 }
 0x6cc   : > { %18839 = vmatprep.mubr.msk.f32.mxu1 %vm1354_vm1, %v23702_v60 }
 0x6cf   : > { %18840 = vmatmul.mubr.msk.f32.gmra.mrb[52].mxu1 %vm1354_vm1, %v23708_v6 }
 0x6d0   : > { %18842 = vmatprep.mubr.msk.f32.mxu1 %vm1354_vm1, %v23710_v45 }
 0x6d3   : > { %18843 = vmatmul.mubr.msk.f32.gmra.mrb[54].mxu1 %vm1354_vm1, %v23716_v1 }
 0x6d4   : > { %18845 = vmatprep.mubr.msk.f32.mxu1 %vm1354_vm1, %v23718_v46 }
 0x6d7   : > { %18846 = vmatmul.mubr.msk.f32.gmra.mrb[56].mxu1 %vm1354_vm1, %v23724_v55 }
 0x6d8   : > { %18848 = vmatprep.mubr.msk.f32.mxu1 %vm1354_vm1, %v23726_v23 }
 0x6db   : > { %18849 = vmatmul.mubr.msk.f32.gmra.mrb[58].mxu1 %vm1354_vm1, %v23732_v27 }
 0x6dc   : > { %18851 = vmatprep.mubr.msk.f32.mxu1 %vm1354_vm1, %v23734_v53  ;;  %v23757_v53 = vld [vmem:[%s25898_s5 + $0x10] sm:$0xf] }
 0x6df   : > { %18852 = vmatmul.mubr.msk.f32.gmra.mrb[60].mxu1 %vm1354_vm1, %v23740_v10  ;;  %v23762_v10 = vld [vmem:[#allocation2 + $0x29] sm:$0xff] }
 0x6e0   : > { %18854 = vmatprep.mubr.msk.f32.mxu1 %vm1354_vm1, %v23742_v44  ;;  %v9612_v44 = vld [vmem:[#allocation2 + $0x21] sm:$0xff]  ;;  %26309 = vst [vmem:[#allocation54_spill] sm:$0xff] %v23762_v10 }
 0x6e3   : > { %18855 = vmatmul.mubr.msk.f32.gmra.mrb[62].mxu1 %vm1354_vm1, %v23748_v29 }
 0x6e4   : > { %18859 = vmatprep.mubr.msk.f32.mxu1 %vm1354_vm1, %v9609_v38  ;;  %v23769_v38 = vld [vmem:[#allocation2 + $0x31] sm:$0xff] }
 0x6e5   : > { %26310 = vst [vmem:[#allocation55_spill] sm:$0xff] %v23769_v38 }
 0x6e7   : > { %18860 = vmatmul.mubr.msk.f32.vlgmr.msra.gmra.mrb[0].mxu1 %vm1354_vm1, %v9610_v2  ;;  %v23771_v2 = vld [vmem:[#allocation2 + $0x39] sm:$0xff] }
 0x6e8   : > { %18956 = vmatpush3.msk.msra.mxu1 %vm1547_vm0, %v23504_v15  ;;  %18862 = vmatprep.mubr.msk.f32.mxu1 %vm1354_vm1, %v9611_v41  ;;  %26311 = vst [vmem:[#allocation56_spill] sm:$0xff] %v23771_v2  ;;  %v23777_v15 = vld [vmem:[#allocation2 + $0x41] sm:$0xff]  ;;  %v23779_v41 = vld [vmem:[#allocation2 + $0x49] sm:$0xff] }
 0x6e9   : > { %19053 = vmatprep.subr.msk.mxu1 %vm1547_vm0, %v23757_v53  ;;  %26312 = vst [vmem:[#allocation57_spill] sm:$0xff] %v23777_v15  ;;  %26313 = vst [vmem:[#allocation58_spill] sm:$0xff] %v23779_v41 }
 0x6eb   : > { %18863 = vmatmul.mubr.msk.f32.gmra.mrb[2].mxu1 %vm1354_vm1, %v9612_v44  ;;  %v23785_v44 = vld [vmem:[#allocation2 + $0x51] sm:$0xff] }
 0x6ec   : > { %18865 = vmatprep.mubr.msk.f32.mxu1 %vm1354_vm1, %v23762_v10  ;;  %26314 = vst [vmem:[#allocation59_spill] sm:$0xff] %v23785_v44  ;;  %v23787_v10 = vld [vmem:[#allocation2 + $0x59] sm:$0xff] }
 0x6ed   : > { %26315 = vst [vmem:[#allocation60_spill] sm:$0xff] %v23787_v10 }
 0x6ef   : > { %18866 = vmatmul.mubr.msk.f32.gmra.mrb[4].mxu1 %vm1354_vm1, %v23769_v38  ;;  %v23795_v38 = vld [vmem:[#allocation2 + $0x69] sm:$0xff] }
 0x6f0   : > { %18868 = vmatprep.mubr.msk.f32.mxu1 %vm1354_vm1, %v23771_v2  ;;  %v23793_v2 = vld [vmem:[#allocation2 + $0x61] sm:$0xff]  ;;  %26317 = vst [vmem:[#allocation4_spill] sm:$0xff] %v23795_v38 }
 0x6f1   : > { %26316 = vst [vmem:[#allocation3_spill] sm:$0xff] %v23793_v2 }
 0x6f3   : > { %18869 = vmatmul.mubr.msk.f32.gmra.mrb[6].mxu1 %vm1354_vm1, %v23777_v15  ;;  %v23803_v15 = vld [vmem:[#allocation2 + $0x79] sm:$0xff] }
 0x6f4   : > { %18871 = vmatprep.mubr.msk.f32.mxu1 %vm1354_vm1, %v23779_v41  ;;  %v23801_v41 = vld [vmem:[#allocation2 + $0x71] sm:$0xff]  ;;  %26319 = vst [vmem:[#allocation61_spill] sm:$0xff] %v23803_v15 }
 0x6f5   : > { %26318 = vst [vmem:[#allocation5_spill] sm:$0xff] %v23801_v41 }
 0x6f7   : > { %18872 = vmatmul.mubr.msk.f32.gmra.mrb[8].mxu1 %vm1354_vm1, %v23785_v44  ;;  %v23811_v44 = vld [vmem:[#allocation2 + $0x89] sm:$0xff] }
 0x6f8   : > { %18874 = vmatprep.mubr.msk.f32.mxu1 %vm1354_vm1, %v23787_v10  ;;  %v23809_v10 = vld [vmem:[#allocation2 + $0x81] sm:$0xff]  ;;  %26321 = vst [vmem:[#allocation63_spill] sm:$0xff] %v23811_v44 }
 0x6f9   : > { %26320 = vst [vmem:[#allocation62_spill] sm:$0xff] %v23809_v10 }
 0x6fb   : > { %18875 = vmatmul.mubr.msk.f32.gmra.mrb[10].mxu1 %vm1354_vm1, %v23793_v2  ;;  %v23819_v2 = vld [vmem:[#allocation2 + $0x99] sm:$0xff] }
 0x6fc   : > { %18877 = vmatprep.mubr.msk.f32.mxu1 %vm1354_vm1, %v23795_v38  ;;  %v23817_v38 = vld [vmem:[#allocation2 + $0x91] sm:$0xff]  ;;  %26323 = vst [vmem:[#allocation65_spill] sm:$0xff] %v23819_v2 }
 0x6fd   : > { %26322 = vst [vmem:[#allocation64_spill] sm:$0xff] %v23817_v38 }
 0x6ff   : > { %18878 = vmatmul.mubr.msk.f32.gmra.mrb[12].mxu1 %vm1354_vm1, %v23801_v41  ;;  %v23827_v41 = vld [vmem:[#allocation2 + $0xa9] sm:$0xff] }
 0x700   : > { %18880 = vmatprep.mubr.msk.f32.mxu1 %vm1354_vm1, %v23803_v15  ;;  %v23825_v15 = vld [vmem:[#allocation2 + $0xa1] sm:$0xff]  ;;  %26325 = vst [vmem:[#allocation67_spill] sm:$0xff] %v23827_v41 }
 0x701   : > { %26324 = vst [vmem:[#allocation66_spill] sm:$0xff] %v23825_v15 }
 0x703   : > { %18881 = vmatmul.mubr.msk.f32.gmra.mrb[14].mxu1 %vm1354_vm1, %v23809_v10  ;;  %v23835_v10 = vld [vmem:[#allocation2 + $0xb9] sm:$0xff] }
 0x704   : > { %18883 = vmatprep.mubr.msk.f32.mxu1 %vm1354_vm1, %v23811_v44  ;;  %v23833_v44 = vld [vmem:[#allocation2 + $0xb1] sm:$0xff]  ;;  %26327 = vst [vmem:[#allocation69_spill] sm:$0xff] %v23835_v10 }
 0x705   : > { %26326 = vst [vmem:[#allocation68_spill] sm:$0xff] %v23833_v44 }
 0x707   : > { %18884 = vmatmul.mubr.msk.f32.gmra.mrb[16].mxu1 %vm1354_vm1, %v23817_v38  ;;  %v23843_v38 = vld [vmem:[#allocation2 + $0xc9] sm:$0xff] }
 0x708   : > { %18886 = vmatprep.mubr.msk.f32.mxu1 %vm1354_vm1, %v23819_v2  ;;  %v23841_v2 = vld [vmem:[#allocation2 + $0xc1] sm:$0xff]  ;;  %26329 = vst [vmem:[#allocation71_spill] sm:$0xff] %v23843_v38 }
 0x709   : > { %26328 = vst [vmem:[#allocation70_spill] sm:$0xff] %v23841_v2 }
 0x70b   : > { %18887 = vmatmul.mubr.msk.f32.gmra.mrb[18].mxu1 %vm1354_vm1, %v23825_v15  ;;  %v23851_v15 = vld [vmem:[#allocation2 + $0xd9] sm:$0xff] }
 0x70c   : > { %18889 = vmatprep.mubr.msk.f32.mxu1 %vm1354_vm1, %v23827_v41  ;;  %v23849_v41 = vld [vmem:[#allocation2 + $0xd1] sm:$0xff]  ;;  %26331 = vst [vmem:[#allocation8_spill] sm:$0xff] %v23851_v15 }
 0x70d   : > { %26330 = vst [vmem:[#allocation6_spill] sm:$0xff] %v23849_v41 }
 0x70f   : > { %18890 = vmatmul.mubr.msk.f32.gmra.mrb[20].mxu1 %vm1354_vm1, %v23833_v44  ;;  %v23859_v44 = vld [vmem:[#allocation2 + $0xe9] sm:$0xff] }
 0x710   : > { %18892 = vmatprep.mubr.msk.f32.mxu1 %vm1354_vm1, %v23835_v10  ;;  %v23857_v10 = vld [vmem:[#allocation2 + $0xe1] sm:$0xff]  ;;  %26333 = vst [vmem:[#allocation10_spill] sm:$0xff] %v23859_v44 }
 0x711   : > { %26332 = vst [vmem:[#allocation7_spill] sm:$0xff] %v23857_v10 }
 0x713   : > { %18893 = vmatmul.mubr.msk.f32.gmra.mrb[22].mxu1 %vm1354_vm1, %v23841_v2  ;;  %v23867_v2 = vld [vmem:[#allocation2 + $0xf9] sm:$0xff] }
 0x714   : > { %18895 = vmatprep.mubr.msk.f32.mxu1 %vm1354_vm1, %v23843_v38  ;;  %v23865_v38 = vld [vmem:[#allocation2 + $0xf1] sm:$0xff]  ;;  %26335 = vst [vmem:[#allocation12_spill] sm:$0xff] %v23867_v2 }
 0x715   : > { %26334 = vst [vmem:[#allocation9_spill] sm:$0xff] %v23865_v38 }
 0x717   : > { %18896 = vmatmul.mubr.msk.f32.gmra.mrb[24].mxu1 %vm1354_vm1, %v23849_v41  ;;  %v23875_v41 = vld [vmem:[#allocation2 + $0x109] sm:$0xff] }
 0x718   : > { %18898 = vmatprep.mubr.msk.f32.mxu1 %vm1354_vm1, %v23851_v15  ;;  %v23873_v15 = vld [vmem:[#allocation2 + $0x101] sm:$0xff]  ;;  %26337 = vst [vmem:[#allocation14_spill] sm:$0xff] %v23875_v41 }
 0x719   : > { %26336 = vst [vmem:[#allocation11_spill] sm:$0xff] %v23873_v15 }
 0x71b   : > { %18899 = vmatmul.mubr.msk.f32.gmra.mrb[26].mxu1 %vm1354_vm1, %v23857_v10  ;;  %v23883_v10 = vld [vmem:[#allocation2 + $0x119] sm:$0xff] }
 0x71c   : > { %18901 = vmatprep.mubr.msk.f32.mxu1 %vm1354_vm1, %v23859_v44  ;;  %v23881_v44 = vld [vmem:[#allocation2 + $0x111] sm:$0xff]  ;;  %26339 = vst [vmem:[#allocation16_spill] sm:$0xff] %v23883_v10 }
 0x71d   : > { %26338 = vst [vmem:[#allocation13_spill] sm:$0xff] %v23881_v44 }
 0x71f   : > { %18902 = vmatmul.mubr.msk.f32.gmra.mrb[28].mxu1 %vm1354_vm1, %v23865_v38  ;;  %v23891_v38 = vld [vmem:[#allocation2 + $0x129] sm:$0xff] }
 0x720   : > { %18904 = vmatprep.mubr.msk.f32.mxu1 %vm1354_vm1, %v23867_v2  ;;  %v23889_v2 = vld [vmem:[#allocation2 + $0x121] sm:$0xff]  ;;  %26341 = vst [vmem:[#allocation18_spill] sm:$0xff] %v23891_v38 }
 0x721   : > { %26340 = vst [vmem:[#allocation15_spill] sm:$0xff] %v23889_v2 }
 0x723   : > { %18905 = vmatmul.mubr.msk.f32.gmra.mrb[30].mxu1 %vm1354_vm1, %v23873_v15  ;;  %v23899_v15 = vld [vmem:[#allocation2 + $0x139] sm:$0xff] }
 0x724   : > { %18907 = vmatprep.mubr.msk.f32.mxu1 %vm1354_vm1, %v23875_v41  ;;  %v23897_v41 = vld [vmem:[#allocation2 + $0x131] sm:$0xff]  ;;  %26343 = vst [vmem:[#allocation20_spill] sm:$0xff] %v23899_v15 }
 0x725   : > { %26342 = vst [vmem:[#allocation17_spill] sm:$0xff] %v23897_v41 }
 0x727   : > { %18908 = vmatmul.mubr.msk.f32.gmra.mrb[32].mxu1 %vm1354_vm1, %v23881_v44  ;;  %v23907_v44 = vld [vmem:[#allocation2 + $0x149] sm:$0xff] }
 0x728   : > { %18910 = vmatprep.mubr.msk.f32.mxu1 %vm1354_vm1, %v23883_v10  ;;  %v23905_v10 = vld [vmem:[#allocation2 + $0x141] sm:$0xff]  ;;  %26345 = vst [vmem:[#allocation22_spill] sm:$0xff] %v23907_v44 }
 0x729   : > { %26344 = vst [vmem:[#allocation19_spill] sm:$0xff] %v23905_v10 }
 0x72b   : > { %18911 = vmatmul.mubr.msk.f32.gmra.mrb[34].mxu1 %vm1354_vm1, %v23889_v2  ;;  %v23915_v2 = vld [vmem:[#allocation2 + $0x159] sm:$0xff] }
 0x72c   : > { %18913 = vmatprep.mubr.msk.f32.mxu1 %vm1354_vm1, %v23891_v38  ;;  %v23913_v38 = vld [vmem:[#allocation2 + $0x151] sm:$0xff]  ;;  %26347 = vst [vmem:[#allocation24_spill] sm:$0xff] %v23915_v2 }
 0x72d   : > { %26346 = vst [vmem:[#allocation21_spill] sm:$0xff] %v23913_v38 }
 0x72f   : > { %18914 = vmatmul.mubr.msk.f32.gmra.mrb[36].mxu1 %vm1354_vm1, %v23897_v41  ;;  %v23923_v41 = vld [vmem:[#allocation2 + $0x169] sm:$0xff] }
 0x730   : > { %18916 = vmatprep.mubr.msk.f32.mxu1 %vm1354_vm1, %v23899_v15  ;;  %v23921_v15 = vld [vmem:[#allocation2 + $0x161] sm:$0xff]  ;;  %26349 = vst [vmem:[#allocation26_spill] sm:$0xff] %v23923_v41 }
 0x731   : > { %26348 = vst [vmem:[#allocation23_spill] sm:$0xff] %v23921_v15 }
 0x733   : > { %18917 = vmatmul.mubr.msk.f32.gmra.mrb[38].mxu1 %vm1354_vm1, %v23905_v10  ;;  %v23931_v10 = vld [vmem:[#allocation2 + $0x179] sm:$0xff] }
 0x734   : > { %18919 = vmatprep.mubr.msk.f32.mxu1 %vm1354_vm1, %v23907_v44  ;;  %v23929_v44 = vld [vmem:[#allocation2 + $0x171] sm:$0xff]  ;;  %26351 = vst [vmem:[#allocation27_spill] sm:$0xff] %v23931_v10 }
 0x735   : > { %26350 = vst [vmem:[#allocation25_spill] sm:$0xff] %v23929_v44 }
 0x737   : > { %18920 = vmatmul.mubr.msk.f32.gmra.mrb[40].mxu1 %vm1354_vm1, %v23913_v38  ;;  %v23939_v38 = vld [vmem:[#allocation2 + $0x189] sm:$0xff] }
 0x738   : > { %18922 = vmatprep.mubr.msk.f32.mxu1 %vm1354_vm1, %v23915_v2  ;;  %v23937_v2 = vld [vmem:[#allocation2 + $0x181] sm:$0xff]  ;;  %26353 = vst [vmem:[#allocation30_spill] sm:$0xff] %v23939_v38 }
 0x739   : > { %26352 = vst [vmem:[#allocation28_spill] sm:$0xff] %v23937_v2 }
 0x73b   : > { %18923 = vmatmul.mubr.msk.f32.gmra.mrb[42].mxu1 %vm1354_vm1, %v23921_v15  ;;  %v23947_v15 = vld [vmem:[#allocation2 + $0x199] sm:$0xff] }
 0x73c   : > { %18925 = vmatprep.mubr.msk.f32.mxu1 %vm1354_vm1, %v23923_v41  ;;  %v23945_v41 = vld [vmem:[#allocation2 + $0x191] sm:$0xff]  ;;  %26355 = vst [vmem:[#allocation32_spill] sm:$0xff] %v23947_v15 }
 0x73d   : > { %26354 = vst [vmem:[#allocation31_spill] sm:$0xff] %v23945_v41 }
 0x73f   : > { %18926 = vmatmul.mubr.msk.f32.gmra.mrb[44].mxu1 %vm1354_vm1, %v23929_v44  ;;  %v23955_v44 = vld [vmem:[#allocation2 + $0x1a9] sm:$0xff] }
 0x740   : > { %18928 = vmatprep.mubr.msk.f32.mxu1 %vm1354_vm1, %v23931_v10  ;;  %v23953_v10 = vld [vmem:[#allocation2 + $0x1a1] sm:$0xff]  ;;  %26357 = vst [vmem:[#allocation34_spill] sm:$0xff] %v23955_v44 }
 0x741   : > { %26356 = vst [vmem:[#allocation33_spill] sm:$0xff] %v23953_v10 }
 0x743   : > { %18929 = vmatmul.mubr.msk.f32.gmra.mrb[46].mxu1 %vm1354_vm1, %v23937_v2  ;;  %v23963_v2 = vld [vmem:[#allocation2 + $0x1b9] sm:$0xff] }
 0x744   : > { %18931 = vmatprep.mubr.msk.f32.mxu1 %vm1354_vm1, %v23939_v38  ;;  %v23961_v38 = vld [vmem:[#allocation2 + $0x1b1] sm:$0xff]  ;;  %26359 = vst [vmem:[#allocation36_spill] sm:$0xff] %v23963_v2 }
 0x745   : > { %26358 = vst [vmem:[#allocation35_spill] sm:$0xff] %v23961_v38 }
 0x747   : > { %18932 = vmatmul.mubr.msk.f32.gmra.mrb[48].mxu1 %vm1354_vm1, %v23945_v41  ;;  %v23971_v41 = vld [vmem:[#allocation2 + $0x1c9] sm:$0xff] }
 0x748   : > { %18934 = vmatprep.mubr.msk.f32.mxu1 %vm1354_vm1, %v23947_v15  ;;  %v23969_v15 = vld [vmem:[#allocation2 + $0x1c1] sm:$0xff]  ;;  %26361 = vst [vmem:[#allocation38_spill] sm:$0xff] %v23971_v41 }
 0x749   : > { %26360 = vst [vmem:[#allocation37_spill] sm:$0xff] %v23969_v15 }
 0x74b   : > { %18935 = vmatmul.mubr.msk.f32.gmra.mrb[50].mxu1 %vm1354_vm1, %v23953_v10  ;;  %v23979_v10 = vld [vmem:[#allocation2 + $0x1d9] sm:$0xff] }
 0x74c   : > { %18937 = vmatprep.mubr.msk.f32.mxu1 %vm1354_vm1, %v23955_v44  ;;  %v23977_v44 = vld [vmem:[#allocation2 + $0x1d1] sm:$0xff]  ;;  %26362 = vst [vmem:[#allocation39_spill] sm:$0xff] %v23979_v10 }
 0x74f   : > { %18938 = vmatmul.mubr.msk.f32.gmra.mrb[52].mxu1 %vm1354_vm1, %v23961_v38  ;;  %v23987_v38 = vld [vmem:[#allocation2 + $0x1e9] sm:$0xff] }
 0x750   : > { %18940 = vmatprep.mubr.msk.f32.mxu1 %vm1354_vm1, %v23963_v2  ;;  %v23985_v2 = vld [vmem:[#allocation2 + $0x1e1] sm:$0xff]  ;;  %26363 = vst [vmem:[#allocation42_spill] sm:$0xff] %v23987_v38 }
 0x753   : > { %18941 = vmatmul.mubr.msk.f32.gmra.mrb[54].mxu1 %vm1354_vm1, %v23969_v15  ;;  %v23995_v15 = vld [vmem:[#allocation2 + $0x1f9] sm:$0xff] }
 0x754   : > { %18943 = vmatprep.mubr.msk.f32.mxu1 %vm1354_vm1, %v23971_v41  ;;  %v23993_v41 = vld [vmem:[#allocation2 + $0x1f1] sm:$0xff] }
 0x757   : > { %18944 = vmatmul.mubr.msk.f32.gmra.mrb[56].mxu1 %vm1354_vm1, %v23977_v44 }
 0x758   : > { %18946 = vmatprep.mubr.msk.f32.mxu1 %vm1354_vm1, %v23979_v10  ;;  %v24001_v10 = vld [vmem:[#allocation2 + $0x201] sm:$0xff] }
 0x75b   : > { %18947 = vmatmul.mubr.msk.f32.gmra.mrb[58].mxu1 %vm1354_vm1, %v23985_v2 }
 0x75c   : > { %18949 = vmatprep.mubr.msk.f32.mxu1 %vm1354_vm1, %v23987_v38  ;;  %v24012_v38 = vld [vmem:[%s25898_s5 + $0x14] sm:$0xf] }
 0x75f   : > { %18950 = vmatmul.mubr.msk.f32.gmra.mrb[60].mxu1 %vm1354_vm1, %v23993_v41 }
 0x760   : > { %18952 = vmatprep.mubr.msk.f32.mxu1 %vm1354_vm1, %v23995_v15 }
 0x763   : > { %18953 = vmatmul.mubr.msk.f32.gmra.mrb[62].mxu1 %vm1354_vm1, %v24001_v10 }
 0x764   : > { %18957 = vmatprep.mubr.msk.f32.mxu1 %vm1354_vm1, %v23509_v39  ;;  %v26364_v39 = vld [vmem:[#allocation51_spill] sm:$0xff] }
 0x767   : > { %18958 = vmatmul.mubr.msk.f32.vlgmr.msra.gmra.mrb[0].mxu1 %vm1354_vm1, %v23516_v43  ;;  %v26365_v43 = vld [vmem:[#allocation52_spill] sm:$0xff] }
 0x768   : > { %19054 = vmatpush3.msk.msra.mxu1 %vm1547_vm0, %v23757_v53  ;;  %18960 = vmatprep.mubr.msk.f32.mxu1 %vm1354_vm1, %v23518_v42  ;;  %v26366_v42 = vld [vmem:[#allocation53_spill] sm:$0xff]  ;;  %v24337_v53 = vld [vmem:[#allocation2 + $0x1a8] sm:$0xff] }
 0x769   : > { %19151 = vmatprep.subr.msk.mxu1 %vm1547_vm0, %v24012_v38 }
 0x76b   : > { %18961 = vmatmul.mubr.msk.f32.gmra.mrb[2].mxu1 %vm1354_vm1, %v23524_v52  ;;  %v24132_v52 = vld [vmem:[#allocation2 + $0x207] sm:$0xff] }
 0x76c   : > { %18963 = vmatprep.mubr.msk.f32.mxu1 %vm1354_vm1, %v23526_v50  ;;  %v24138_v50 = vld [vmem:[#allocation2 + $0x20f] sm:$0xff] }
 0x76f   : > { %18964 = vmatmul.mubr.msk.f32.gmra.mrb[4].mxu1 %vm1354_vm1, %v23532_v57  ;;  %v24140_v57 = vld [vmem:[#allocation2 + $0x217] sm:$0xff] }
 0x770   : > { %18966 = vmatprep.mubr.msk.f32.mxu1 %vm1354_vm1, %v23534_v56  ;;  %v24146_v56 = vld [vmem:[#allocation2 + $0x21f] sm:$0xff] }
 0x773   : > { %18967 = vmatmul.mubr.msk.f32.gmra.mrb[6].mxu1 %vm1354_vm1, %v23540_v16  ;;  %v11029_v16 = vld [vmem:[#allocation2 + $0x28] sm:$0xff] }
 0x774   : > { %18969 = vmatprep.mubr.msk.f32.mxu1 %vm1354_vm1, %v23542_v0  ;;  %v11030_v0 = vld [vmem:[#allocation2 + $0x30] sm:$0xff] }
 0x777   : > { %18970 = vmatmul.mubr.msk.f32.gmra.mrb[8].mxu1 %vm1354_vm1, %v23548_v8  ;;  %v11031_v8 = vld [vmem:[#allocation2 + $0x38] sm:$0xff] }
 0x778   : > { %18972 = vmatprep.mubr.msk.f32.mxu1 %vm1354_vm1, %v23550_v4  ;;  %v24155_v4 = vld [vmem:[%s25898_s5 + $0x18] sm:$0xf] }
 0x77b   : > { %18973 = vmatmul.mubr.msk.f32.gmra.mrb[10].mxu1 %vm1354_vm1, %v23556_v20  ;;  %v11032_v20 = vld [vmem:[#allocation2 + $0x40] sm:$0xff] }
 0x77c   : > { %18975 = vmatprep.mubr.msk.f32.mxu1 %vm1354_vm1, %v23558_v13  ;;  %v24160_v13 = vld [vmem:[#allocation2 + $0x48] sm:$0xff] }
 0x77f   : > { %18976 = vmatmul.mubr.msk.f32.gmra.mrb[12].mxu1 %vm1354_vm1, %v23564_v25  ;;  %v24167_v25 = vld [vmem:[#allocation2 + $0x50] sm:$0xff] }
 0x780   : > { %18978 = vmatprep.mubr.msk.f32.mxu1 %vm1354_vm1, %v23566_v24  ;;  %v24169_v24 = vld [vmem:[#allocation2 + $0x58] sm:$0xff] }
 0x783   : > { %18979 = vmatmul.mubr.msk.f32.gmra.mrb[14].mxu1 %vm1354_vm1, %v23572_v7  ;;  %v24175_v7 = vld [vmem:[#allocation2 + $0x60] sm:$0xff] }
 0x784   : > { %18981 = vmatprep.mubr.msk.f32.mxu1 %vm1354_vm1, %v23574_v32  ;;  %v24177_v32 = vld [vmem:[#allocation2 + $0x68] sm:$0xff] }
 0x787   : > { %18982 = vmatmul.mubr.msk.f32.gmra.mrb[16].mxu1 %vm1354_vm1, %v23580_v37  ;;  %v24183_v37 = vld [vmem:[#allocation2 + $0x70] sm:$0xff] }
 0x788   : > { %18984 = vmatprep.mubr.msk.f32.mxu1 %vm1354_vm1, %v23582_v36  ;;  %v24185_v36 = vld [vmem:[#allocation2 + $0x78] sm:$0xff] }
 0x78b   : > { %18985 = vmatmul.mubr.msk.f32.gmra.mrb[18].mxu1 %vm1354_vm1, %v23588_v51  ;;  %v24191_v51 = vld [vmem:[#allocation2 + $0x80] sm:$0xff] }
 0x78c   : > { %18987 = vmatprep.mubr.msk.f32.mxu1 %vm1354_vm1, %v23590_v48  ;;  %v24193_v48 = vld [vmem:[#allocation2 + $0x88] sm:$0xff] }
 0x78f   : > { %18988 = vmatmul.mubr.msk.f32.gmra.mrb[20].mxu1 %vm1354_vm1, %v23596_v59  ;;  %v24199_v59 = vld [vmem:[#allocation2 + $0x90] sm:$0xff] }
 0x790   : > { %18990 = vmatprep.mubr.msk.f32.mxu1 %vm1354_vm1, %v23598_v58  ;;  %v24201_v58 = vld [vmem:[#allocation2 + $0x98] sm:$0xff] }
 0x793   : > { %18991 = vmatmul.mubr.msk.f32.gmra.mrb[22].mxu1 %vm1354_vm1, %v23604_v18  ;;  %v24207_v18 = vld [vmem:[#allocation2 + $0xa0] sm:$0xff] }
 0x794   : > { %18993 = vmatprep.mubr.msk.f32.mxu1 %vm1354_vm1, %v23606_v11  ;;  %v24209_v11 = vld [vmem:[#allocation2 + $0xa8] sm:$0xff] }
 0x797   : > { %18994 = vmatmul.mubr.msk.f32.gmra.mrb[24].mxu1 %vm1354_vm1, %v23612_v12  ;;  %v24215_v12 = vld [vmem:[#allocation2 + $0xb0] sm:$0xff] }
 0x798   : > { %18996 = vmatprep.mubr.msk.f32.mxu1 %vm1354_vm1, %v23614_v5  ;;  %v24217_v5 = vld [vmem:[#allocation2 + $0xb8] sm:$0xff] }
 0x79b   : > { %18997 = vmatmul.mubr.msk.f32.gmra.mrb[26].mxu1 %vm1354_vm1, %v23620_v30  ;;  %v24223_v30 = vld [vmem:[#allocation2 + $0xc0] sm:$0xff] }
 0x79c   : > { %18999 = vmatprep.mubr.msk.f32.mxu1 %vm1354_vm1, %v23622_v28  ;;  %v24225_v28 = vld [vmem:[#allocation2 + $0xc8] sm:$0xff] }
 0x79f   : > { %19000 = vmatmul.mubr.msk.f32.gmra.mrb[28].mxu1 %vm1354_vm1, %v23628_v35  ;;  %v24231_v35 = vld [vmem:[#allocation2 + $0xd0] sm:$0xff] }
 0x7a0   : > { %19002 = vmatprep.mubr.msk.f32.mxu1 %vm1354_vm1, %v23630_v34  ;;  %v24233_v34 = vld [vmem:[#allocation2 + $0xd8] sm:$0xff] }
 0x7a3   : > { %19003 = vmatmul.mubr.msk.f32.gmra.mrb[30].mxu1 %vm1354_vm1, %v23636_v54  ;;  %v24239_v54 = vld [vmem:[#allocation2 + $0xe0] sm:$0xff] }
 0x7a4   : > { %19005 = vmatprep.mubr.msk.f32.mxu1 %vm1354_vm1, %v23638_v49  ;;  %v24241_v49 = vld [vmem:[#allocation2 + $0xe8] sm:$0xff] }
 0x7a7   : > { %19006 = vmatmul.mubr.msk.f32.gmra.mrb[32].mxu1 %vm1354_vm1, %v23644_v63  ;;  %v24247_v63 = vld [vmem:[#allocation2 + $0xf0] sm:$0xff] }
 0x7a8   : > { %19008 = vmatprep.mubr.msk.f32.mxu1 %vm1354_vm1, %v23646_v62  ;;  %v24249_v62 = vld [vmem:[#allocation2 + $0xf8] sm:$0xff] }
 0x7ab   : > { %19009 = vmatmul.mubr.msk.f32.gmra.mrb[34].mxu1 %vm1354_vm1, %v23652_v22  ;;  %v24255_v22 = vld [vmem:[#allocation2 + $0x100] sm:$0xff] }
 0x7ac   : > { %19011 = vmatprep.mubr.msk.f32.mxu1 %vm1354_vm1, %v23654_v19  ;;  %v24257_v19 = vld [vmem:[#allocation2 + $0x108] sm:$0xff] }
 0x7af   : > { %19012 = vmatmul.mubr.msk.f32.gmra.mrb[36].mxu1 %vm1354_vm1, %v23660_v9  ;;  %v24263_v9 = vld [vmem:[#allocation2 + $0x110] sm:$0xff] }
 0x7b0   : > { %19014 = vmatprep.mubr.msk.f32.mxu1 %vm1354_vm1, %v23662_v31  ;;  %v24265_v31 = vld [vmem:[#allocation2 + $0x118] sm:$0xff] }
 0x7b3   : > { %19015 = vmatmul.mubr.msk.f32.gmra.mrb[38].mxu1 %vm1354_vm1, %v23668_v47  ;;  %v24271_v47 = vld [vmem:[#allocation2 + $0x120] sm:$0xff] }
 0x7b4   : > { %19017 = vmatprep.mubr.msk.f32.mxu1 %vm1354_vm1, %v23670_v26  ;;  %v24273_v26 = vld [vmem:[#allocation2 + $0x128] sm:$0xff] }
 0x7b7   : > { %19018 = vmatmul.mubr.msk.f32.gmra.mrb[40].mxu1 %vm1354_vm1, %v23676_v14  ;;  %v24279_v14 = vld [vmem:[#allocation2 + $0x130] sm:$0xff] }
 0x7b8   : > { %19020 = vmatprep.mubr.msk.f32.mxu1 %vm1354_vm1, %v23678_v40  ;;  %v24281_v40 = vld [vmem:[#allocation2 + $0x138] sm:$0xff] }
 0x7bb   : > { %19021 = vmatmul.mubr.msk.f32.gmra.mrb[42].mxu1 %vm1354_vm1, %v23684_v33  ;;  %v24287_v33 = vld [vmem:[#allocation2 + $0x140] sm:$0xff] }
 0x7bc   : > { %19023 = vmatprep.mubr.msk.f32.mxu1 %vm1354_vm1, %v23686_v17  ;;  %v24289_v17 = vld [vmem:[#allocation2 + $0x148] sm:$0xff] }
 0x7bf   : > { %19024 = vmatmul.mubr.msk.f32.gmra.mrb[44].mxu1 %vm1354_vm1, %v23692_v3  ;;  %v24295_v3 = vld [vmem:[#allocation2 + $0x150] sm:$0xff] }
 0x7c0   : > { %19026 = vmatprep.mubr.msk.f32.mxu1 %vm1354_vm1, %v23694_v61  ;;  %v24297_v61 = vld [vmem:[#allocation2 + $0x158] sm:$0xff] }
 0x7c3   : > { %19027 = vmatmul.mubr.msk.f32.gmra.mrb[46].mxu1 %vm1354_vm1, %v23700_v21  ;;  %v24303_v21 = vld [vmem:[#allocation2 + $0x160] sm:$0xff] }
 0x7c4   : > { %19029 = vmatprep.mubr.msk.f32.mxu1 %vm1354_vm1, %v23702_v60  ;;  %v24305_v60 = vld [vmem:[#allocation2 + $0x168] sm:$0xff] }
 0x7c7   : > { %19030 = vmatmul.mubr.msk.f32.gmra.mrb[48].mxu1 %vm1354_vm1, %v23708_v6  ;;  %v24311_v6 = vld [vmem:[#allocation2 + $0x170] sm:$0xff] }
 0x7c8   : > { %19032 = vmatprep.mubr.msk.f32.mxu1 %vm1354_vm1, %v23710_v45  ;;  %v24313_v45 = vld [vmem:[#allocation2 + $0x178] sm:$0xff] }
 0x7cb   : > { %19033 = vmatmul.mubr.msk.f32.gmra.mrb[50].mxu1 %vm1354_vm1, %v23716_v1  ;;  %v24319_v1 = vld [vmem:[#allocation2 + $0x180] sm:$0xff] }
 0x7cc   : > { %19035 = vmatprep.mubr.msk.f32.mxu1 %vm1354_vm1, %v23718_v46  ;;  %v24321_v46 = vld [vmem:[#allocation2 + $0x188] sm:$0xff] }
 0x7cf   : > { %19036 = vmatmul.mubr.msk.f32.gmra.mrb[52].mxu1 %vm1354_vm1, %v23724_v55  ;;  %v24327_v55 = vld [vmem:[#allocation2 + $0x190] sm:$0xff] }
 0x7d0   : > { %19038 = vmatprep.mubr.msk.f32.mxu1 %vm1354_vm1, %v23726_v23  ;;  %v24329_v23 = vld [vmem:[#allocation2 + $0x198] sm:$0xff] }
 0x7d3   : > { %19039 = vmatmul.mubr.msk.f32.gmra.mrb[54].mxu1 %vm1354_vm1, %v23732_v27  ;;  %v24335_v27 = vld [vmem:[#allocation2 + $0x1a0] sm:$0xff] }
 0x7d4   : > { %19041 = vmatprep.mubr.msk.f32.mxu1 %vm1354_vm1, %v26364_v39  ;;  %v24351_v39 = vld [vmem:[#allocation2 + $0x1c0] sm:$0xff] }
 0x7d5   : > { %26368 = vst [vmem:[#allocation44_spill] sm:$0xff] %v24351_v39 }
 0x7d7   : > { %19042 = vmatmul.mubr.msk.f32.gmra.mrb[56].mxu1 %vm1354_vm1, %v26365_v43  ;;  %v24353_v43 = vld [vmem:[#allocation2 + $0x1c8] sm:$0xff] }
 0x7d8   : > { %19044 = vmatprep.mubr.msk.f32.mxu1 %vm1354_vm1, %v26366_v42  ;;  %26369 = vst [vmem:[#allocation45_spill] sm:$0xff] %v24353_v43  ;;  %v24359_v42 = vld [vmem:[#allocation2 + $0x1d0] sm:$0xff] }
 0x7d9   : > { %26370 = vst [vmem:[#allocation46_spill] sm:$0xff] %v24359_v42 }
 0x7db   : > { %19045 = vmatmul.mubr.msk.f32.gmra.mrb[58].mxu1 %vm1354_vm1, %v23748_v29  ;;  %v24343_v29 = vld [vmem:[#allocation2 + $0x1b0] sm:$0xff] }
 0x7dc   : > { %19047 = vmatprep.mubr.msk.f32.mxu1 %vm1354_vm1, %v24132_v52 }
 0x7df   : > { %19048 = vmatmul.mubr.msk.f32.gmra.mrb[60].mxu1 %vm1354_vm1, %v24138_v50 }
 0x7e0   : > { %19050 = vmatprep.mubr.msk.f32.mxu1 %vm1354_vm1, %v24140_v57 }
 0x7e3   : > { %19051 = vmatmul.mubr.msk.f32.gmra.mrb[62].mxu1 %vm1354_vm1, %v24146_v56 }
 0x7e4   : > { %19055 = vmatprep.mubr.msk.f32.mxu1 %vm1354_vm1, %v11029_v16  ;;  %v24361_v16 = vld [vmem:[#allocation2 + $0x1d8] sm:$0xff] }
 0x7e5   : > { %26371 = vst [vmem:[#allocation47_spill] sm:$0xff] %v24361_v16 }
 0x7e7   : > { %19056 = vmatmul.mubr.msk.f32.vlgmr.msra.gmra.mrb[0].mxu1 %vm1354_vm1, %v11030_v0  ;;  %v24367_v0 = vld [vmem:[#allocation2 + $0x1e0] sm:$0xff] }
 0x7e8   : > { %19152 = vmatpush3.msk.msra.mxu1 %vm1547_vm0, %v24012_v38  ;;  %19058 = vmatprep.mubr.msk.f32.mxu1 %vm1354_vm1, %v11031_v8  ;;  %v24345_v38 = vld [vmem:[#allocation2 + $0x1b8] sm:$0xff]  ;;  %26372 = vst [vmem:[#allocation48_spill] sm:$0xff] %v24367_v0  ;;  %v24369_v8 = vld [vmem:[#allocation2 + $0x1e8] sm:$0xff] }
 0x7e9   : > { %19249 = vmatprep.subr.msk.mxu1 %vm1547_vm0, %v24155_v4  ;;  %26367 = vst [vmem:[#allocation43_spill] sm:$0xff] %v24345_v38  ;;  %26373 = vst [vmem:[#allocation49_spill] sm:$0xff] %v24369_v8 }
 0x7eb   : > { %19059 = vmatmul.mubr.msk.f32.gmra.mrb[2].mxu1 %vm1354_vm1, %v11032_v20  ;;  %v24375_v20 = vld [vmem:[#allocation2 + $0x1f0] sm:$0xff] }
 0x7ec   : > { %19061 = vmatprep.mubr.msk.f32.mxu1 %vm1354_vm1, %v24160_v13  ;;  %26374 = vst [vmem:[#allocation50_spill] sm:$0xff] %v24375_v20 }
 0x7ef   : > { %19062 = vmatmul.mubr.msk.f32.gmra.mrb[4].mxu1 %vm1354_vm1, %v24167_v25 }
 0x7f0   : > { %19064 = vmatprep.mubr.msk.f32.mxu1 %vm1354_vm1, %v24169_v24 }
 0x7f3   : > { %19065 = vmatmul.mubr.msk.f32.gmra.mrb[6].mxu1 %vm1354_vm1, %v24175_v7 }
 0x7f4   : > { %19067 = vmatprep.mubr.msk.f32.mxu1 %vm1354_vm1, %v24177_v32 }
 0x7f7   : > { %19068 = vmatmul.mubr.msk.f32.gmra.mrb[8].mxu1 %vm1354_vm1, %v24183_v37 }
 0x7f8   : > { %19070 = vmatprep.mubr.msk.f32.mxu1 %vm1354_vm1, %v24185_v36 }
 0x7fb   : > { %19071 = vmatmul.mubr.msk.f32.gmra.mrb[10].mxu1 %vm1354_vm1, %v24191_v51 }
 0x7fc   : > { %19073 = vmatprep.mubr.msk.f32.mxu1 %vm1354_vm1, %v24193_v48 }
 0x7ff   : > { %19074 = vmatmul.mubr.msk.f32.gmra.mrb[12].mxu1 %vm1354_vm1, %v24199_v59 }
 0x800   : > { %19076 = vmatprep.mubr.msk.f32.mxu1 %vm1354_vm1, %v24201_v58 }
 0x803   : > { %19077 = vmatmul.mubr.msk.f32.gmra.mrb[14].mxu1 %vm1354_vm1, %v24207_v18 }
 0x804   : > { %19079 = vmatprep.mubr.msk.f32.mxu1 %vm1354_vm1, %v24209_v11 }
 0x807   : > { %19080 = vmatmul.mubr.msk.f32.gmra.mrb[16].mxu1 %vm1354_vm1, %v24215_v12 }
 0x808   : > { %19082 = vmatprep.mubr.msk.f32.mxu1 %vm1354_vm1, %v24217_v5 }
 0x80b   : > { %19083 = vmatmul.mubr.msk.f32.gmra.mrb[18].mxu1 %vm1354_vm1, %v24223_v30 }
 0x80c   : > { %19085 = vmatprep.mubr.msk.f32.mxu1 %vm1354_vm1, %v24225_v28 }
 0x80f   : > { %19086 = vmatmul.mubr.msk.f32.gmra.mrb[20].mxu1 %vm1354_vm1, %v24231_v35 }
 0x810   : > { %19088 = vmatprep.mubr.msk.f32.mxu1 %vm1354_vm1, %v24233_v34 }
 0x813   : > { %19089 = vmatmul.mubr.msk.f32.gmra.mrb[22].mxu1 %vm1354_vm1, %v24239_v54 }
 0x814   : > { %19091 = vmatprep.mubr.msk.f32.mxu1 %vm1354_vm1, %v24241_v49 }
 0x817   : > { %19092 = vmatmul.mubr.msk.f32.gmra.mrb[24].mxu1 %vm1354_vm1, %v24247_v63 }
 0x818   : > { %19094 = vmatprep.mubr.msk.f32.mxu1 %vm1354_vm1, %v24249_v62 }
 0x81b   : > { %19095 = vmatmul.mubr.msk.f32.gmra.mrb[26].mxu1 %vm1354_vm1, %v24255_v22 }
 0x81c   : > { %19097 = vmatprep.mubr.msk.f32.mxu1 %vm1354_vm1, %v24257_v19 }
 0x81f   : > { %19098 = vmatmul.mubr.msk.f32.gmra.mrb[28].mxu1 %vm1354_vm1, %v24263_v9 }
 0x820   : > { %19100 = vmatprep.mubr.msk.f32.mxu1 %vm1354_vm1, %v24265_v31 }
 0x823   : > { %19101 = vmatmul.mubr.msk.f32.gmra.mrb[30].mxu1 %vm1354_vm1, %v24271_v47 }
 0x824   : > { %19103 = vmatprep.mubr.msk.f32.mxu1 %vm1354_vm1, %v24273_v26 }
 0x827   : > { %19104 = vmatmul.mubr.msk.f32.gmra.mrb[32].mxu1 %vm1354_vm1, %v24279_v14 }
 0x828   : > { %19106 = vmatprep.mubr.msk.f32.mxu1 %vm1354_vm1, %v24281_v40 }
 0x82b   : > { %19107 = vmatmul.mubr.msk.f32.gmra.mrb[34].mxu1 %vm1354_vm1, %v24287_v33 }
 0x82c   : > { %19109 = vmatprep.mubr.msk.f32.mxu1 %vm1354_vm1, %v24289_v17 }
 0x82f   : > { %19110 = vmatmul.mubr.msk.f32.gmra.mrb[36].mxu1 %vm1354_vm1, %v24295_v3 }
 0x830   : > { %19112 = vmatprep.mubr.msk.f32.mxu1 %vm1354_vm1, %v24297_v61 }
 0x833   : > { %19113 = vmatmul.mubr.msk.f32.gmra.mrb[38].mxu1 %vm1354_vm1, %v24303_v21 }
 0x834   : > { %19115 = vmatprep.mubr.msk.f32.mxu1 %vm1354_vm1, %v24305_v60 }
 0x837   : > { %19116 = vmatmul.mubr.msk.f32.gmra.mrb[40].mxu1 %vm1354_vm1, %v24311_v6 }
 0x838   : > { %19118 = vmatprep.mubr.msk.f32.mxu1 %vm1354_vm1, %v24313_v45 }
 0x83b   : > { %19119 = vmatmul.mubr.msk.f32.gmra.mrb[42].mxu1 %vm1354_vm1, %v24319_v1 }
 0x83c   : > { %19121 = vmatprep.mubr.msk.f32.mxu1 %vm1354_vm1, %v24321_v46 }
 0x83f   : > { %19122 = vmatmul.mubr.msk.f32.gmra.mrb[44].mxu1 %vm1354_vm1, %v24327_v55 }
 0x840   : > { %19124 = vmatprep.mubr.msk.f32.mxu1 %vm1354_vm1, %v24329_v23 }
 0x843   : > { %19125 = vmatmul.mubr.msk.f32.gmra.mrb[46].mxu1 %vm1354_vm1, %v24335_v27 }
 0x844   : > { %19127 = vmatprep.mubr.msk.f32.mxu1 %vm1354_vm1, %v24337_v53 }
 0x847   : > { %19128 = vmatmul.mubr.msk.f32.gmra.mrb[48].mxu1 %vm1354_vm1, %v24343_v29 }
 0x848   : > { %19130 = vmatprep.mubr.msk.f32.mxu1 %vm1354_vm1, %v24345_v38  ;;  %v26391_v38 = vld [vmem:[#allocation61_spill] sm:$0xff] }
 0x84b   : > { %19131 = vmatmul.mubr.msk.f32.gmra.mrb[50].mxu1 %vm1354_vm1, %v24351_v39  ;;  %v26388_v39 = vld [vmem:[#allocation3_spill] sm:$0xff] }
 0x84c   : > { %19133 = vmatprep.mubr.msk.f32.mxu1 %vm1354_vm1, %v24353_v43  ;;  %v24377_v43 = vld [vmem:[#allocation2 + $0x1f8] sm:$0xff] }
 0x84d   : > { %26375 = vst [vmem:[#allocation40_spill] sm:$0xff] %v24377_v43 }
 0x84f   : > { %19134 = vmatmul.mubr.msk.f32.gmra.mrb[52].mxu1 %vm1354_vm1, %v24359_v42  ;;  %v24385_v42 = vld [vmem:[#allocation2 + $0x208] sm:$0xff] }
 0x850   : > { %19136 = vmatprep.mubr.msk.f32.mxu1 %vm1354_vm1, %v24361_v16  ;;  %v24383_v16 = vld [vmem:[#allocation2 + $0x200] sm:$0xff]  ;;  %26377 = vst [vmem:[#allocation51_spill] sm:$0xff] %v24385_v42 }
 0x851   : > { %26376 = vst [vmem:[#allocation41_spill] sm:$0xff] %v24383_v16 }
 0x853   : > { %19137 = vmatmul.mubr.msk.f32.gmra.mrb[54].mxu1 %vm1354_vm1, %v24367_v0  ;;  %v24393_v0 = vld [vmem:[#allocation2 + $0x218] sm:$0xff] }
 0x854   : > { %19139 = vmatprep.mubr.msk.f32.mxu1 %vm1354_vm1, %v24369_v8  ;;  %v24391_v8 = vld [vmem:[#allocation2 + $0x210] sm:$0xff]  ;;  %26379 = vst [vmem:[#allocation53_spill] sm:$0xff] %v24393_v0 }
 0x855   : > { %26378 = vst [vmem:[#allocation52_spill] sm:$0xff] %v24391_v8 }
 0x857   : > { %19140 = vmatmul.mubr.msk.f32.gmra.mrb[56].mxu1 %vm1354_vm1, %v24375_v20  ;;  %v26381_v20 = vld [vmem:[#allocation54_spill] sm:$0xff] }
 0x858   : > { %19142 = vmatprep.mubr.msk.f32.mxu1 %vm1354_vm1, %v24377_v43  ;;  %v24399_v43 = vld [vmem:[#allocation2 + $0x220] sm:$0xff] }
 0x859   : > { %26380 = vst [vmem:[#allocation72_spill] sm:$0xff] %v24399_v43 }
 0x85b   : > { %19143 = vmatmul.mubr.msk.f32.gmra.mrb[58].mxu1 %vm1354_vm1, %v24383_v16  ;;  %v26382_v16 = vld [vmem:[#allocation55_spill] sm:$0xff] }
 0x85c   : > { %19145 = vmatprep.mubr.msk.f32.mxu1 %vm1354_vm1, %v24385_v42  ;;  %v24410_v42 = vld [vmem:[%s25898_s5 + $0x1c] sm:$0xf] }
 0x85f   : > { %19146 = vmatmul.mubr.msk.f32.gmra.mrb[60].mxu1 %vm1354_vm1, %v24391_v8  ;;  %v26387_v8 = vld [vmem:[#allocation60_spill] sm:$0xff] }
 0x860   : > { %19148 = vmatprep.mubr.msk.f32.mxu1 %vm1354_vm1, %v24393_v0  ;;  %v26383_v0 = vld [vmem:[#allocation56_spill] sm:$0xff] }
 0x863   : > { %19149 = vmatmul.mubr.msk.f32.gmra.mrb[62].mxu1 %vm1354_vm1, %v24399_v43  ;;  %v26384_v43 = vld [vmem:[#allocation57_spill] sm:$0xff] }
 0x864   : > { %19153 = vmatprep.mubr.msk.f32.mxu1 %vm1354_vm1, %v26381_v20  ;;  %v26385_v20 = vld [vmem:[#allocation58_spill] sm:$0xff] }
 0x867   : > { %19154 = vmatmul.mubr.msk.f32.vlgmr.msra.gmra.mrb[0].mxu1 %vm1354_vm1, %v26382_v16  ;;  %v26386_v16 = vld [vmem:[#allocation59_spill] sm:$0xff] }
 0x868   : > { %19250 = vmatpush3.msk.msra.mxu1 %vm1547_vm0, %v24155_v4  ;;  %19156 = vmatprep.mubr.msk.f32.mxu1 %vm1354_vm1, %v26383_v0  ;;  %v26389_v4 = vld [vmem:[#allocation4_spill] sm:$0xff]  ;;  %v26390_v0 = vld [vmem:[#allocation5_spill] sm:$0xff] }
 0x869   : > { %19347 = vmatprep.subr.msk.mxu1 %vm1547_vm0, %v24410_v42 }
 0x86b   : > { %19157 = vmatmul.mubr.msk.f32.gmra.mrb[2].mxu1 %vm1354_vm1, %v26384_v43  ;;  %v26392_v43 = vld [vmem:[#allocation62_spill] sm:$0xff] }
 0x86c   : > { %19159 = vmatprep.mubr.msk.f32.mxu1 %vm1354_vm1, %v26385_v20  ;;  %v26393_v20 = vld [vmem:[#allocation63_spill] sm:$0xff] }
 0x86f   : > { %19160 = vmatmul.mubr.msk.f32.gmra.mrb[4].mxu1 %vm1354_vm1, %v26386_v16  ;;  %v26394_v16 = vld [vmem:[#allocation64_spill] sm:$0xff] }
 0x870   : > { %19162 = vmatprep.mubr.msk.f32.mxu1 %vm1354_vm1, %v26387_v8  ;;  %v26395_v8 = vld [vmem:[#allocation65_spill] sm:$0xff] }
 0x873   : > { %19163 = vmatmul.mubr.msk.f32.gmra.mrb[6].mxu1 %vm1354_vm1, %v26388_v39  ;;  %v26396_v39 = vld [vmem:[#allocation66_spill] sm:$0xff] }
 0x874   : > { %19165 = vmatprep.mubr.msk.f32.mxu1 %vm1354_vm1, %v26389_v4  ;;  %v26397_v4 = vld [vmem:[#allocation67_spill] sm:$0xff] }
 0x877   : > { %19166 = vmatmul.mubr.msk.f32.gmra.mrb[8].mxu1 %vm1354_vm1, %v26390_v0  ;;  %v26398_v0 = vld [vmem:[#allocation68_spill] sm:$0xff] }
 0x878   : > { %19168 = vmatprep.mubr.msk.f32.mxu1 %vm1354_vm1, %v26391_v38  ;;  %v26399_v38 = vld [vmem:[#allocation69_spill] sm:$0xff] }
 0x87b   : > { %19169 = vmatmul.mubr.msk.f32.gmra.mrb[10].mxu1 %vm1354_vm1, %v26392_v43  ;;  %v26400_v43 = vld [vmem:[#allocation70_spill] sm:$0xff] }
 0x87c   : > { %19171 = vmatprep.mubr.msk.f32.mxu1 %vm1354_vm1, %v26393_v20  ;;  %v26401_v20 = vld [vmem:[#allocation71_spill] sm:$0xff] }
 0x87f   : > { %19172 = vmatmul.mubr.msk.f32.gmra.mrb[12].mxu1 %vm1354_vm1, %v26394_v16  ;;  %v26402_v16 = vld [vmem:[#allocation6_spill] sm:$0xff] }
 0x880   : > { %19174 = vmatprep.mubr.msk.f32.mxu1 %vm1354_vm1, %v26395_v8  ;;  %v26403_v8 = vld [vmem:[#allocation8_spill] sm:$0xff] }
 0x883   : > { %19175 = vmatmul.mubr.msk.f32.gmra.mrb[14].mxu1 %vm1354_vm1, %v26396_v39  ;;  %v26404_v39 = vld [vmem:[#allocation7_spill] sm:$0xff] }
 0x884   : > { %19177 = vmatprep.mubr.msk.f32.mxu1 %vm1354_vm1, %v26397_v4  ;;  %v26405_v4 = vld [vmem:[#allocation10_spill] sm:$0xff] }
 0x887   : > { %19178 = vmatmul.mubr.msk.f32.gmra.mrb[16].mxu1 %vm1354_vm1, %v26398_v0  ;;  %v26406_v0 = vld [vmem:[#allocation9_spill] sm:$0xff] }
 0x888   : > { %19180 = vmatprep.mubr.msk.f32.mxu1 %vm1354_vm1, %v26399_v38  ;;  %v26407_v38 = vld [vmem:[#allocation12_spill] sm:$0xff] }
 0x88b   : > { %19181 = vmatmul.mubr.msk.f32.gmra.mrb[18].mxu1 %vm1354_vm1, %v26400_v43  ;;  %v26408_v43 = vld [vmem:[#allocation11_spill] sm:$0xff] }
 0x88c   : > { %19183 = vmatprep.mubr.msk.f32.mxu1 %vm1354_vm1, %v26401_v20  ;;  %v26409_v20 = vld [vmem:[#allocation14_spill] sm:$0xff] }
 0x88f   : > { %19184 = vmatmul.mubr.msk.f32.gmra.mrb[20].mxu1 %vm1354_vm1, %v26402_v16  ;;  %v26410_v16 = vld [vmem:[#allocation13_spill] sm:$0xff] }
 0x890   : > { %19186 = vmatprep.mubr.msk.f32.mxu1 %vm1354_vm1, %v26403_v8  ;;  %v26411_v8 = vld [vmem:[#allocation16_spill] sm:$0xff] }
 0x893   : > { %19187 = vmatmul.mubr.msk.f32.gmra.mrb[22].mxu1 %vm1354_vm1, %v26404_v39  ;;  %v26412_v39 = vld [vmem:[#allocation15_spill] sm:$0xff] }
 0x894   : > { %19189 = vmatprep.mubr.msk.f32.mxu1 %vm1354_vm1, %v26405_v4  ;;  %v26413_v4 = vld [vmem:[#allocation18_spill] sm:$0xff] }
 0x897   : > { %19190 = vmatmul.mubr.msk.f32.gmra.mrb[24].mxu1 %vm1354_vm1, %v26406_v0  ;;  %v26414_v0 = vld [vmem:[#allocation17_spill] sm:$0xff] }
 0x898   : > { %19192 = vmatprep.mubr.msk.f32.mxu1 %vm1354_vm1, %v26407_v38  ;;  %v26415_v38 = vld [vmem:[#allocation20_spill] sm:$0xff] }
 0x89b   : > { %19193 = vmatmul.mubr.msk.f32.gmra.mrb[26].mxu1 %vm1354_vm1, %v26408_v43  ;;  %v26416_v43 = vld [vmem:[#allocation19_spill] sm:$0xff] }
 0x89c   : > { %19195 = vmatprep.mubr.msk.f32.mxu1 %vm1354_vm1, %v26409_v20  ;;  %v26417_v20 = vld [vmem:[#allocation22_spill] sm:$0xff] }
 0x89f   : > { %19196 = vmatmul.mubr.msk.f32.gmra.mrb[28].mxu1 %vm1354_vm1, %v26410_v16  ;;  %v26418_v16 = vld [vmem:[#allocation21_spill] sm:$0xff] }
 0x8a0   : > { %19198 = vmatprep.mubr.msk.f32.mxu1 %vm1354_vm1, %v26411_v8  ;;  %v26419_v8 = vld [vmem:[#allocation24_spill] sm:$0xff] }
 0x8a3   : > { %19199 = vmatmul.mubr.msk.f32.gmra.mrb[30].mxu1 %vm1354_vm1, %v26412_v39  ;;  %v26420_v39 = vld [vmem:[#allocation23_spill] sm:$0xff] }
 0x8a4   : > { %19201 = vmatprep.mubr.msk.f32.mxu1 %vm1354_vm1, %v26413_v4  ;;  %v26421_v4 = vld [vmem:[#allocation26_spill] sm:$0xff] }
 0x8a7   : > { %19202 = vmatmul.mubr.msk.f32.gmra.mrb[32].mxu1 %vm1354_vm1, %v26414_v0  ;;  %v26422_v0 = vld [vmem:[#allocation25_spill] sm:$0xff] }
 0x8a8   : > { %19204 = vmatprep.mubr.msk.f32.mxu1 %vm1354_vm1, %v26415_v38  ;;  %v26423_v38 = vld [vmem:[#allocation27_spill] sm:$0xff] }
 0x8ab   : > { %19205 = vmatmul.mubr.msk.f32.gmra.mrb[34].mxu1 %vm1354_vm1, %v26416_v43  ;;  %v26424_v43 = vld [vmem:[#allocation28_spill] sm:$0xff] }
 0x8ac   : > { %19207 = vmatprep.mubr.msk.f32.mxu1 %vm1354_vm1, %v26417_v20  ;;  %v26425_v20 = vld [vmem:[#allocation30_spill] sm:$0xff] }
 0x8af   : > { %19208 = vmatmul.mubr.msk.f32.gmra.mrb[36].mxu1 %vm1354_vm1, %v26418_v16  ;;  %v26426_v16 = vld [vmem:[#allocation31_spill] sm:$0xff] }
 0x8b0   : > { %19210 = vmatprep.mubr.msk.f32.mxu1 %vm1354_vm1, %v26419_v8  ;;  %v26427_v8 = vld [vmem:[#allocation32_spill] sm:$0xff] }
 0x8b3   : > { %19211 = vmatmul.mubr.msk.f32.gmra.mrb[38].mxu1 %vm1354_vm1, %v26420_v39  ;;  %v26428_v39 = vld [vmem:[#allocation33_spill] sm:$0xff] }
 0x8b4   : > { %19213 = vmatprep.mubr.msk.f32.mxu1 %vm1354_vm1, %v26421_v4  ;;  %v26429_v4 = vld [vmem:[#allocation34_spill] sm:$0xff] }
 0x8b7   : > { %19214 = vmatmul.mubr.msk.f32.gmra.mrb[40].mxu1 %vm1354_vm1, %v26422_v0  ;;  %v26430_v0 = vld [vmem:[#allocation35_spill] sm:$0xff] }
 0x8b8   : > { %19216 = vmatprep.mubr.msk.f32.mxu1 %vm1354_vm1, %v26423_v38  ;;  %v26431_v38 = vld [vmem:[#allocation36_spill] sm:$0xff] }
 0x8bb   : > { %19217 = vmatmul.mubr.msk.f32.gmra.mrb[42].mxu1 %vm1354_vm1, %v26424_v43  ;;  %v26432_v43 = vld [vmem:[#allocation37_spill] sm:$0xff] }
 0x8bc   : > { %19219 = vmatprep.mubr.msk.f32.mxu1 %vm1354_vm1, %v26425_v20  ;;  %v26433_v20 = vld [vmem:[#allocation38_spill] sm:$0xff] }
 0x8bf   : > { %19220 = vmatmul.mubr.msk.f32.gmra.mrb[44].mxu1 %vm1354_vm1, %v26426_v16  ;;  %v26434_v16 = vld [vmem:[#allocation39_spill] sm:$0xff] }
 0x8c0   : > { %19222 = vmatprep.mubr.msk.f32.mxu1 %vm1354_vm1, %v26427_v8  ;;  %v26435_v8 = vld [vmem:[#allocation42_spill] sm:$0xff] }
 0x8c3   : > { %19223 = vmatmul.mubr.msk.f32.gmra.mrb[46].mxu1 %vm1354_vm1, %v26428_v39  ;;  %v24530_v39 = vld [vmem:[#allocation2 + $0x209] sm:$0xff] }
 0x8c4   : > { %19225 = vmatprep.mubr.msk.f32.mxu1 %vm1354_vm1, %v26429_v4  ;;  %v12451_v4 = vld [vmem:[#allocation2 + $0x57] sm:$0xff] }
 0x8c7   : > { %19226 = vmatmul.mubr.msk.f32.gmra.mrb[48].mxu1 %vm1354_vm1, %v26430_v0  ;;  %v24553_v0 = vld [vmem:[%s25898_s5 + $0x20] sm:$0xf] }
 0x8c8   : > { %19228 = vmatprep.mubr.msk.f32.mxu1 %vm1354_vm1, %v26431_v38  ;;  %v12452_v38 = vld [vmem:[#allocation2 + $0x5f] sm:$0xff] }
 0x8cb   : > { %19229 = vmatmul.mubr.msk.f32.gmra.mrb[50].mxu1 %vm1354_vm1, %v26432_v43  ;;  %v12453_v43 = vld [vmem:[#allocation2 + $0x67] sm:$0xff] }
 0x8cc   : > { %19231 = vmatprep.mubr.msk.f32.mxu1 %vm1354_vm1, %v26433_v20  ;;  %v12454_v20 = vld [vmem:[#allocation2 + $0x6f] sm:$0xff] }
 0x8cf   : > { %19232 = vmatmul.mubr.msk.f32.gmra.mrb[52].mxu1 %vm1354_vm1, %v23977_v44  ;;  %v24536_v44 = vld [vmem:[#allocation2 + $0x211] sm:$0xff] }
 0x8d0   : > { %19234 = vmatprep.mubr.msk.f32.mxu1 %vm1354_vm1, %v26434_v16  ;;  %v12455_v16 = vld [vmem:[#allocation2 + $0x77] sm:$0xff] }
 0x8d3   : > { %19235 = vmatmul.mubr.msk.f32.gmra.mrb[54].mxu1 %vm1354_vm1, %v23985_v2  ;;  %v24538_v2 = vld [vmem:[#allocation2 + $0x219] sm:$0xff] }
 0x8d4   : > { %19237 = vmatprep.mubr.msk.f32.mxu1 %vm1354_vm1, %v26435_v8  ;;  %v12456_v8 = vld [vmem:[#allocation2 + $0x7f] sm:$0xff] }
 0x8d7   : > { %19238 = vmatmul.mubr.msk.f32.gmra.mrb[56].mxu1 %vm1354_vm1, %v23993_v41  ;;  %v24544_v41 = vld [vmem:[#allocation2 + $0x221] sm:$0xff] }
 0x8d8   : > { %19240 = vmatprep.mubr.msk.f32.mxu1 %vm1354_vm1, %v23995_v15  ;;  %v12449_v15 = vld [vmem:[#allocation2 + $0x47] sm:$0xff] }
 0x8db   : > { %19241 = vmatmul.mubr.msk.f32.gmra.mrb[58].mxu1 %vm1354_vm1, %v24001_v10  ;;  %v12450_v10 = vld [vmem:[#allocation2 + $0x4f] sm:$0xff] }
 0x8dc   : > { %19243 = vmatprep.mubr.msk.f32.mxu1 %vm1354_vm1, %v24530_v39 }
 0x8df   : > { %19244 = vmatmul.mubr.msk.f32.gmra.mrb[60].mxu1 %vm1354_vm1, %v24536_v44 }
 0x8e0   : > { %19246 = vmatprep.mubr.msk.f32.mxu1 %vm1354_vm1, %v24538_v2 }
 0x8e3   : > { %19247 = vmatmul.mubr.msk.f32.gmra.mrb[62].mxu1 %vm1354_vm1, %v24544_v41 }
 0x8e4   : > { %19251 = vmatprep.mubr.msk.f32.mxu1 %vm1354_vm1, %v12449_v15  ;;  %v12457_v15 = vld [vmem:[#allocation2 + $0x87] sm:$0xff] }
 0x8e7   : > { %19252 = vmatmul.mubr.msk.f32.vlgmr.msra.gmra.mrb[0].mxu1 %vm1354_vm1, %v12450_v10  ;;  %v12459_v10 = vld [vmem:[#allocation2 + $0x97] sm:$0xff] }
 0x8e8   : > { %19348 = vmatpush3.msk.msra.mxu1 %vm1547_vm0, %v24410_v42  ;;  %19254 = vmatprep.mubr.msk.f32.mxu1 %vm1354_vm1, %v12451_v4  ;;  %v12458_v42 = vld [vmem:[#allocation2 + $0x8f] sm:$0xff]  ;;  %v12460_v4 = vld [vmem:[#allocation2 + $0x9f] sm:$0xff] }
 0x8e9   : > { %19445 = vmatprep.subr.msk.mxu1 %vm1547_vm0, %v24553_v0 }
 0x8eb   : > { %19255 = vmatmul.mubr.msk.f32.gmra.mrb[2].mxu1 %vm1354_vm1, %v12452_v38  ;;  %v12461_v38 = vld [vmem:[#allocation2 + $0xa7] sm:$0xff] }
 0x8ec   : > { %19257 = vmatprep.mubr.msk.f32.mxu1 %vm1354_vm1, %v12453_v43  ;;  %v12462_v43 = vld [vmem:[#allocation2 + $0xaf] sm:$0xff] }
 0x8ef   : > { %19258 = vmatmul.mubr.msk.f32.gmra.mrb[4].mxu1 %vm1354_vm1, %v12454_v20  ;;  %v12463_v20 = vld [vmem:[#allocation2 + $0xb7] sm:$0xff] }
 0x8f0   : > { %19260 = vmatprep.mubr.msk.f32.mxu1 %vm1354_vm1, %v12455_v16  ;;  %v12464_v16 = vld [vmem:[#allocation2 + $0xbf] sm:$0xff] }
 0x8f3   : > { %19261 = vmatmul.mubr.msk.f32.gmra.mrb[6].mxu1 %vm1354_vm1, %v12456_v8  ;;  %v12465_v8 = vld [vmem:[#allocation2 + $0xc7] sm:$0xff] }
 0x8f4   : > { %19263 = vmatprep.mubr.msk.f32.mxu1 %vm1354_vm1, %v12457_v15  ;;  %v12466_v15 = vld [vmem:[#allocation2 + $0xcf] sm:$0xff] }
 0x8f7   : > { %19264 = vmatmul.mubr.msk.f32.gmra.mrb[8].mxu1 %vm1354_vm1, %v12458_v42  ;;  %v12467_v42 = vld [vmem:[#allocation2 + $0xd7] sm:$0xff] }
 0x8f8   : > { %19266 = vmatprep.mubr.msk.f32.mxu1 %vm1354_vm1, %v12459_v10  ;;  %v12468_v10 = vld [vmem:[#allocation2 + $0xdf] sm:$0xff] }
 0x8fb   : > { %19267 = vmatmul.mubr.msk.f32.gmra.mrb[10].mxu1 %vm1354_vm1, %v12460_v4  ;;  %v12469_v4 = vld [vmem:[#allocation2 + $0xe7] sm:$0xff] }
 0x8fc   : > { %19269 = vmatprep.mubr.msk.f32.mxu1 %vm1354_vm1, %v12461_v38  ;;  %v12470_v38 = vld [vmem:[#allocation2 + $0xef] sm:$0xff] }
 0x8ff   : > { %19270 = vmatmul.mubr.msk.f32.gmra.mrb[12].mxu1 %vm1354_vm1, %v12462_v43  ;;  %v12471_v43 = vld [vmem:[#allocation2 + $0xf7] sm:$0xff] }
 0x900   : > { %19272 = vmatprep.mubr.msk.f32.mxu1 %vm1354_vm1, %v12463_v20  ;;  %v12472_v20 = vld [vmem:[#allocation2 + $0xff] sm:$0xff] }
 0x903   : > { %19273 = vmatmul.mubr.msk.f32.gmra.mrb[14].mxu1 %vm1354_vm1, %v12464_v16  ;;  %v12473_v16 = vld [vmem:[#allocation2 + $0x107] sm:$0xff] }
 0x904   : > { %19275 = vmatprep.mubr.msk.f32.mxu1 %vm1354_vm1, %v12465_v8  ;;  %v12474_v8 = vld [vmem:[#allocation2 + $0x10f] sm:$0xff] }
 0x907   : > { %19276 = vmatmul.mubr.msk.f32.gmra.mrb[16].mxu1 %vm1354_vm1, %v12466_v15  ;;  %v12475_v15 = vld [vmem:[#allocation2 + $0x117] sm:$0xff] }
 0x908   : > { %19278 = vmatprep.mubr.msk.f32.mxu1 %vm1354_vm1, %v12467_v42  ;;  %v12476_v42 = vld [vmem:[#allocation2 + $0x11f] sm:$0xff] }
 0x90b   : > { %19279 = vmatmul.mubr.msk.f32.gmra.mrb[18].mxu1 %vm1354_vm1, %v12468_v10  ;;  %v12477_v10 = vld [vmem:[#allocation2 + $0x127] sm:$0xff] }
 0x90c   : > { %19281 = vmatprep.mubr.msk.f32.mxu1 %vm1354_vm1, %v12469_v4  ;;  %v12478_v4 = vld [vmem:[#allocation2 + $0x12f] sm:$0xff] }
 0x90f   : > { %19282 = vmatmul.mubr.msk.f32.gmra.mrb[20].mxu1 %vm1354_vm1, %v12470_v38  ;;  %v12479_v38 = vld [vmem:[#allocation2 + $0x137] sm:$0xff] }
 0x910   : > { %19284 = vmatprep.mubr.msk.f32.mxu1 %vm1354_vm1, %v12471_v43  ;;  %v12480_v43 = vld [vmem:[#allocation2 + $0x13f] sm:$0xff] }
 0x913   : > { %19285 = vmatmul.mubr.msk.f32.gmra.mrb[22].mxu1 %vm1354_vm1, %v12472_v20  ;;  %v12481_v20 = vld [vmem:[#allocation2 + $0x147] sm:$0xff] }
 0x914   : > { %19287 = vmatprep.mubr.msk.f32.mxu1 %vm1354_vm1, %v12473_v16  ;;  %v12482_v16 = vld [vmem:[#allocation2 + $0x14f] sm:$0xff] }
 0x917   : > { %19288 = vmatmul.mubr.msk.f32.gmra.mrb[24].mxu1 %vm1354_vm1, %v12474_v8  ;;  %v12483_v8 = vld [vmem:[#allocation2 + $0x157] sm:$0xff] }
 0x918   : > { %19290 = vmatprep.mubr.msk.f32.mxu1 %vm1354_vm1, %v12475_v15  ;;  %v12484_v15 = vld [vmem:[#allocation2 + $0x15f] sm:$0xff] }
 0x91b   : > { %19291 = vmatmul.mubr.msk.f32.gmra.mrb[26].mxu1 %vm1354_vm1, %v12476_v42  ;;  %v12485_v42 = vld [vmem:[#allocation2 + $0x167] sm:$0xff] }
 0x91c   : > { %19293 = vmatprep.mubr.msk.f32.mxu1 %vm1354_vm1, %v12477_v10  ;;  %v12486_v10 = vld [vmem:[#allocation2 + $0x16f] sm:$0xff] }
 0x91f   : > { %19294 = vmatmul.mubr.msk.f32.gmra.mrb[28].mxu1 %vm1354_vm1, %v12478_v4  ;;  %v12487_v4 = vld [vmem:[#allocation2 + $0x177] sm:$0xff] }
 0x920   : > { %19296 = vmatprep.mubr.msk.f32.mxu1 %vm1354_vm1, %v12479_v38  ;;  %v12488_v38 = vld [vmem:[#allocation2 + $0x17f] sm:$0xff] }
 0x923   : > { %19297 = vmatmul.mubr.msk.f32.gmra.mrb[30].mxu1 %vm1354_vm1, %v12480_v43  ;;  %v12489_v43 = vld [vmem:[#allocation2 + $0x187] sm:$0xff] }
 0x924   : > { %19299 = vmatprep.mubr.msk.f32.mxu1 %vm1354_vm1, %v12481_v20  ;;  %v12490_v20 = vld [vmem:[#allocation2 + $0x18f] sm:$0xff] }
 0x927   : > { %19300 = vmatmul.mubr.msk.f32.gmra.mrb[32].mxu1 %vm1354_vm1, %v12482_v16  ;;  %v12491_v16 = vld [vmem:[#allocation2 + $0x197] sm:$0xff] }
 0x928   : > { %19302 = vmatprep.mubr.msk.f32.mxu1 %vm1354_vm1, %v12483_v8  ;;  %v12492_v8 = vld [vmem:[#allocation2 + $0x19f] sm:$0xff] }
 0x92b   : > { %19303 = vmatmul.mubr.msk.f32.gmra.mrb[34].mxu1 %vm1354_vm1, %v12484_v15  ;;  %v12493_v15 = vld [vmem:[#allocation2 + $0x1a7] sm:$0xff] }
 0x92c   : > { %19305 = vmatprep.mubr.msk.f32.mxu1 %vm1354_vm1, %v12485_v42  ;;  %v12494_v42 = vld [vmem:[#allocation2 + $0x1af] sm:$0xff] }
 0x92f   : > { %19306 = vmatmul.mubr.msk.f32.gmra.mrb[36].mxu1 %vm1354_vm1, %v12486_v10  ;;  %v12495_v10 = vld [vmem:[#allocation2 + $0x1b7] sm:$0xff] }
 0x930   : > { %19308 = vmatprep.mubr.msk.f32.mxu1 %vm1354_vm1, %v12487_v4  ;;  %v12496_v4 = vld [vmem:[#allocation2 + $0x1bf] sm:$0xff] }
 0x933   : > { %19309 = vmatmul.mubr.msk.f32.gmra.mrb[38].mxu1 %vm1354_vm1, %v12488_v38  ;;  %v12497_v38 = vld [vmem:[#allocation2 + $0x1c7] sm:$0xff] }
 0x934   : > { %19311 = vmatprep.mubr.msk.f32.mxu1 %vm1354_vm1, %v12489_v43  ;;  %v12498_v43 = vld [vmem:[#allocation2 + $0x1cf] sm:$0xff] }
 0x937   : > { %19312 = vmatmul.mubr.msk.f32.gmra.mrb[40].mxu1 %vm1354_vm1, %v12490_v20  ;;  %v12499_v20 = vld [vmem:[#allocation2 + $0x1d7] sm:$0xff] }
 0x938   : > { %19314 = vmatprep.mubr.msk.f32.mxu1 %vm1354_vm1, %v12491_v16  ;;  %v12500_v16 = vld [vmem:[#allocation2 + $0x1df] sm:$0xff] }
 0x93b   : > { %19315 = vmatmul.mubr.msk.f32.gmra.mrb[42].mxu1 %vm1354_vm1, %v12492_v8  ;;  %v12501_v8 = vld [vmem:[#allocation2 + $0x1e7] sm:$0xff] }
 0x93c   : > { %19317 = vmatprep.mubr.msk.f32.mxu1 %vm1354_vm1, %v12493_v15  ;;  %v12502_v15 = vld [vmem:[#allocation2 + $0x1ef] sm:$0xff] }
 0x93f   : > { %19318 = vmatmul.mubr.msk.f32.gmra.mrb[44].mxu1 %vm1354_vm1, %v12494_v42  ;;  %v12503_v42 = vld [vmem:[#allocation2 + $0x1f7] sm:$0xff] }
 0x940   : > { %19320 = vmatprep.mubr.msk.f32.mxu1 %vm1354_vm1, %v12495_v10  ;;  %v12504_v10 = vld [vmem:[#allocation2 + $0x1ff] sm:$0xff] }
 0x943   : > { %19321 = vmatmul.mubr.msk.f32.gmra.mrb[46].mxu1 %vm1354_vm1, %v12496_v4  ;;  %v12509_v4 = vld [vmem:[#allocation2 + $0x227] sm:$0xff] }
 0x944   : > { %19323 = vmatprep.mubr.msk.f32.mxu1 %vm1354_vm1, %v12497_v38  ;;  %v12510_v38 = vld [vmem:[#allocation2 + $0x22f] sm:$0xff] }
 0x947   : > { %19324 = vmatmul.mubr.msk.f32.gmra.mrb[48].mxu1 %vm1354_vm1, %v12498_v43  ;;  %v12511_v43 = vld [vmem:[#allocation2 + $0x237] sm:$0xff] }
 0x948   : > { %19326 = vmatprep.mubr.msk.f32.mxu1 %vm1354_vm1, %v12499_v20  ;;  %v12512_v20 = vld [vmem:[#allocation2 + $0x23f] sm:$0xff] }
 0x94b   : > { %19327 = vmatmul.mubr.msk.f32.gmra.mrb[50].mxu1 %vm1354_vm1, %v12500_v16  ;;  %v13902_v16 = vld [vmem:[#allocation2 + $0x151] sm:$0xff] }
 0x94c   : > { %19329 = vmatprep.mubr.msk.f32.mxu1 %vm1354_vm1, %v12501_v8  ;;  %v13903_v8 = vld [vmem:[#allocation2 + $0x159] sm:$0xff] }
 0x94f   : > { %19330 = vmatmul.mubr.msk.f32.gmra.mrb[52].mxu1 %vm1354_vm1, %v12502_v15  ;;  %v13904_v15 = vld [vmem:[#allocation2 + $0x161] sm:$0xff] }
 0x950   : > { %19332 = vmatprep.mubr.msk.f32.mxu1 %vm1354_vm1, %v12503_v42  ;;  %v13905_v42 = vld [vmem:[#allocation2 + $0x169] sm:$0xff] }
 0x953   : > { %19333 = vmatmul.mubr.msk.f32.gmra.mrb[54].mxu1 %vm1354_vm1, %v12504_v10  ;;  %v13906_v10 = vld [vmem:[#allocation2 + $0x171] sm:$0xff] }
 0x954   : > { %19335 = vmatprep.mubr.msk.f32.mxu1 %vm1354_vm1, %v24132_v52  ;;  %v26436_v52 = vld [vmem:[#allocation43_spill] sm:$0xff] }
 0x957   : > { %19336 = vmatmul.mubr.msk.f32.gmra.mrb[56].mxu1 %vm1354_vm1, %v24138_v50  ;;  %v26437_v50 = vld [vmem:[#allocation44_spill] sm:$0xff] }
 0x958   : > { %19338 = vmatprep.mubr.msk.f32.mxu1 %vm1354_vm1, %v24140_v57  ;;  %v26438_v57 = vld [vmem:[#allocation45_spill] sm:$0xff] }
 0x95b   : > { %19339 = vmatmul.mubr.msk.f32.gmra.mrb[58].mxu1 %vm1354_vm1, %v24146_v56  ;;  %v26439_v56 = vld [vmem:[#allocation46_spill] sm:$0xff] }
 0x95c   : > { %19341 = vmatprep.mubr.msk.f32.mxu1 %vm1354_vm1, %v12509_v4  ;;  %v13907_v4 = vld [vmem:[#allocation2 + $0x179] sm:$0xff] }
 0x95f   : > { %19342 = vmatmul.mubr.msk.f32.gmra.mrb[60].mxu1 %vm1354_vm1, %v12510_v38  ;;  %v13908_v38 = vld [vmem:[#allocation2 + $0x181] sm:$0xff] }
 0x960   : > { %19344 = vmatprep.mubr.msk.f32.mxu1 %vm1354_vm1, %v12511_v43  ;;  %v13909_v43 = vld [vmem:[#allocation2 + $0x189] sm:$0xff] }
 0x963   : > { %19345 = vmatmul.mubr.msk.f32.gmra.mrb[62].mxu1 %vm1354_vm1, %v12512_v20  ;;  %v13910_v20 = vld [vmem:[#allocation2 + $0x191] sm:$0xff] }
 0x964   : > { %19349 = vmatprep.mubr.msk.f32.mxu1 %vm1354_vm1, %v24160_v13  ;;  %v26440_v13 = vld [vmem:[#allocation47_spill] sm:$0xff] }
 0x967   : > { %19350 = vmatmul.mubr.msk.f32.vlgmr.msra.gmra.mrb[0].mxu1 %vm1354_vm1, %v24167_v25  ;;  %v26441_v25 = vld [vmem:[#allocation48_spill] sm:$0xff] }
 0x968   : > { %19446 = vmatpush3.msk.msra.mxu1 %vm1547_vm0, %v24553_v0  ;;  %19352 = vmatprep.mubr.msk.f32.mxu1 %vm1354_vm1, %v24169_v24  ;;  %v26442_v24 = vld [vmem:[#allocation49_spill] sm:$0xff]  ;;  %v13901_v0 = vld [vmem:[#allocation2 + $0x149] sm:$0xff] }
 0x96b   : > { %19353 = vmatmul.mubr.msk.f32.gmra.mrb[2].mxu1 %vm1354_vm1, %v24175_v7  ;;  %v26443_v7 = vld [vmem:[#allocation50_spill] sm:$0xff] }
 0x96c   : > { %19355 = vmatprep.mubr.msk.f32.mxu1 %vm1354_vm1, %v24177_v32  ;;  %v26444_v32 = vld [vmem:[#allocation40_spill] sm:$0xff] }
 0x96f   : > { %19356 = vmatmul.mubr.msk.f32.gmra.mrb[4].mxu1 %vm1354_vm1, %v24183_v37  ;;  %v26445_v37 = vld [vmem:[#allocation41_spill] sm:$0xff] }
 0x970   : > { %19358 = vmatprep.mubr.msk.f32.mxu1 %vm1354_vm1, %v24185_v36  ;;  %v26446_v36 = vld [vmem:[#allocation51_spill] sm:$0xff] }
 0x973   : > { %19359 = vmatmul.mubr.msk.f32.gmra.mrb[6].mxu1 %vm1354_vm1, %v24191_v51  ;;  %v26447_v51 = vld [vmem:[#allocation52_spill] sm:$0xff] }
 0x974   : > { %19361 = vmatprep.mubr.msk.f32.mxu1 %vm1354_vm1, %v24193_v48  ;;  %v26448_v48 = vld [vmem:[#allocation53_spill] sm:$0xff] }
 0x977   : > { %19362 = vmatmul.mubr.msk.f32.gmra.mrb[8].mxu1 %vm1354_vm1, %v24199_v59  ;;  %v13219_v59 = vld [vmem:[#allocation2 + $0x228] sm:$0xff] }
 0x978   : > { %19364 = vmatprep.mubr.msk.f32.mxu1 %vm1354_vm1, %v24201_v58  ;;  %v26449_v58 = vld [vmem:[#allocation72_spill] sm:$0xff] }
 0x97b   : > { %19365 = vmatmul.mubr.msk.f32.gmra.mrb[10].mxu1 %vm1354_vm1, %v24207_v18  ;;  %v13220_v18 = vld [vmem:[#allocation2 + $0x230] sm:$0xff] }
 0x97c   : > { %19367 = vmatprep.mubr.msk.f32.mxu1 %vm1354_vm1, %v24209_v11  ;;  %v13221_v11 = vld [vmem:[#allocation2 + $0x238] sm:$0xff] }
 0x97f   : > { %19368 = vmatmul.mubr.msk.f32.gmra.mrb[12].mxu1 %vm1354_vm1, %v24215_v12  ;;  %v13222_v12 = vld [vmem:[#allocation2 + $0x240] sm:$0xff] }
 0x980   : > { %19370 = vmatprep.mubr.msk.f32.mxu1 %vm1354_vm1, %v24217_v5  ;;  %v13869_v5 = vld [vmem:[#allocation2 + $0x49] sm:$0xff] }
 0x983   : > { %19371 = vmatmul.mubr.msk.f32.gmra.mrb[14].mxu1 %vm1354_vm1, %v24223_v30  ;;  %v13870_v30 = vld [vmem:[#allocation2 + $0x51] sm:$0xff] }
 0x984   : > { %19373 = vmatprep.mubr.msk.f32.mxu1 %vm1354_vm1, %v24225_v28  ;;  %v13871_v28 = vld [vmem:[#allocation2 + $0x59] sm:$0xff] }
 0x987   : > { %19374 = vmatmul.mubr.msk.f32.gmra.mrb[16].mxu1 %vm1354_vm1, %v24231_v35  ;;  %v13872_v35 = vld [vmem:[#allocation2 + $0x61] sm:$0xff] }
 0x988   : > { %19376 = vmatprep.mubr.msk.f32.mxu1 %vm1354_vm1, %v24233_v34  ;;  %v13873_v34 = vld [vmem:[#allocation2 + $0x69] sm:$0xff] }
 0x98b   : > { %19377 = vmatmul.mubr.msk.f32.gmra.mrb[18].mxu1 %vm1354_vm1, %v24239_v54  ;;  %v13874_v54 = vld [vmem:[#allocation2 + $0x71] sm:$0xff] }
 0x98c   : > { %19379 = vmatprep.mubr.msk.f32.mxu1 %vm1354_vm1, %v24241_v49  ;;  %v13875_v49 = vld [vmem:[#allocation2 + $0x79] sm:$0xff] }
 0x98f   : > { %19380 = vmatmul.mubr.msk.f32.gmra.mrb[20].mxu1 %vm1354_vm1, %v24247_v63  ;;  %v13876_v63 = vld [vmem:[#allocation2 + $0x81] sm:$0xff] }
 0x990   : > { %19382 = vmatprep.mubr.msk.f32.mxu1 %vm1354_vm1, %v24249_v62  ;;  %v13877_v62 = vld [vmem:[#allocation2 + $0x89] sm:$0xff] }
 0x993   : > { %19383 = vmatmul.mubr.msk.f32.gmra.mrb[22].mxu1 %vm1354_vm1, %v24255_v22  ;;  %v13878_v22 = vld [vmem:[#allocation2 + $0x91] sm:$0xff] }
 0x994   : > { %19385 = vmatprep.mubr.msk.f32.mxu1 %vm1354_vm1, %v24257_v19  ;;  %v13879_v19 = vld [vmem:[#allocation2 + $0x99] sm:$0xff] }
 0x997   : > { %19386 = vmatmul.mubr.msk.f32.gmra.mrb[24].mxu1 %vm1354_vm1, %v24263_v9  ;;  %v13880_v9 = vld [vmem:[#allocation2 + $0xa1] sm:$0xff] }
 0x998   : > { %19388 = vmatprep.mubr.msk.f32.mxu1 %vm1354_vm1, %v24265_v31  ;;  %v13881_v31 = vld [vmem:[#allocation2 + $0xa9] sm:$0xff] }
 0x99b   : > { %19389 = vmatmul.mubr.msk.f32.gmra.mrb[26].mxu1 %vm1354_vm1, %v24271_v47  ;;  %v13882_v47 = vld [vmem:[#allocation2 + $0xb1] sm:$0xff] }
 0x99c   : > { %19391 = vmatprep.mubr.msk.f32.mxu1 %vm1354_vm1, %v24273_v26  ;;  %v13883_v26 = vld [vmem:[#allocation2 + $0xb9] sm:$0xff] }
 0x99f   : > { %19392 = vmatmul.mubr.msk.f32.gmra.mrb[28].mxu1 %vm1354_vm1, %v24279_v14  ;;  %v13884_v14 = vld [vmem:[#allocation2 + $0xc1] sm:$0xff] }
 0x9a0   : > { %19394 = vmatprep.mubr.msk.f32.mxu1 %vm1354_vm1, %v24281_v40  ;;  %v13885_v40 = vld [vmem:[#allocation2 + $0xc9] sm:$0xff] }
 0x9a3   : > { %19395 = vmatmul.mubr.msk.f32.gmra.mrb[30].mxu1 %vm1354_vm1, %v24287_v33  ;;  %v13886_v33 = vld [vmem:[#allocation2 + $0xd1] sm:$0xff] }
 0x9a4   : > { %19397 = vmatprep.mubr.msk.f32.mxu1 %vm1354_vm1, %v24289_v17  ;;  %v13887_v17 = vld [vmem:[#allocation2 + $0xd9] sm:$0xff] }
 0x9a7   : > { %19398 = vmatmul.mubr.msk.f32.gmra.mrb[32].mxu1 %vm1354_vm1, %v24295_v3  ;;  %v13888_v3 = vld [vmem:[#allocation2 + $0xe1] sm:$0xff] }
 0x9a8   : > { %19400 = vmatprep.mubr.msk.f32.mxu1 %vm1354_vm1, %v24297_v61  ;;  %v13889_v61 = vld [vmem:[#allocation2 + $0xe9] sm:$0xff] }
 0x9ab   : > { %19401 = vmatmul.mubr.msk.f32.gmra.mrb[34].mxu1 %vm1354_vm1, %v24303_v21  ;;  %v13890_v21 = vld [vmem:[#allocation2 + $0xf1] sm:$0xff] }
 0x9ac   : > { %19403 = vmatprep.mubr.msk.f32.mxu1 %vm1354_vm1, %v24305_v60  ;;  %v13891_v60 = vld [vmem:[#allocation2 + $0xf9] sm:$0xff] }
 0x9af   : > { %19404 = vmatmul.mubr.msk.f32.gmra.mrb[36].mxu1 %vm1354_vm1, %v24311_v6  ;;  %v13892_v6 = vld [vmem:[#allocation2 + $0x101] sm:$0xff] }
 0x9b0   : > { %19406 = vmatprep.mubr.msk.f32.mxu1 %vm1354_vm1, %v24313_v45  ;;  %v13893_v45 = vld [vmem:[#allocation2 + $0x109] sm:$0xff] }
 0x9b3   : > { %19407 = vmatmul.mubr.msk.f32.gmra.mrb[38].mxu1 %vm1354_vm1, %v24319_v1  ;;  %v13894_v1 = vld [vmem:[#allocation2 + $0x111] sm:$0xff] }
 0x9b4   : > { %19409 = vmatprep.mubr.msk.f32.mxu1 %vm1354_vm1, %v24321_v46  ;;  %v13895_v46 = vld [vmem:[#allocation2 + $0x119] sm:$0xff] }
 0x9b7   : > { %19410 = vmatmul.mubr.msk.f32.gmra.mrb[40].mxu1 %vm1354_vm1, %v24327_v55  ;;  %v13896_v55 = vld [vmem:[#allocation2 + $0x121] sm:$0xff] }
 0x9b8   : > { %19412 = vmatprep.mubr.msk.f32.mxu1 %vm1354_vm1, %v24329_v23  ;;  %v13897_v23 = vld [vmem:[#allocation2 + $0x129] sm:$0xff] }
 0x9bb   : > { %19413 = vmatmul.mubr.msk.f32.gmra.mrb[42].mxu1 %vm1354_vm1, %v24335_v27  ;;  %v13898_v27 = vld [vmem:[#allocation2 + $0x131] sm:$0xff] }
 0x9bc   : > { %19415 = vmatprep.mubr.msk.f32.mxu1 %vm1354_vm1, %v24337_v53  ;;  %v13899_v53 = vld [vmem:[#allocation2 + $0x139] sm:$0xff] }
 0x9bf   : > { %19416 = vmatmul.mubr.msk.f32.gmra.mrb[44].mxu1 %vm1354_vm1, %v24343_v29  ;;  %v13900_v29 = vld [vmem:[#allocation2 + $0x141] sm:$0xff] }
 0x9c0   : > { %19418 = vmatprep.mubr.msk.f32.mxu1 %vm1354_vm1, %v26436_v52  ;;  %v13911_v52 = vld [vmem:[#allocation2 + $0x199] sm:$0xff] }
 0x9c3   : > { %19419 = vmatmul.mubr.msk.f32.gmra.mrb[46].mxu1 %vm1354_vm1, %v26437_v50  ;;  %v13912_v50 = vld [vmem:[#allocation2 + $0x1a1] sm:$0xff] }
 0x9c4   : > { %19421 = vmatprep.mubr.msk.f32.mxu1 %vm1354_vm1, %v26438_v57  ;;  %v13913_v57 = vld [vmem:[#allocation2 + $0x1a9] sm:$0xff] }
 0x9c7   : > { %19422 = vmatmul.mubr.msk.f32.gmra.mrb[48].mxu1 %vm1354_vm1, %v26439_v56  ;;  %v13914_v56 = vld [vmem:[#allocation2 + $0x1b1] sm:$0xff] }
 0x9c8   : > { %19424 = vmatprep.mubr.msk.f32.mxu1 %vm1354_vm1, %v26440_v13  ;;  %v13915_v13 = vld [vmem:[#allocation2 + $0x1b9] sm:$0xff] }
 0x9cb   : > { %19425 = vmatmul.mubr.msk.f32.gmra.mrb[50].mxu1 %vm1354_vm1, %v26441_v25  ;;  %v13916_v25 = vld [vmem:[#allocation2 + $0x1c1] sm:$0xff] }
 0x9cc   : > { %19427 = vmatprep.mubr.msk.f32.mxu1 %vm1354_vm1, %v26442_v24  ;;  %v13917_v24 = vld [vmem:[#allocation2 + $0x1c9] sm:$0xff] }
 0x9cf   : > { %19428 = vmatmul.mubr.msk.f32.gmra.mrb[52].mxu1 %vm1354_vm1, %v26443_v7  ;;  %v13918_v7 = vld [vmem:[#allocation2 + $0x1d1] sm:$0xff] }
 0x9d0   : > { %19430 = vmatprep.mubr.msk.f32.mxu1 %vm1354_vm1, %v26444_v32  ;;  %v13919_v32 = vld [vmem:[#allocation2 + $0x1d9] sm:$0xff] }
 0x9d3   : > { %19431 = vmatmul.mubr.msk.f32.gmra.mrb[54].mxu1 %vm1354_vm1, %v26445_v37  ;;  %v13920_v37 = vld [vmem:[#allocation2 + $0x1e1] sm:$0xff] }
 0x9d4   : > { %19433 = vmatprep.mubr.msk.f32.mxu1 %vm1354_vm1, %v26446_v36  ;;  %v13921_v36 = vld [vmem:[#allocation2 + $0x1e9] sm:$0xff] }
 0x9d7   : > { %19434 = vmatmul.mubr.msk.f32.gmra.mrb[56].mxu1 %vm1354_vm1, %v26447_v51  ;;  %v13922_v51 = vld [vmem:[#allocation2 + $0x1f1] sm:$0xff] }
 0x9d8   : > { %19436 = vmatprep.mubr.msk.f32.mxu1 %vm1354_vm1, %v26448_v48  ;;  %v13923_v48 = vld [vmem:[#allocation2 + $0x1f9] sm:$0xff] }
 0x9db   : > { %19437 = vmatmul.mubr.msk.f32.gmra.mrb[58].mxu1 %vm1354_vm1, %v26449_v58  ;;  %v13929_v58 = vld [vmem:[#allocation2 + $0x229] sm:$0xff] }
 0x9dc   : > { %19439 = vmatprep.mubr.msk.f32.mxu1 %vm1354_vm1, %v13219_v59  ;;  %v13924_v59 = vld [vmem:[#allocation2 + $0x201] sm:$0xff] }
 0x9df   : > { %19440 = vmatmul.mubr.msk.f32.gmra.mrb[60].mxu1 %vm1354_vm1, %v13220_v18  ;;  %v13930_v18 = vld [vmem:[#allocation2 + $0x231] sm:$0xff] }
 0x9e0   : > { %19442 = vmatprep.mubr.msk.f32.mxu1 %vm1354_vm1, %v13221_v11  ;;  %v13931_v11 = vld [vmem:[#allocation2 + $0x239] sm:$0xff] }
 0x9e3   : > { %19443 = vmatmul.mubr.msk.f32.gmra.mrb[62].mxu1 %vm1354_vm1, %v13222_v12  ;;  %v13932_v12 = vld [vmem:[#allocation2 + $0x241] sm:$0xff] }
 0x9e4   : > { %19447 = vmatprep.mubr.msk.f32.mxu1 %vm1354_vm1, %v13869_v5 }
 0x9e7   : > { %19448 = vmatmul.mubr.msk.f32.vlgmr.msra.gmra.mrb[0].mxu1 %vm1354_vm1, %v13870_v30 }
 0x9e8   : > { %19450 = vmatprep.mubr.msk.f32.mxu1 %vm1354_vm1, %v13871_v28 }
 0x9eb   : > { %19451 = vmatmul.mubr.msk.f32.gmra.mrb[2].mxu1 %vm1354_vm1, %v13872_v35 }
 0x9ec   : > { %19453 = vmatprep.mubr.msk.f32.mxu1 %vm1354_vm1, %v13873_v34 }
 0x9ef   : > { %19454 = vmatmul.mubr.msk.f32.gmra.mrb[4].mxu1 %vm1354_vm1, %v13874_v54 }
 0x9f0   : > { %19456 = vmatprep.mubr.msk.f32.mxu1 %vm1354_vm1, %v13875_v49 }
 0x9f3   : > { %19457 = vmatmul.mubr.msk.f32.gmra.mrb[6].mxu1 %vm1354_vm1, %v13876_v63 }
 0x9f4   : > { %19459 = vmatprep.mubr.msk.f32.mxu1 %vm1354_vm1, %v13877_v62 }
 0x9f7   : > { %19460 = vmatmul.mubr.msk.f32.gmra.mrb[8].mxu1 %vm1354_vm1, %v13878_v22 }
 0x9f8   : > { %19462 = vmatprep.mubr.msk.f32.mxu1 %vm1354_vm1, %v13879_v19 }
 0x9fb   : > { %19463 = vmatmul.mubr.msk.f32.gmra.mrb[10].mxu1 %vm1354_vm1, %v13880_v9 }
 0x9fc   : > { %19465 = vmatprep.mubr.msk.f32.mxu1 %vm1354_vm1, %v13881_v31 }
 0x9ff   : > { %19466 = vmatmul.mubr.msk.f32.gmra.mrb[12].mxu1 %vm1354_vm1, %v13882_v47 }
 0xa00   : > { %19468 = vmatprep.mubr.msk.f32.mxu1 %vm1354_vm1, %v13883_v26 }
 0xa03   : > { %19469 = vmatmul.mubr.msk.f32.gmra.mrb[14].mxu1 %vm1354_vm1, %v13884_v14 }
 0xa04   : > { %19471 = vmatprep.mubr.msk.f32.mxu1 %vm1354_vm1, %v13885_v40 }
 0xa07   : > { %19472 = vmatmul.mubr.msk.f32.gmra.mrb[16].mxu1 %vm1354_vm1, %v13886_v33 }
 0xa08   : > { %19474 = vmatprep.mubr.msk.f32.mxu1 %vm1354_vm1, %v13887_v17 }
 0xa0b   : > { %19475 = vmatmul.mubr.msk.f32.gmra.mrb[18].mxu1 %vm1354_vm1, %v13888_v3 }
 0xa0c   : > { %19477 = vmatprep.mubr.msk.f32.mxu1 %vm1354_vm1, %v13889_v61 }
 0xa0f   : > { %19478 = vmatmul.mubr.msk.f32.gmra.mrb[20].mxu1 %vm1354_vm1, %v13890_v21 }
 0xa10   : > { %19480 = vmatprep.mubr.msk.f32.mxu1 %vm1354_vm1, %v13891_v60 }
 0xa13   : > { %19481 = vmatmul.mubr.msk.f32.gmra.mrb[22].mxu1 %vm1354_vm1, %v13892_v6 }
 0xa14   : > { %19483 = vmatprep.mubr.msk.f32.mxu1 %vm1354_vm1, %v13893_v45 }
 0xa17   : > { %19484 = vmatmul.mubr.msk.f32.gmra.mrb[24].mxu1 %vm1354_vm1, %v13894_v1 }
 0xa18   : > { %19486 = vmatprep.mubr.msk.f32.mxu1 %vm1354_vm1, %v13895_v46 }
 0xa1b   : > { %19487 = vmatmul.mubr.msk.f32.gmra.mrb[26].mxu1 %vm1354_vm1, %v13896_v55 }
 0xa1c   : > { %19489 = vmatprep.mubr.msk.f32.mxu1 %vm1354_vm1, %v13897_v23 }
 0xa1f   : > { %19490 = vmatmul.mubr.msk.f32.gmra.mrb[28].mxu1 %vm1354_vm1, %v13898_v27 }
 0xa20   : > { %19492 = vmatprep.mubr.msk.f32.mxu1 %vm1354_vm1, %v13899_v53 }
 0xa23   : > { %19493 = vmatmul.mubr.msk.f32.gmra.mrb[30].mxu1 %vm1354_vm1, %v13900_v29 }
 0xa24   : > { %19495 = vmatprep.mubr.msk.f32.mxu1 %vm1354_vm1, %v13901_v0 }
 0xa27   : > { %19496 = vmatmul.mubr.msk.f32.gmra.mrb[32].mxu1 %vm1354_vm1, %v13902_v16 }
 0xa28   : > { %19498 = vmatprep.mubr.msk.f32.mxu1 %vm1354_vm1, %v13903_v8 }
 0xa2b   : > { %19499 = vmatmul.mubr.msk.f32.gmra.mrb[34].mxu1 %vm1354_vm1, %v13904_v15 }
 0xa2c   : > { %19501 = vmatprep.mubr.msk.f32.mxu1 %vm1354_vm1, %v13905_v42 }
 0xa2f   : > { %19502 = vmatmul.mubr.msk.f32.gmra.mrb[36].mxu1 %vm1354_vm1, %v13906_v10 }
 0xa30   : > { %19504 = vmatprep.mubr.msk.f32.mxu1 %vm1354_vm1, %v13907_v4 }
 0xa33   : > { %19505 = vmatmul.mubr.msk.f32.gmra.mrb[38].mxu1 %vm1354_vm1, %v13908_v38 }
 0xa34   : > { %19507 = vmatprep.mubr.msk.f32.mxu1 %vm1354_vm1, %v13909_v43 }
 0xa37   : > { %19508 = vmatmul.mubr.msk.f32.gmra.mrb[40].mxu1 %vm1354_vm1, %v13910_v20 }
 0xa38   : > { %19510 = vmatprep.mubr.msk.f32.mxu1 %vm1354_vm1, %v13911_v52 }
 0xa3b   : > { %19511 = vmatmul.mubr.msk.f32.gmra.mrb[42].mxu1 %vm1354_vm1, %v13912_v50 }
 0xa3c   : > { %19513 = vmatprep.mubr.msk.f32.mxu1 %vm1354_vm1, %v13913_v57 }
 0xa3f   : > { %19514 = vmatmul.mubr.msk.f32.gmra.mrb[44].mxu1 %vm1354_vm1, %v13914_v56 }
 0xa40   : > { %19516 = vmatprep.mubr.msk.f32.mxu1 %vm1354_vm1, %v13915_v13 }
 0xa43   : > { %19517 = vmatmul.mubr.msk.f32.gmra.mrb[46].mxu1 %vm1354_vm1, %v13916_v25 }
 0xa44   : > { %19519 = vmatprep.mubr.msk.f32.mxu1 %vm1354_vm1, %v13917_v24 }
 0xa47   : > { %19520 = vmatmul.mubr.msk.f32.gmra.mrb[48].mxu1 %vm1354_vm1, %v13918_v7 }
 0xa48   : > { %19522 = vmatprep.mubr.msk.f32.mxu1 %vm1354_vm1, %v13919_v32 }
 0xa4b   : > { %19523 = vmatmul.mubr.msk.f32.gmra.mrb[50].mxu1 %vm1354_vm1, %v13920_v37 }
 0xa4c   : > { %19525 = vmatprep.mubr.msk.f32.mxu1 %vm1354_vm1, %v13921_v36 }
 0xa4f   : > { %19526 = vmatmul.mubr.msk.f32.gmra.mrb[52].mxu1 %vm1354_vm1, %v13922_v51 }
 0xa50   : > { %19528 = vmatprep.mubr.msk.f32.mxu1 %vm1354_vm1, %v13923_v48 }
 0xa53   : > { %19529 = vmatmul.mubr.msk.f32.gmra.mrb[54].mxu1 %vm1354_vm1, %v13924_v59 }
 0xa54   : > { %19531 = vmatprep.mubr.msk.f32.mxu1 %vm1354_vm1, %v24530_v39 }
 0xa57   : > { %19532 = vmatmul.mubr.msk.f32.gmra.mrb[56].mxu1 %vm1354_vm1, %v24536_v44 }
 0xa58   : > { %19534 = vmatprep.mubr.msk.f32.mxu1 %vm1354_vm1, %v24538_v2 }
 0xa5b   : > { %19535 = vmatmul.mubr.msk.f32.gmra.mrb[58].mxu1 %vm1354_vm1, %v24544_v41 }
 0xa5c   : > { %19537 = vmatprep.mubr.msk.f32.mxu1 %vm1354_vm1, %v13929_v58 }
 0xa5f   : > { %19538 = vmatmul.mubr.msk.f32.gmra.mrb[60].mxu1 %vm1354_vm1, %v13930_v18 }
 0xa60   : > { %19540 = vmatprep.mubr.msk.f32.mxu1 %vm1354_vm1, %v13931_v11 }
 0xa63   : > { %19541 = vmatmul.mubr.msk.f32.gmra.mrb[62].mxu1 %vm1354_vm1, %v13932_v12 }
 0xaba   : > { %v24819_v39 = vpop.f32.mrb[0].mxu1 }
 0xabb   : > { %v14644_v44 = vsel %vm1354_vm1, %v24819_v39, 0.0  ;;  %v14778_v2 = vmul.f32 %v24819_v39, %v24819_v39  ;;  %v24825_v41 = vpop.f32.mrb[1].mxu1 }
 0xabc   : > { %v14643_v5 = vsel %vm1354_vm1, %v24825_v41, 0.0  ;;  %v14777_v30 = vmul.f32 %v24825_v41, %v24825_v41 }
 0xabd   : > { %v14842_v28 = vsel %vm1354_vm1, %v14778_v2, 0.0  ;;  %v14645_v35 = vadd.f32 %v14644_v44, %v14643_v5 }
 0xabe   : > { %v14841_v34 = vsel %vm1354_vm1, %v14777_v30, 0.0  ;;  %v24833_v54 = vpop.f32.mrb[2].mxu1 }
 0xabf   : > { %v14843_v49 = vadd.f32 %v14842_v28, %v14841_v34  ;;  %v24835_v63 = vpop.f32.mrb[3].mxu1 }
 0xac2   : > { %v24837_v62 = vpop.f32.mrb[4].mxu1 }
 0xac3   : > { %v24839_v22 = vpop.f32.mrb[5].mxu1  ;;  %v14782_v19 = vmul.f32 %v24837_v62, %v24837_v62  ;;  %v14652_v26 = vsel %vm1354_vm1, %v24837_v62, 0.0 }
 0xac4   : > { %v14650_v9 = vsel %vm1354_vm1, %v24839_v22, 0.0  ;;  %v14781_v31 = vmul.f32 %v24839_v22, %v24839_v22 }
 0xac5   : > { %v14651_v47 = vadd.f32 %v14650_v9, %v14645_v35  ;;  %v14850_v61 = vsel %vm1354_vm1, %v14782_v19, 0.0 }
 0xac6   : > { %v14848_v14 = vsel %vm1354_vm1, %v14781_v31, 0.0  ;;  %v24850_v40 = vpop.f32.mrb[6].mxu1 }
 0xac7   : > { %v14849_v33 = vadd.f32 %v14848_v14, %v14843_v49  ;;  %v24852_v17 = vpop.f32.mrb[7].mxu1  ;;  %v14653_v3 = vadd.f32 %v14652_v26, %v14651_v47 }
 0xac9   : > { %v14851_v21 = vadd.f32 %v14850_v61, %v14849_v33 }
 0xaca   : > { %v24855_v60 = vpop.f32.mrb[8].mxu1 }
 0xacb   : > { %v24857_v6 = vpop.f32.mrb[9].mxu1  ;;  %v14786_v45 = vmul.f32 %v24855_v60, %v24855_v60  ;;  %v14660_v23 = vsel %vm1354_vm1, %v24855_v60, 0.0 }
 0xacc   : > { %v14658_v1 = vsel %vm1354_vm1, %v24857_v6, 0.0  ;;  %v14785_v46 = vmul.f32 %v24857_v6, %v24857_v6 }
 0xacd   : > { %v14659_v55 = vadd.f32 %v14658_v1, %v14653_v3  ;;  %v14858_v8 = vsel %vm1354_vm1, %v14786_v45, 0.0 }
 0xace   : > { %v14856_v27 = vsel %vm1354_vm1, %v14785_v46, 0.0  ;;  %v24868_v53 = vpop.f32.mrb[10].mxu1 }
 0xacf   : > { %v14857_v29 = vadd.f32 %v14856_v27, %v14851_v21  ;;  %v24870_v0 = vpop.f32.mrb[11].mxu1  ;;  %v14661_v16 = vadd.f32 %v14660_v23, %v14659_v55 }
 0xad1   : > { %v14859_v15 = vadd.f32 %v14858_v8, %v14857_v29 }
 0xad2   : > { %v24873_v42 = vpop.f32.mrb[12].mxu1 }
 0xad3   : > { %v24875_v10 = vpop.f32.mrb[13].mxu1  ;;  %v14790_v4 = vmul.f32 %v24873_v42, %v24873_v42  ;;  %v14668_v52 = vsel %vm1354_vm1, %v24873_v42, 0.0 }
 0xad4   : > { %v14666_v38 = vsel %vm1354_vm1, %v24875_v10, 0.0  ;;  %v14789_v43 = vmul.f32 %v24875_v10, %v24875_v10 }
 0xad5   : > { %v14667_v20 = vadd.f32 %v14666_v38, %v14661_v16  ;;  %v14866_v24 = vsel %vm1354_vm1, %v14790_v4, 0.0 }
 0xad6   : > { %v14864_v50 = vsel %vm1354_vm1, %v14789_v43, 0.0  ;;  %v24886_v57 = vpop.f32.mrb[14].mxu1 }
 0xad7   : > { %v14865_v56 = vadd.f32 %v14864_v50, %v14859_v15  ;;  %v24888_v13 = vpop.f32.mrb[15].mxu1  ;;  %v14669_v25 = vadd.f32 %v14668_v52, %v14667_v20 }
 0xad9   : > { %v14867_v7 = vadd.f32 %v14866_v24, %v14865_v56 }
 0xada   : > { %v24891_v32 = vpop.f32.mrb[16].mxu1 }
 0xadb   : > { %v24893_v37 = vpop.f32.mrb[17].mxu1  ;;  %v14794_v36 = vmul.f32 %v24891_v32, %v24891_v32  ;;  %v14676_v58 = vsel %vm1354_vm1, %v24891_v32, 0.0 }
 0xadc   : > { %v14674_v51 = vsel %vm1354_vm1, %v24893_v37, 0.0  ;;  %v14793_v48 = vmul.f32 %v24893_v37, %v24893_v37 }
 0xadd   : > { %v14675_v59 = vadd.f32 %v14674_v51, %v14669_v25  ;;  %v14874_v5 = vsel %vm1354_vm1, %v14794_v36, 0.0 }
 0xade   : > { %v14872_v18 = vsel %vm1354_vm1, %v14793_v48, 0.0  ;;  %v24904_v11 = vpop.f32.mrb[18].mxu1 }
 0xadf   : > { %v14873_v12 = vadd.f32 %v14872_v18, %v14867_v7  ;;  %v24906_v44 = vpop.f32.mrb[19].mxu1  ;;  %v14677_v2 = vadd.f32 %v14676_v58, %v14675_v59 }
 0xae1   : > { %v14875_v30 = vadd.f32 %v14874_v5, %v14873_v12 }
 0xae2   : > { %v24909_v28 = vpop.f32.mrb[20].mxu1 }
 0xae3   : > { %v24911_v35 = vpop.f32.mrb[21].mxu1  ;;  %v14798_v34 = vmul.f32 %v24909_v28, %v24909_v28  ;;  %v14684_v31 = vsel %vm1354_vm1, %v24909_v28, 0.0 }
 0xae4   : > { %v14682_v49 = vsel %vm1354_vm1, %v24911_v35, 0.0  ;;  %v14797_v19 = vmul.f32 %v24911_v35, %v24911_v35 }
 0xae5   : > { %v14683_v9 = vadd.f32 %v14682_v49, %v14677_v2  ;;  %v14882_v61 = vsel %vm1354_vm1, %v14798_v34, 0.0 }
 0xae6   : > { %v14880_v47 = vsel %vm1354_vm1, %v14797_v19, 0.0  ;;  %v24922_v26 = vpop.f32.mrb[22].mxu1 }
 0xae7   : > { %v14881_v14 = vadd.f32 %v14880_v47, %v14875_v30  ;;  %v24924_v33 = vpop.f32.mrb[23].mxu1  ;;  %v14685_v3 = vadd.f32 %v14684_v31, %v14683_v9 }
 0xae9   : > { %v14883_v21 = vadd.f32 %v14882_v61, %v14881_v14 }
 0xaea   : > { %v24927_v45 = vpop.f32.mrb[24].mxu1 }
 0xaeb   : > { %v24929_v1 = vpop.f32.mrb[25].mxu1  ;;  %v14802_v46 = vmul.f32 %v24927_v45, %v24927_v45  ;;  %v14692_v29 = vsel %vm1354_vm1, %v24927_v45, 0.0 }
 0xaec   : > { %v14690_v55 = vsel %vm1354_vm1, %v24929_v1, 0.0  ;;  %v14801_v23 = vmul.f32 %v24929_v1, %v24929_v1 }
 0xaed   : > { %v14691_v27 = vadd.f32 %v14690_v55, %v14685_v3  ;;  %v14890_v43 = vsel %vm1354_vm1, %v14802_v46, 0.0 }
 0xaee   : > { %v14888_v16 = vsel %vm1354_vm1, %v14801_v23, 0.0  ;;  %v24940_v8 = vpop.f32.mrb[26].mxu1 }
 0xaef   : > { %v14889_v15 = vadd.f32 %v14888_v16, %v14883_v21  ;;  %v24942_v4 = vpop.f32.mrb[27].mxu1  ;;  %v14693_v38 = vadd.f32 %v14692_v29, %v14691_v27 }
 0xaf1   : > { %v14891_v20 = vadd.f32 %v14890_v43, %v14889_v15 }
 0xaf2   : > { %v24945_v52 = vpop.f32.mrb[28].mxu1 }
 0xaf3   : > { %v24947_v50 = vpop.f32.mrb[29].mxu1  ;;  %v14806_v56 = vmul.f32 %v24945_v52, %v24945_v52  ;;  %v14700_v36 = vsel %vm1354_vm1, %v24945_v52, 0.0 }
 0xaf4   : > { %v14698_v25 = vsel %vm1354_vm1, %v24947_v50, 0.0  ;;  %v14805_v24 = vmul.f32 %v24947_v50, %v24947_v50 }
 0xaf5   : > { %v14699_v7 = vadd.f32 %v14698_v25, %v14693_v38  ;;  %v14898_v12 = vsel %vm1354_vm1, %v14806_v56, 0.0 }
 0xaf6   : > { %v14896_v51 = vsel %vm1354_vm1, %v14805_v24, 0.0  ;;  %v24958_v48 = vpop.f32.mrb[30].mxu1 }
 0xaf7   : > { %v14897_v59 = vadd.f32 %v14896_v51, %v14891_v20  ;;  %v24960_v58 = vpop.f32.mrb[31].mxu1  ;;  %v14701_v18 = vadd.f32 %v14700_v36, %v14699_v7 }
 0xaf9   : > { %v14899_v2 = vadd.f32 %v14898_v12, %v14897_v59 }
 0xafa   : > { %v24963_v5 = vpop.f32.mrb[32].mxu1 }
 0xafb   : > { %v24965_v30 = vpop.f32.mrb[33].mxu1  ;;  %v14810_v34 = vmul.f32 %v24963_v5, %v24963_v5  ;;  %v14708_v31 = vsel %vm1354_vm1, %v24963_v5, 0.0 }
 0xafc   : > { %v14706_v49 = vsel %vm1354_vm1, %v24965_v30, 0.0  ;;  %v14809_v19 = vmul.f32 %v24965_v30, %v24965_v30 }
 0xafd   : > { %v14707_v9 = vadd.f32 %v14706_v49, %v14701_v18  ;;  %v14906_v46 = vsel %vm1354_vm1, %v14810_v34, 0.0 }
 0xafe   : > { %v14904_v47 = vsel %vm1354_vm1, %v14809_v19, 0.0  ;;  %v24976_v14 = vpop.f32.mrb[34].mxu1 }
 0xaff   : > { %v14905_v3 = vadd.f32 %v14904_v47, %v14899_v2  ;;  %v24978_v61 = vpop.f32.mrb[35].mxu1  ;;  %v14709_v21 = vadd.f32 %v14708_v31, %v14707_v9 }
 0xb01   : > { %v14907_v55 = vadd.f32 %v14906_v46, %v14905_v3 }
 0xb02   : > { %v24981_v23 = vpop.f32.mrb[36].mxu1 }
 0xb03   : > { %v24983_v27 = vpop.f32.mrb[37].mxu1  ;;  %v14814_v29 = vmul.f32 %v24981_v23, %v24981_v23  ;;  %v14716_v43 = vsel %vm1354_vm1, %v24981_v23, 0.0 }
 0xb04   : > { %v14714_v16 = vsel %vm1354_vm1, %v24983_v27, 0.0  ;;  %v14813_v15 = vmul.f32 %v24983_v27, %v24983_v27 }
 0xb05   : > { %v14715_v38 = vadd.f32 %v14714_v16, %v14709_v21  ;;  %v14914_v36 = vsel %vm1354_vm1, %v14814_v29, 0.0 }
 0xb06   : > { %v14912_v20 = vsel %vm1354_vm1, %v14813_v15, 0.0  ;;  %v24994_v56 = vpop.f32.mrb[38].mxu1 }
 0xb07   : > { %v14913_v25 = vadd.f32 %v14912_v20, %v14907_v55  ;;  %v24996_v24 = vpop.f32.mrb[39].mxu1  ;;  %v14717_v7 = vadd.f32 %v14716_v43, %v14715_v38 }
 0xb09   : > { %v14915_v51 = vadd.f32 %v14914_v36, %v14913_v25 }
 0xb0a   : > { %v24999_v59 = vpop.f32.mrb[40].mxu1 }
 0xb0b   : > { %26450 = vst [vmem:[#allocation54_spill] sm:$0xff] %v24999_v59  ;;  %v25001_v18 = vpop.f32.mrb[41].mxu1  ;;  %v14818_v12 = vmul.f32 %v24999_v59, %v24999_v59  ;;  %v14724_v19 = vsel %vm1354_vm1, %v24999_v59, 0.0 }
 0xb0c   : > { %v14722_v2 = vsel %vm1354_vm1, %v25001_v18, 0.0  ;;  %v14817_v34 = vmul.f32 %v25001_v18, %v25001_v18 }
 0xb0d   : > { %v14723_v49 = vadd.f32 %v14722_v2, %v14717_v7  ;;  %v14922_v46 = vsel %vm1354_vm1, %v14818_v12, 0.0 }
 0xb0e   : > { %v14920_v9 = vsel %vm1354_vm1, %v14817_v34, 0.0  ;;  %v25012_v31 = vpop.f32.mrb[42].mxu1 }
 0xb0f   : > { %26451 = vst [vmem:[#allocation55_spill] sm:$0xff] %v25012_v31  ;;  %v14921_v47 = vadd.f32 %v14920_v9, %v14915_v51  ;;  %v25014_v3 = vpop.f32.mrb[43].mxu1  ;;  %v14725_v21 = vadd.f32 %v14724_v19, %v14723_v49 }
 0xb10   : > { %26452 = vst [vmem:[#allocation56_spill] sm:$0xff] %v25014_v3 }
 0xb11   : > { %v14923_v55 = vadd.f32 %v14922_v46, %v14921_v47 }
 0xb12   : > { %v25017_v29 = vpop.f32.mrb[44].mxu1 }
 0xb13   : > { %26453 = vst [vmem:[#allocation57_spill] sm:$0xff] %v25017_v29  ;;  %v25019_v16 = vpop.f32.mrb[45].mxu1  ;;  %v14822_v15 = vmul.f32 %v25017_v29, %v25017_v29  ;;  %v14732_v25 = vsel %vm1354_vm1, %v25017_v29, 0.0 }
 0xb14   : > { %26454 = vst [vmem:[#allocation58_spill] sm:$0xff] %v25019_v16  ;;  %v14730_v38 = vsel %vm1354_vm1, %v25019_v16, 0.0  ;;  %v14821_v43 = vmul.f32 %v25019_v16, %v25019_v16 }
 0xb15   : > { %v14731_v20 = vadd.f32 %v14730_v38, %v14725_v21  ;;  %v14930_v34 = vsel %vm1354_vm1, %v14822_v15, 0.0 }
 0xb16   : > { %v14928_v7 = vsel %vm1354_vm1, %v14821_v43, 0.0  ;;  %v25030_v36 = vpop.f32.mrb[46].mxu1 }
 0xb17   : > { %26455 = vst [vmem:[#allocation59_spill] sm:$0xff] %v25030_v36  ;;  %v14929_v51 = vadd.f32 %v14928_v7, %v14923_v55  ;;  %v25032_v12 = vpop.f32.mrb[47].mxu1  ;;  %v14733_v2 = vadd.f32 %v14732_v25, %v14731_v20 }
 0xb18   : > { %26456 = vst [vmem:[#allocation60_spill] sm:$0xff] %v25032_v12 }
 0xb19   : > { %v14931_v49 = vadd.f32 %v14930_v34, %v14929_v51 }
 0xb1a   : > { %v25035_v19 = vpop.f32.mrb[48].mxu1 }
 0xb1b   : > { %26457 = vst [vmem:[#allocation3_spill] sm:$0xff] %v25035_v19  ;;  %v25037_v9 = vpop.f32.mrb[49].mxu1  ;;  %v14826_v47 = vmul.f32 %v25035_v19, %v25035_v19  ;;  %v14740_v38 = vsel %vm1354_vm1, %v25035_v19, 0.0 }
 0xb1c   : > { %26458 = vst [vmem:[#allocation4_spill] sm:$0xff] %v25037_v9  ;;  %v14738_v21 = vsel %vm1354_vm1, %v25037_v9, 0.0  ;;  %v14825_v46 = vmul.f32 %v25037_v9, %v25037_v9 }
 0xb1d   : > { %v14739_v55 = vadd.f32 %v14738_v21, %v14733_v2  ;;  %v14938_v51 = vsel %vm1354_vm1, %v14826_v47, 0.0 }
 0xb1e   : > { %v14936_v15 = vsel %vm1354_vm1, %v14825_v46, 0.0  ;;  %v25048_v43 = vpop.f32.mrb[50].mxu1 }
 0xb1f   : > { %26459 = vst [vmem:[#allocation5_spill] sm:$0xff] %v25048_v43  ;;  %v14937_v20 = vadd.f32 %v14936_v15, %v14931_v49  ;;  %v25050_v25 = vpop.f32.mrb[51].mxu1  ;;  %v14741_v7 = vadd.f32 %v14740_v38, %v14739_v55 }
 0xb20   : > { %26460 = vst [vmem:[#allocation61_spill] sm:$0xff] %v25050_v25 }
 0xb21   : > { %v14939_v34 = vadd.f32 %v14938_v51, %v14937_v20 }
 0xb22   : > { %v25053_v36 = vpop.f32.mrb[52].mxu1 }
 0xb23   : > { %26461 = vst [vmem:[#allocation62_spill] sm:$0xff] %v25053_v36  ;;  %v25055_v12 = vpop.f32.mrb[53].mxu1  ;;  %v14830_v2 = vmul.f32 %v25053_v36, %v25053_v36  ;;  %v14748_v55 = vsel %vm1354_vm1, %v25053_v36, 0.0 }
 0xb24   : > { %26462 = vst [vmem:[#allocation63_spill] sm:$0xff] %v25055_v12  ;;  %v14746_v21 = vsel %vm1354_vm1, %v25055_v12, 0.0  ;;  %v14829_v46 = vmul.f32 %v25055_v12, %v25055_v12 }
 0xb25   : > { %v14747_v49 = vadd.f32 %v14746_v21, %v14741_v7  ;;  %v14946_v43 = vsel %vm1354_vm1, %v14830_v2, 0.0 }
 0xb26   : > { %v14944_v47 = vsel %vm1354_vm1, %v14829_v46, 0.0  ;;  %v25066_v38 = vpop.f32.mrb[54].mxu1 }
 0xb27   : > { %26463 = vst [vmem:[#allocation64_spill] sm:$0xff] %v25066_v38  ;;  %v14945_v15 = vadd.f32 %v14944_v47, %v14939_v34  ;;  %v25068_v20 = vpop.f32.mrb[55].mxu1  ;;  %v14749_v51 = vadd.f32 %v14748_v55, %v14747_v49 }
 0xb28   : > { %26464 = vst [vmem:[#allocation65_spill] sm:$0xff] %v25068_v20 }
 0xb29   : > { %v14947_v25 = vadd.f32 %v14946_v43, %v14945_v15 }
 0xb2a   : > { %v25071_v19 = vpop.f32.mrb[56].mxu1 }
 0xb2b   : > { %26465 = vst [vmem:[#allocation66_spill] sm:$0xff] %v25071_v19  ;;  %v25073_v9 = vpop.f32.mrb[57].mxu1  ;;  %v14834_v7 = vmul.f32 %v25071_v19, %v25071_v19  ;;  %v14756_v49 = vsel %vm1354_vm1, %v25071_v19, 0.0 }
 0xb2c   : > { %26466 = vst [vmem:[#allocation67_spill] sm:$0xff] %v25073_v9  ;;  %v14754_v21 = vsel %vm1354_vm1, %v25073_v9, 0.0  ;;  %v14833_v46 = vmul.f32 %v25073_v9, %v25073_v9 }
 0xb2d   : > { %v14755_v34 = vadd.f32 %v14754_v21, %v14749_v51  ;;  %v14954_v38 = vsel %vm1354_vm1, %v14834_v7, 0.0 }
 0xb2e   : > { %v14952_v2 = vsel %vm1354_vm1, %v14833_v46, 0.0  ;;  %v25084_v43 = vpop.f32.mrb[58].mxu1 }
 0xb2f   : > { %26467 = vst [vmem:[#allocation68_spill] sm:$0xff] %v25084_v43  ;;  %v14953_v55 = vadd.f32 %v14952_v2, %v14947_v25  ;;  %v25086_v47 = vpop.f32.mrb[59].mxu1  ;;  %v14757_v15 = vadd.f32 %v14756_v49, %v14755_v34 }
 0xb30   : > { %26468 = vst [vmem:[#allocation69_spill] sm:$0xff] %v25086_v47 }
 0xb31   : > { %v14955_v20 = vadd.f32 %v14954_v38, %v14953_v55 }
 0xb32   : > { %v25089_v36 = vpop.f32.mrb[60].mxu1 }
 0xb33   : > { %26469 = vst [vmem:[#allocation70_spill] sm:$0xff] %v25089_v36  ;;  %v25091_v12 = vpop.f32.mrb[61].mxu1  ;;  %v14838_v51 = vmul.f32 %v25089_v36, %v25089_v36  ;;  %v14764_v34 = vsel %vm1354_vm1, %v25089_v36, 0.0 }
 0xb34   : > { %26470 = vst [vmem:[#allocation71_spill] sm:$0xff] %v25091_v12  ;;  %v14762_v21 = vsel %vm1354_vm1, %v25091_v12, 0.0  ;;  %v14837_v46 = vmul.f32 %v25091_v12, %v25091_v12 }
 0xb35   : > { %v14763_v25 = vadd.f32 %v14762_v21, %v14757_v15  ;;  %v14962_v43 = vsel %vm1354_vm1, %v14838_v51, 0.0 }
 0xb36   : > { %v14960_v7 = vsel %vm1354_vm1, %v14837_v46, 0.0  ;;  %v25102_v38 = vpop.f32.mrb[62].mxu1 }
 0xb37   : > { %26471 = vst [vmem:[#allocation6_spill] sm:$0xff] %v25102_v38  ;;  %v14765_v49 = vadd.f32 %v14764_v34, %v14763_v25  ;;  %v14961_v2 = vadd.f32 %v14960_v7, %v14955_v20  ;;  %v25104_v55 = vpop.f32.mrb[63].mxu1 }
 0xb38   : > { %26472 = vst [vmem:[#allocation8_spill] sm:$0xff] %v25104_v55 }
 0xb39   : > { %v14770_v47 = vrot.slane %v14765_v49, 4  ;;  %v14963_v19 = vadd.f32 %v14962_v43, %v14961_v2  ;;  %v14978_v43 = vld [vmem:[%s25899_s6] sm:$0x1]  ;;  %v26475_v2 = vld [vmem:[#allocation56_spill] sm:$0xff] }
 0xb3b   : > { %v14771_v9 = vadd.f32 %v14770_v47, %v14765_v49  ;;  %v14968_v29 = vrot.slane %v14963_v19, 4  ;;  %v26474_v49 = vld [vmem:[#allocation54_spill] sm:$0xff] }
 0xb3d   : > { %v14772_v16 = vrot.slane %v14771_v9, 2  ;;  %v14969_v12 = vadd.f32 %v14968_v29, %v14963_v19 }
 0xb3f   : > { %v14773_v15 = vadd.f32 %v14772_v16, %v14771_v9  ;;  %v14970_v21 = vrot.slane %v14969_v12, 2  ;;  %v25113_v16 = vld [vmem:[%s25900_s7] sm:$0x1] }
 0xb41   : > { %v14774_v31 = vrot.slane %v14773_v15, 1  ;;  %v14971_v36 = vadd.f32 %v14970_v21, %v14969_v12  ;;  %v26478_v21 = vld [vmem:[#allocation57_spill] sm:$0xff] }
 0xb42   : > { %v26492_v12 = vld [vmem:[#allocation65_spill] sm:$0xff] }
 0xb43   : > { %v14775_v3 = vadd.f32 %v14774_v31, %v14773_v15  ;;  %v14972_v46 = vrot.slane %v14971_v36, 1  ;;  %v26477_v15 = vld [vmem:[#allocation58_spill] sm:$0xff] }
 0xb45   : > { %v14776_v59 = vmul.f32 0.00390625, %v14775_v3  ;;  %v14973_v38 = vadd.f32 %v14972_v46, %v14971_v36  ;;  %v26473_v3 = vld [vmem:[#allocation29_spill] sm:$0xff]  ;;  %v26479_v46 = vld [vmem:[#allocation60_spill] sm:$0xff] }
 0xb47   : > { %v14974_v25 = vmul.f32 0.00390625, %v14973_v38  ;;  %v14975_v20 = vmul.f32 %v14776_v59, %v14776_v59 }
 0xb49   : > { %v14976_v34 = vsub.f32 %v14974_v25, %v14975_v20  ;;  %v26480_v20 = vld [vmem:[#allocation59_spill] sm:$0xff] }
 0xb4b   : > { %v14977_v7 = vmax.f32 %v14976_v34, 0.0 }
 0xb4d   : > { %v14979_v55 = vadd.f32 1e-05, %v14977_v7  ;;  %v26481_v7 = vld [vmem:[#allocation4_spill] sm:$0xff] }
 0xb4f   : > { %20587 = vrsqrt.f32 %v14979_v55  ;;  %v26476_v55 = vld [vmem:[#allocation55_spill] sm:$0xff] }
 0xb59   : > { %v20588_v47 = vpop.eup %20587 }
 0xb5a   : > { %v14981_v29 = vmul.f32 %v20588_v47, %v14978_v43  ;;  %v26482_v47 = vld [vmem:[#allocation3_spill] sm:$0xff] }
 0xb5c   : > { %v25115_v31 = vmul.f32 %v14981_v29, %v14776_v59  ;;  %v25118_v36 = vrot.slane %v14981_v29, %v26473_v3 }
 0xb5e   : > { %v25124_v19 = vmul.f32 %v25118_v36, %v24825_v41  ;;  %v25128_v9 = vmul.f32 %v24819_v39, %v25118_v36  ;;  %v25132_v51 = vmul.f32 %v25118_v36, %v24835_v63  ;;  %v25136_v59 = vmul.f32 %v24833_v54, %v25118_v36 }
 0xb5f   : > { %v25140_v38 = vmul.f32 %v25118_v36, %v24839_v22  ;;  %v25144_v41 = vmul.f32 %v24837_v62, %v25118_v36  ;;  %v25148_v39 = vmul.f32 %v25118_v36, %v24852_v17  ;;  %v25152_v63 = vmul.f32 %v24850_v40, %v25118_v36 }
 0xb60   : > { %v25156_v54 = vmul.f32 %v25118_v36, %v24857_v6  ;;  %v25160_v22 = vmul.f32 %v24855_v60, %v25118_v36  ;;  %v25164_v62 = vmul.f32 %v25118_v36, %v24870_v0  ;;  %v25168_v17 = vmul.f32 %v24868_v53, %v25118_v36 }
 0xb61   : > { %v25172_v40 = vmul.f32 %v25118_v36, %v24875_v10  ;;  %v25176_v6 = vmul.f32 %v24873_v42, %v25118_v36  ;;  %v25180_v60 = vmul.f32 %v25118_v36, %v24888_v13  ;;  %v25184_v0 = vmul.f32 %v24886_v57, %v25118_v36 }
 0xb62   : > { %v25188_v53 = vmul.f32 %v25118_v36, %v24893_v37  ;;  %v25192_v10 = vmul.f32 %v24891_v32, %v25118_v36  ;;  %v25196_v42 = vmul.f32 %v25118_v36, %v24906_v44  ;;  %v25200_v13 = vmul.f32 %v24904_v11, %v25118_v36 }
 0xb63   : > { %v25204_v57 = vmul.f32 %v25118_v36, %v24911_v35  ;;  %v25208_v37 = vmul.f32 %v24909_v28, %v25118_v36  ;;  %v25212_v32 = vmul.f32 %v25118_v36, %v24924_v33  ;;  %v25216_v44 = vmul.f32 %v24922_v26, %v25118_v36 }
 0xb64   : > { %v25220_v11 = vmul.f32 %v25118_v36, %v24929_v1  ;;  %v25224_v35 = vmul.f32 %v24927_v45, %v25118_v36  ;;  %v25228_v28 = vmul.f32 %v25118_v36, %v24942_v4  ;;  %v25232_v33 = vmul.f32 %v24940_v8, %v25118_v36 }
 0xb65   : > { %v25236_v26 = vmul.f32 %v25118_v36, %v24947_v50  ;;  %v25240_v1 = vmul.f32 %v24945_v52, %v25118_v36  ;;  %v25244_v45 = vmul.f32 %v25118_v36, %v24960_v58  ;;  %v25248_v4 = vmul.f32 %v24958_v48, %v25118_v36 }
 0xb66   : > { %v25252_v8 = vmul.f32 %v25118_v36, %v24965_v30  ;;  %v25256_v50 = vmul.f32 %v24963_v5, %v25118_v36  ;;  %v25260_v52 = vmul.f32 %v25118_v36, %v24978_v61  ;;  %v25264_v58 = vmul.f32 %v24976_v14, %v25118_v36 }
 0xb67   : > { %v25268_v48 = vmul.f32 %v25118_v36, %v24983_v27  ;;  %v25272_v30 = vmul.f32 %v24981_v23, %v25118_v36  ;;  %v25276_v5 = vmul.f32 %v25118_v36, %v24996_v24  ;;  %v25280_v61 = vmul.f32 %v24994_v56, %v25118_v36 }
 0xb68   : > { %v25284_v14 = vmul.f32 %v25118_v36, %v25001_v18  ;;  %v25288_v27 = vmul.f32 %v26474_v49, %v25118_v36  ;;  %v25292_v23 = vmul.f32 %v25118_v36, %v26475_v2  ;;  %v25296_v24 = vmul.f32 %v26476_v55, %v25118_v36  ;;  %v26484_v49 = vld [vmem:[#allocation61_spill] sm:$0xff] }
 0xb69   : > { %v25300_v56 = vmul.f32 %v25118_v36, %v26477_v15  ;;  %v25304_v18 = vmul.f32 %v26478_v21, %v25118_v36  ;;  %v25308_v25 = vmul.f32 %v25118_v36, %v26479_v46  ;;  %v25312_v34 = vmul.f32 %v26480_v20, %v25118_v36  ;;  %v26486_v55 = vld [vmem:[#allocation5_spill] sm:$0xff]  ;;  %v26488_v21 = vld [vmem:[#allocation63_spill] sm:$0xff]  ;;  %v26490_v20 = vld [vmem:[#allocation62_spill] sm:$0xff] }
 0xb6a   : > { %v25316_v43 = vmul.f32 %v25118_v36, %v26481_v7  ;;  %v25320_v29 = vmul.f32 %v26482_v47, %v25118_v36  ;;  %v25324_v2 = vmul.f32 %v25118_v36, %v26484_v49  ;;  %v25328_v15 = vmul.f32 %v26486_v55, %v25118_v36 }
 0xb6b   : > { %v25332_v46 = vmul.f32 %v25118_v36, %v26488_v21  ;;  %v25336_v7 = vmul.f32 %v26490_v20, %v25118_v36  ;;  %v25340_v47 = vmul.f32 %v25118_v36, %v26492_v12 }
 0xb6c   : > { %26483 = vst [vmem:[#allocation7_spill] sm:$0xff] %v25320_v29  ;;  %26485 = vst [vmem:[#allocation10_spill] sm:$0xff] %v25324_v2  ;;  %v26494_v29 = vld [vmem:[#allocation64_spill] sm:$0xff]  ;;  %v26496_v2 = vld [vmem:[#allocation67_spill] sm:$0xff] }
 0xb6d   : > { %26487 = vst [vmem:[#allocation9_spill] sm:$0xff] %v25328_v15  ;;  %26489 = vst [vmem:[#allocation12_spill] sm:$0xff] %v25332_v46  ;;  %v25344_v49 = vmul.f32 %v26494_v29, %v25118_v36  ;;  %v25348_v55 = vmul.f32 %v25118_v36, %v26496_v2  ;;  %v26497_v15 = vld [vmem:[#allocation66_spill] sm:$0xff]  ;;  %v26499_v46 = vld [vmem:[#allocation69_spill] sm:$0xff] }
 0xb6e   : > { %26491 = vst [vmem:[#allocation11_spill] sm:$0xff] %v25336_v7  ;;  %26493 = vst [vmem:[#allocation14_spill] sm:$0xff] %v25340_v47  ;;  %v25352_v21 = vmul.f32 %v26497_v15, %v25118_v36  ;;  %v25356_v20 = vmul.f32 %v25118_v36, %v26499_v46  ;;  %v26501_v7 = vld [vmem:[#allocation68_spill] sm:$0xff]  ;;  %v26503_v47 = vld [vmem:[#allocation71_spill] sm:$0xff]  ;;  %v26505_v15 = vsub.f32 %v25113_v16, %v25115_v31 }
 0xb6f   : > { %26495 = vst [vmem:[#allocation13_spill] sm:$0xff] %v25344_v49  ;;  %v25360_v12 = vmul.f32 %v26501_v7, %v25118_v36  ;;  %v25364_v29 = vmul.f32 %v25118_v36, %v26503_v47  ;;  %v26504_v49 = vld [vmem:[#allocation70_spill] sm:$0xff]  ;;  %v26509_v7 = vld [vmem:[#allocation8_spill] sm:$0xff] }
 0xb70   : > { %26498 = vst [vmem:[#allocation16_spill] sm:$0xff] %v25352_v21  ;;  %26500 = vst [vmem:[#allocation15_spill] sm:$0xff] %v25356_v20  ;;  %v25368_v2 = vmul.f32 %v26504_v49, %v25118_v36  ;;  %v25374_v21 = vrot.slane %v26505_v15, %v26473_v3  ;;  %v26507_v46 = vld [vmem:[#allocation6_spill] sm:$0xff]  ;;  %v15127_v15 = vld [vmem:[%s20671_s15 + $0x10] sm:$0xff] }
 0xb71   : > { %26502 = vst [vmem:[#allocation18_spill] sm:$0xff] %v25360_v12  ;;  %v25378_v20 = vmul.f32 %v26507_v46, %v25118_v36  ;;  %v25382_v12 = vmul.f32 %v25118_v36, %v26509_v7  ;;  %v15128_v46 = vld [vmem:[%s20671_s15 + $0x18] sm:$0xff]  ;;  %v15129_v7 = vld [vmem:[%s20671_s15 + $0x20] sm:$0xff] }
 0xb72   : > { %26506 = vst [vmem:[#allocation17_spill] sm:$0xff] %v25374_v21  ;;  %v25386_v47 = vadd.f32 %v25374_v21, %v25124_v19  ;;  %v25390_v49 = vadd.f32 %v25374_v21, %v25128_v9  ;;  %v25394_v16 = vadd.f32 %v25374_v21, %v25132_v51  ;;  %v25398_v31 = vadd.f32 %v25374_v21, %v25136_v59 }
 0xb73   : > { %26508 = vst [vmem:[#allocation20_spill] sm:$0xff] %v25378_v20  ;;  %26510 = vst [vmem:[#allocation19_spill] sm:$0xff] %v25382_v12  ;;  %v25402_v3 = vadd.f32 %v25374_v21, %v25140_v38  ;;  %v25406_v36 = vadd.f32 %v25374_v21, %v25144_v41  ;;  %v25410_v19 = vadd.f32 %v25374_v21, %v25148_v39  ;;  %v26530_v12 = vld [vmem:[#allocation7_spill] sm:$0xff]  ;;  %v26532_v20 = vld [vmem:[#allocation10_spill] sm:$0xff] }
 0xb74   : > { %v25414_v9 = vadd.f32 %v25374_v21, %v25152_v63  ;;  %v25418_v51 = vadd.f32 %v25374_v21, %v25156_v54  ;;  %v25422_v59 = vadd.f32 %v25374_v21, %v25160_v22  ;;  %v25426_v38 = vadd.f32 %v25374_v21, %v25164_v62 }
 0xb75   : > { %v25430_v41 = vadd.f32 %v25374_v21, %v25168_v17  ;;  %v25434_v39 = vadd.f32 %v25374_v21, %v25172_v40  ;;  %v25438_v63 = vadd.f32 %v25374_v21, %v25176_v6  ;;  %v25442_v54 = vadd.f32 %v25374_v21, %v25180_v60 }
 0xb76   : > { %v25446_v22 = vadd.f32 %v25374_v21, %v25184_v0  ;;  %v25450_v62 = vadd.f32 %v25374_v21, %v25188_v53  ;;  %v25454_v17 = vadd.f32 %v25374_v21, %v25192_v10  ;;  %v25458_v40 = vadd.f32 %v25374_v21, %v25196_v42 }
 0xb77   : > { %v25462_v6 = vadd.f32 %v25374_v21, %v25200_v13  ;;  %v25466_v60 = vadd.f32 %v25374_v21, %v25204_v57  ;;  %v25470_v0 = vadd.f32 %v25374_v21, %v25208_v37  ;;  %v25474_v53 = vadd.f32 %v25374_v21, %v25212_v32 }
 0xb78   : > { %v25478_v10 = vadd.f32 %v25374_v21, %v25216_v44  ;;  %v25482_v42 = vadd.f32 %v25374_v21, %v25220_v11  ;;  %v25486_v13 = vadd.f32 %v25374_v21, %v25224_v35  ;;  %v25490_v57 = vadd.f32 %v25374_v21, %v25228_v28 }
 0xb79   : > { %v25494_v37 = vadd.f32 %v25374_v21, %v25232_v33  ;;  %v25498_v32 = vadd.f32 %v25374_v21, %v25236_v26  ;;  %v25502_v44 = vadd.f32 %v25374_v21, %v25240_v1  ;;  %v25506_v11 = vadd.f32 %v25374_v21, %v25244_v45 }
 0xb7a   : > { %v25510_v35 = vadd.f32 %v25374_v21, %v25248_v4  ;;  %v25514_v28 = vadd.f32 %v25374_v21, %v25252_v8  ;;  %v25518_v33 = vadd.f32 %v25374_v21, %v25256_v50  ;;  %v25522_v26 = vadd.f32 %v25374_v21, %v25260_v52 }
 0xb7b   : > { %26511 = vst [vmem:[#allocation22_spill] sm:$0xff] %v25506_v11  ;;  %v25526_v1 = vadd.f32 %v25374_v21, %v25264_v58  ;;  %v25530_v45 = vadd.f32 %v25374_v21, %v25268_v48  ;;  %v25534_v4 = vadd.f32 %v25374_v21, %v25272_v30  ;;  %v25538_v8 = vadd.f32 %v25374_v21, %v25276_v5  ;;  %v15125_v5 = vld [vmem:[%s20671_s15] sm:$0xff] }
 0xb7c   : > { %26512 = vst [vmem:[#allocation21_spill] sm:$0xff] %v25510_v35  ;;  %26513 = vst [vmem:[#allocation24_spill] sm:$0xff] %v25514_v28  ;;  %v25542_v50 = vadd.f32 %v25374_v21, %v25280_v61  ;;  %v25546_v52 = vadd.f32 %v25374_v21, %v25284_v14  ;;  %v25550_v58 = vadd.f32 %v25374_v21, %v25288_v27  ;;  %v15126_v61 = vld [vmem:[%s20671_s15 + $0x8] sm:$0xff] }
 0xb7d   : > { %26514 = vst [vmem:[#allocation23_spill] sm:$0xff] %v25518_v33  ;;  %26515 = vst [vmem:[#allocation26_spill] sm:$0xff] %v25522_v26  ;;  %v25554_v48 = vadd.f32 %v25374_v21, %v25292_v23  ;;  %v25558_v30 = vadd.f32 %v25374_v21, %v25296_v24  ;;  %v25564_v14 = vadd.f32 %v25374_v21, %v25300_v56  ;;  %v15130_v56 = vld [vmem:[%s20671_s15 + $0x28] sm:$0xff]  ;;  %v15147_v26 = vld [vmem:[%s20671_s15 + $0xb0] sm:$0xff] }
 0xb7e   : > { %26516 = vst [vmem:[#allocation25_spill] sm:$0xff] %v25526_v1  ;;  %26517 = vst [vmem:[#allocation27_spill] sm:$0xff] %v25530_v45  ;;  %v25568_v27 = vadd.f32 %v25374_v21, %v25304_v18  ;;  %v25572_v23 = vadd.f32 %v25374_v21, %v25308_v25  ;;  %v25576_v24 = vadd.f32 %v25374_v21, %v25312_v34  ;;  %v15150_v33 = vld [vmem:[%s20671_s15 + $0xc8] sm:$0xff] }
 0xb7f   : > { %26518 = vst [vmem:[#allocation28_spill] sm:$0xff] %v25534_v4  ;;  %26519 = vst [vmem:[#allocation30_spill] sm:$0xff] %v25538_v8  ;;  %v25584_v18 = vadd.f32 %v25374_v21, %v25316_v43  ;;  %v25588_v25 = vadd.f32 %v25374_v21, %v26530_v12  ;;  %v25592_v34 = vadd.f32 %v25374_v21, %v26532_v20  ;;  %v15134_v43 = vld [vmem:[%s20671_s15 + $0x48] sm:$0xff]  ;;  %v15139_v8 = vld [vmem:[%s20671_s15 + $0x70] sm:$0xff] }
 0xb80   : > { %26520 = vst [vmem:[#allocation31_spill] sm:$0xff] %v25542_v50  ;;  %26521 = vst [vmem:[#allocation32_spill] sm:$0xff] %v25546_v52  ;;  %v15136_v52 = vld [vmem:[%s20671_s15 + $0x58] sm:$0xff]  ;;  %v25644_v45 = vadd.f32 %v25374_v21, %v25364_v29  ;;  %v15190_v1 = vadd.f32 %v15126_v61, %v25390_v49  ;;  %v15153_v61 = vld [vmem:[%s20671_s15 + $0xe0] sm:$0xff] }
 0xb81   : > { %26522 = vst [vmem:[#allocation33_spill] sm:$0xff] %v25550_v58  ;;  %26523 = vst [vmem:[#allocation34_spill] sm:$0xff] %v25554_v48  ;;  %v15135_v58 = vld [vmem:[%s20671_s15 + $0x50] sm:$0xff]  ;;  %v15140_v4 = vld [vmem:[%s20671_s15 + $0x78] sm:$0xff] }
 0xb82   : > { %26524 = vst [vmem:[#allocation35_spill] sm:$0xff] %v25558_v30  ;;  %26525 = vst [vmem:[#allocation36_spill] sm:$0xff] %v25564_v14  ;;  %v15132_v14 = vld [vmem:[%s20671_s15 + $0x38] sm:$0xff]  ;;  %v15133_v30 = vld [vmem:[%s20671_s15 + $0x40] sm:$0xff] }
 0xb83   : > { %26526 = vst [vmem:[#allocation37_spill] sm:$0xff] %v25568_v27  ;;  %26527 = vst [vmem:[#allocation38_spill] sm:$0xff] %v25572_v23  ;;  %v15131_v27 = vld [vmem:[%s20671_s15 + $0x30] sm:$0xff]  ;;  %v15148_v29 = vld [vmem:[%s20671_s15 + $0xb8] sm:$0xff]  ;;  %v15196_v11 = vadd.f32 %v15132_v14, %v25414_v9  ;;  %v15200_v9 = vadd.f32 %v15136_v52, %v25430_v41 }
 0xb84   : > { %26528 = vst [vmem:[#allocation39_spill] sm:$0xff] %v25576_v24  ;;  %26529 = vst [vmem:[#allocation42_spill] sm:$0xff] %v25584_v18  ;;  %v26534_v24 = vld [vmem:[#allocation9_spill] sm:$0xff]  ;;  %v26536_v18 = vld [vmem:[#allocation12_spill] sm:$0xff]  ;;  %v15195_v35 = vadd.f32 %v15131_v27, %v25410_v19  ;;  %v15199_v27 = vadd.f32 %v15135_v58, %v25426_v38 }
 0xb85   : > { %26531 = vst [vmem:[#allocation43_spill] sm:$0xff] %v25588_v25  ;;  %26533 = vst [vmem:[#allocation44_spill] sm:$0xff] %v25592_v34  ;;  %v25596_v23 = vadd.f32 %v25374_v21, %v26534_v24  ;;  %v25604_v12 = vadd.f32 %v25374_v21, %v26536_v18  ;;  %v26538_v25 = vld [vmem:[#allocation11_spill] sm:$0xff]  ;;  %v26540_v34 = vld [vmem:[#allocation14_spill] sm:$0xff] }
 0xb86   : > { %v25608_v20 = vadd.f32 %v25374_v21, %v26538_v25  ;;  %v25612_v24 = vadd.f32 %v25374_v21, %v26540_v34  ;;  %v15137_v18 = vld [vmem:[%s20671_s15 + $0x60] sm:$0xff]  ;;  %v25624_v25 = vadd.f32 %v25374_v21, %v25348_v55  ;;  %26551 = vst [vmem:[#allocation52_spill] sm:$0xff] %v25644_v45  ;;  %v15152_v49 = vld [vmem:[%s20671_s15 + $0xd8] sm:$0xff]  ;;  %v15154_v28 = vld [vmem:[%s20671_s15 + $0xe8] sm:$0xff] }
 0xb87   : > { %26535 = vst [vmem:[#allocation45_spill] sm:$0xff] %v25596_v23  ;;  %26537 = vst [vmem:[#allocation46_spill] sm:$0xff] %v25604_v12  ;;  %v26542_v23 = vld [vmem:[#allocation13_spill] sm:$0xff]  ;;  %v15138_v12 = vld [vmem:[%s20671_s15 + $0x68] sm:$0xff] }
 0xb88   : > { %26539 = vst [vmem:[#allocation47_spill] sm:$0xff] %v25608_v20  ;;  %26541 = vst [vmem:[#allocation48_spill] sm:$0xff] %v25612_v24  ;;  %v25616_v48 = vadd.f32 %v25374_v21, %v26542_v23  ;;  %v26545_v20 = vld [vmem:[#allocation16_spill] sm:$0xff]  ;;  %v26547_v24 = vld [vmem:[#allocation15_spill] sm:$0xff] }
 0xb89   : > { %26544 = vst [vmem:[#allocation50_spill] sm:$0xff] %v25624_v25  ;;  %v25628_v34 = vadd.f32 %v25374_v21, %v26545_v20  ;;  %v25632_v23 = vadd.f32 %v25374_v21, %v26547_v24  ;;  %v15141_v55 = vld [vmem:[%s20671_s15 + $0x80] sm:$0xff]  ;;  %v15142_v25 = vld [vmem:[%s20671_s15 + $0x88] sm:$0xff]  ;;  %v25648_v20 = vadd.f32 %v25374_v21, %v25368_v2  ;;  %v15143_v24 = vld [vmem:[%s20671_s15 + $0x90] sm:$0xff]  ;;  %v15191_v2 = vadd.f32 %v15127_v15, %v25394_v16 }
 0xb8a   : > { %26543 = vst [vmem:[#allocation49_spill] sm:$0xff] %v25616_v48  ;;  %v26549_v48 = vld [vmem:[#allocation18_spill] sm:$0xff]  ;;  %v15149_v45 = vld [vmem:[%s20671_s15 + $0xc0] sm:$0xff]  ;;  %v15197_v16 = vadd.f32 %v15133_v30, %v25418_v51  ;;  %15254 = vst.msk [vmem:[%s20676_s18 + $0x8] sm:$0xff] %vm1354_vm1, %v15190_v1  ;;  %v15201_v51 = vadd.f32 %v15137_v18, %v25434_v39  ;;  %v15203_v39 = vadd.f32 %v15139_v8, %v25442_v54 }
 0xb8b   : > { %26546 = vst [vmem:[#allocation40_spill] sm:$0xff] %v25628_v34  ;;  %26548 = vst [vmem:[#allocation41_spill] sm:$0xff] %v25632_v23  ;;  %v25636_v50 = vadd.f32 %v25374_v21, %v26549_v48  ;;  %v15144_v23 = vld [vmem:[%s20671_s15 + $0x98] sm:$0xff]  ;;  %v15145_v48 = vld [vmem:[%s20671_s15 + $0xa0] sm:$0xff]  ;;  %v15189_v34 = vadd.f32 %v15125_v5, %v25386_v47  ;;  %v15192_v21 = vadd.f32 %v15128_v46, %v25398_v31 }
 0xb8c   : > { %26552 = vst [vmem:[#allocation53_spill] sm:$0xff] %v25648_v20  ;;  %v15193_v20 = vadd.f32 %v15129_v7, %v25402_v3  ;;  %v15194_v47 = vadd.f32 %v15130_v56, %v25406_v36  ;;  %v15151_v5 = vld [vmem:[%s20671_s15 + $0xd0] sm:$0xff]  ;;  %v15198_v31 = vadd.f32 %v15134_v43, %v25422_v59  ;;  %v15156_v36 = vld [vmem:[%s20671_s15 + $0xf8] sm:$0xff]  ;;  %v15157_v15 = vld [vmem:[%s20671_s15 + $0x100] sm:$0xff]  ;;  %v15202_v59 = vadd.f32 %v15138_v12, %v25438_v63 }
 0xb8d   : > { %26550 = vst [vmem:[#allocation51_spill] sm:$0xff] %v25636_v50  ;;  %v15146_v50 = vld [vmem:[%s20671_s15 + $0xa8] sm:$0xff]  ;;  %15253 = vst.msk [vmem:[%s20676_s18] sm:$0xff] %vm1354_vm1, %v15189_v34  ;;  %v15155_v3 = vld [vmem:[%s20671_s15 + $0xf0] sm:$0xff]  ;;  %v15204_v63 = vadd.f32 %v15140_v4, %v25446_v22  ;;  %v15205_v58 = vadd.f32 %v15141_v55, %v25450_v62  ;;  %v15207_v62 = vadd.f32 %v15143_v24, %v25458_v40 }
 0xb8e   : > { %v15158_v19 = vld [vmem:[%s20671_s15 + $0x108] sm:$0xff]  ;;  %15255 = vst.msk [vmem:[%s20676_s18 + $0x10] sm:$0xff] %vm1354_vm1, %v15191_v2  ;;  %15256 = vst.msk [vmem:[%s20676_s18 + $0x18] sm:$0xff] %vm1354_vm1, %v15192_v21  ;;  %v15159_v38 = vld [vmem:[%s20671_s15 + $0x110] sm:$0xff]  ;;  %v15206_v21 = vadd.f32 %v15142_v25, %v25454_v17  ;;  %v15208_v17 = vadd.f32 %v15144_v23, %v25462_v6  ;;  %v15214_v30 = vadd.f32 %v15150_v33, %v25486_v13 }
 0xb8f   : > { %15257 = vst.msk [vmem:[%s20676_s18 + $0x20] sm:$0xff] %vm1354_vm1, %v15193_v20  ;;  %15258 = vst.msk [vmem:[%s20676_s18 + $0x28] sm:$0xff] %vm1354_vm1, %v15194_v47  ;;  %v15160_v41 = vld [vmem:[%s20671_s15 + $0x118] sm:$0xff]  ;;  %v15161_v1 = vld [vmem:[%s20671_s15 + $0x120] sm:$0xff]  ;;  %v15216_v13 = vadd.f32 %v15152_v49, %v25494_v37  ;;  %v15217_v33 = vadd.f32 %v15153_v61, %v25498_v32 }
 0xb90   : > { %v15162_v52 = vld [vmem:[%s20671_s15 + $0x128] sm:$0xff]  ;;  %15259 = vst.msk [vmem:[%s20676_s18 + $0x30] sm:$0xff] %vm1354_vm1, %v15195_v35  ;;  %15260 = vst.msk [vmem:[%s20676_s18 + $0x38] sm:$0xff] %vm1354_vm1, %v15196_v11  ;;  %v15163_v54 = vld [vmem:[%s20671_s15 + $0x130] sm:$0xff]  ;;  %v15209_v35 = vadd.f32 %v15145_v48, %v25466_v60  ;;  %v15210_v11 = vadd.f32 %v15146_v50, %v25470_v0  ;;  %v15211_v60 = vadd.f32 %v15147_v26, %v25474_v53 }
 0xb91   : > { %15261 = vst.msk [vmem:[%s20676_s18 + $0x40] sm:$0xff] %vm1354_vm1, %v15197_v16  ;;  %15262 = vst.msk [vmem:[%s20676_s18 + $0x48] sm:$0xff] %vm1354_vm1, %v15198_v31  ;;  %v15164_v8 = vld [vmem:[%s20671_s15 + $0x138] sm:$0xff]  ;;  %v15165_v22 = vld [vmem:[%s20671_s15 + $0x140] sm:$0xff]  ;;  %v15212_v0 = vadd.f32 %v15148_v29, %v25478_v10  ;;  %v15213_v50 = vadd.f32 %v15149_v45, %v25482_v42  ;;  %v15215_v42 = vadd.f32 %v15151_v5, %v25490_v57 }
 0xb92   : > { %15263 = vst.msk [vmem:[%s20676_s18 + $0x50] sm:$0xff] %vm1354_vm1, %v15199_v27  ;;  %15264 = vst.msk [vmem:[%s20676_s18 + $0x58] sm:$0xff] %vm1354_vm1, %v15200_v9  ;;  %v15166_v40 = vld [vmem:[%s20671_s15 + $0x148] sm:$0xff]  ;;  %v15167_v4 = vld [vmem:[%s20671_s15 + $0x150] sm:$0xff]  ;;  %v15218_v45 = vadd.f32 %v15154_v28, %v25502_v44 }
 0xb93   : > { %15265 = vst.msk [vmem:[%s20676_s18 + $0x60] sm:$0xff] %vm1354_vm1, %v15201_v51  ;;  %15266 = vst.msk [vmem:[%s20676_s18 + $0x68] sm:$0xff] %vm1354_vm1, %v15202_v59  ;;  %v15168_v6 = vld [vmem:[%s20671_s15 + $0x158] sm:$0xff]  ;;  %v15169_v53 = vld [vmem:[%s20671_s15 + $0x160] sm:$0xff] }
 0xb94   : > { %15267 = vst.msk [vmem:[%s20676_s18 + $0x70] sm:$0xff] %vm1354_vm1, %v15203_v39  ;;  %15268 = vst.msk [vmem:[%s20676_s18 + $0x78] sm:$0xff] %vm1354_vm1, %v15204_v63  ;;  %v15170_v26 = vld [vmem:[%s20671_s15 + $0x168] sm:$0xff]  ;;  %v15171_v10 = vld [vmem:[%s20671_s15 + $0x170] sm:$0xff] }
 0xb95   : > { %15269 = vst.msk [vmem:[%s20676_s18 + $0x80] sm:$0xff] %vm1354_vm1, %v15205_v58  ;;  %15270 = vst.msk [vmem:[%s20676_s18 + $0x88] sm:$0xff] %vm1354_vm1, %v15206_v21  ;;  %v15172_v57 = vld [vmem:[%s20671_s15 + $0x178] sm:$0xff]  ;;  %v15173_v14 = vld [vmem:[%s20671_s15 + $0x180] sm:$0xff] }
 0xb96   : > { %15271 = vst.msk [vmem:[%s20676_s18 + $0x90] sm:$0xff] %vm1354_vm1, %v15207_v62  ;;  %15272 = vst.msk [vmem:[%s20676_s18 + $0x98] sm:$0xff] %vm1354_vm1, %v15208_v17  ;;  %v15174_v37 = vld [vmem:[%s20671_s15 + $0x188] sm:$0xff]  ;;  %v26554_v7 = vld [vmem:[#allocation21_spill] sm:$0xff] }
 0xb97   : > { %15273 = vst.msk [vmem:[%s20676_s18 + $0xa0] sm:$0xff] %vm1354_vm1, %v15209_v35  ;;  %15274 = vst.msk [vmem:[%s20676_s18 + $0xa8] sm:$0xff] %vm1354_vm1, %v15210_v11  ;;  %v26553_v46 = vld [vmem:[#allocation22_spill] sm:$0xff]  ;;  %v15220_v44 = vadd.f32 %v15156_v36, %v26554_v7  ;;  %v26555_v28 = vld [vmem:[#allocation24_spill] sm:$0xff] }
 0xb98   : > { %v15219_v32 = vadd.f32 %v15155_v3, %v26553_v46  ;;  %v15221_v56 = vadd.f32 %v15157_v15, %v26555_v28  ;;  %v26556_v43 = vld [vmem:[#allocation23_spill] sm:$0xff]  ;;  %15275 = vst.msk [vmem:[%s20676_s18 + $0xb0] sm:$0xff] %vm1354_vm1, %v15211_v60  ;;  %15276 = vst.msk [vmem:[%s20676_s18 + $0xb8] sm:$0xff] %vm1354_vm1, %v15212_v0  ;;  %v15176_v25 = vld [vmem:[%s20671_s15 + $0x198] sm:$0xff] }
 0xb99   : > { %v15222_v12 = vadd.f32 %v15158_v19, %v26556_v43  ;;  %15277 = vst.msk [vmem:[%s20676_s18 + $0xc0] sm:$0xff] %vm1354_vm1, %v15213_v50  ;;  %15278 = vst.msk [vmem:[%s20676_s18 + $0xc8] sm:$0xff] %vm1354_vm1, %v15214_v30  ;;  %v15175_v18 = vld [vmem:[%s20671_s15 + $0x190] sm:$0xff]  ;;  %v15177_v34 = vld [vmem:[%s20671_s15 + $0x1a0] sm:$0xff] }
 0xb9a   : > { %v26557_v23 = vld [vmem:[#allocation26_spill] sm:$0xff]  ;;  %v26558_v20 = vld [vmem:[#allocation25_spill] sm:$0xff]  ;;  %v26559_v48 = vld [vmem:[#allocation27_spill] sm:$0xff]  ;;  %15279 = vst.msk [vmem:[%s20676_s18 + $0xd0] sm:$0xff] %vm1354_vm1, %v15215_v42 }
 0xb9b   : > { %v15223_v55 = vadd.f32 %v15159_v38, %v26557_v23  ;;  %v15224_v24 = vadd.f32 %v15160_v41, %v26558_v20  ;;  %v15225_v29 = vadd.f32 %v15161_v1, %v26559_v48  ;;  %v26560_v2 = vld [vmem:[#allocation28_spill] sm:$0xff]  ;;  %15280 = vst.msk [vmem:[%s20676_s18 + $0xd8] sm:$0xff] %vm1354_vm1, %v15216_v13  ;;  %15281 = vst.msk [vmem:[%s20676_s18 + $0xe0] sm:$0xff] %vm1354_vm1, %v15217_v33  ;;  %v15178_v5 = vld [vmem:[%s20671_s15 + $0x1a8] sm:$0xff] }
 0xb9c   : > { %v15226_v47 = vadd.f32 %v15162_v52, %v26560_v2  ;;  %15282 = vst.msk [vmem:[%s20676_s18 + $0xe8] sm:$0xff] %vm1354_vm1, %v15218_v45  ;;  %v15179_v49 = vld [vmem:[%s20671_s15 + $0x1b0] sm:$0xff]  ;;  %v15180_v61 = vld [vmem:[%s20671_s15 + $0x1b8] sm:$0xff]  ;;  %v26561_v16 = vld [vmem:[#allocation30_spill] sm:$0xff] }
 0xb9d   : > { %v15227_v31 = vadd.f32 %v15163_v54, %v26561_v16  ;;  %v26562_v3 = vld [vmem:[#allocation31_spill] sm:$0xff]  ;;  %v26563_v15 = vld [vmem:[#allocation32_spill] sm:$0xff]  ;;  %v26564_v27 = vld [vmem:[#allocation33_spill] sm:$0xff]  ;;  %15283 = vst.msk [vmem:[%s20676_s18 + $0xf0] sm:$0xff] %vm1354_vm1, %v15219_v32 }
 0xb9e   : > { %v15228_v36 = vadd.f32 %v15164_v8, %v26562_v3  ;;  %v15229_v19 = vadd.f32 %v15165_v22, %v26563_v15  ;;  %v15230_v9 = vadd.f32 %v15166_v40, %v26564_v27  ;;  %15284 = vst.msk [vmem:[%s20676_s18 + $0xf8] sm:$0xff] %vm1354_vm1, %v15220_v44  ;;  %15285 = vst.msk [vmem:[%s20676_s18 + $0x100] sm:$0xff] %vm1354_vm1, %v15221_v56  ;;  %v15181_v51 = vld [vmem:[%s20671_s15 + $0x1c0] sm:$0xff]  ;;  %v15182_v59 = vld [vmem:[%s20671_s15 + $0x1c8] sm:$0xff] }
 0xb9f   : > { %15286 = vst.msk [vmem:[%s20676_s18 + $0x108] sm:$0xff] %vm1354_vm1, %v15222_v12  ;;  %v15183_v38 = vld [vmem:[%s20671_s15 + $0x1d0] sm:$0xff]  ;;  %v26565_v41 = vld [vmem:[#allocation34_spill] sm:$0xff]  ;;  %v26567_v63 = vld [vmem:[#allocation36_spill] sm:$0xff] }
 0xba0   : > { %v15231_v1 = vadd.f32 %v15167_v4, %v26565_v41  ;;  %v26566_v52 = vld [vmem:[#allocation35_spill] sm:$0xff]  ;;  %v15233_v58 = vadd.f32 %v15169_v53, %v26567_v63  ;;  %v26568_v21 = vld [vmem:[#allocation37_spill] sm:$0xff]  ;;  %15287 = vst.msk [vmem:[%s20676_s18 + $0x110] sm:$0xff] %vm1354_vm1, %v15223_v55  ;;  %15288 = vst.msk [vmem:[%s20676_s18 + $0x118] sm:$0xff] %vm1354_vm1, %v15224_v24 }
 0xba1   : > { %v15232_v39 = vadd.f32 %v15168_v6, %v26566_v52  ;;  %v15234_v54 = vadd.f32 %v15170_v26, %v26568_v21  ;;  %15289 = vst.msk [vmem:[%s20676_s18 + $0x120] sm:$0xff] %vm1354_vm1, %v15225_v29  ;;  %15290 = vst.msk [vmem:[%s20676_s18 + $0x128] sm:$0xff] %vm1354_vm1, %v15226_v47  ;;  %v15184_v8 = vld [vmem:[%s20671_s15 + $0x1d8] sm:$0xff]  ;;  %v15185_v22 = vld [vmem:[%s20671_s15 + $0x1e0] sm:$0xff] }
 0xba2   : > { %v15186_v62 = vld [vmem:[%s20671_s15 + $0x1e8] sm:$0xff]  ;;  %v26570_v11 = vld [vmem:[#allocation39_spill] sm:$0xff]  ;;  %15291 = vst.msk [vmem:[%s20676_s18 + $0x130] sm:$0xff] %vm1354_vm1, %v15227_v31  ;;  %15292 = vst.msk [vmem:[%s20676_s18 + $0x138] sm:$0xff] %vm1354_vm1, %v15228_v36 }
 0xba3   : > { %v26569_v17 = vld [vmem:[#allocation38_spill] sm:$0xff]  ;;  %v15236_v40 = vadd.f32 %v15172_v57, %v26570_v11  ;;  %v26572_v60 = vld [vmem:[#allocation43_spill] sm:$0xff]  ;;  %15293 = vst.msk [vmem:[%s20676_s18 + $0x140] sm:$0xff] %vm1354_vm1, %v15229_v19  ;;  %15294 = vst.msk [vmem:[%s20676_s18 + $0x148] sm:$0xff] %vm1354_vm1, %v15230_v9 }
 0xba4   : > { %v15235_v35 = vadd.f32 %v15171_v10, %v26569_v17  ;;  %v26571_v4 = vld [vmem:[#allocation42_spill] sm:$0xff]  ;;  %v15238_v0 = vadd.f32 %v15174_v37, %v26572_v60  ;;  %v26573_v50 = vld [vmem:[#allocation44_spill] sm:$0xff]  ;;  %v26574_v53 = vld [vmem:[#allocation45_spill] sm:$0xff]  ;;  %15295 = vst.msk [vmem:[%s20676_s18 + $0x150] sm:$0xff] %vm1354_vm1, %v15231_v1 }
 0xba5   : > { %v15237_v6 = vadd.f32 %v15173_v14, %v26571_v4  ;;  %v15239_v30 = vadd.f32 %v15175_v18, %v26573_v50  ;;  %v15240_v26 = vadd.f32 %v15176_v25, %v26574_v53  ;;  %v26575_v10 = vld [vmem:[#allocation46_spill] sm:$0xff]  ;;  %v26576_v13 = vld [vmem:[#allocation47_spill] sm:$0xff]  ;;  %15296 = vst.msk [vmem:[%s20676_s18 + $0x158] sm:$0xff] %vm1354_vm1, %v15232_v39  ;;  %15297 = vst.msk [vmem:[%s20676_s18 + $0x160] sm:$0xff] %vm1354_vm1, %v15233_v58 }
 0xba6   : > { %v15241_v42 = vadd.f32 %v15177_v34, %v26575_v10  ;;  %v15242_v33 = vadd.f32 %v15178_v5, %v26576_v13  ;;  %15298 = vst.msk [vmem:[%s20676_s18 + $0x168] sm:$0xff] %vm1354_vm1, %v15234_v54  ;;  %v26577_v45 = vld [vmem:[#allocation48_spill] sm:$0xff]  ;;  %v26578_v14 = vld [vmem:[#allocation49_spill] sm:$0xff]  ;;  %v26579_v46 = vld [vmem:[#allocation50_spill] sm:$0xff] }
 0xba7   : > { %v15243_v57 = vadd.f32 %v15179_v49, %v26577_v45  ;;  %v15244_v37 = vadd.f32 %v15180_v61, %v26578_v14  ;;  %v15245_v32 = vadd.f32 %v15181_v51, %v26579_v46  ;;  %v26580_v7 = vld [vmem:[#allocation40_spill] sm:$0xff]  ;;  %15299 = vst.msk [vmem:[%s20676_s18 + $0x170] sm:$0xff] %vm1354_vm1, %v15235_v35  ;;  %15300 = vst.msk [vmem:[%s20676_s18 + $0x178] sm:$0xff] %vm1354_vm1, %v15236_v40  ;;  %v26581_v28 = vld [vmem:[#allocation41_spill] sm:$0xff] }
 0xba8   : > { %v15246_v44 = vadd.f32 %v15182_v59, %v26580_v7  ;;  %15301 = vst.msk [vmem:[%s20676_s18 + $0x180] sm:$0xff] %vm1354_vm1, %v15237_v6  ;;  %15302 = vst.msk [vmem:[%s20676_s18 + $0x188] sm:$0xff] %vm1354_vm1, %v15238_v0  ;;  %v15247_v56 = vadd.f32 %v15183_v38, %v26581_v28  ;;  %v26582_v43 = vld [vmem:[#allocation51_spill] sm:$0xff]  ;;  %v26583_v18 = vld [vmem:[#allocation52_spill] sm:$0xff] }
 0xba9   : > { %v15248_v12 = vadd.f32 %v15184_v8, %v26582_v43  ;;  %v15249_v25 = vadd.f32 %v15185_v22, %v26583_v18  ;;  %v26584_v34 = vld [vmem:[#allocation53_spill] sm:$0xff]  ;;  %15303 = vst.msk [vmem:[%s20676_s18 + $0x190] sm:$0xff] %vm1354_vm1, %v15239_v30  ;;  %15304 = vst.msk [vmem:[%s20676_s18 + $0x198] sm:$0xff] %vm1354_vm1, %v15240_v26  ;;  %v15188_v55 = vld [vmem:[%s20671_s15 + $0x1f8] sm:$0xff] }
 0xbaa   : > { %v15250_v23 = vadd.f32 %v15186_v62, %v26584_v34  ;;  %15305 = vst.msk [vmem:[%s20676_s18 + $0x1a0] sm:$0xff] %vm1354_vm1, %v15241_v42  ;;  %15306 = vst.msk [vmem:[%s20676_s18 + $0x1a8] sm:$0xff] %vm1354_vm1, %v15242_v33  ;;  %v15187_v20 = vld [vmem:[%s20671_s15 + $0x1f0] sm:$0xff]  ;;  %v26585_v24 = vld [vmem:[#allocation20_spill] sm:$0xff] }
 0xbab   : > { %15307 = vst.msk [vmem:[%s20676_s18 + $0x1b0] sm:$0xff] %vm1354_vm1, %v15243_v57  ;;  %15308 = vst.msk [vmem:[%s20676_s18 + $0x1b8] sm:$0xff] %vm1354_vm1, %v15244_v37  ;;  %v26586_v48 = vld [vmem:[#allocation17_spill] sm:$0xff]  ;;  %v26587_v2 = vld [vmem:[#allocation19_spill] sm:$0xff] }
 0xbac   : > { %15309 = vst.msk [vmem:[%s20676_s18 + $0x1c0] sm:$0xff] %vm1354_vm1, %v15245_v32  ;;  %15310 = vst.msk [vmem:[%s20676_s18 + $0x1c8] sm:$0xff] %vm1354_vm1, %v15246_v44  ;;  %v15124_v29 = vadd.f32 %v26586_v48, %v26585_v24  ;;  %v15123_v47 = vadd.f32 %v26586_v48, %v26587_v2 }
 0xbad   : > { %15311 = vst.msk [vmem:[%s20676_s18 + $0x1d0] sm:$0xff] %vm1354_vm1, %v15247_v56  ;;  %15312 = vst.msk [vmem:[%s20676_s18 + $0x1d8] sm:$0xff] %vm1354_vm1, %v15248_v12 }
 0xbae   : > { %15313 = vst.msk [vmem:[%s20676_s18 + $0x1e0] sm:$0xff] %vm1354_vm1, %v15249_v25  ;;  %15314 = vst.msk [vmem:[%s20676_s18 + $0x1e8] sm:$0xff] %vm1354_vm1, %v15250_v23  ;;  %v15252_v5 = vadd.f32 %v15188_v55, %v15124_v29  ;;  %v15251_v49 = vadd.f32 %v15187_v20, %v15123_v47 }
 0xbb0   : > { %15316 = vst.msk [vmem:[%s20676_s18 + $0x1f8] sm:$0xff] %vm1354_vm1, %v15252_v5  ;;  %15315 = vst.msk [vmem:[%s20676_s18 + $0x1f0] sm:$0xff] %vm1354_vm1, %v15251_v49 }
 0xbb1 PF: > { %s18_s27 = sadd.s32 1, %s20599_s27  }
 0xbb2   : > { %p15_p5 = scmp.ge.s32.totalorder %s18_s27, 4  }
 0xbb4   :  { %17 = sbr.rel (!%p15_p5) target bundleno = 1 (0x1), region = 123 }

</bundles_post_ra>
